<compile_context>
chip_gen: v6e
topology: v6e:2x2x1
jax: 0.10.0
libtpu: 0.0.40
codegen_flags: <defaults>
</compile_context>

<pallas_src>
import functools

import jax
import jax.numpy as jnp
from jax.experimental import pallas as pl
from jax.experimental.pallas import tpu as pltpu

LANE = 128


def _round_up(x, m):
    return (x + m - 1) // m * m


def _num_groups(out_channels: int) -> int:
    # Mirrors Conv3x3GNReLU.__init__ logic.
    g = 32
    if out_channels % g != 0 or out_channels == g:
        g = out_channels // 2
    return g


def _decoder_block_kernel(xin_ref, w1_ref, w2_ref, g1_ref, b1_ref, g2_ref,
                          b2_ref, gsum_ref, o_ref, acc_ref, mid_ref,
                          *, H, W, Cout, G, eps):
    """Fused [Conv3x3(no bias)+GN+ReLU] x2 for one batch element.

    xin_ref : (H+2, W+2, Cin_p)  bf16  halo- and channel-padded NHWC input
    w*_ref  : (9*C_p, Cout_p)    bf16  HWIO weights, tap-major / channel-minor rows
    g*/b*   : (1, Cout_p)        f32   GroupNorm affine (padded channels -> 0)
    gsum_ref: (Cout_p, Cout_p)   f32   one-hot "same group" matrix
    o_ref   : (H, W, Cout_p)     bf16
    acc_ref : (H*W, Cout_p)      f32   conv accumulator (shared by both stages)
    mid_ref : (H+2, W+2, Cout_p) bf16  VMEM-resident intermediate with zero halo
    """
    Cp = o_ref.shape[-1]
    cnt = float(H * W * (Cout // G))          # real elements per (sample, group)

    def conv_gn_relu(x_ref, w_ref, gamma, beta):
        # x_ref: (H+2, W+2, C) bf16 ref.  9 accumulating K=C MXU matmuls; taps are
        # read straight from the padded activation ref (no im2col staging buffer,
        # no per-tap dtype casts).
        C = x_ref.shape[-1]
        for dy in range(3):
            for dx in range(3):
                tap = dy * 3 + dx
                lhs = x_ref[dy:dy + H, dx:dx + W, :].reshape(H * W, C)     # bf16
                contrib = jnp.dot(lhs, w_ref[tap * C:(tap + 1) * C, :],
                                  preferred_element_type=jnp.float32)
                if tap == 0:
                    acc_ref[...] = contrib
                else:
                    acc_ref[...] += contrib
        acc = acc_ref[...]                                          # (H*W, Cp) f32

        # GroupNorm stats: spatial reduce first (cheap XLU reductions), then tiny
        # (1,Cp)x(Cp,Cp) group-sum matmuls.  sum_rows(acc @ gsum) == sum_rows(acc) @ gsum.
        col_sum = jnp.sum(acc, axis=0, keepdims=True)               # (1, Cp)
        col_sq = jnp.sum(acc * acc, axis=0, keepdims=True)          # (1, Cp)
        gsum = gsum_ref[...]
        mean_c = jnp.dot(col_sum, gsum, preferred_element_type=jnp.float32) / cnt
        ex2_c = jnp.dot(col_sq, gsum, preferred_element_type=jnp.float32) / cnt
        rstd_c = jax.lax.rsqrt(ex2_c - mean_c * mean_c + eps)
        # Fold GN affine into per-channel scale/shift: 3 VPU ops on the big tile.
        scale = rstd_c * gamma                                      # (1, Cp)
        shift = beta - mean_c * scale                               # (1, Cp)
        return jnp.maximum(acc * scale + shift, 0.0)                # (H*W, Cp) f32

    # Zero ONLY the 1-px halo ring of the intermediate (its interior is fully
    # overwritten below).  Done every grid step so it remains correct when the
    # batch axis is split across TensorCores under "parallel" semantics.
    zr = jnp.zeros((1, W + 2, Cp), dtype=mid_ref.dtype)
    zc = jnp.zeros((H + 2, 1, Cp), dtype=mid_ref.dtype)
    mid_ref[0:1, :, :] = zr
    mid_ref[H + 1:H + 2, :, :] = zr
    mid_ref[:, 0:1, :] = zc
    mid_ref[:, W + 1:W + 2, :] = zc

    # ---- stage 1: conv(x) + GN + ReLU; result stays in VMEM as bf16 ----
    y1 = conv_gn_relu(xin_ref, w1_ref, g1_ref[...], b1_ref[...])
    mid_ref[1:H + 1, 1:W + 1, :] = y1.reshape(H, W, Cp).astype(mid_ref.dtype)

    # ---- stage 2: conv(mid) + GN + ReLU -> bf16 NHWC output ----
    y2 = conv_gn_relu(mid_ref, w2_ref, g2_ref[...], b2_ref[...])
    o_ref[...] = y2.reshape(H, W, Cp).astype(o_ref.dtype)


def _fused_decoder_block(x_padded, params):
    N, Hp2, Wp2, Cin_p = x_padded.shape
    H, W = Hp2 - 2, Wp2 - 2
    Cout_p = params["Cout_p"]

    kern = functools.partial(_decoder_block_kernel, H=H, W=W,
                             Cout=params["Cout"], G=params["G"], eps=1e-5)
    return pl.pallas_call(
        kern,
        out_shape=jax.ShapeDtypeStruct((N, H, W, Cout_p), jnp.bfloat16),
        grid=(N,),
        in_specs=[
            pl.BlockSpec((None, Hp2, Wp2, Cin_p), lambda n: (n, 0, 0, 0)),
            # Grid-invariant operands (constant index_map -> no re-fetch per step).
            pl.BlockSpec((9 * Cin_p, Cout_p), lambda n: (0, 0)),
            pl.BlockSpec((9 * Cout_p, Cout_p), lambda n: (0, 0)),
            pl.BlockSpec((1, Cout_p), lambda n: (0, 0)),
            pl.BlockSpec((1, Cout_p), lambda n: (0, 0)),
            pl.BlockSpec((1, Cout_p), lambda n: (0, 0)),
            pl.BlockSpec((1, Cout_p), lambda n: (0, 0)),
            pl.BlockSpec((Cout_p, Cout_p), lambda n: (0, 0)),
        ],
        out_specs=pl.BlockSpec((None, H, W, Cout_p), lambda n: (n, 0, 0, 0)),
        scratch_shapes=[
            pltpu.VMEM((H * W, Cout_p), jnp.float32),          # conv accumulator
            pltpu.VMEM((H + 2, W + 2, Cout_p), jnp.bfloat16),  # intermediate + halo
        ],
        compiler_params=pltpu.CompilerParams(
            dimension_semantics=("parallel",),   # batch axis -> megacore on v7x
            # Working set is small after dropping the im2col staging buffers;
            # 48 MB is above every generation's scoped-VMEM default and safely
            # below v7x's 64 MiB physical VMEM.
            vmem_limit_bytes=48 * 1024 * 1024,
        ),
    )(x_padded, params["w1m"], params["w2m"], params["g1p"], params["b1p"],
      params["g2p"], params["b2p"], params["gsum"])


# ------------------------------ parameter prep ------------------------------
def _prep_conv_weight(w_oihw, cin_p, cout_p):
    cout, cin = w_oihw.shape[0], w_oihw.shape[1]
    w = jnp.transpose(w_oihw, (2, 3, 1, 0))                   # OIHW -> HWIO
    w = jnp.pad(w, ((0, 0), (0, 0), (0, cin_p - cin), (0, cout_p - cout)))
    return w.reshape(9 * cin_p, cout_p).astype(jnp.bfloat16)  # tap-major rows, bf16


def _pad_vec(v, cp):
    return jnp.pad(v, (0, cp - v.shape[0])).reshape(1, cp).astype(jnp.float32)


def init_decoder_block_params(key, in_channels, out_channels):
    G = _num_groups(out_channels)
    assert G >= 1 and out_channels % G == 0, (out_channels, G)
    cin_p = _round_up(in_channels, LANE)
    cout_p = _round_up(out_channels, LANE)

    k1, k2, k3, k4 = jax.random.split(key, 4)
    # PyTorch conv weights are OIHW (Cout, Cin, 3, 3), no bias.
    w1 = 0.1 * jax.random.normal(k1, (out_channels, in_channels, 3, 3), jnp.float32)
    w2 = 0.1 * jax.random.normal(k2, (out_channels, out_channels, 3, 3), jnp.float32)
    g1 = 1.0 + 0.1 * jax.random.normal(k3, (out_channels,), jnp.float32)
    b1 = 0.1 * jax.random.normal(k4, (out_channels,), jnp.float32)
    g2 = jnp.ones((out_channels,), jnp.float32)
    b2 = jnp.zeros((out_channels,), jnp.float32)

    # Same-group one-hot matrix; padded channels belong to no group.
    cg = out_channels // G
    cid = jnp.arange(cout_p)
    same = (cid[:, None] // cg) == (cid[None, :] // cg)
    real = (cid[:, None] < out_channels) & (cid[None, :] < out_channels)
    gsum = (same & real).astype(jnp.float32)                  # (Cout_p, Cout_p)

    return {
        "G": G, "Cout": out_channels, "Cin": in_channels,
        "Cin_p": cin_p, "Cout_p": cout_p,
        "w1m": _prep_conv_weight(w1, cin_p, cout_p),
        "w2m": _prep_conv_weight(w2, cout_p, cout_p),
        "g1p": _pad_vec(g1, cout_p), "b1p": _pad_vec(b1, cout_p),
        "g2p": _pad_vec(g2, cout_p), "b2p": _pad_vec(b2, cout_p),
        "gsum": gsum,
        # raw tensors for the pure-JAX reference
        "w1_oihw": w1, "w2_oihw": w2, "g1": g1, "b1": b1, "g2": g2, "b2": b2,
    }


# --------------------------------- forward ----------------------------------
def decoder_block_forward(x_nchw, skip_nchw, params, up_sample=True):
    # Nearest-upsample / skip-concat / layout+halo pad are pure data movement,
    # fused by XLA into the bf16 NHWC feed of the kernel.
    # TODO(synk): fold upsample + concat + layout change into the kernel.
    if up_sample:
        x_nchw = jnp.repeat(jnp.repeat(x_nchw, 2, axis=2), 2, axis=3)
    if skip_nchw is not None:
        x_nchw = jnp.concatenate([x_nchw, skip_nchw], axis=1)
    N, Cin, H, W = x_nchw.shape
    assert Cin == params["Cin"], (Cin, params["Cin"])

    x = jnp.transpose(x_nchw, (0, 2, 3, 1))                   # NHWC
    # One fused pad: 1-px conv halo + channel pad to a lane multiple; bf16 feed.
    x = jnp.pad(x, ((0, 0), (1, 1), (1, 1), (0, params["Cin_p"] - Cin)))
    x = x.astype(jnp.bfloat16)

    out = _fused_decoder_block(x, params)                     # (N, H, W, Cout_p) bf16
    # Kernel emits bf16 NHWC (what a fused downstream consumer would take);
    # convert to the PyTorch module's NCHW f32 convention only at the boundary.
    out = out[..., :params["Cout"]]
    return jnp.transpose(out, (0, 3, 1, 2)).astype(jnp.float32)


# ---------------- pure-JAX reference (bf16 conv operands, f32 GN) -----------
def _conv_gn_relu_ref(x_nchw, w_oihw, gamma, beta, G, eps=1e-5):
    y = jax.lax.conv_general_dilated(
        x_nchw.astype(jnp.bfloat16), w_oihw.astype(jnp.bfloat16),
        window_strides=(1, 1), padding="SAME",
        dimension_numbers=("NCHW", "OIHW", "NCHW"),
        preferred_element_type=jnp.float32)
    N, C, H, W = y.shape
    yr = y.reshape(N, G, C // G, H, W)
    mean = yr.mean(axis=(2, 3, 4), keepdims=True)
    var = yr.var(axis=(2, 3, 4), keepdims=True)
    yr = (yr - mean) * jax.lax.rsqrt(var + eps)
    y = yr.reshape(N, C, H, W) * gamma[None, :, None, None] + beta[None, :, None, None]
    return jnp.maximum(y, 0.0)


def _decoder_block_ref(x_nchw, skip_nchw, params, up_sample=True):
    if up_sample:
        x_nchw = jnp.repeat(jnp.repeat(x_nchw, 2, axis=2), 2, axis=3)
    if skip_nchw is not None:
        x_nchw = jnp.concatenate([x_nchw, skip_nchw], axis=1)
    x = _conv_gn_relu_ref(x_nchw, params["w1_oihw"], params["g1"], params["b1"], params["G"])
    x = _conv_gn_relu_ref(x, params["w2_oihw"], params["g2"], params["b2"], params["G"])
    return x


if __name__ == "__main__":
    key = jax.random.PRNGKey(0)
    kx, kskip, kp = jax.random.split(key, 3)

    # x: low-res feature map (NCHW); skip: encoder feature at 2x resolution.
    x = jax.random.normal(kx, (2, 4, 8, 8), jnp.float32)
    skip = jax.random.normal(kskip, (2, 4, 16, 16), jnp.float32)

    in_channels = x.shape[1] + skip.shape[1]    # 8 (after upsample + concat)
    out_channels = 8                            # -> num_groups = 4
    params = init_decoder_block_params(kp, in_channels, out_channels)

    out = jax.block_until_ready(decoder_block_forward(x, skip, params, up_sample=True))
    assert out.shape == (2, out_channels, 16, 16), out.shape

    ref = jax.block_until_ready(_decoder_block_ref(x, skip, params, up_sample=True))
    # Both paths use bf16 MXU operands with f32 accumulation and f32 GroupNorm;
    # the kernel additionally writes back bf16 activations, so tolerance covers
    # bf16 output rounding plus bf16 summation-order differences.
    err = float(jnp.max(jnp.abs(out - ref)))
    assert jnp.allclose(out, ref, rtol=2e-2, atol=2e-2), err

    print("KERNEL_OK")
</pallas_src>

<mosaic_0001>
module attributes {stable_mosaic.version = 11 : i64} {
  func.func @_decoder_block_kernel(%arg0: i32, %arg1: memref<1x18x18x128xbf16, #tpu.memory_space<vmem>>, %arg2: memref<1152x128xbf16, #tpu.memory_space<vmem>>, %arg3: memref<1152x128xbf16, #tpu.memory_space<vmem>>, %arg4: memref<1x128xf32, #tpu.memory_space<vmem>>, %arg5: memref<1x128xf32, #tpu.memory_space<vmem>>, %arg6: memref<1x128xf32, #tpu.memory_space<vmem>>, %arg7: memref<1x128xf32, #tpu.memory_space<vmem>>, %arg8: memref<128x128xf32, #tpu.memory_space<vmem>>, %arg9: memref<1x16x16x128xbf16, #tpu.memory_space<vmem>>, %arg10: memref<256x128xf32, #tpu.memory_space<vmem>>, %arg11: memref<18x18x128xbf16, #tpu.memory_space<vmem>>) attributes {dimension_semantics = [#tpu.dimension_semantics<parallel>], iteration_bounds = array<i64: 2>, scalar_prefetch = 0 : i64, scratch_operands = 2 : i64, tpu.core_type = #tpu.core_type<tc>, window_params = [{transform_indices = @transform_0, window_bounds = array<i64: 1, 18, 18, 128>}, {pipeline_mode = #tpu.pipeline_mode<synchronous>, transform_indices = @transform_1, window_bounds = array<i64: 1152, 128>}, {pipeline_mode = #tpu.pipeline_mode<synchronous>, transform_indices = @transform_2, window_bounds = array<i64: 1152, 128>}, {pipeline_mode = #tpu.pipeline_mode<synchronous>, transform_indices = @transform_3, window_bounds = array<i64: 1, 128>}, {pipeline_mode = #tpu.pipeline_mode<synchronous>, transform_indices = @transform_4, window_bounds = array<i64: 1, 128>}, {pipeline_mode = #tpu.pipeline_mode<synchronous>, transform_indices = @transform_5, window_bounds = array<i64: 1, 128>}, {pipeline_mode = #tpu.pipeline_mode<synchronous>, transform_indices = @transform_6, window_bounds = array<i64: 1, 128>}, {pipeline_mode = #tpu.pipeline_mode<synchronous>, transform_indices = @transform_7, window_bounds = array<i64: 128, 128>}, {transform_indices = @transform_8, window_bounds = array<i64: 1, 16, 16, 128>}]} {
    %cst = arith.constant 0.000000e+00 : bf16
    %0 = vector.broadcast %cst : bf16 to vector<1x18x128xbf16>
    %cst_0 = arith.constant 0.000000e+00 : bf16
    %1 = vector.broadcast %cst_0 : bf16 to vector<18x1x128xbf16>
    %c0 = arith.constant 0 : index
    %c0_1 = arith.constant 0 : index
    %c0_2 = arith.constant 0 : index
    %2 = vector.load %arg11[%c0, %c0_1, %c0_2] : memref<18x18x128xbf16, #tpu.memory_space<vmem>>, vector<1x18x128xbf16>
    tpu.vector_store %arg11[%c0, %c0_1, %c0_2], %0 {strides = array<i32>} : memref<18x18x128xbf16, #tpu.memory_space<vmem>>, vector<1x18x128xbf16>,
    %c17 = arith.constant 17 : index
    %c0_3 = arith.constant 0 : index
    %c0_4 = arith.constant 0 : index
    %3 = vector.load %arg11[%c17, %c0_3, %c0_4] : memref<18x18x128xbf16, #tpu.memory_space<vmem>>, vector<1x18x128xbf16>
    tpu.vector_store %arg11[%c17, %c0_3, %c0_4], %0 {strides = array<i32>} : memref<18x18x128xbf16, #tpu.memory_space<vmem>>, vector<1x18x128xbf16>,
    %c0_5 = arith.constant 0 : index
    %c0_6 = arith.constant 0 : index
    %c0_7 = arith.constant 0 : index
    %4 = vector.load %arg11[%c0_5, %c0_6, %c0_7] : memref<18x18x128xbf16, #tpu.memory_space<vmem>>, vector<18x1x128xbf16>
    tpu.vector_store %arg11[%c0_5, %c0_6, %c0_7], %1 {strides = array<i32>} : memref<18x18x128xbf16, #tpu.memory_space<vmem>>, vector<18x1x128xbf16>,
    %c0_8 = arith.constant 0 : index
    %c17_9 = arith.constant 17 : index
    %c0_10 = arith.constant 0 : index
    %5 = vector.load %arg11[%c0_8, %c17_9, %c0_10] : memref<18x18x128xbf16, #tpu.memory_space<vmem>>, vector<18x1x128xbf16>
    tpu.vector_store %arg11[%c0_8, %c17_9, %c0_10], %1 {strides = array<i32>} : memref<18x18x128xbf16, #tpu.memory_space<vmem>>, vector<18x1x128xbf16>,
    %c0_11 = arith.constant 0 : index
    %c0_12 = arith.constant 0 : index
    %6 = vector.load %arg4[%c0_11, %c0_12] : memref<1x128xf32, #tpu.memory_space<vmem>>, vector<1x128xf32>
    %c0_13 = arith.constant 0 : index
    %c0_14 = arith.constant 0 : index
    %7 = vector.load %arg5[%c0_13, %c0_14] : memref<1x128xf32, #tpu.memory_space<vmem>>, vector<1x128xf32>
    %c0_15 = arith.constant 0 : index
    %c0_16 = arith.constant 0 : index
    %c0_17 = arith.constant 0 : index
    %c0_18 = arith.constant 0 : index
    %8 = vector.load %arg1[%c0_15, %c0_16, %c0_17, %c0_18] : memref<1x18x18x128xbf16, #tpu.memory_space<vmem>>, vector<1x16x16x128xbf16>
    %9 = vector.shape_cast %8 : vector<1x16x16x128xbf16> to vector<16x16x128xbf16>
    %10 = vector.shape_cast %9 : vector<16x16x128xbf16> to vector<256x128xbf16>
    %c0_19 = arith.constant 0 : index
    %c0_20 = arith.constant 0 : index
    %11 = vector.load %arg2[%c0_19, %c0_20] : memref<1152x128xbf16, #tpu.memory_space<vmem>>, vector<128x128xbf16>
    %cst_21 = arith.constant dense<0.000000e+00> : vector<256x128xf32>
    %12 = tpu.matmul %10, %11, %cst_21 {dimension_numbers = #tpu.dot_dimension_numbers<[1], [0], [0], [1], [0, 0, 1, 1], [], []>} : vector<256x128xbf16>, vector<128x128xbf16>, vector<256x128xf32> -> vector<256x128xf32>
    %c0_22 = arith.constant 0 : index
    %c0_23 = arith.constant 0 : index
    %13 = vector.load %arg10[%c0_22, %c0_23] : memref<256x128xf32, #tpu.memory_space<vmem>>, vector<256x128xf32>
    tpu.vector_store %arg10[%c0_22, %c0_23], %12 {strides = array<i32>} : memref<256x128xf32, #tpu.memory_space<vmem>>, vector<256x128xf32>,
    %c0_24 = arith.constant 0 : index
    %c0_25 = arith.constant 0 : index
    %c1 = arith.constant 1 : index
    %c0_26 = arith.constant 0 : index
    %14 = vector.load %arg1[%c0_24, %c0_25, %c1, %c0_26] : memref<1x18x18x128xbf16, #tpu.memory_space<vmem>>, vector<1x16x16x128xbf16>
    %15 = vector.shape_cast %14 : vector<1x16x16x128xbf16> to vector<16x16x128xbf16>
    %16 = vector.shape_cast %15 : vector<16x16x128xbf16> to vector<256x128xbf16>
    %c128 = arith.constant 128 : index
    %c0_27 = arith.constant 0 : index
    %17 = vector.load %arg2[%c128, %c0_27] : memref<1152x128xbf16, #tpu.memory_space<vmem>>, vector<128x128xbf16>
    %cst_28 = arith.constant dense<0.000000e+00> : vector<256x128xf32>
    %18 = tpu.matmul %16, %17, %cst_28 {dimension_numbers = #tpu.dot_dimension_numbers<[1], [0], [0], [1], [0, 0, 1, 1], [], []>} : vector<256x128xbf16>, vector<128x128xbf16>, vector<256x128xf32> -> vector<256x128xf32>
    %c0_29 = arith.constant 0 : index
    %c0_30 = arith.constant 0 : index
    %19 = vector.load %arg10[%c0_29, %c0_30] : memref<256x128xf32, #tpu.memory_space<vmem>>, vector<256x128xf32>
    %20 = arith.addf %19, %18 : vector<256x128xf32>
    %c0_31 = arith.constant 0 : index
    %c0_32 = arith.constant 0 : index
    %21 = vector.load %arg10[%c0_31, %c0_32] : memref<256x128xf32, #tpu.memory_space<vmem>>, vector<256x128xf32>
    tpu.vector_store %arg10[%c0_31, %c0_32], %20 {strides = array<i32>} : memref<256x128xf32, #tpu.memory_space<vmem>>, vector<256x128xf32>,
    %c0_33 = arith.constant 0 : index
    %c0_34 = arith.constant 0 : index
    %c2 = arith.constant 2 : index
    %c0_35 = arith.constant 0 : index
    %22 = vector.load %arg1[%c0_33, %c0_34, %c2, %c0_35] : memref<1x18x18x128xbf16, #tpu.memory_space<vmem>>, vector<1x16x16x128xbf16>
    %23 = vector.shape_cast %22 : vector<1x16x16x128xbf16> to vector<16x16x128xbf16>
    %24 = vector.shape_cast %23 : vector<16x16x128xbf16> to vector<256x128xbf16>
    %c256 = arith.constant 256 : index
    %c0_36 = arith.constant 0 : index
    %25 = vector.load %arg2[%c256, %c0_36] : memref<1152x128xbf16, #tpu.memory_space<vmem>>, vector<128x128xbf16>
    %cst_37 = arith.constant dense<0.000000e+00> : vector<256x128xf32>
    %26 = tpu.matmul %24, %25, %cst_37 {dimension_numbers = #tpu.dot_dimension_numbers<[1], [0], [0], [1], [0, 0, 1, 1], [], []>} : vector<256x128xbf16>, vector<128x128xbf16>, vector<256x128xf32> -> vector<256x128xf32>
    %c0_38 = arith.constant 0 : index
    %c0_39 = arith.constant 0 : index
    %27 = vector.load %arg10[%c0_38, %c0_39] : memref<256x128xf32, #tpu.memory_space<vmem>>, vector<256x128xf32>
    %28 = arith.addf %27, %26 : vector<256x128xf32>
    %c0_40 = arith.constant 0 : index
    %c0_41 = arith.constant 0 : index
    %29 = vector.load %arg10[%c0_40, %c0_41] : memref<256x128xf32, #tpu.memory_space<vmem>>, vector<256x128xf32>
    tpu.vector_store %arg10[%c0_40, %c0_41], %28 {strides = array<i32>} : memref<256x128xf32, #tpu.memory_space<vmem>>, vector<256x128xf32>,
    %c0_42 = arith.constant 0 : index
    %c1_43 = arith.constant 1 : index
    %c0_44 = arith.constant 0 : index
    %c0_45 = arith.constant 0 : index
    %30 = vector.load %arg1[%c0_42, %c1_43, %c0_44, %c0_45] : memref<1x18x18x128xbf16, #tpu.memory_space<vmem>>, vector<1x16x16x128xbf16>
    %31 = vector.shape_cast %30 : vector<1x16x16x128xbf16> to vector<16x16x128xbf16>
    %32 = vector.shape_cast %31 : vector<16x16x128xbf16> to vector<256x128xbf16>
    %c384 = arith.constant 384 : index
    %c0_46 = arith.constant 0 : index
    %33 = vector.load %arg2[%c384, %c0_46] : memref<1152x128xbf16, #tpu.memory_space<vmem>>, vector<128x128xbf16>
    %cst_47 = arith.constant dense<0.000000e+00> : vector<256x128xf32>
    %34 = tpu.matmul %32, %33, %cst_47 {dimension_numbers = #tpu.dot_dimension_numbers<[1], [0], [0], [1], [0, 0, 1, 1], [], []>} : vector<256x128xbf16>, vector<128x128xbf16>, vector<256x128xf32> -> vector<256x128xf32>
    %c0_48 = arith.constant 0 : index
    %c0_49 = arith.constant 0 : index
    %35 = vector.load %arg10[%c0_48, %c0_49] : memref<256x128xf32, #tpu.memory_space<vmem>>, vector<256x128xf32>
    %36 = arith.addf %35, %34 : vector<256x128xf32>
    %c0_50 = arith.constant 0 : index
    %c0_51 = arith.constant 0 : index
    %37 = vector.load %arg10[%c0_50, %c0_51] : memref<256x128xf32, #tpu.memory_space<vmem>>, vector<256x128xf32>
    tpu.vector_store %arg10[%c0_50, %c0_51], %36 {strides = array<i32>} : memref<256x128xf32, #tpu.memory_space<vmem>>, vector<256x128xf32>,
    %c0_52 = arith.constant 0 : index
    %c1_53 = arith.constant 1 : index
    %c1_54 = arith.constant 1 : index
    %c0_55 = arith.constant 0 : index
    %38 = vector.load %arg1[%c0_52, %c1_53, %c1_54, %c0_55] : memref<1x18x18x128xbf16, #tpu.memory_space<vmem>>, vector<1x16x16x128xbf16>
    %39 = vector.shape_cast %38 : vector<1x16x16x128xbf16> to vector<16x16x128xbf16>
    %40 = vector.shape_cast %39 : vector<16x16x128xbf16> to vector<256x128xbf16>
    %c512 = arith.constant 512 : index
    %c0_56 = arith.constant 0 : index
    %41 = vector.load %arg2[%c512, %c0_56] : memref<1152x128xbf16, #tpu.memory_space<vmem>>, vector<128x128xbf16>
    %cst_57 = arith.constant dense<0.000000e+00> : vector<256x128xf32>
    %42 = tpu.matmul %40, %41, %cst_57 {dimension_numbers = #tpu.dot_dimension_numbers<[1], [0], [0], [1], [0, 0, 1, 1], [], []>} : vector<256x128xbf16>, vector<128x128xbf16>, vector<256x128xf32> -> vector<256x128xf32>
    %c0_58 = arith.constant 0 : index
    %c0_59 = arith.constant 0 : index
    %43 = vector.load %arg10[%c0_58, %c0_59] : memref<256x128xf32, #tpu.memory_space<vmem>>, vector<256x128xf32>
    %44 = arith.addf %43, %42 : vector<256x128xf32>
    %c0_60 = arith.constant 0 : index
    %c0_61 = arith.constant 0 : index
    %45 = vector.load %arg10[%c0_60, %c0_61] : memref<256x128xf32, #tpu.memory_space<vmem>>, vector<256x128xf32>
    tpu.vector_store %arg10[%c0_60, %c0_61], %44 {strides = array<i32>} : memref<256x128xf32, #tpu.memory_space<vmem>>, vector<256x128xf32>,
    %c0_62 = arith.constant 0 : index
    %c1_63 = arith.constant 1 : index
    %c2_64 = arith.constant 2 : index
    %c0_65 = arith.constant 0 : index
    %46 = vector.load %arg1[%c0_62, %c1_63, %c2_64, %c0_65] : memref<1x18x18x128xbf16, #tpu.memory_space<vmem>>, vector<1x16x16x128xbf16>
    %47 = vector.shape_cast %46 : vector<1x16x16x128xbf16> to vector<16x16x128xbf16>
    %48 = vector.shape_cast %47 : vector<16x16x128xbf16> to vector<256x128xbf16>
    %c640 = arith.constant 640 : index
    %c0_66 = arith.constant 0 : index
    %49 = vector.load %arg2[%c640, %c0_66] : memref<1152x128xbf16, #tpu.memory_space<vmem>>, vector<128x128xbf16>
    %cst_67 = arith.constant dense<0.000000e+00> : vector<256x128xf32>
    %50 = tpu.matmul %48, %49, %cst_67 {dimension_numbers = #tpu.dot_dimension_numbers<[1], [0], [0], [1], [0, 0, 1, 1], [], []>} : vector<256x128xbf16>, vector<128x128xbf16>, vector<256x128xf32> -> vector<256x128xf32>
    %c0_68 = arith.constant 0 : index
    %c0_69 = arith.constant 0 : index
    %51 = vector.load %arg10[%c0_68, %c0_69] : memref<256x128xf32, #tpu.memory_space<vmem>>, vector<256x128xf32>
    %52 = arith.addf %51, %50 : vector<256x128xf32>
    %c0_70 = arith.constant 0 : index
    %c0_71 = arith.constant 0 : index
    %53 = vector.load %arg10[%c0_70, %c0_71] : memref<256x128xf32, #tpu.memory_space<vmem>>, vector<256x128xf32>
    tpu.vector_store %arg10[%c0_70, %c0_71], %52 {strides = array<i32>} : memref<256x128xf32, #tpu.memory_space<vmem>>, vector<256x128xf32>,
    %c0_72 = arith.constant 0 : index
    %c2_73 = arith.constant 2 : index
    %c0_74 = arith.constant 0 : index
    %c0_75 = arith.constant 0 : index
    %54 = vector.load %arg1[%c0_72, %c2_73, %c0_74, %c0_75] : memref<1x18x18x128xbf16, #tpu.memory_space<vmem>>, vector<1x16x16x128xbf16>
    %55 = vector.shape_cast %54 : vector<1x16x16x128xbf16> to vector<16x16x128xbf16>
    %56 = vector.shape_cast %55 : vector<16x16x128xbf16> to vector<256x128xbf16>
    %c768 = arith.constant 768 : index
    %c0_76 = arith.constant 0 : index
    %57 = vector.load %arg2[%c768, %c0_76] : memref<1152x128xbf16, #tpu.memory_space<vmem>>, vector<128x128xbf16>
    %cst_77 = arith.constant dense<0.000000e+00> : vector<256x128xf32>
    %58 = tpu.matmul %56, %57, %cst_77 {dimension_numbers = #tpu.dot_dimension_numbers<[1], [0], [0], [1], [0, 0, 1, 1], [], []>} : vector<256x128xbf16>, vector<128x128xbf16>, vector<256x128xf32> -> vector<256x128xf32>
    %c0_78 = arith.constant 0 : index
    %c0_79 = arith.constant 0 : index
    %59 = vector.load %arg10[%c0_78, %c0_79] : memref<256x128xf32, #tpu.memory_space<vmem>>, vector<256x128xf32>
    %60 = arith.addf %59, %58 : vector<256x128xf32>
    %c0_80 = arith.constant 0 : index
    %c0_81 = arith.constant 0 : index
    %61 = vector.load %arg10[%c0_80, %c0_81] : memref<256x128xf32, #tpu.memory_space<vmem>>, vector<256x128xf32>
    tpu.vector_store %arg10[%c0_80, %c0_81], %60 {strides = array<i32>} : memref<256x128xf32, #tpu.memory_space<vmem>>, vector<256x128xf32>,
    %c0_82 = arith.constant 0 : index
    %c2_83 = arith.constant 2 : index
    %c1_84 = arith.constant 1 : index
    %c0_85 = arith.constant 0 : index
    %62 = vector.load %arg1[%c0_82, %c2_83, %c1_84, %c0_85] : memref<1x18x18x128xbf16, #tpu.memory_space<vmem>>, vector<1x16x16x128xbf16>
    %63 = vector.shape_cast %62 : vector<1x16x16x128xbf16> to vector<16x16x128xbf16>
    %64 = vector.shape_cast %63 : vector<16x16x128xbf16> to vector<256x128xbf16>
    %c896 = arith.constant 896 : index
    %c0_86 = arith.constant 0 : index
    %65 = vector.load %arg2[%c896, %c0_86] : memref<1152x128xbf16, #tpu.memory_space<vmem>>, vector<128x128xbf16>
    %cst_87 = arith.constant dense<0.000000e+00> : vector<256x128xf32>
    %66 = tpu.matmul %64, %65, %cst_87 {dimension_numbers = #tpu.dot_dimension_numbers<[1], [0], [0], [1], [0, 0, 1, 1], [], []>} : vector<256x128xbf16>, vector<128x128xbf16>, vector<256x128xf32> -> vector<256x128xf32>
    %c0_88 = arith.constant 0 : index
    %c0_89 = arith.constant 0 : index
    %67 = vector.load %arg10[%c0_88, %c0_89] : memref<256x128xf32, #tpu.memory_space<vmem>>, vector<256x128xf32>
    %68 = arith.addf %67, %66 : vector<256x128xf32>
    %c0_90 = arith.constant 0 : index
    %c0_91 = arith.constant 0 : index
    %69 = vector.load %arg10[%c0_90, %c0_91] : memref<256x128xf32, #tpu.memory_space<vmem>>, vector<256x128xf32>
    tpu.vector_store %arg10[%c0_90, %c0_91], %68 {strides = array<i32>} : memref<256x128xf32, #tpu.memory_space<vmem>>, vector<256x128xf32>,
    %c0_92 = arith.constant 0 : index
    %c2_93 = arith.constant 2 : index
    %c2_94 = arith.constant 2 : index
    %c0_95 = arith.constant 0 : index
    %70 = vector.load %arg1[%c0_92, %c2_93, %c2_94, %c0_95] : memref<1x18x18x128xbf16, #tpu.memory_space<vmem>>, vector<1x16x16x128xbf16>
    %71 = vector.shape_cast %70 : vector<1x16x16x128xbf16> to vector<16x16x128xbf16>
    %72 = vector.shape_cast %71 : vector<16x16x128xbf16> to vector<256x128xbf16>
    %c1024 = arith.constant 1024 : index
    %c0_96 = arith.constant 0 : index
    %73 = vector.load %arg2[%c1024, %c0_96] : memref<1152x128xbf16, #tpu.memory_space<vmem>>, vector<128x128xbf16>
    %cst_97 = arith.constant dense<0.000000e+00> : vector<256x128xf32>
    %74 = tpu.matmul %72, %73, %cst_97 {dimension_numbers = #tpu.dot_dimension_numbers<[1], [0], [0], [1], [0, 0, 1, 1], [], []>} : vector<256x128xbf16>, vector<128x128xbf16>, vector<256x128xf32> -> vector<256x128xf32>
    %c0_98 = arith.constant 0 : index
    %c0_99 = arith.constant 0 : index
    %75 = vector.load %arg10[%c0_98, %c0_99] : memref<256x128xf32, #tpu.memory_space<vmem>>, vector<256x128xf32>
    %76 = arith.addf %75, %74 : vector<256x128xf32>
    %c0_100 = arith.constant 0 : index
    %c0_101 = arith.constant 0 : index
    %77 = vector.load %arg10[%c0_100, %c0_101] : memref<256x128xf32, #tpu.memory_space<vmem>>, vector<256x128xf32>
    tpu.vector_store %arg10[%c0_100, %c0_101], %76 {strides = array<i32>} : memref<256x128xf32, #tpu.memory_space<vmem>>, vector<256x128xf32>,
    %c0_102 = arith.constant 0 : index
    %c0_103 = arith.constant 0 : index
    %78 = vector.load %arg10[%c0_102, %c0_103] : memref<256x128xf32, #tpu.memory_space<vmem>>, vector<256x128xf32>
    %cst_104 = arith.constant dense<0.000000e+00> : vector<128xf32>
    %79 = vector.multi_reduction <add>, %78, %cst_104 [0] : vector<256x128xf32> to vector<128xf32>
    %80 = vector.shape_cast %79 : vector<128xf32> to vector<1x128xf32>
    %81 = arith.mulf %78, %78 : vector<256x128xf32>
    %cst_105 = arith.constant dense<0.000000e+00> : vector<128xf32>
    %82 = vector.multi_reduction <add>, %81, %cst_105 [0] : vector<256x128xf32> to vector<128xf32>
    %83 = vector.shape_cast %82 : vector<128xf32> to vector<1x128xf32>
    %c0_106 = arith.constant 0 : index
    %c0_107 = arith.constant 0 : index
    %84 = vector.load %arg8[%c0_106, %c0_107] : memref<128x128xf32, #tpu.memory_space<vmem>>, vector<128x128xf32>
    %cst_108 = arith.constant dense<0.000000e+00> : vector<1x128xf32>
    %85 = tpu.matmul %80, %84, %cst_108 {dimension_numbers = #tpu.dot_dimension_numbers<[1], [0], [0], [1], [0, 0, 1, 1], [], []>} : vector<1x128xf32>, vector<128x128xf32>, vector<1x128xf32> -> vector<1x128xf32>
    %cst_109 = arith.constant 5.120000e+02 : f32
    %86 = vector.broadcast %cst_109 : f32 to vector<1x128xf32>
    %87 = arith.divf %85, %86 : vector<1x128xf32>
    %cst_110 = arith.constant dense<0.000000e+00> : vector<1x128xf32>
    %88 = tpu.matmul %83, %84, %cst_110 {dimension_numbers = #tpu.dot_dimension_numbers<[1], [0], [0], [1], [0, 0, 1, 1], [], []>} : vector<1x128xf32>, vector<128x128xf32>, vector<1x128xf32> -> vector<1x128xf32>
    %cst_111 = arith.constant 5.120000e+02 : f32
    %89 = vector.broadcast %cst_111 : f32 to vector<1x128xf32>
    %90 = arith.divf %88, %89 : vector<1x128xf32>
    %91 = arith.mulf %87, %87 : vector<1x128xf32>
    %92 = arith.subf %90, %91 : vector<1x128xf32>
    %cst_112 = arith.constant 9.99999974E-6 : f32
    %93 = vector.broadcast %cst_112 : f32 to vector<1x128xf32>
    %94 = arith.addf %92, %93 : vector<1x128xf32>
    %95 = math.rsqrt %94 : vector<1x128xf32>
    %96 = arith.mulf %95, %6 : vector<1x128xf32>
    %97 = arith.mulf %87, %96 : vector<1x128xf32>
    %98 = arith.subf %7, %97 : vector<1x128xf32>
    %99 = vector.broadcast %96 : vector<1x128xf32> to vector<256x128xf32>
    %100 = arith.mulf %78, %99 : vector<256x128xf32>
    %101 = vector.broadcast %98 : vector<1x128xf32> to vector<256x128xf32>
    %102 = arith.addf %100, %101 : vector<256x128xf32>
    %cst_113 = arith.constant 0.000000e+00 : f32
    %103 = vector.broadcast %cst_113 : f32 to vector<256x128xf32>
    %104 = arith.maximumf %102, %103 : vector<256x128xf32>
    %105 = vector.shape_cast %104 : vector<256x128xf32> to vector<16x16x128xf32>
    %106 = arith.truncf %105 : vector<16x16x128xf32> to vector<16x16x128xbf16>
    %c1_114 = arith.constant 1 : index
    %c1_115 = arith.constant 1 : index
    %c0_116 = arith.constant 0 : index
    %107 = vector.load %arg11[%c1_114, %c1_115, %c0_116] : memref<18x18x128xbf16, #tpu.memory_space<vmem>>, vector<16x16x128xbf16>
    tpu.vector_store %arg11[%c1_114, %c1_115, %c0_116], %106 {strides = array<i32>} : memref<18x18x128xbf16, #tpu.memory_space<vmem>>, vector<16x16x128xbf16>,
    %c0_117 = arith.constant 0 : index
    %c0_118 = arith.constant 0 : index
    %108 = vector.load %arg6[%c0_117, %c0_118] : memref<1x128xf32, #tpu.memory_space<vmem>>, vector<1x128xf32>
    %c0_119 = arith.constant 0 : index
    %c0_120 = arith.constant 0 : index
    %109 = vector.load %arg7[%c0_119, %c0_120] : memref<1x128xf32, #tpu.memory_space<vmem>>, vector<1x128xf32>
    %c0_121 = arith.constant 0 : index
    %c0_122 = arith.constant 0 : index
    %c0_123 = arith.constant 0 : index
    %110 = vector.load %arg11[%c0_121, %c0_122, %c0_123] : memref<18x18x128xbf16, #tpu.memory_space<vmem>>, vector<16x16x128xbf16>
    %111 = vector.shape_cast %110 : vector<16x16x128xbf16> to vector<256x128xbf16>
    %c0_124 = arith.constant 0 : index
    %c0_125 = arith.constant 0 : index
    %112 = vector.load %arg3[%c0_124, %c0_125] : memref<1152x128xbf16, #tpu.memory_space<vmem>>, vector<128x128xbf16>
    %cst_126 = arith.constant dense<0.000000e+00> : vector<256x128xf32>
    %113 = tpu.matmul %111, %112, %cst_126 {dimension_numbers = #tpu.dot_dimension_numbers<[1], [0], [0], [1], [0, 0, 1, 1], [], []>} : vector<256x128xbf16>, vector<128x128xbf16>, vector<256x128xf32> -> vector<256x128xf32>
    %c0_127 = arith.constant 0 : index
    %c0_128 = arith.constant 0 : index
    %114 = vector.load %arg10[%c0_127, %c0_128] : memref<256x128xf32, #tpu.memory_space<vmem>>, vector<256x128xf32>
    tpu.vector_store %arg10[%c0_127, %c0_128], %113 {strides = array<i32>} : memref<256x128xf32, #tpu.memory_space<vmem>>, vector<256x128xf32>,
    %c0_129 = arith.constant 0 : index
    %c1_130 = arith.constant 1 : index
    %c0_131 = arith.constant 0 : index
    %115 = vector.load %arg11[%c0_129, %c1_130, %c0_131] : memref<18x18x128xbf16, #tpu.memory_space<vmem>>, vector<16x16x128xbf16>
    %116 = vector.shape_cast %115 : vector<16x16x128xbf16> to vector<256x128xbf16>
    %c128_132 = arith.constant 128 : index
    %c0_133 = arith.constant 0 : index
    %117 = vector.load %arg3[%c128_132, %c0_133] : memref<1152x128xbf16, #tpu.memory_space<vmem>>, vector<128x128xbf16>
    %cst_134 = arith.constant dense<0.000000e+00> : vector<256x128xf32>
    %118 = tpu.matmul %116, %117, %cst_134 {dimension_numbers = #tpu.dot_dimension_numbers<[1], [0], [0], [1], [0, 0, 1, 1], [], []>} : vector<256x128xbf16>, vector<128x128xbf16>, vector<256x128xf32> -> vector<256x128xf32>
    %c0_135 = arith.constant 0 : index
    %c0_136 = arith.constant 0 : index
    %119 = vector.load %arg10[%c0_135, %c0_136] : memref<256x128xf32, #tpu.memory_space<vmem>>, vector<256x128xf32>
    %120 = arith.addf %119, %118 : vector<256x128xf32>
    %c0_137 = arith.constant 0 : index
    %c0_138 = arith.constant 0 : index
    %121 = vector.load %arg10[%c0_137, %c0_138] : memref<256x128xf32, #tpu.memory_space<vmem>>, vector<256x128xf32>
    tpu.vector_store %arg10[%c0_137, %c0_138], %120 {strides = array<i32>} : memref<256x128xf32, #tpu.memory_space<vmem>>, vector<256x128xf32>,
    %c0_139 = arith.constant 0 : index
    %c2_140 = arith.constant 2 : index
    %c0_141 = arith.constant 0 : index
    %122 = vector.load %arg11[%c0_139, %c2_140, %c0_141] : memref<18x18x128xbf16, #tpu.memory_space<vmem>>, vector<16x16x128xbf16>
    %123 = vector.shape_cast %122 : vector<16x16x128xbf16> to vector<256x128xbf16>
    %c256_142 = arith.constant 256 : index
    %c0_143 = arith.constant 0 : index
    %124 = vector.load %arg3[%c256_142, %c0_143] : memref<1152x128xbf16, #tpu.memory_space<vmem>>, vector<128x128xbf16>
    %cst_144 = arith.constant dense<0.000000e+00> : vector<256x128xf32>
    %125 = tpu.matmul %123, %124, %cst_144 {dimension_numbers = #tpu.dot_dimension_numbers<[1], [0], [0], [1], [0, 0, 1, 1], [], []>} : vector<256x128xbf16>, vector<128x128xbf16>, vector<256x128xf32> -> vector<256x128xf32>
    %c0_145 = arith.constant 0 : index
    %c0_146 = arith.constant 0 : index
    %126 = vector.load %arg10[%c0_145, %c0_146] : memref<256x128xf32, #tpu.memory_space<vmem>>, vector<256x128xf32>
    %127 = arith.addf %126, %125 : vector<256x128xf32>
    %c0_147 = arith.constant 0 : index
    %c0_148 = arith.constant 0 : index
    %128 = vector.load %arg10[%c0_147, %c0_148] : memref<256x128xf32, #tpu.memory_space<vmem>>, vector<256x128xf32>
    tpu.vector_store %arg10[%c0_147, %c0_148], %127 {strides = array<i32>} : memref<256x128xf32, #tpu.memory_space<vmem>>, vector<256x128xf32>,
    %c1_149 = arith.constant 1 : index
    %c0_150 = arith.constant 0 : index
    %c0_151 = arith.constant 0 : index
    %129 = vector.load %arg11[%c1_149, %c0_150, %c0_151] : memref<18x18x128xbf16, #tpu.memory_space<vmem>>, vector<16x16x128xbf16>
    %130 = vector.shape_cast %129 : vector<16x16x128xbf16> to vector<256x128xbf16>
    %c384_152 = arith.constant 384 : index
    %c0_153 = arith.constant 0 : index
    %131 = vector.load %arg3[%c384_152, %c0_153] : memref<1152x128xbf16, #tpu.memory_space<vmem>>, vector<128x128xbf16>
    %cst_154 = arith.constant dense<0.000000e+00> : vector<256x128xf32>
    %132 = tpu.matmul %130, %131, %cst_154 {dimension_numbers = #tpu.dot_dimension_numbers<[1], [0], [0], [1], [0, 0, 1, 1], [], []>} : vector<256x128xbf16>, vector<128x128xbf16>, vector<256x128xf32> -> vector<256x128xf32>
    %c0_155 = arith.constant 0 : index
    %c0_156 = arith.constant 0 : index
    %133 = vector.load %arg10[%c0_155, %c0_156] : memref<256x128xf32, #tpu.memory_space<vmem>>, vector<256x128xf32>
    %134 = arith.addf %133, %132 : vector<256x128xf32>
    %c0_157 = arith.constant 0 : index
    %c0_158 = arith.constant 0 : index
    %135 = vector.load %arg10[%c0_157, %c0_158] : memref<256x128xf32, #tpu.memory_space<vmem>>, vector<256x128xf32>
    tpu.vector_store %arg10[%c0_157, %c0_158], %134 {strides = array<i32>} : memref<256x128xf32, #tpu.memory_space<vmem>>, vector<256x128xf32>,
    %c1_159 = arith.constant 1 : index
    %c1_160 = arith.constant 1 : index
    %c0_161 = arith.constant 0 : index
    %136 = vector.load %arg11[%c1_159, %c1_160, %c0_161] : memref<18x18x128xbf16, #tpu.memory_space<vmem>>, vector<16x16x128xbf16>
    %137 = vector.shape_cast %136 : vector<16x16x128xbf16> to vector<256x128xbf16>
    %c512_162 = arith.constant 512 : index
    %c0_163 = arith.constant 0 : index
    %138 = vector.load %arg3[%c512_162, %c0_163] : memref<1152x128xbf16, #tpu.memory_space<vmem>>, vector<128x128xbf16>
    %cst_164 = arith.constant dense<0.000000e+00> : vector<256x128xf32>
    %139 = tpu.matmul %137, %138, %cst_164 {dimension_numbers = #tpu.dot_dimension_numbers<[1], [0], [0], [1], [0, 0, 1, 1], [], []>} : vector<256x128xbf16>, vector<128x128xbf16>, vector<256x128xf32> -> vector<256x128xf32>
    %c0_165 = arith.constant 0 : index
    %c0_166 = arith.constant 0 : index
    %140 = vector.load %arg10[%c0_165, %c0_166] : memref<256x128xf32, #tpu.memory_space<vmem>>, vector<256x128xf32>
    %141 = arith.addf %140, %139 : vector<256x128xf32>
    %c0_167 = arith.constant 0 : index
    %c0_168 = arith.constant 0 : index
    %142 = vector.load %arg10[%c0_167, %c0_168] : memref<256x128xf32, #tpu.memory_space<vmem>>, vector<256x128xf32>
    tpu.vector_store %arg10[%c0_167, %c0_168], %141 {strides = array<i32>} : memref<256x128xf32, #tpu.memory_space<vmem>>, vector<256x128xf32>,
    %c1_169 = arith.constant 1 : index
    %c2_170 = arith.constant 2 : index
    %c0_171 = arith.constant 0 : index
    %143 = vector.load %arg11[%c1_169, %c2_170, %c0_171] : memref<18x18x128xbf16, #tpu.memory_space<vmem>>, vector<16x16x128xbf16>
    %144 = vector.shape_cast %143 : vector<16x16x128xbf16> to vector<256x128xbf16>
    %c640_172 = arith.constant 640 : index
    %c0_173 = arith.constant 0 : index
    %145 = vector.load %arg3[%c640_172, %c0_173] : memref<1152x128xbf16, #tpu.memory_space<vmem>>, vector<128x128xbf16>
    %cst_174 = arith.constant dense<0.000000e+00> : vector<256x128xf32>
    %146 = tpu.matmul %144, %145, %cst_174 {dimension_numbers = #tpu.dot_dimension_numbers<[1], [0], [0], [1], [0, 0, 1, 1], [], []>} : vector<256x128xbf16>, vector<128x128xbf16>, vector<256x128xf32> -> vector<256x128xf32>
    %c0_175 = arith.constant 0 : index
    %c0_176 = arith.constant 0 : index
    %147 = vector.load %arg10[%c0_175, %c0_176] : memref<256x128xf32, #tpu.memory_space<vmem>>, vector<256x128xf32>
    %148 = arith.addf %147, %146 : vector<256x128xf32>
    %c0_177 = arith.constant 0 : index
    %c0_178 = arith.constant 0 : index
    %149 = vector.load %arg10[%c0_177, %c0_178] : memref<256x128xf32, #tpu.memory_space<vmem>>, vector<256x128xf32>
    tpu.vector_store %arg10[%c0_177, %c0_178], %148 {strides = array<i32>} : memref<256x128xf32, #tpu.memory_space<vmem>>, vector<256x128xf32>,
    %c2_179 = arith.constant 2 : index
    %c0_180 = arith.constant 0 : index
    %c0_181 = arith.constant 0 : index
    %150 = vector.load %arg11[%c2_179, %c0_180, %c0_181] : memref<18x18x128xbf16, #tpu.memory_space<vmem>>, vector<16x16x128xbf16>
    %151 = vector.shape_cast %150 : vector<16x16x128xbf16> to vector<256x128xbf16>
    %c768_182 = arith.constant 768 : index
    %c0_183 = arith.constant 0 : index
    %152 = vector.load %arg3[%c768_182, %c0_183] : memref<1152x128xbf16, #tpu.memory_space<vmem>>, vector<128x128xbf16>
    %cst_184 = arith.constant dense<0.000000e+00> : vector<256x128xf32>
    %153 = tpu.matmul %151, %152, %cst_184 {dimension_numbers = #tpu.dot_dimension_numbers<[1], [0], [0], [1], [0, 0, 1, 1], [], []>} : vector<256x128xbf16>, vector<128x128xbf16>, vector<256x128xf32> -> vector<256x128xf32>
    %c0_185 = arith.constant 0 : index
    %c0_186 = arith.constant 0 : index
    %154 = vector.load %arg10[%c0_185, %c0_186] : memref<256x128xf32, #tpu.memory_space<vmem>>, vector<256x128xf32>
    %155 = arith.addf %154, %153 : vector<256x128xf32>
    %c0_187 = arith.constant 0 : index
    %c0_188 = arith.constant 0 : index
    %156 = vector.load %arg10[%c0_187, %c0_188] : memref<256x128xf32, #tpu.memory_space<vmem>>, vector<256x128xf32>
    tpu.vector_store %arg10[%c0_187, %c0_188], %155 {strides = array<i32>} : memref<256x128xf32, #tpu.memory_space<vmem>>, vector<256x128xf32>,
    %c2_189 = arith.constant 2 : index
    %c1_190 = arith.constant 1 : index
    %c0_191 = arith.constant 0 : index
    %157 = vector.load %arg11[%c2_189, %c1_190, %c0_191] : memref<18x18x128xbf16, #tpu.memory_space<vmem>>, vector<16x16x128xbf16>
    %158 = vector.shape_cast %157 : vector<16x16x128xbf16> to vector<256x128xbf16>
    %c896_192 = arith.constant 896 : index
    %c0_193 = arith.constant 0 : index
    %159 = vector.load %arg3[%c896_192, %c0_193] : memref<1152x128xbf16, #tpu.memory_space<vmem>>, vector<128x128xbf16>
    %cst_194 = arith.constant dense<0.000000e+00> : vector<256x128xf32>
    %160 = tpu.matmul %158, %159, %cst_194 {dimension_numbers = #tpu.dot_dimension_numbers<[1], [0], [0], [1], [0, 0, 1, 1], [], []>} : vector<256x128xbf16>, vector<128x128xbf16>, vector<256x128xf32> -> vector<256x128xf32>
    %c0_195 = arith.constant 0 : index
    %c0_196 = arith.constant 0 : index
    %161 = vector.load %arg10[%c0_195, %c0_196] : memref<256x128xf32, #tpu.memory_space<vmem>>, vector<256x128xf32>
    %162 = arith.addf %161, %160 : vector<256x128xf32>
    %c0_197 = arith.constant 0 : index
    %c0_198 = arith.constant 0 : index
    %163 = vector.load %arg10[%c0_197, %c0_198] : memref<256x128xf32, #tpu.memory_space<vmem>>, vector<256x128xf32>
    tpu.vector_store %arg10[%c0_197, %c0_198], %162 {strides = array<i32>} : memref<256x128xf32, #tpu.memory_space<vmem>>, vector<256x128xf32>,
    %c2_199 = arith.constant 2 : index
    %c2_200 = arith.constant 2 : index
    %c0_201 = arith.constant 0 : index
    %164 = vector.load %arg11[%c2_199, %c2_200, %c0_201] : memref<18x18x128xbf16, #tpu.memory_space<vmem>>, vector<16x16x128xbf16>
    %165 = vector.shape_cast %164 : vector<16x16x128xbf16> to vector<256x128xbf16>
    %c1024_202 = arith.constant 1024 : index
    %c0_203 = arith.constant 0 : index
    %166 = vector.load %arg3[%c1024_202, %c0_203] : memref<1152x128xbf16, #tpu.memory_space<vmem>>, vector<128x128xbf16>
    %cst_204 = arith.constant dense<0.000000e+00> : vector<256x128xf32>
    %167 = tpu.matmul %165, %166, %cst_204 {dimension_numbers = #tpu.dot_dimension_numbers<[1], [0], [0], [1], [0, 0, 1, 1], [], []>} : vector<256x128xbf16>, vector<128x128xbf16>, vector<256x128xf32> -> vector<256x128xf32>
    %c0_205 = arith.constant 0 : index
    %c0_206 = arith.constant 0 : index
    %168 = vector.load %arg10[%c0_205, %c0_206] : memref<256x128xf32, #tpu.memory_space<vmem>>, vector<256x128xf32>
    %169 = arith.addf %168, %167 : vector<256x128xf32>
    %c0_207 = arith.constant 0 : index
    %c0_208 = arith.constant 0 : index
    %170 = vector.load %arg10[%c0_207, %c0_208] : memref<256x128xf32, #tpu.memory_space<vmem>>, vector<256x128xf32>
    tpu.vector_store %arg10[%c0_207, %c0_208], %169 {strides = array<i32>} : memref<256x128xf32, #tpu.memory_space<vmem>>, vector<256x128xf32>,
    %c0_209 = arith.constant 0 : index
    %c0_210 = arith.constant 0 : index
    %171 = vector.load %arg10[%c0_209, %c0_210] : memref<256x128xf32, #tpu.memory_space<vmem>>, vector<256x128xf32>
    %cst_211 = arith.constant dense<0.000000e+00> : vector<128xf32>
    %172 = vector.multi_reduction <add>, %171, %cst_211 [0] : vector<256x128xf32> to vector<128xf32>
    %173 = vector.shape_cast %172 : vector<128xf32> to vector<1x128xf32>
    %174 = arith.mulf %171, %171 : vector<256x128xf32>
    %cst_212 = arith.constant dense<0.000000e+00> : vector<128xf32>
    %175 = vector.multi_reduction <add>, %174, %cst_212 [0] : vector<256x128xf32> to vector<128xf32>
    %176 = vector.shape_cast %175 : vector<128xf32> to vector<1x128xf32>
    %c0_213 = arith.constant 0 : index
    %c0_214 = arith.constant 0 : index
    %177 = vector.load %arg8[%c0_213, %c0_214] : memref<128x128xf32, #tpu.memory_space<vmem>>, vector<128x128xf32>
    %cst_215 = arith.constant dense<0.000000e+00> : vector<1x128xf32>
    %178 = tpu.matmul %173, %177, %cst_215 {dimension_numbers = #tpu.dot_dimension_numbers<[1], [0], [0], [1], [0, 0, 1, 1], [], []>} : vector<1x128xf32>, vector<128x128xf32>, vector<1x128xf32> -> vector<1x128xf32>
    %cst_216 = arith.constant 5.120000e+02 : f32
    %179 = vector.broadcast %cst_216 : f32 to vector<1x128xf32>
    %180 = arith.divf %178, %179 : vector<1x128xf32>
    %cst_217 = arith.constant dense<0.000000e+00> : vector<1x128xf32>
    %181 = tpu.matmul %176, %177, %cst_217 {dimension_numbers = #tpu.dot_dimension_numbers<[1], [0], [0], [1], [0, 0, 1, 1], [], []>} : vector<1x128xf32>, vector<128x128xf32>, vector<1x128xf32> -> vector<1x128xf32>
    %cst_218 = arith.constant 5.120000e+02 : f32
    %182 = vector.broadcast %cst_218 : f32 to vector<1x128xf32>
    %183 = arith.divf %181, %182 : vector<1x128xf32>
    %184 = arith.mulf %180, %180 : vector<1x128xf32>
    %185 = arith.subf %183, %184 : vector<1x128xf32>
    %cst_219 = arith.constant 9.99999974E-6 : f32
    %186 = vector.broadcast %cst_219 : f32 to vector<1x128xf32>
    %187 = arith.addf %185, %186 : vector<1x128xf32>
    %188 = math.rsqrt %187 : vector<1x128xf32>
    %189 = arith.mulf %188, %108 : vector<1x128xf32>
    %190 = arith.mulf %180, %189 : vector<1x128xf32>
    %191 = arith.subf %109, %190 : vector<1x128xf32>
    %192 = vector.broadcast %189 : vector<1x128xf32> to vector<256x128xf32>
    %193 = arith.mulf %171, %192 : vector<256x128xf32>
    %194 = vector.broadcast %191 : vector<1x128xf32> to vector<256x128xf32>
    %195 = arith.addf %193, %194 : vector<256x128xf32>
    %cst_220 = arith.constant 0.000000e+00 : f32
    %196 = vector.broadcast %cst_220 : f32 to vector<256x128xf32>
    %197 = arith.maximumf %195, %196 : vector<256x128xf32>
    %198 = vector.shape_cast %197 : vector<256x128xf32> to vector<16x16x128xf32>
    %199 = arith.truncf %198 : vector<16x16x128xf32> to vector<16x16x128xbf16>
    %c0_221 = arith.constant 0 : index
    %c0_222 = arith.constant 0 : index
    %c0_223 = arith.constant 0 : index
    %c0_224 = arith.constant 0 : index
    %200 = vector.load %arg9[%c0_221, %c0_222, %c0_223, %c0_224] : memref<1x16x16x128xbf16, #tpu.memory_space<vmem>>, vector<1x16x16x128xbf16>
    %201 = vector.shape_cast %200 : vector<1x16x16x128xbf16> to vector<16x16x128xbf16>
    %202 = vector.shape_cast %199 : vector<16x16x128xbf16> to vector<1x16x16x128xbf16>
    tpu.vector_store %arg9[%c0_221, %c0_222, %c0_223, %c0_224], %202 {strides = array<i32>} : memref<1x16x16x128xbf16, #tpu.memory_space<vmem>>, vector<1x16x16x128xbf16>,
    return
  }
  func.func @transform_0(%arg0: i32) -> (i32, i32, i32, i32) {
    %c0_i32 = arith.constant 0 : i32
    %c0_i32_0 = arith.constant 0 : i32
    %c0_i32_1 = arith.constant 0 : i32
    %c0_i32_2 = arith.constant 0 : i32
    return %arg0, %c0_i32, %c0_i32_0, %c0_i32_1 : i32, i32, i32, i32
  }
  func.func @transform_1(%arg0: i32) -> (i32, i32) {
    %c0_i32 = arith.constant 0 : i32
    %c0_i32_0 = arith.constant 0 : i32
    %c0_i32_1 = arith.constant 0 : i32
    return %c0_i32, %c0_i32_0 : i32, i32
  }
  func.func @transform_2(%arg0: i32) -> (i32, i32) {
    %c0_i32 = arith.constant 0 : i32
    %c0_i32_0 = arith.constant 0 : i32
    %c0_i32_1 = arith.constant 0 : i32
    return %c0_i32, %c0_i32_0 : i32, i32
  }
  func.func @transform_3(%arg0: i32) -> (i32, i32) {
    %c0_i32 = arith.constant 0 : i32
    %c0_i32_0 = arith.constant 0 : i32
    %c0_i32_1 = arith.constant 0 : i32
    return %c0_i32, %c0_i32_0 : i32, i32
  }
  func.func @transform_4(%arg0: i32) -> (i32, i32) {
    %c0_i32 = arith.constant 0 : i32
    %c0_i32_0 = arith.constant 0 : i32
    %c0_i32_1 = arith.constant 0 : i32
    return %c0_i32, %c0_i32_0 : i32, i32
  }
  func.func @transform_5(%arg0: i32) -> (i32, i32) {
    %c0_i32 = arith.constant 0 : i32
    %c0_i32_0 = arith.constant 0 : i32
    %c0_i32_1 = arith.constant 0 : i32
    return %c0_i32, %c0_i32_0 : i32, i32
  }
  func.func @transform_6(%arg0: i32) -> (i32, i32) {
    %c0_i32 = arith.constant 0 : i32
    %c0_i32_0 = arith.constant 0 : i32
    %c0_i32_1 = arith.constant 0 : i32
    return %c0_i32, %c0_i32_0 : i32, i32
  }
  func.func @transform_7(%arg0: i32) -> (i32, i32) {
    %c0_i32 = arith.constant 0 : i32
    %c0_i32_0 = arith.constant 0 : i32
    %c0_i32_1 = arith.constant 0 : i32
    return %c0_i32, %c0_i32_0 : i32, i32
  }
  func.func @transform_8(%arg0: i32) -> (i32, i32, i32, i32) {
    %c0_i32 = arith.constant 0 : i32
    %c0_i32_0 = arith.constant 0 : i32
    %c0_i32_1 = arith.constant 0 : i32
    %c0_i32_2 = arith.constant 0 : i32
    return %arg0, %c0_i32, %c0_i32_0, %c0_i32_1 : i32, i32, i32, i32
  }
}

</mosaic_0001>

<bundles_post_ra>
// kernel: tpu_custom_call.1
= control target key start
LH: loop header
LB: loop body
LE: loop exit
PB: predicated region body
PF: predicated region fallthrough
CT: control target
= control target key end

     0   :  { %13 = vsyncpa [#allocation5], 0  ;;  %s20705_s0 = inlined_call_operand.vmem [shape: bf16[2,18,18,128], index: 0, kind: input, shape index: {}]   ;;  %s20706_s1 = inlined_call_operand.vmem [shape: bf16[1152,128], index: 1, kind: input, shape index: {}]   ;;  %s20707_s2 = inlined_call_operand.hbm [shape: bf16[1152,128], index: 2, kind: input, shape index: {}]   ;;  %s20708_s3 = inlined_call_operand.vmem [shape: f32[1,128], index: 3, kind: input, shape index: {}]   ;;  %s20709_s4 = inlined_call_operand.vmem [shape: f32[1,128], index: 4, kind: input, shape index: {}]   ;;  %s20710_s5 = inlined_call_operand.vmem [shape: f32[1,128], index: 5, kind: input, shape index: {}]   ;;  %s20711_s6 = inlined_call_operand.vmem [shape: f32[1,128], index: 6, kind: input, shape index: {}]   ;;  %s20712_s7 = inlined_call_operand.vmem [shape: f32[128,128], index: 7, kind: input, shape index: {}]   ;;  %s20713_s8 = inlined_call_operand.hbm [shape: bf16[2,16,16,128], index: 8, kind: output, shape index: {}]  }
   0x1   :  { %14 = vsyncpa [#allocation6], 0 }
   0x2   :  { %16 = vsyncpa [#allocation6 + $0x1], 0  ;;  %s16054_s27 = smov 0   ;;  %s16056_s28 = smov 0  }
   0x3   :  { %s16058_s29 = smov 0   ;;  %s16060_s30 = smov 0  }
   0x4 LB: > { %s16075_s9 = sadd.s32 4294967295, %s15998_s30   ;;  %s13079_s10 = sadd.s32 4294967294, %s15998_s30   ;;  %s15998_s30 = sphi %s16060_s30, %s21059_s30   ;;  %s15994_s29 = sphi %s16058_s29, %s21058_s29   ;;  %s15990_s28 = sphi %s16056_s28, %s21057_s28   ;;  %s15986_s27 = sphi %s16054_s27, %s21056_s27  }
   0x5   : > { %s16079_s11 = sadd.s32 1, %s15998_s30   ;;  %s202_s12 = sadd.s32 1, %s15994_s29 }
   0x6   : > { %s199_s13 = ssub.s32 %s15998_s30, %s16079_s11  ;;  %p212_p0 = scmp.ne.s32.totalorder %s15994_s29, %s15990_s28 }
   0x7   : > { %p200_p1 = scmp.eq.s32.totalorder %s199_s13, 0  ;;  %p213_p2 = scmp.eq.s32.totalorder %s16075_s9, 1 }
   0x8   : > { %p218_p3 = scmp.ne.s32.totalorder %s15990_s28, %s15986_s27  ;;  %p219_p4 = scmp.eq.s32.totalorder %s13079_s10, 1 }
   0x9   : > { %s16090_s14 = scalar_select %p200_p1, %s15994_s29, %s202_s12  }
   0xa   : > { %p16092_p5 = por %p213_p2, %p212_p0  ;;  %p16096_p6 = por %p219_p4, %p218_p3 }
   0xb   : > { %p13080_p7 = scmp.ge.s32.totalorder %s15998_s30, 1  ;;  %p226_p8 = scmp.lt.s32.totalorder %s15998_s30, 3 }
   0xc   : > { %s20763_s16 = scalar_select %p16096_p6, 1, 0 }
   0xd   : > { %p15619_p9 = scmp.eq.s32.totalorder %s16075_s9, 0  ;;  %p16103_p10 = pnand %p13080_p7, %p226_p8 }
   0xe   : > { %s16000_s18 = smov [#allocation4]  }
   0xf   : > { %s241_s19 = sshll.u32 %s16000_s18, 4  ;;  %p15611_p11 = pneg %p16103_p10  ;;  %s242_s19 = int_to_ptr.vmem [resolvable:$true] %s241_s19 }
  0x10   : > { %s15919_s20 = scalar_lea.vmem %s242_s19, 9216  ;;  %p15927_p3 = scmp.lt.s32.totalorder %s242_s19, %s242_s19 }
  0x11   : > { %p15612_p12 = pnand %p15619_p9, %p15611_p11  ;;  %p15920_p0 = scmp.ne.s32.totalorder %s242_s19, %s15919_s20 }
  0x12   : > { %p15928_p4 = scmp.lt.s32.totalorder %s15919_s20, %s15919_s20 }
  0x13   : > { %p15910_p13 = pneg %p15612_p12 }
  0x14   : > { %p15929_p6 = por %p15928_p4, %p15927_p3 }
  0x15   : > { %p15922_p1 = pnand %p15920_p0, %p15910_p13 }
  0x17   : > { %p15923_p2 = pneg %p15922_p1 }
  0x19   : > { %p15930_p7 = pnand %p15929_p6, %p15923_p2 }
  0x1b   : > { %15933 = shalt.err (!%p15930_p7)
}
  0x1c   : > { %s16001_s21 = smov 64   ;;  %s16002_s22 = smov 4  }
  0x1d   : > { %15614 = dma.hbm_to_vmem [thread:$0]  (!%p15612_p12), %s20707_s2, 9216, %s242_s19, [#allocation5], %s16001_s21, %s16001_s21, %s16002_s22  }
  0x1e   : > { %280 = sbr.rel (%p16103_p10) target bundleno = 1804 (0x70c), region = 52 }
  0x23   : > { %15977 = dma.done.wait (%p15619_p9), [#allocation5], 9216  }
  0x24   : > { %15979 = vsyncadd (%p15619_p9), [#allocation5], 4294958080  ;;  %v15662_v0 = vld [vmem:[%s20706_s1 + $0x38] sm:$0xff]   ;;  %v15664_v2 = vld [vmem:[%s20706_s1 + $0x30] sm:$0xff]   ;;  %p314_p6 = scmp.lt.s32.totalorder %s16075_s9, 1  ;;  %v20765_v38 = vmov 0 }
  0x25   : > { %v15663_v1 = vld [vmem:[%s20706_s1 + $0x78] sm:$0xff]   ;;  %14600 = vmatprep.subr.bf16.mxu0 %v15662_v0  ;;  %v15665_v3 = vld [vmem:[%s20706_s1 + $0x70] sm:$0xff]   ;;  %v15666_v4 = vld [vmem:[%s20706_s1 + $0x28] sm:$0xff]   ;;  %vm875_vm0 = vsmask.f32 3328  ;;  %vm1743_vm3 = vcmask 1042432  }
  0x26   : > { %14648 = vmatprep.subr.bf16.mxu1 %v15663_v1  ;;  %14601 = vmatpush3.bf16.msra.mxu0 %v15662_v0  ;;  %v15667_v5 = vld [vmem:[%s20706_s1 + $0x68] sm:$0xff]   ;;  %s315_s24 = scalar_select %p314_p6, %s16075_s9, 1  ;;  %v15668_v6 = vld [vmem:[%s20706_s1 + $0x20] sm:$0xff]   ;;  %v15670_v8 = vld [vmem:[%s20706_s1 + $0x18] sm:$0xff]   ;;  %vm876_vm1 = vsmask.f32 7440 }
  0x27   : > { %14649 = vmatpush3.bf16.msra.mxu1 %v15663_v1  ;;  %14602 = vmatprep.subr.bf16.mxu0 %v15664_v2  ;;  %v15669_v7 = vld [vmem:[%s20706_s1 + $0x60] sm:$0xff]   ;;  %v15671_v9 = vld [vmem:[%s20706_s1 + $0x58] sm:$0xff]   ;;  %v15672_v10 = vld [vmem:[%s20706_s1 + $0x10] sm:$0xff]   ;;  %vm1744_vm4 = vcmask 1046532   ;;  %vm327_vm6 = vcmask 1040384   ;;  %vm16004_vm11 = vmmov 0  }
  0x28   : > { %14650 = vmatprep.subr.bf16.mxu1 %v15665_v3  ;;  %s15604_s13 = smul.u32 216, %s315_s24  ;;  %v15673_v11 = vld [vmem:[%s20706_s1 + $0x50] sm:$0xff]   ;;  %v15674_v16 = vld [vmem:[%s20706_s1 + $0x8] sm:$0xff]   ;;  %vm16178_vm2 = vmor %vm875_vm0, %vm876_vm1  ;;  %vm328_vm7 = vsmask.f32 256  ;;  %vm6792_vm14 = vcmask 1043456  }
  0x29   : > { %v15675_v21 = vld [vmem:[%s20706_s1 + $0x48] sm:$0xff]   ;;  %v20766_v38 = vsel %vm16178_vm2, 4294967295, %v20765_v38  ;;  %v15676_v42 = vld [vmem:[%s20706_s1] sm:$0xff]   ;;  %v15680_v58 = vld [vmem:[%s20706_s1 + $0xb8] sm:$0xff]   ;;  %vm384_vm9 = vsmask.f32 7938 }
  0x2a   : > { %14603 = vmatpush3.bf16.msra.mxu0 %v15664_v2  ;;  %s16158_s25 = scalar_lea.vmem %s20705_s0, %s15604_s13  ;;  %20767 = vst [vmem:[#allocation10_spill] sm:$0xff] %v20766_v38  ;;  %v15677_v46 = vld [vmem:[%s20706_s1 + $0x40] sm:$0xff]   ;;  %vm16358_vm5 = vmor %vm1743_vm3, %vm1744_vm4  ;;  %vm6469_vm12 = vsmask.f32 4368  ;;  %s311_s21 = sand.u32 1, %s15990_s28  }
  0x2b   : > { %14651 = vmatpush3.bf16.msra.mxu1 %v15665_v3  ;;  %14604 = vmatprep.subr.bf16.mxu0 %v15666_v4  ;;  %v15678_v12 = vld [vmem:[%s16158_s25] sm:$0xff]   ;;  %v829_v15 = vld [vmem:[%s16158_s25 + $0x8] sm:$0x1]  ;;  %v830_v23 = vld [vmem:[%s16158_s25 + $0xc] sm:$0xf]  ;;  %s20610_s22 = sshll.u32 %s311_s21, 7 }
  0x2c   : > { %14652 = vmatprep.subr.bf16.mxu1 %v15667_v5  ;;  %v827_v13 = vld [vmem:[%s16158_s25] sm:$0xf]  ;;  %v828_v14 = vld [vmem:[%s16158_s25 + $0x4] sm:$0xf]  ;;  %14616 = vmatprep.mubr.bf16.mxu0 %v15678_v12  ;;  %v898_v22 = vshll.u32 %v829_v15, 16  ;;  %v903_v31 = vshrl.u32 %v830_v23, 16  ;;  %vm17637_vm8 = vmand %vm327_vm6, %vm328_vm7 }
  0x2d   : > { %v879_v17 = vshrl.u32 %v827_v13, 16  ;;  %v882_v18 = vshll.u32 %v827_v13, 16  ;;  %v888_v19 = vshll.u32 %v828_v14, 16  ;;  %v892_v20 = vshrl.u32 %v828_v14, 16  ;;  %v831_v28 = vld [vmem:[%s16158_s25 + $0x10] sm:$0xf]  ;;  %vm17646_vm10 = vmand %vm327_vm6, %vm384_vm9 }
  0x2e   : > { %14605 = vmatpush3.bf16.msra.mxu0 %v15666_v4  ;;  %v900_v29 = vrot.slane %v898_v22, 5  ;;  %v832_v30 = vld [vmem:[%s16158_s25 + $0x14] sm:$0x1]  ;;  %v906_v32 = vshll.u32 %v830_v23, 16  ;;  %v912_v33 = vshll.u32 %v831_v28, 16  ;;  %v916_v36 = vshrl.u32 %v831_v28, 16  ;;  %vm18536_vm13 = vmor %vm328_vm7, %vm6469_vm12 }
  0x2f   : > { %14653 = vmatpush3.bf16.msra.mxu1 %v15667_v5  ;;  %14606 = vmatprep.subr.bf16.mxu0 %v15668_v6  ;;  %v881_v24 = vrot.slane %v879_v17, 4  ;;  %v884_v25 = vrot.slane %v882_v18, 5  ;;  %v890_v26 = vrot.slane %v888_v19, 5  ;;  %v894_v27 = vrot.slane %v892_v20, 4  ;;  %v833_v49 = vld [vmem:[%s16158_s25 + $0x18] sm:$0xf]  ;;  %vm18694_vm15 = vmand %vm6792_vm14, %vm384_vm9 }
  0x30   : > { %14654 = vmatprep.subr.bf16.mxu1 %v15669_v7  ;;  %v922_v37 = vshll.u32 %v832_v30, 16  ;;  %v905_v39 = vrot.slane %v903_v31, 4  ;;  %v908_v40 = vrot.slane %v906_v32, 5  ;;  %v914_v41 = vrot.slane %v912_v33, 5  ;;  %v834_v50 = vld [vmem:[%s16158_s25 + $0x1c] sm:$0xf] }
  0x31   : > { %v885_v34 = vor.u32 %v884_v25, %v881_v24  ;;  %v895_v35 = vor.u32 %v894_v27, %v890_v26  ;;  %v918_v45 = vrot.slane %v916_v36, 4  ;;  %v835_v54 = vld [vmem:[%s16158_s25 + $0x20] sm:$0x1]  ;;  %v927_v55 = vshrl.u32 %v833_v49, 16  ;;  %v15679_v61 = vld [vmem:[%s16158_s25 + $0xc] sm:$0xff]   ;;  %s14004_s23 = sshll.u32 %s16075_s9, 11 }
  0x32   : > { %14607 = vmatpush3.bf16.msra.mxu0 %v15668_v6  ;;  %v909_v47 = vor.u32 %v908_v40, %v905_v39  ;;  %v924_v48 = vrot.slane %v922_v37, 5  ;;  %v930_v59 = vshll.u32 %v833_v49, 16  ;;  %v936_v60 = vshll.u32 %v834_v50, 16  ;;  %v836_v2 = vld [vmem:[%s16158_s25 + $0x24] sm:$0xf]  ;;  %v15686_v31 = vld [vmem:[%s20706_s1 + $0xa8] sm:$0xff]  }
  0x33   : > { %14655 = vmatpush3.bf16.msra.mxu1 %v15669_v7  ;;  %14608 = vmatprep.subr.bf16.mxu0 %v15670_v8  ;;  %v886_v43 = vrot.slane %v885_v34, 4  ;;  %v896_v44 = vrot.slane %v895_v35, 4  ;;  %v919_v53 = vor.u32 %v918_v45, %v914_v41  ;;  %v929_v63 = vrot.slane %v927_v55, 4  ;;  %v837_v6 = vld [vmem:[%s16158_s25 + $0x28] sm:$0xf]  ;;  %s20637_s24 = scalar_lea.vmem [#allocation7], %s20610_s22 }
  0x34   : > { %14656 = vmatprep.subr.bf16.mxu1 %v15671_v9  ;;  %v910_v57 = vrot.slane %v909_v47, 4  ;;  %v940_v0 = vshrl.u32 %v834_v50, 16  ;;  %v946_v1 = vshll.u32 %v835_v54, 16  ;;  %v932_v4 = vrot.slane %v930_v59, 5  ;;  %v838_v7 = vld [vmem:[%s16158_s25 + $0x2c] sm:$0x1] }
  0x35   : > { %v891_v51 = vsel %vm16178_vm2, %v886_v43, %v890_v26  ;;  %v901_v52 = vsel %vm16178_vm2, %v896_v44, %v900_v29  ;;  %v920_v62 = vrot.slane %v919_v53, 4  ;;  %v938_v5 = vrot.slane %v936_v60, 5  ;;  %v839_v25 = vld [vmem:[%s16158_s25 + $0x30] sm:$0xf]  ;;  %v840_v29 = vld [vmem:[%s16158_s25 + $0x34] sm:$0xf] }
  0x36   : > { %14609 = vmatpush3.bf16.msra.mxu0 %v15670_v8  ;;  %v13111_v56 = vcombine.low %v891_v51, %v901_v52  ;;  %v915_v3 = vsel %vm16178_vm2, %v910_v57, %v914_v41  ;;  %v951_v12 = vshrl.u32 %v836_v2, 16  ;;  %v933_v14 = vor.u32 %v932_v4, %v929_v63  ;;  %v841_v34 = vld [vmem:[%s16158_s25 + $0x38] sm:$0x1]  ;;  %v15682_v39 = vld [vmem:[%s16158_s25 + $0x24] sm:$0xff]   ;;  %v842_v43 = vld [vmem:[%s16158_s25 + $0x3c] sm:$0xf] }
  0x37   : > { %14657 = vmatpush3.bf16.msra.mxu1 %v15671_v9  ;;  %14610 = vmatprep.subr.bf16.mxu0 %v15672_v10  ;;  %v925_v8 = vsel %vm16178_vm2, %v920_v62, %v924_v48  ;;  %v15681_v9 = vld [vmem:[%s16158_s25 + $0x18] sm:$0xff]   ;;  %v954_v15 = vshll.u32 %v836_v2, 16  ;;  %v964_v19 = vshrl.u32 %v837_v6, 16  ;;  %v970_v20 = vshll.u32 %v838_v7, 16  ;;  %v843_v49 = vld [vmem:[%s16158_s25 + $0x40] sm:$0xf] }
  0x38   : > { %14658 = vmatprep.subr.bf16.mxu1 %v15673_v11  ;;  %14664 = vmatprep.mubr.bf16.mxu1 %v13111_v56  ;;  %v13112_v13 = vcombine.low %v915_v3, %v925_v8  ;;  %v953_v18 = vrot.slane %v951_v12, 4  ;;  %v934_v22 = vrot.slane %v933_v14, 4  ;;  %v975_v30 = vshrl.u32 %v839_v25, 16  ;;  %v844_v53 = vld [vmem:[%s16158_s25 + $0x44] sm:$0x1]  ;;  %s13005_s26 = sshll.u32 %s20637_s24, 4  ;;  %s20651_s26 = int_to_ptr.vmem [resolvable:$true] %s13005_s26 }
  0x39   : > { %v956_v23 = vrot.slane %v954_v15, 5  ;;  %v966_v27 = vrot.slane %v964_v19, 4  ;;  %v972_v28 = vrot.slane %v970_v20, 5  ;;  %v978_v35 = vshll.u32 %v839_v25, 16  ;;  %v845_v3 = vld [vmem:[%s16158_s25 + $0x48] sm:$0xf] }
  0x3a   : > { %14611 = vmatpush3.bf16.msra.mxu0 %v15672_v10  ;;  %v942_v10 = vrot.slane %v940_v0, 4  ;;  %v939_v32 = vsel %vm16178_vm2, %v934_v22, %v938_v5  ;;  %v984_v36 = vshll.u32 %v840_v29, 16  ;;  %v977_v41 = vrot.slane %v975_v30, 4  ;;  %v846_v7 = vld [vmem:[%s16158_s25 + $0x4c] sm:$0xf]  ;;  %v15685_v15 = vld [vmem:[%s16158_s25 + $0x3c] sm:$0xff]  }
  0x3b   : > { %14659 = vmatpush3.bf16.msra.mxu1 %v15673_v11  ;;  %14612 = vmatprep.subr.bf16.mxu0 %v15674_v16  ;;  %v948_v11 = vrot.slane %v946_v1, 5  ;;  %v957_v33 = vor.u32 %v956_v23, %v953_v18  ;;  %v980_v47 = vrot.slane %v978_v35, 5  ;;  %v994_v52 = vshll.u32 %v841_v34, 16  ;;  %v15689_v19 = vld [vmem:[%s20706_s1 + $0xa0] sm:$0xff]   ;;  %v15687_v22 = vld [vmem:[%s16158_s25 + $0x48] sm:$0xff]   ;;  %s20665_s12 = scalar_lea.sflag [#allocation6], %s311_s21 }
  0x3c   : > { %14660 = vmatprep.subr.bf16.mxu1 %v15675_v21  ;;  %v943_v17 = vor.u32 %v942_v10, %v938_v5  ;;  %v986_v48 = vrot.slane %v984_v36, 5  ;;  %v999_v54 = vshrl.u32 %v842_v43, 16  ;;  %v1002_v57 = vshll.u32 %v842_v43, 16  ;;  %v848_v25 = vld [vmem:[%s16158_s25 + $0x54] sm:$0xf]  ;;  %s15934_s13 = scalar_lea.vmem %s20651_s26, 2048 }
  0x3d   : > { %v958_v45 = vrot.slane %v957_v33, 4  ;;  %v981_v56 = vor.u32 %v980_v47, %v977_v41  ;;  %v1012_v5 = vshrl.u32 %v843_v49, 16  ;;  %v1023_v8 = vshrl.u32 %v845_v3, 16  ;;  %v850_v30 = vld [vmem:[%s16158_s25 + $0x5c] sm:$0x1]  ;;  %p15935_p8 = scmp.ne.s32.totalorder %s20651_s26, %s15934_s13  ;;  %s16006_s17 = smov [#allocation7]  }
  0x3e   : > { %14613 = vmatpush3.bf16.msra.mxu0 %v15674_v16  ;;  %v960_v16 = vshll.u32 %v837_v6, 16  ;;  %v944_v26 = vrot.slane %v943_v17, 4  ;;  %v1001_v62 = vrot.slane %v999_v54, 4  ;;  %v1004_v1 = vrot.slane %v1002_v57, 5  ;;  %v853_v54 = vld [vmem:[%s16158_s25 + $0x68] sm:$0x1] }
  0x3f   : > { %14661 = vmatpush3.bf16.msra.mxu1 %v15675_v21  ;;  %14614 = vmatprep.subr.bf16.mxu0 %v15676_v42  ;;  %v15683_v21 = vld [vmem:[%s20706_s1 + $0xb0] sm:$0xff]   ;;  %v982_v0 = vrot.slane %v981_v56, 4  ;;  %v1018_v6 = vshll.u32 %v844_v53, 16  ;;  %v1026_v12 = vshll.u32 %v845_v3, 16  ;;  %v1025_v18 = vrot.slane %v1023_v8, 4  ;;  %v15693_v8 = vld [vmem:[%s20706_s1 + $0xf8] sm:$0xff]   ;;  %p15936_p9 = pnand %p15935_p8, %p16092_p5 }
  0x40   : > { %14662 = vmatprep.subr.bf16.mxu1 %v15677_v46  ;;  %v962_v24 = vrot.slane %v960_v16, 5  ;;  %v949_v37 = vsel %vm16178_vm2, %v944_v26, %v948_v11  ;;  %v1005_v10 = vor.u32 %v1004_v1, %v1001_v62  ;;  %v847_v11 = vld [vmem:[%s16158_s25 + $0x50] sm:$0x1]  ;;  %v1014_v16 = vrot.slane %v1012_v5, 4  ;;  %v15688_v56 = vld [vmem:[%s16158_s25 + $0x54] sm:$0xff]   ;;  %v15690_v62 = vld [vmem:[%s16158_s25 + $0x60] sm:$0xff]  }
  0x41   : > { %v13113_v44 = vcombine.low %v939_v32, %v949_v37  ;;  %v1020_v17 = vrot.slane %v1018_v6, 5  ;;  %v1028_v23 = vrot.slane %v1026_v12, 5  ;;  %v1047_v33 = vshrl.u32 %v848_v25, 16  ;;  %v854_v1 = vld [vmem:[%s16158_s25 + $0x6c] sm:$0xf]  ;;  %p15937_p10 = pneg %p15936_p9  ;;  %s15938_s18 = sshll.u32 %s16006_s17, 4  ;;  %s15939_s18 = int_to_ptr.vmem [resolvable:$false] %s15938_s18 }
  0x42   : > { %14615 = vmatpush3.bf16.msra.mxu0 %v15676_v42  ;;  %v967_v40 = vor.u32 %v966_v27, %v962_v24  ;;  %v988_v42 = vshrl.u32 %v840_v29, 16  ;;  %v963_v55 = vsel %vm16178_vm2, %v958_v45, %v962_v24  ;;  %v1036_v27 = vshrl.u32 %v846_v7, 16  ;;  %v849_v29 = vld [vmem:[%s16158_s25 + $0x58] sm:$0xf]  ;;  %s15940_s19 = scalar_lea.vmem %s15939_s18, 4096  ;;  %p15941_p11 = scmp.lt.s32.totalorder %s20651_s26, %s15939_s18 }
  0x43   : > { %14663 = vmatpush3.bf16.msra.mxu1 %v15677_v46  ;;  %14696 = vmatprep.subr.bf16.mxu0 %v15680_v58  ;;  %v15684_v46 = vld [vmem:[%s16158_s25 + $0x30] sm:$0xff]   ;;  %v1029_v32 = vor.u32 %v1028_v23, %v1025_v18  ;;  %v1050_v34 = vshll.u32 %v848_v25, 16  ;;  %v1049_v41 = vrot.slane %v1047_v33, 4  ;;  %v1060_v43 = vshrl.u32 %v849_v29, 16  ;;  %p15942_p12 = scmp.lt.s32.totalorder %s15940_s19, %s15934_s13 }
  0x44   : > { %v968_v50 = vrot.slane %v967_v40, 4  ;;  %v990_v51 = vrot.slane %v988_v42, 4  ;;  %v1038_v36 = vrot.slane %v1036_v27, 4  ;;  %v1066_v47 = vshll.u32 %v850_v30, 16  ;;  %14744 = vmatprep.subr.bf16.mxu1 %v15693_v8  ;;  %v15694_v18 = vld [vmem:[%s20706_s1 + $0xf0] sm:$0xff]  }
  0x45   : > { %14617 = vmatmul.mubr.bf16.vlgmr.msra.gmra.mxu0 %v15679_v61  ;;  %v996_v61 = vrot.slane %v994_v52, 5  ;;  %v1030_v40 = vrot.slane %v1029_v32, 4  ;;  %v1052_v42 = vrot.slane %v1050_v34, 5  ;;  %v1062_v53 = vrot.slane %v1060_v43, 4  ;;  %v15691_v33 = vld [vmem:[%s16158_s25 + $0x6c] sm:$0xff]   ;;  %p15943_p13 = por %p15942_p12, %p15941_p11 }
  0x46   : > { %14665 = vmatmul.mubr.bf16.vlgmr.msra.gmra.mxu1 %v13112_v13  ;;  %14697 = vmatpush3.bf16.msra.mxu0 %v15680_v58  ;;  %v1008_v58 = vshll.u32 %v843_v49, 16  ;;  %v973_v59 = vsel %vm16178_vm2, %v968_v50, %v972_v28  ;;  %v991_v60 = vor.u32 %v990_v51, %v986_v48  ;;  %v1032_v13 = vshll.u32 %v846_v7, 16  ;;  %v852_v49 = vld [vmem:[%s16158_s25 + $0x64] sm:$0xf]  ;;  %v855_v7 = vld [vmem:[%s16158_s25 + $0x70] sm:$0xf] }
  0x47   : > { %14620 = vmatprep.mubr.bf16.mxu0 %v15681_v9  ;;  %14698 = vmatprep.subr.bf16.mxu0 %v15683_v21  ;;  %v13114_v63 = vcombine.low %v963_v55, %v973_v59  ;;  %v987_v9 = vsel %vm16178_vm2, %v982_v0, %v986_v48  ;;  %v1042_v28 = vshll.u32 %v847_v11, 16  ;;  %v851_v48 = vld [vmem:[%s16158_s25 + $0x60] sm:$0xf]  ;;  %v1053_v52 = vor.u32 %v1052_v42, %v1049_v41  ;;  %v15697_v41 = vld [vmem:[%s20706_s1 + $0x90] sm:$0xff]   ;;  %p15944_p0 = pnand %p15943_p13, %p15937_p10 }
  0x48   : > { %14668 = vmatprep.mubr.bf16.mxu1 %v13113_v44  ;;  %v1010_v2 = vrot.slane %v1008_v58, 5  ;;  %v992_v4 = vrot.slane %v991_v60, 4  ;;  %v1034_v24 = vrot.slane %v1032_v13, 5  ;;  %v1068_v57 = vrot.slane %v1066_v47, 5  ;;  %v856_v13 = vld [vmem:[%s16158_s25 + $0x74] sm:$0x1]  ;;  %14745 = vmatpush3.bf16.msra.mxu1 %v15693_v8 }
  0x49   : > { %v1044_v37 = vrot.slane %v1042_v28, 5  ;;  %v1071_v58 = vshrl.u32 %v851_v48, 16  ;;  %v1074_v59 = vshll.u32 %v851_v48, 16  ;;  %v1054_v60 = vrot.slane %v1053_v52, 4  ;;  %14746 = vmatprep.subr.bf16.mxu1 %v15694_v18  ;;  %v859_v43 = vld [vmem:[%s16158_s25 + $0x80] sm:$0x1] }
  0x4a   : > { %14699 = vmatpush3.bf16.msra.mxu0 %v15683_v21  ;;  %v997_v14 = vsel %vm16178_vm2, %v992_v4, %v996_v61  ;;  %v1006_v21 = vrot.slane %v1005_v10, 4  ;;  %v1015_v26 = vor.u32 %v1014_v16, %v1010_v2  ;;  %v1039_v45 = vor.u32 %v1038_v36, %v1034_v24  ;;  %v15698_v47 = vld [vmem:[%s20706_s1 + $0xe8] sm:$0xff]   ;;  %v15699_v52 = vld [vmem:[%s20706_s1 + $0xe0] sm:$0xff]  }
  0x4b   : > { %14700 = vmatprep.subr.bf16.mxu0 %v15686_v31  ;;  %v13115_v20 = vcombine.low %v987_v9, %v997_v14  ;;  %v1035_v51 = vsel %vm16178_vm2, %v1030_v40, %v1034_v24  ;;  %v1084_v0 = vshrl.u32 %v852_v49, 16  ;;  %v1073_v4 = vrot.slane %v1071_v58, 4  ;;  %v858_v40 = vld [vmem:[%s16158_s25 + $0x7c] sm:$0xf]  ;;  %v15696_v8 = vld [vmem:[%s16158_s25 + $0x84] sm:$0xff]  }
  0x4c   : > { %v1016_v35 = vrot.slane %v1015_v26, 4  ;;  %v1040_v55 = vrot.slane %v1039_v45, 4  ;;  %v1076_v5 = vrot.slane %v1074_v59, 5  ;;  %v1090_v6 = vshll.u32 %v853_v54, 16  ;;  %14747 = vmatpush3.bf16.msra.mxu1 %v15694_v18 }
  0x4d   : > { %14621 = vmatmul.mubr.bf16.gmra.mxu0 %v15682_v39  ;;  %v1056_v39 = vshll.u32 %v849_v29, 16  ;;  %v1114_v30 = vshll.u32 %v856_v13, 16  ;;  %14748 = vmatprep.subr.bf16.mxu1 %v15698_v47 }
  0x4e   : > { %14669 = vmatmul.mubr.bf16.gmra.mxu1 %v13114_v63  ;;  %14624 = vmatprep.mubr.bf16.mxu0 %v15684_v46  ;;  %v1021_v44 = vsel %vm16178_vm2, %v1016_v35, %v1020_v17  ;;  %v1080_v63 = vshll.u32 %v852_v49, 16  ;;  %v1045_v3 = vsel %vm16178_vm2, %v1040_v55, %v1044_v37  ;;  %v1077_v14 = vor.u32 %v1076_v5, %v1073_v4  ;;  %v15695_v37 = vld [vmem:[%s16158_s25 + $0x78] sm:$0xff]  }
  0x4f   : > { %14701 = vmatpush3.bf16.msra.mxu0 %v15686_v31  ;;  %14672 = vmatprep.mubr.bf16.mxu1 %v13115_v20  ;;  %v1011_v31 = vsel %vm16178_vm2, %v1006_v21, %v1010_v2  ;;  %v1058_v46 = vrot.slane %v1056_v39, 5  ;;  %v15692_v2 = vld [vmem:[%s20706_s1 + $0x98] sm:$0xff]   ;;  %v13117_v9 = vcombine.low %v1035_v51, %v1045_v3  ;;  %v1092_v16 = vrot.slane %v1090_v6, 5 }
  0x50   : > { %14702 = vmatprep.subr.bf16.mxu0 %v15689_v19  ;;  %v13116_v50 = vcombine.low %v1011_v31, %v1021_v44  ;;  %v1082_v12 = vrot.slane %v1080_v63, 5  ;;  %v1095_v17 = vshrl.u32 %v854_v1, 16  ;;  %v1098_v20 = vshll.u32 %v854_v1, 16  ;;  %v857_v39 = vld [vmem:[%s16158_s25 + $0x78] sm:$0xf]  ;;  %14749 = vmatpush3.bf16.msra.mxu1 %v15698_v47 }
  0x51   : > { %v1063_v61 = vor.u32 %v1062_v53, %v1058_v46  ;;  %v1059_v10 = vsel %vm16178_vm2, %v1054_v60, %v1058_v46  ;;  %v1104_v21 = vshll.u32 %v855_v7, 16  ;;  %v1078_v24 = vrot.slane %v1077_v14, 4  ;;  %v860_v60 = vld [vmem:[%s16158_s25 + $0x84] sm:$0xf]  ;;  %v862_v1 = vld [vmem:[%s16158_s25 + $0x8c] sm:$0x1]  ;;  %14750 = vmatprep.subr.bf16.mxu1 %v15699_v52 }
  0x52   : > { %v1097_v26 = vrot.slane %v1095_v17, 4  ;;  %v1100_v27 = vrot.slane %v1098_v20, 5  ;;  %v1116_v36 = vrot.slane %v1114_v30, 5  ;;  %v1119_v44 = vshrl.u32 %v857_v39, 16  ;;  %v868_v47 = vld [vmem:[%s16158_s25 + $0xa4] sm:$0x1] }
  0x53   : > { %14703 = vmatpush3.bf16.msra.mxu0 %v15689_v19  ;;  %v1064_v11 = vrot.slane %v1063_v61, 4  ;;  %v1106_v28 = vrot.slane %v1104_v21, 5  ;;  %v1083_v31 = vsel %vm16178_vm2, %v1078_v24, %v1082_v12  ;;  %v1122_v45 = vshll.u32 %v857_v39, 16  ;;  %v861_v61 = vld [vmem:[%s16158_s25 + $0x88] sm:$0xf] }
  0x54   : > { %14704 = vmatprep.subr.bf16.mxu0 %v15692_v2  ;;  %v1101_v34 = vor.u32 %v1100_v27, %v1097_v26  ;;  %v1128_v46 = vshll.u32 %v858_v40, 16  ;;  %v1132_v51 = vshrl.u32 %v858_v40, 16  ;;  %v1121_v53 = vrot.slane %v1119_v44, 4  ;;  %14751 = vmatpush3.bf16.msra.mxu1 %v15699_v52  ;;  %v865_v26 = vld [vmem:[%s16158_s25 + $0x98] sm:$0x1] }
  0x55   : > { %14625 = vmatmul.mubr.bf16.gmra.mxu0 %v15685_v15  ;;  %v1086_v15 = vrot.slane %v1084_v0, 4  ;;  %v1069_v19 = vsel %vm16178_vm2, %v1064_v11, %v1068_v57  ;;  %v1124_v54 = vrot.slane %v1122_v45, 5  ;;  %v1146_v4 = vshll.u32 %v860_v60, 16  ;;  %v15702_v11 = vld [vmem:[%s20706_s1 + $0x88] sm:$0xff]  }
  0x56   : > { %14628 = vmatprep.mubr.bf16.mxu0 %v15687_v22  ;;  %14673 = vmatmul.mubr.bf16.gmra.mxu1 %v13116_v50  ;;  %v1108_v22 = vshrl.u32 %v855_v7, 16  ;;  %v13118_v23 = vcombine.low %v1059_v10, %v1069_v19  ;;  %v1102_v49 = vrot.slane %v1101_v34, 4  ;;  %v1130_v55 = vrot.slane %v1128_v46, 5  ;;  %v15703_v19 = vld [vmem:[%s20706_s1 + $0xd8] sm:$0xff]  }
  0x57   : > { %14705 = vmatpush3.bf16.msra.mxu0 %v15692_v2  ;;  %14676 = vmatprep.mubr.bf16.mxu1 %v13117_v9  ;;  %v1087_v25 = vor.u32 %v1086_v15, %v1082_v12  ;;  %v1134_v59 = vrot.slane %v1132_v51, 4  ;;  %v1125_v63 = vor.u32 %v1124_v54, %v1121_v53  ;;  %v1143_v2 = vshrl.u32 %v860_v60, 16 }
  0x58   : > { %v1110_v29 = vrot.slane %v1108_v22, 4  ;;  %14706 = vmatprep.subr.bf16.mxu0 %v15697_v41  ;;  %v1107_v57 = vsel %vm16178_vm2, %v1102_v49, %v1106_v28  ;;  %v1152_v5 = vshll.u32 %v861_v61, 16  ;;  %v1156_v6 = vshrl.u32 %v861_v61, 16  ;;  %14752 = vmatprep.subr.bf16.mxu1 %v15703_v19 }
  0x59   : > { %v1088_v32 = vrot.slane %v1087_v25, 4  ;;  %v1135_v3 = vor.u32 %v1134_v59, %v1130_v55  ;;  %v1126_v7 = vrot.slane %v1125_v63, 4  ;;  %v1145_v9 = vrot.slane %v1143_v2, 4  ;;  %v864_v25 = vld [vmem:[%s16158_s25 + $0x94] sm:$0xf]  ;;  %14753 = vmatpush3.bf16.msra.mxu1 %v15703_v19 }
  0x5a   : > { %v1111_v35 = vor.u32 %v1110_v29, %v1106_v28  ;;  %v1162_v10 = vshll.u32 %v862_v1, 16  ;;  %v1148_v13 = vrot.slane %v1146_v4, 5  ;;  %v1154_v14 = vrot.slane %v1152_v5, 5  ;;  %v869_v4 = vld [vmem:[%s16158_s25 + $0xa8] sm:$0xf] }
  0x5b   : > { %v1093_v42 = vsel %vm16178_vm2, %v1088_v32, %v1092_v16  ;;  %14707 = vmatpush3.bf16.msra.mxu0 %v15697_v41  ;;  %v1136_v12 = vrot.slane %v1135_v3, 4  ;;  %v1158_v15 = vrot.slane %v1156_v6, 4  ;;  %v15700_v16 = vld [vmem:[%s16158_s25 + $0x90] sm:$0xff]   ;;  %v1131_v17 = vsel %vm16178_vm2, %v1126_v7, %v1130_v55  ;;  %v870_v6 = vld [vmem:[%s16158_s25 + $0xac] sm:$0xf] }
  0x5c   : > { %v13119_v48 = vcombine.low %v1083_v31, %v1093_v42  ;;  %v1112_v50 = vrot.slane %v1111_v35, 4  ;;  %v1164_v18 = vrot.slane %v1162_v10, 5  ;;  %14708 = vmatprep.subr.bf16.mxu0 %v15702_v11  ;;  %v1149_v21 = vor.u32 %v1148_v13, %v1145_v9  ;;  %v866_v42 = vld [vmem:[%s16158_s25 + $0x9c] sm:$0xf]  ;;  %v871_v7 = vld [vmem:[%s16158_s25 + $0xb0] sm:$0x1] }
  0x5d   : > { %14629 = vmatmul.mubr.bf16.gmra.mxu0 %v15688_v56  ;;  %v1138_v56 = vshll.u32 %v859_v43, 16  ;;  %v1159_v22 = vor.u32 %v1158_v15, %v1154_v14  ;;  %v1176_v31 = vshll.u32 %v864_v25, 16  ;;  %v1180_v32 = vshrl.u32 %v864_v25, 16  ;;  %v867_v43 = vld [vmem:[%s16158_s25 + $0xa0] sm:$0xf] }
  0x5e   : > { %14632 = vmatprep.mubr.bf16.mxu0 %v15690_v62  ;;  %14677 = vmatmul.mubr.bf16.gmra.mxu1 %v13118_v23  ;;  %v1117_v58 = vsel %vm16178_vm2, %v1112_v50, %v1116_v36  ;;  %v863_v23 = vld [vmem:[%s16158_s25 + $0x90] sm:$0xf]  ;;  %v1150_v29 = vrot.slane %v1149_v21, 4  ;;  %v1186_v35 = vshll.u32 %v865_v26, 16  ;;  %v15701_v50 = vld [vmem:[%s16158_s25 + $0x9c] sm:$0xff]   ;;  %v1194_v51 = vshll.u32 %v866_v42, 16 }
  0x5f   : > { %14680 = vmatprep.mubr.bf16.mxu1 %v13119_v48  ;;  %v13120_v62 = vcombine.low %v1107_v57, %v1117_v58  ;;  %v1140_v0 = vrot.slane %v1138_v56, 5  ;;  %14709 = vmatpush3.bf16.msra.mxu0 %v15702_v11  ;;  %v1167_v27 = vshrl.u32 %v863_v23, 16  ;;  %v1170_v28 = vshll.u32 %v863_v23, 16  ;;  %v15704_v36 = vld [vmem:[%s20706_s1 + $0xd0] sm:$0xff]   ;;  %v15705_v57 = vld [vmem:[%s16158_s25 + $0xa8] sm:$0xff]  }
  0x60   : > { %v1160_v30 = vrot.slane %v1159_v22, 4  ;;  %v1178_v40 = vrot.slane %v1176_v31, 5  ;;  %v1182_v41 = vrot.slane %v1180_v32, 4  ;;  %v1188_v46 = vrot.slane %v1186_v35, 5  ;;  %14754 = vmatprep.subr.bf16.mxu1 %v15704_v36  ;;  %v872_v23 = vld [vmem:[%s16158_s25 + $0xb4] sm:$0xf] }
  0x61   : > { %v1141_v20 = vsel %vm16178_vm2, %v1136_v12, %v1140_v0  ;;  %v1172_v34 = vrot.slane %v1170_v28, 5  ;;  %v1191_v48 = vshrl.u32 %v866_v42, 16  ;;  %v1200_v52 = vshll.u32 %v867_v43, 16  ;;  %14755 = vmatpush3.bf16.msra.mxu1 %v15704_v36  ;;  %v15707_v0 = vld [vmem:[%s20706_s1 + $0x80] sm:$0xff]   ;;  %v874_v28 = vld [vmem:[%s16158_s25 + $0xbc] sm:$0x1] }
  0x62   : > { %v13121_v24 = vcombine.low %v1131_v17, %v1141_v20  ;;  %v1165_v39 = vsel %vm16178_vm2, %v1160_v30, %v1164_v18  ;;  %v1183_v49 = vor.u32 %v1182_v41, %v1178_v40  ;;  %v1204_v53 = vshrl.u32 %v867_v43, 16  ;;  %14710 = vmatprep.subr.bf16.mxu0 %v15707_v0  ;;  %v15706_v17 = vld [vmem:[%s16158_s25 + $0xb4] sm:$0xff]   ;;  %v15708_v18 = vld [vmem:[%s20706_s1 + $0xc8] sm:$0xff]  }
  0x63   : > { %v1193_v55 = vrot.slane %v1191_v48, 4  ;;  %v1210_v56 = vshll.u32 %v868_v47, 16  ;;  %v1196_v59 = vrot.slane %v1194_v51, 5  ;;  %v1202_v60 = vrot.slane %v1200_v52, 5  ;;  %14711 = vmatpush3.bf16.msra.mxu0 %v15707_v0  ;;  %14756 = vmatprep.subr.bf16.mxu1 %v15708_v18  ;;  %v1648_v51 = vld [vmem:[%s16158_s25 + $0x4] sm:$0xf] }
  0x64   : > { %v1184_v58 = vrot.slane %v1183_v49, 4  ;;  %v1206_v61 = vrot.slane %v1204_v53, 4  ;;  %v1218_v9 = vshll.u32 %v869_v4, 16  ;;  %v1224_v12 = vshll.u32 %v870_v6, 16  ;;  %v1649_v52 = vld [vmem:[%s16158_s25 + $0x8] sm:$0x1] }
  0x65   : > { %14633 = vmatmul.mubr.bf16.gmra.mxu0 %v15691_v33  ;;  %v1169_v33 = vrot.slane %v1167_v27, 4  ;;  %v1212_v63 = vrot.slane %v1210_v56, 5  ;;  %v1197_v2 = vor.u32 %v1196_v59, %v1193_v55  ;;  %v1228_v13 = vshrl.u32 %v870_v6, 16  ;;  %14757 = vmatpush3.bf16.msra.mxu1 %v15708_v18  ;;  %v1656_v18 = vld [vmem:[%s16158_s25 + $0x24] sm:$0xe] }
  0x66   : > { %14636 = vmatprep.mubr.bf16.mxu0 %v15695_v37  ;;  %14681 = vmatmul.mubr.bf16.gmra.mxu1 %v13120_v62  ;;  %v1155_v37 = vsel %vm16178_vm2, %v1150_v29, %v1154_v14  ;;  %v1189_v1 = vsel %vm16178_vm2, %v1184_v58, %v1188_v46  ;;  %v1207_v3 = vor.u32 %v1206_v61, %v1202_v60  ;;  %v1220_v15 = vrot.slane %v1218_v9, 5  ;;  %v1652_v61 = vld [vmem:[%s16158_s25 + $0x14] sm:$0x1] }
  0x67   : > { %14684 = vmatprep.mubr.bf16.mxu1 %v13121_v24  ;;  %v13122_v44 = vcombine.low %v1155_v37, %v1165_v39  ;;  %v1173_v45 = vor.u32 %v1172_v34, %v1169_v33  ;;  %v1198_v10 = vrot.slane %v1197_v2, 4  ;;  %v1226_v21 = vrot.slane %v1224_v12, 5  ;;  %v873_v24 = vld [vmem:[%s16158_s25 + $0xb8] sm:$0xf]  ;;  %v15709_v34 = vld [vmem:[%s20706_s1 + $0xc0] sm:$0xff]  }
  0x68   : > { %v1208_v11 = vrot.slane %v1207_v3, 4  ;;  %v1230_v22 = vrot.slane %v1228_v13, 4  ;;  %v1239_v29 = vshrl.u32 %v872_v23, 16  ;;  %v1242_v31 = vshll.u32 %v872_v23, 16  ;;  %v16352_v39 = vld [vmem:[%s20706_s1 + $0x138] sm:$0xff]   ;;  %14758 = vmatprep.subr.bf16.mxu1 %v15709_v34  ;;  %v15713_v13 = vld [vmem:[%s20706_s1 + $0x130] sm:$0xff]  }
  0x69   : > { %v1174_v54 = vrot.slane %v1173_v45, 4  ;;  %v1203_v19 = vsel %vm16178_vm2, %v1198_v10, %v1202_v60  ;;  %v1248_v32 = vshll.u32 %v873_v24, 16  ;;  %v1252_v33 = vshrl.u32 %v873_v24, 16  ;;  %14792 = vmatprep.subr.bf16.mxu0 %v16352_v39  ;;  %14759 = vmatpush3.bf16.msra.mxu1 %v15709_v34  ;;  %v1651_v60 = vld [vmem:[%s16158_s25 + $0x10] sm:$0xf]  ;;  %v15712_v24 = vld [vmem:[%s16158_s25 + $0x18] sm:$0xff]  }
  0x6a   : > { %v1213_v20 = vsel %vm16178_vm2, %v1208_v11, %v1212_v63  ;;  %v1231_v30 = vor.u32 %v1230_v22, %v1226_v21  ;;  %v1241_v36 = vrot.slane %v1239_v29, 4  ;;  %v1258_v37 = vshll.u32 %v874_v28, 16  ;;  %v1653_v11 = vld [vmem:[%s16158_s25 + $0x18] sm:$0xe]  ;;  %v1654_v12 = vld [vmem:[%s16158_s25 + $0x1c] sm:$0xf] }
  0x6b   : > { %v1179_v62 = vsel %vm16178_vm2, %v1174_v54, %v1178_v40  ;;  %v13124_v25 = vcombine.low %v1203_v19, %v1213_v20  ;;  %v1244_v41 = vrot.slane %v1242_v31, 5  ;;  %v1250_v42 = vrot.slane %v1248_v32, 5  ;;  %v1658_v22 = vld [vmem:[%s16158_s25 + $0x2c] sm:$0x1]  ;;  %v15714_v29 = vld [vmem:[%s16158_s25 + $0x24] sm:$0xff]  }
  0x6c   : > { %v13123_v5 = vcombine.low %v1179_v62, %v1189_v1  ;;  %v1232_v40 = vrot.slane %v1231_v30, 4  ;;  %v1254_v43 = vrot.slane %v1252_v33, 4  ;;  %v1260_v45 = vrot.slane %v1258_v37, 5  ;;  %v15716_v33 = vld [vmem:[%s20706_s1 + $0x128] sm:$0xff]   ;;  %v1661_v37 = vld [vmem:[%s16158_s25 + $0x38] sm:$0x1] }
  0x6d   : > { %14637 = vmatmul.mubr.bf16.gmra.mxu0 %v15696_v8  ;;  %v1215_v8 = vshrl.u32 %v869_v4, 16  ;;  %v20768_v46 = vmov 0  ;;  %v1245_v48 = vor.u32 %v1244_v41, %v1241_v36  ;;  %v1748_v55 = vrot.slane %v1648_v51, 5  ;;  %v1660_v36 = vld [vmem:[%s16158_s25 + $0x34] sm:$0xf] }
  0x6e   : > { %14640 = vmatprep.mubr.bf16.mxu0 %v15700_v16  ;;  %14685 = vmatmul.mubr.bf16.gmra.mxu1 %v13122_v44  ;;  %v1234_v16 = vshll.u32 %v871_v7, 16  ;;  %v20769_v46 = vsel %vm16358_vm5, 4294967295, %v20768_v46  ;;  %v1255_v49 = vor.u32 %v1254_v43, %v1250_v42  ;;  %v1751_v56 = vrot.slane %v1649_v52, 5  ;;  %v1662_v43 = vld [vmem:[%s16158_s25 + $0x3c] sm:$0xe] }
  0x6f   : > { %14688 = vmatprep.mubr.bf16.mxu1 %v13123_v5  ;;  %v1217_v14 = vrot.slane %v1215_v8, 4  ;;  %20770 = vst [vmem:[#allocation11_spill] sm:$0xff] %v20769_v46  ;;  %v1246_v58 = vrot.slane %v1245_v48, 4  ;;  %v1750_v63 = vrot.slane %v1748_v55, 4  ;;  %v1755_v1 = vrot.slane %v1651_v60, 5  ;;  %v15711_v5 = vld [vmem:[%s16158_s25 + $0xc] sm:$0xff]  }
  0x70   : > { %v1236_v27 = vrot.slane %v1234_v16, 5  ;;  %v1256_v59 = vrot.slane %v1255_v49, 4  ;;  %v1758_v4 = vrot.slane %v1652_v61, 5  ;;  %v13137_v16 = vrot.slane %v1653_v11, 9  ;;  %v1666_v60 = vld [vmem:[%s16158_s25 + $0x4c] sm:$0xf] }
  0x71   : > { %v1221_v26 = vor.u32 %v1220_v15, %v1217_v14  ;;  %v1251_v2 = vsel %vm16178_vm2, %v1246_v58, %v1250_v42  ;;  %v1752_v7 = vsel %vm16358_vm5, %v1750_v63, %v1751_v56  ;;  %v1757_v9 = vrot.slane %v1755_v1, 4  ;;  %v1655_v15 = vld [vmem:[%s16158_s25 + $0x20] sm:$0x1]  ;;  %v1667_v61 = vld [vmem:[%s16158_s25 + $0x50] sm:$0x1] }
  0x72   : > { %v1237_v47 = vsel %vm16178_vm2, %v1232_v40, %v1236_v27  ;;  %v1261_v3 = vsel %vm16178_vm2, %v1256_v59, %v1260_v45  ;;  %v1765_v20 = vrot.slane %v1655_v15, 5  ;;  %v13138_v23 = vrot.slane %v1656_v18, 9  ;;  %v1663_v45 = vld [vmem:[%s16158_s25 + $0x40] sm:$0xf]  ;;  %v1665_v59 = vld [vmem:[%s16158_s25 + $0x48] sm:$0xe] }
  0x73   : > { %v1222_v35 = vrot.slane %v1221_v26, 4  ;;  %v13126_v6 = vcombine.low %v1251_v2, %v1261_v3  ;;  %v1759_v14 = vsel %vm16358_vm5, %v1757_v9, %v1758_v4  ;;  %v1772_v28 = vrot.slane %v1658_v22, 5  ;;  %v15717_v63 = vld [vmem:[%s16158_s25 + $0x3c] sm:$0xff]   ;;  %v1668_v3 = vld [vmem:[%s16158_s25 + $0x54] sm:$0xe] }
  0x74   : > { %v1776_v41 = vrot.slane %v1660_v36, 5  ;;  %v1779_v42 = vrot.slane %v1661_v37, 5  ;;  %v13140_v48 = vrot.slane %v1662_v43, 9  ;;  %v1783_v51 = vrot.slane %v1663_v45, 5  ;;  %v1669_v4 = vld [vmem:[%s16158_s25 + $0x58] sm:$0xf] }
  0x75   : > { %14641 = vmatmul.mubr.bf16.gmra.mxu0 %v15701_v50  ;;  %v1227_v44 = vsel %vm16178_vm2, %v1222_v35, %v1226_v21  ;;  %v1647_v50 = vld [vmem:[%s16158_s25] sm:$0xe]  ;;  %v1657_v21 = vld [vmem:[%s16158_s25 + $0x28] sm:$0xf]  ;;  %v1659_v35 = vld [vmem:[%s16158_s25 + $0x30] sm:$0xe] }
  0x76   : > { %14644 = vmatprep.mubr.bf16.mxu0 %v15705_v57  ;;  %14689 = vmatmul.mubr.bf16.gmra.mxu1 %v13124_v25  ;;  %v13125_v53 = vcombine.low %v1227_v44, %v1237_v47  ;;  %v13135_v54 = vrot.slane %v1647_v50, 9  ;;  %v1650_v57 = vld [vmem:[%s16158_s25 + $0xc] sm:$0xe]  ;;  %v1769_v27 = vrot.slane %v1657_v21, 5  ;;  %v13139_v40 = vrot.slane %v1659_v35, 9  ;;  %v15725_v15 = vld [vmem:[%s20706_s1 + $0x178] sm:$0xff]  }
  0x77   : > { %v13136_v0 = vrot.slane %v1650_v57, 9  ;;  %v1664_v47 = vld [vmem:[%s16158_s25 + $0x44] sm:$0x1]  ;;  %v1778_v50 = vrot.slane %v1776_v41, 4  ;;  %v1785_v56 = vrot.slane %v1783_v51, 4  ;;  %v1784_v58 = vsel %vm16358_vm5, %v13140_v48, %v1783_v51  ;;  %14840 = vmatprep.subr.bf16.mxu1 %v15725_v15 }
  0x78   : > { %14692 = vmatprep.mubr.bf16.mxu1 %v13125_v53  ;;  %v1749_v62 = vsel %vm16358_vm5, %v13135_v54, %v1748_v55  ;;  %v1770_v31 = vsel %vm16358_vm5, %v13138_v23, %v1769_v27  ;;  %v1771_v32 = vrot.slane %v1769_v27, 4  ;;  %v1777_v49 = vsel %vm16358_vm5, %v13139_v40, %v1776_v41  ;;  %v15719_v53 = vld [vmem:[%s20706_s1 + $0x120] sm:$0xff]   ;;  %v15715_v54 = vld [vmem:[%s16158_s25 + $0x30] sm:$0xff]   ;;  %v1678_v43 = vld [vmem:[%s16158_s25 + $0x7c] sm:$0xf] }
  0x79   : > { %v1756_v8 = vsel %vm16358_vm5, %v13136_v0, %v1755_v1  ;;  %v13151_v10 = vcombine.low %v1749_v62, %v1752_v7  ;;  %v1786_v52 = vrot.slane %v1664_v47, 5  ;;  %v1780_v55 = vsel %vm16358_vm5, %v1778_v50, %v1779_v42  ;;  %v15722_v7 = vld [vmem:[%s20706_s1 + $0x118] sm:$0xff]   ;;  %v1672_v18 = vld [vmem:[%s16158_s25 + $0x64] sm:$0xf]  ;;  %v1675_v27 = vld [vmem:[%s16158_s25 + $0x70] sm:$0xf] }
  0x7a   : > { %v13152_v19 = vcombine.low %v1756_v8, %v1759_v14  ;;  %v13155_v57 = vcombine.low %v1777_v49, %v1780_v55  ;;  %v13141_v0 = vrot.slane %v1665_v59, 9  ;;  %v1790_v1 = vrot.slane %v1666_v60, 5  ;;  %v1677_v42 = vld [vmem:[%s16158_s25 + $0x78] sm:$0xe]  ;;  %v1680_v48 = vld [vmem:[%s16158_s25 + $0x84] sm:$0xe] }
  0x7b   : > { %v1787_v62 = vsel %vm16358_vm5, %v1785_v56, %v1786_v52  ;;  %v1793_v2 = vrot.slane %v1667_v61, 5  ;;  %v1804_v22 = vrot.slane %v1672_v18, 5  ;;  %v13145_v45 = vrot.slane %v1677_v42, 9  ;;  %v15721_v49 = vld [vmem:[%s16158_s25 + $0x60] sm:$0xff]   ;;  %v1681_v51 = vld [vmem:[%s16158_s25 + $0x88] sm:$0xf] }
  0x7c   : > { %v1791_v8 = vsel %vm16358_vm5, %v13141_v0, %v1790_v1  ;;  %v1792_v9 = vrot.slane %v1790_v1, 4  ;;  %v1818_v47 = vrot.slane %v1678_v43, 5  ;;  %v1682_v52 = vld [vmem:[%s16158_s25 + $0x8c] sm:$0x1]  ;;  %v13146_v55 = vrot.slane %v1680_v48, 9  ;;  %v15728_v18 = vld [vmem:[%s16158_s25 + $0x84] sm:$0xff]  }
  0x7d   : > { %14645 = vmatmul.mubr.bf16.gmra.mxu0 %v15706_v17  ;;  %v1762_v17 = vrot.slane %v1654_v12, 5  ;;  %v13156_v12 = vcombine.low %v1784_v58, %v1787_v62  ;;  %v1825_v56 = vrot.slane %v1681_v51, 5  ;;  %v1828_v62 = vrot.slane %v1682_v52, 5  ;;  %v1683_v1 = vld [vmem:[%s16158_s25 + $0x90] sm:$0xe]  ;;  %v15740_v51 = vld [vmem:[%s20706_s1 + $0x148] sm:$0xff]  }
  0x7e   : > { %14693 = vmatmul.mubr.bf16.gmra.mxu1 %v13126_v6  ;;  %14712 = vmatprep.mubr.bf16.mxu0 %v13151_v10  ;;  %v13142_v6 = vrot.slane %v1668_v3, 9  ;;  %v1797_v10 = vrot.slane %v1669_v4, 5  ;;  %v1819_v60 = vsel %vm16358_vm5, %v13145_v45, %v1818_v47 }
  0x7f   : > { %14760 = vmatprep.mubr.bf16.mxu1 %v15711_v5  ;;  %v1763_v25 = vsel %vm16358_vm5, %v13137_v16, %v1762_v17  ;;  %v1764_v26 = vrot.slane %v1762_v17, 4  ;;  %v1670_v5 = vld [vmem:[%s16158_s25 + $0x5c] sm:$0x1]  ;;  %v1671_v17 = vld [vmem:[%s16158_s25 + $0x60] sm:$0xe]  ;;  %v1827_v4 = vrot.slane %v1825_v56, 4 }
  0x80   : > { %v1800_v11 = vrot.slane %v1670_v5, 5  ;;  %v1799_v14 = vrot.slane %v1797_v10, 4  ;;  %v13143_v21 = vrot.slane %v1671_v17, 9  ;;  %v1685_v5 = vld [vmem:[%s16158_s25 + $0x98] sm:$0x1] }
  0x81   : > { %v1766_v30 = vsel %vm16358_vm5, %v1764_v26, %v1765_v20  ;;  %v15718_v20 = vld [vmem:[%s16158_s25 + $0x48] sm:$0xff]   ;;  %v1798_v26 = vsel %vm16358_vm5, %v13142_v6, %v1797_v10  ;;  %v1687_v10 = vld [vmem:[%s16158_s25 + $0xa0] sm:$0xf]  ;;  %v1829_v17 = vsel %vm16358_vm5, %v1827_v4, %v1828_v62 }
  0x82   : > { %v13153_v34 = vcombine.low %v1763_v25, %v1766_v30  ;;  %v15726_v25 = vld [vmem:[%s20706_s1 + $0x170] sm:$0xff]   ;;  %v1801_v30 = vsel %vm16358_vm5, %v1799_v14, %v1800_v11  ;;  %v1805_v35 = vsel %vm16358_vm5, %v13143_v21, %v1804_v22  ;;  %v1688_v11 = vld [vmem:[%s16158_s25 + $0xa4] sm:$0x1]  ;;  %v15732_v14 = vld [vmem:[%s20706_s1 + $0x108] sm:$0xff]  }
  0x83   : > { %v13158_v40 = vcombine.low %v1798_v26, %v1801_v30  ;;  %v15736_v26 = vld [vmem:[%s20706_s1 + $0x150] sm:$0xff]   ;;  %v15734_v4 = vld [vmem:[%s16158_s25 + $0xa8] sm:$0xff]  }
  0x84   : > { %v1691_v30 = vld [vmem:[%s16158_s25 + $0xb0] sm:$0x1] }
  0x85   : > { %14713 = vmatmul.mubr.bf16.vlgmr.msra.gmra.mxu0 %v13152_v19  ;;  %v1673_v19 = vld [vmem:[%s16158_s25 + $0x68] sm:$0x1] }
  0x86   : > { %14793 = vmatpush3.bf16.msra.mxu0 %v16352_v39  ;;  %v1773_v39 = vsel %vm16358_vm5, %v1771_v32, %v1772_v28  ;;  %14716 = vmatprep.mubr.bf16.mxu0 %v13153_v34  ;;  %v1807_v23 = vrot.slane %v1673_v19, 5  ;;  %v1676_v28 = vld [vmem:[%s16158_s25 + $0x74] sm:$0x1]  ;;  %v1806_v32 = vrot.slane %v1804_v22, 4  ;;  %v1811_v34 = vrot.slane %v1675_v27, 5 }
  0x87   : > { %14794 = vmatprep.subr.bf16.mxu0 %v15713_v13  ;;  %v13154_v44 = vcombine.low %v1770_v31, %v1773_v39  ;;  %14761 = vmatmul.mubr.bf16.vlgmr.msra.gmra.mxu1 %v15712_v24  ;;  %v1674_v24 = vld [vmem:[%s16158_s25 + $0x6c] sm:$0xe]  ;;  %v15720_v31 = vld [vmem:[%s16158_s25 + $0x54] sm:$0xff]   ;;  %v1814_v39 = vrot.slane %v1676_v28, 5  ;;  %v1842_v22 = vrot.slane %v1688_v11, 5 }
  0x88   : > { %14764 = vmatprep.mubr.bf16.mxu1 %v15714_v29  ;;  %14841 = vmatpush3.bf16.msra.mxu1 %v15725_v15  ;;  %v15727_v29 = vld [vmem:[%s20706_s1 + $0x110] sm:$0xff]   ;;  %v1808_v36 = vsel %vm16358_vm5, %v1806_v32, %v1807_v23  ;;  %v1813_v37 = vrot.slane %v1811_v34, 4  ;;  %v15724_v15 = vld [vmem:[%s16158_s25 + $0x78] sm:$0xff]   ;;  %v1689_v27 = vld [vmem:[%s16158_s25 + $0xa8] sm:$0xe] }
  0x89   : > { %14842 = vmatprep.subr.bf16.mxu1 %v15726_v25  ;;  %v13159_v41 = vcombine.low %v1805_v35, %v1808_v36  ;;  %v15735_v23 = vld [vmem:[%s20706_s1 + $0x158] sm:$0xff]   ;;  %v1690_v28 = vld [vmem:[%s16158_s25 + $0xac] sm:$0xf] }
  0x8a   : > { %14795 = vmatpush3.bf16.msra.mxu0 %v15713_v13  ;;  %v1794_v13 = vsel %vm16358_vm5, %v1792_v9, %v1793_v2  ;;  %v1815_v59 = vsel %vm16358_vm5, %v1813_v37, %v1814_v39  ;;  %v1684_v2 = vld [vmem:[%s16158_s25 + $0x94] sm:$0xf]  ;;  %v1835_v9 = vrot.slane %v1685_v5, 5  ;;  %v1846_v32 = vrot.slane %v1690_v28, 5  ;;  %v1693_v35 = vld [vmem:[%s16158_s25 + $0xb8] sm:$0xf] }
  0x8b   : > { %14796 = vmatprep.subr.bf16.mxu0 %v15716_v33  ;;  %v13157_v16 = vcombine.low %v1791_v8, %v1794_v13  ;;  %v1832_v6 = vrot.slane %v1684_v2, 5  ;;  %v13147_v8 = vrot.slane %v1683_v1, 9  ;;  %v1839_v13 = vrot.slane %v1687_v10, 5  ;;  %v1694_v36 = vld [vmem:[%s16158_s25 + $0xbc] sm:$0x1]  ;;  %v15729_v37 = vld [vmem:[%s16158_s25 + $0x90] sm:$0xff]  }
  0x8c   : > { %14843 = vmatpush3.bf16.msra.mxu1 %v15726_v25  ;;  %v1848_v39 = vrot.slane %v1846_v32, 4  ;;  %v13234_v1 = vld [vmem:[%s16158_s25 + $0x18] sm:$0xf]  ;;  %v13235_v2 = vld [vmem:[%s16158_s25 + $0x1c] sm:$0xf] }
  0x8d   : > { %14717 = vmatmul.mubr.bf16.gmra.mxu0 %v13154_v44  ;;  %v1679_v44 = vld [vmem:[%s16158_s25 + $0x80] sm:$0x1]  ;;  %v1833_v19 = vsel %vm16358_vm5, %v13147_v8, %v1832_v6  ;;  %v1841_v25 = vrot.slane %v1839_v13, 4  ;;  %v15738_v10 = vld [vmem:[%s16158_s25 + $0xb4] sm:$0xff]  }
  0x8e   : > { %14797 = vmatpush3.bf16.msra.mxu0 %v15716_v33  ;;  %14720 = vmatprep.mubr.bf16.mxu0 %v13155_v57  ;;  %v13144_v33 = vrot.slane %v1674_v24, 9  ;;  %v1821_v50 = vrot.slane %v1679_v44, 5  ;;  %v15730_v57 = vld [vmem:[%s20706_s1 + $0x168] sm:$0xff]   ;;  %v15733_v44 = vld [vmem:[%s16158_s25 + $0x9c] sm:$0xff]  }
  0x8f   : > { %14798 = vmatprep.subr.bf16.mxu0 %v15719_v53  ;;  %14765 = vmatmul.mubr.bf16.gmra.mxu1 %v15715_v54  ;;  %v1820_v54 = vrot.slane %v1818_v47, 4  ;;  %v1843_v43 = vsel %vm16358_vm5, %v1841_v25, %v1842_v22 }
  0x90   : > { %14768 = vmatprep.mubr.bf16.mxu1 %v15717_v63  ;;  %v1812_v58 = vsel %vm16358_vm5, %v13144_v33, %v1811_v34  ;;  %14844 = vmatprep.subr.bf16.mxu1 %v15730_v57  ;;  %v15731_v63 = vld [vmem:[%s20706_s1 + $0x160] sm:$0xff]   ;;  %v1692_v33 = vld [vmem:[%s16158_s25 + $0xb4] sm:$0xe]  ;;  %v1849_v34 = vrot.slane %v1691_v30, 5 }
  0x91   : > { %v1822_v61 = vsel %vm16358_vm5, %v1820_v54, %v1821_v50  ;;  %14845 = vmatpush3.bf16.msra.mxu1 %v15730_v57  ;;  %v13160_v0 = vcombine.low %v1812_v58, %v1815_v59  ;;  %v13150_v48 = vrot.slane %v1692_v33, 9  ;;  %v1856_v50 = vrot.slane %v1694_v36, 5  ;;  %v15741_v54 = vld [vmem:[%s20706_s1 + $0x140] sm:$0xff]   ;;  %v13233_v57 = vld [vmem:[%s16158_s25 + $0x14] sm:$0x1] }
  0x92   : > { %14799 = vmatpush3.bf16.msra.mxu0 %v15719_v53  ;;  %v15723_v53 = vld [vmem:[%s16158_s25 + $0x6c] sm:$0xff]   ;;  %14846 = vmatprep.subr.bf16.mxu1 %v15731_v63  ;;  %v13161_v3 = vcombine.low %v1819_v60, %v1822_v61  ;;  %v1850_v47 = vsel %vm16358_vm5, %v1848_v39, %v1849_v34  ;;  %v13306_v34 = vld [vmem:[%s16158_s25 + $0x18] sm:$0xe] }
  0x93   : > { %14800 = vmatprep.subr.bf16.mxu0 %v15722_v7 }
  0x95   : > { %14721 = vmatmul.mubr.bf16.gmra.mxu0 %v13156_v12  ;;  %v1834_v12 = vrot.slane %v1832_v6, 4  ;;  %14847 = vmatpush3.bf16.msra.mxu1 %v15731_v63 }
  0x96   : > { %14724 = vmatprep.mubr.bf16.mxu0 %v13157_v16  ;;  %14801 = vmatpush3.bf16.msra.mxu0 %v15722_v7  ;;  %v1686_v7 = vld [vmem:[%s16158_s25 + $0x9c] sm:$0xe]  ;;  %v1826_v16 = vsel %vm16358_vm5, %v13146_v55, %v1825_v56  ;;  %v13231_v55 = vld [vmem:[%s16158_s25 + $0xc] sm:$0xf]  ;;  %v13232_v56 = vld [vmem:[%s16158_s25 + $0x10] sm:$0xf] }
  0x97   : > { %14802 = vmatprep.subr.bf16.mxu0 %v15727_v29  ;;  %14769 = vmatmul.mubr.bf16.gmra.mxu1 %v15718_v20  ;;  %v1836_v20 = vsel %vm16358_vm5, %v1834_v12, %v1835_v9  ;;  %v13148_v21 = vrot.slane %v1686_v7, 9  ;;  %v13162_v24 = vcombine.low %v1826_v16, %v1829_v17  ;;  %v2742_v58 = vshrl.u32 %v13231_v55, 16  ;;  %v13236_v9 = vld [vmem:[%s16158_s25 + $0x20] sm:$0x1] }
  0x98   : > { %14772 = vmatprep.mubr.bf16.mxu1 %v15720_v31  ;;  %14848 = vmatprep.subr.bf16.mxu1 %v15735_v23  ;;  %v13149_v31 = vrot.slane %v1689_v27, 9  ;;  %v2745_v59 = vshll.u32 %v13231_v55, 16  ;;  %v2751_v60 = vshll.u32 %v13232_v56, 16  ;;  %v2755_v61 = vshrl.u32 %v13232_v56, 16 }
  0x99   : > { %14849 = vmatpush3.bf16.msra.mxu1 %v15735_v23  ;;  %v1840_v42 = vsel %vm16358_vm5, %v13148_v21, %v1839_v13  ;;  %v2744_v5 = vrot.slane %v2742_v58, 4  ;;  %v2766_v12 = vshrl.u32 %v13234_v1, 16  ;;  %v2769_v13 = vshll.u32 %v13234_v1, 16  ;;  %v13304_v23 = vld [vmem:[%s16158_s25 + $0x10] sm:$0xf] }
  0x9a   : > { %14803 = vmatpush3.bf16.msra.mxu0 %v15727_v29  ;;  %v13163_v29 = vcombine.low %v1833_v19, %v1836_v20  ;;  %14850 = vmatprep.subr.bf16.mxu1 %v15736_v26  ;;  %v1847_v45 = vsel %vm16358_vm5, %v13149_v31, %v1846_v32  ;;  %v13164_v52 = vcombine.low %v1840_v42, %v1843_v43  ;;  %v2747_v6 = vrot.slane %v2745_v59, 5  ;;  %v13303_v19 = vld [vmem:[%s16158_s25 + $0xc] sm:$0xe]  ;;  %v13237_v42 = vld [vmem:[%s16158_s25 + $0x24] sm:$0xf] }
  0x9b   : > { %14804 = vmatprep.subr.bf16.mxu0 %v15732_v14  ;;  %v2753_v7 = vrot.slane %v2751_v60, 5  ;;  %v2757_v8 = vrot.slane %v2755_v61, 4  ;;  %v2779_v17 = vshrl.u32 %v13235_v2, 16  ;;  %v2768_v20 = vrot.slane %v2766_v12, 4  ;;  %v13240_v58 = vld [vmem:[%s16158_s25 + $0x30] sm:$0xf] }
  0x9c   : > { %v2771_v21 = vrot.slane %v2769_v13, 5  ;;  %v3608_v32 = vrot.slane %v13304_v23, 5  ;;  %v2793_v56 = vshll.u32 %v13237_v42, 16  ;;  %v13241_v59 = vld [vmem:[%s16158_s25 + $0x34] sm:$0xf]  ;;  %v15739_v60 = vld [vmem:[%s16158_s25 + $0xc0] sm:$0xff]  }
  0x9d   : > { %14725 = vmatmul.mubr.bf16.gmra.mxu0 %v13158_v40  ;;  %v1853_v40 = vrot.slane %v1693_v35, 5  ;;  %14851 = vmatpush3.bf16.msra.mxu1 %v15736_v26  ;;  %v2758_v16 = vor.u32 %v2757_v8, %v2753_v7  ;;  %v2781_v27 = vrot.slane %v2779_v17, 4  ;;  %v13307_v35 = vld [vmem:[%s16158_s25 + $0x1c] sm:$0xf]  ;;  %v13310_v17 = vld [vmem:[%s16158_s25 + $0x28] sm:$0xf] }
  0x9e   : > { %14728 = vmatprep.mubr.bf16.mxu0 %v13159_v41  ;;  %14805 = vmatpush3.bf16.msra.mxu0 %v15732_v14  ;;  %v15737_v41 = vld [vmem:[%s20706_s1 + $0x100] sm:$0xff]   ;;  %v2775_v14 = vshll.u32 %v13235_v2, 16  ;;  %v2772_v31 = vor.u32 %v2771_v21, %v2768_v20  ;;  %v13312_v23 = vld [vmem:[%s16158_s25 + $0x30] sm:$0xe] }
  0x9f   : > { %14773 = vmatmul.mubr.bf16.gmra.mxu1 %v15721_v49  ;;  %14806 = vmatprep.subr.bf16.mxu0 %v15737_v41  ;;  %v1855_v49 = vrot.slane %v1853_v40, 4  ;;  %v1854_v62 = vsel %vm16358_vm5, %v13150_v48, %v1853_v40  ;;  %v2759_v26 = vrot.slane %v2758_v16, 4  ;;  %v13308_v40 = vld [vmem:[%s16158_s25 + $0x20] sm:$0x1]  ;;  %v13238_v48 = vld [vmem:[%s16158_s25 + $0x28] sm:$0xf] }
  0xa0   : > { %14776 = vmatprep.mubr.bf16.mxu1 %v15723_v53  ;;  %v13165_v53 = vcombine.low %v1847_v45, %v1850_v47  ;;  %14852 = vmatprep.subr.bf16.mxu1 %v15740_v51  ;;  %v2777_v22 = vrot.slane %v2775_v14, 5  ;;  %v3610_v47 = vrot.slane %v3608_v32, 4  ;;  %v2803_v8 = vshrl.u32 %v13238_v48, 16  ;;  %v15743_v16 = vld [vmem:[%s20706_s1 + $0x1b0] sm:$0xff]  }
  0xa1   : > { %v1857_v63 = vsel %vm16358_vm5, %v1855_v49, %v1856_v50  ;;  %14853 = vmatpush3.bf16.msra.mxu1 %v15740_v51  ;;  %v3615_v50 = vrot.slane %v13307_v35, 5  ;;  %v3618_v51 = vrot.slane %v13308_v40, 5  ;;  %v2817_v14 = vshll.u32 %v13240_v58, 16  ;;  %v13243_v40 = vld [vmem:[%s16158_s25 + $0x3c] sm:$0xf] }
  0xa2   : > { %14807 = vmatpush3.bf16.msra.mxu0 %v15737_v41  ;;  %14854 = vmatprep.subr.bf16.mxu1 %v15741_v54  ;;  %v13166_v30 = vcombine.low %v1854_v62, %v1857_v63  ;;  %v2782_v39 = vor.u32 %v2781_v27, %v2777_v22  ;;  %v13352_v41 = vrot.slane %v13306_v34, 9  ;;  %v15747_v34 = vld [vmem:[%s20706_s1 + $0x1f8] sm:$0xff]  }
  0xa4   : > { %v2783_v49 = vrot.slane %v2782_v39, 4  ;;  %v16580_v63 = vsel %vm16358_vm5, %v13352_v41, %v3615_v50 }
  0xa5   : > { %14729 = vmatmul.mubr.bf16.gmra.mxu0 %v13160_v0  ;;  %v2761_v0 = vshll.u32 %v13233_v57, 16  ;;  %14855 = vmatpush3.bf16.msra.mxu1 %v15741_v54  ;;  %v2799_v57 = vshll.u32 %v13238_v48, 16 }
  0xa6   : > { %14732 = vmatprep.mubr.bf16.mxu0 %v13161_v3  ;;  %v16548_v3 = vld [vmem:[%s20706_s1 + $0x1b8] sm:$0xff]   ;;  %14936 = vmatprep.subr.bf16.mxu1 %v15747_v34 }
  0xa7   : > { %14777 = vmatmul.mubr.bf16.gmra.mxu1 %v15724_v15  ;;  %v2763_v11 = vrot.slane %v2761_v0, 5  ;;  %14888 = vmatprep.subr.bf16.mxu0 %v16548_v3  ;;  %v2748_v15 = vor.u32 %v2747_v6, %v2744_v5  ;;  %v3617_v0 = vrot.slane %v3615_v50, 4  ;;  %v2801_v5 = vrot.slane %v2799_v57, 5  ;;  %v13242_v6 = vld [vmem:[%s16158_s25 + $0x38] sm:$0x1] }
  0xa8   : > { %14780 = vmatprep.mubr.bf16.mxu1 %v15728_v18  ;;  %v2785_v18 = vshll.u32 %v13236_v9, 16  ;;  %v2833_v27 = vshll.u32 %v13242_v6, 16 }
  0xa9   : > { %v2749_v25 = vrot.slane %v2748_v15, 4  ;;  %v2823_v15 = vshll.u32 %v13241_v59, 16 }
  0xaa   : > { %v2787_v28 = vrot.slane %v2785_v18, 5  ;;  %v13311_v18 = vld [vmem:[%s16158_s25 + $0x2c] sm:$0x1] }
  0xab   : > { %v2754_v36 = vsel %vm16178_vm2, %v2749_v25, %v2753_v7  ;;  %v3619_v7 = vsel %vm16358_vm5, %v3617_v0, %v3618_v51  ;;  %v2819_v25 = vrot.slane %v2817_v14, 5  ;;  %v3625_v39 = vrot.slane %v13311_v18, 5 }
  0xac   : > { %v2788_v61 = vsel %vm16178_vm2, %v2783_v49, %v2787_v28  ;;  %v13368_v12 = vcombine.low %v16580_v63, %v3619_v7  ;;  %v13313_v28 = vld [vmem:[%s16158_s25 + $0x34] sm:$0xf]  ;;  %v13354_v49 = vrot.slane %v13312_v23, 9 }
  0xad   : > { %14733 = vmatmul.mubr.bf16.gmra.mxu0 %v13162_v24  ;;  %v13351_v24 = vrot.slane %v13303_v19, 9  ;;  %v2805_v19 = vrot.slane %v2803_v8, 4  ;;  %v3629_v50 = vrot.slane %v13313_v28, 5 }
  0xae   : > { %14736 = vmatprep.mubr.bf16.mxu0 %v13163_v29  ;;  %v13305_v29 = vld [vmem:[%s16158_s25 + $0x14] sm:$0x1] }
  0xaf   : > { %14781 = vmatmul.mubr.bf16.gmra.mxu1 %v15729_v37  ;;  %v3611_v33 = vrot.slane %v13305_v29, 5  ;;  %v2764_v37 = vsel %vm16178_vm2, %v2759_v26, %v2763_v11  ;;  %v3609_v45 = vsel %vm16358_vm5, %v13351_v24, %v3608_v32  ;;  %v13309_v11 = vld [vmem:[%s16158_s25 + $0x24] sm:$0xe]  ;;  %v2825_v26 = vrot.slane %v2823_v15, 5  ;;  %v13316_v15 = vld [vmem:[%s16158_s25 + $0x40] sm:$0xf] }
  0xb0   : > { %14784 = vmatprep.mubr.bf16.mxu1 %v15733_v44  ;;  %v13279_v43 = vcombine.low %v2754_v36, %v2764_v37  ;;  %v2773_v44 = vrot.slane %v2772_v31, 4  ;;  %v2806_v29 = vor.u32 %v2805_v19, %v2801_v5  ;;  %v13353_v31 = vrot.slane %v13309_v11, 9 }
  0xb1   : > { %v3612_v55 = vsel %vm16358_vm5, %v3610_v47, %v3611_v33  ;;  %v3622_v32 = vrot.slane %v13310_v17, 5  ;;  %v13314_v33 = vld [vmem:[%s16158_s25 + $0x38] sm:$0x1]  ;;  %v2835_v37 = vrot.slane %v2833_v27, 5  ;;  %v15744_v47 = vld [vmem:[%s20706_s1 + $0x1a8] sm:$0xff]   ;;  %v3631_v63 = vrot.slane %v3629_v50, 4 }
  0xb2   : > { %v2778_v54 = vsel %vm16178_vm2, %v2773_v44, %v2777_v22  ;;  %v13367_v62 = vcombine.low %v3609_v45, %v3612_v55  ;;  %v2827_v22 = vshrl.u32 %v13241_v59, 16  ;;  %v2807_v41 = vrot.slane %v2806_v29, 4  ;;  %v13244_v45 = vld [vmem:[%s16158_s25 + $0x40] sm:$0xf] }
  0xb3   : > { %v13280_v1 = vcombine.low %v2778_v54, %v2788_v61  ;;  %v3624_v44 = vrot.slane %v3622_v32, 4  ;;  %v3632_v51 = vrot.slane %v13314_v33, 5  ;;  %v2838_v55 = vshrl.u32 %v13243_v40, 16  ;;  %v13247_v61 = vld [vmem:[%s16158_s25 + $0x4c] sm:$0xf] }
  0xb4   : > { %v3630_v59 = vsel %vm16358_vm5, %v13354_v49, %v3629_v50  ;;  %v2847_v6 = vshll.u32 %v13244_v45, 16  ;;  %v2851_v7 = vshrl.u32 %v13244_v45, 16  ;;  %v2875_v28 = vshrl.u32 %v13247_v61, 16  ;;  %v13249_v50 = vld [vmem:[%s16158_s25 + $0x54] sm:$0xf] }
  0xb5   : > { %14737 = vmatmul.mubr.bf16.gmra.mxu0 %v13164_v52  ;;  %v13239_v52 = vld [vmem:[%s16158_s25 + $0x2c] sm:$0x1]  ;;  %v3626_v54 = vsel %vm16358_vm5, %v3624_v44, %v3625_v39  ;;  %v2840_v0 = vrot.slane %v2838_v55, 4  ;;  %v3633_v11 = vsel %vm16358_vm5, %v3631_v63, %v3632_v51  ;;  %v15751_v44 = vld [vmem:[%s20706_s1 + $0x1e0] sm:$0xff]  }
  0xb6   : > { %14740 = vmatprep.mubr.bf16.mxu0 %v13165_v53  ;;  %v2790_v53 = vshrl.u32 %v13237_v42, 16  ;;  %v2809_v9 = vshll.u32 %v13239_v52, 16  ;;  %v2849_v17 = vrot.slane %v2847_v6, 5  ;;  %v2853_v18 = vrot.slane %v2851_v7, 4  ;;  %v15752_v7 = vld [vmem:[%s20706_s1 + $0x188] sm:$0xff]  }
  0xb7   : > { %14785 = vmatmul.mubr.bf16.gmra.mxu1 %v15734_v4  ;;  %v2795_v4 = vrot.slane %v2793_v56, 5 }
  0xb8   : > { %14788 = vmatprep.mubr.bf16.mxu1 %v15738_v10  ;;  %v2792_v2 = vrot.slane %v2790_v53, 4  ;;  %v2814_v10 = vshrl.u32 %v13240_v58, 16  ;;  %v2811_v20 = vrot.slane %v2809_v9, 5  ;;  %v13315_v9 = vld [vmem:[%s16158_s25 + $0x3c] sm:$0xe]  ;;  %v2854_v27 = vor.u32 %v2853_v18, %v2849_v17 }
  0xba   : > { %v2796_v13 = vor.u32 %v2795_v4, %v2792_v2  ;;  %v2816_v21 = vrot.slane %v2814_v10, 4  ;;  %v2812_v52 = vsel %vm16178_vm2, %v2807_v41, %v2811_v20  ;;  %v13248_v2 = vld [vmem:[%s16158_s25 + $0x50] sm:$0x1]  ;;  %v15745_v10 = vld [vmem:[%s20706_s1 + $0x1a0] sm:$0xff]   ;;  %v2855_v39 = vrot.slane %v2854_v27, 4 }
  0xbb   : > { %v15748_v4 = vld [vmem:[%s20706_s1 + $0x1f0] sm:$0xff]   ;;  %v13317_v20 = vld [vmem:[%s16158_s25 + $0x44] sm:$0x1]  ;;  %v2881_v29 = vshll.u32 %v13248_v2, 16  ;;  %v2886_v2 = vshrl.u32 %v13249_v50, 16 }
  0xbc   : > { %v2797_v24 = vrot.slane %v2796_v13, 4  ;;  %v2820_v36 = vor.u32 %v2819_v25, %v2816_v21  ;;  %v15750_v21 = vld [vmem:[%s20706_s1 + $0x1e8] sm:$0xff]   ;;  %v2871_v25 = vshll.u32 %v13247_v61, 16 }
  0xbd   : > { %14741 = vmatmul.mubr.bf16.gmra.mxu0 %v13166_v30  ;;  %v2829_v30 = vrot.slane %v2827_v22, 4  ;;  %v2883_v41 = vrot.slane %v2881_v29, 5 }
  0xbe   : > { %14808 = vmatprep.mubr.bf16.mxu0 %v13279_v43  ;;  %v2802_v35 = vsel %vm16178_vm2, %v2797_v24, %v2801_v5  ;;  %v3623_v43 = vsel %vm16358_vm5, %v13353_v31, %v3622_v32  ;;  %v2821_v48 = vrot.slane %v2820_v36, 4  ;;  %v13319_v31 = vld [vmem:[%s16158_s25 + $0x4c] sm:$0xf]  ;;  %v15746_v32 = vld [vmem:[%s20706_s1 + $0x198] sm:$0xff]   ;;  %v3636_v36 = vrot.slane %v13316_v15, 5 }
  0xbf   : > { %14789 = vmatmul.mubr.bf16.gmra.mxu1 %v15739_v60  ;;  %v2830_v42 = vor.u32 %v2829_v30, %v2825_v26  ;;  %v13281_v56 = vcombine.low %v2802_v35, %v2812_v52  ;;  %v13369_v58 = vcombine.low %v3623_v43, %v3626_v54  ;;  %v13246_v60 = vld [vmem:[%s16158_s25 + $0x48] sm:$0xf]  ;;  %v13355_v30 = vrot.slane %v13315_v9, 9  ;;  %v16645_v43 = vld [vmem:[%s20706_s1 + $0x190] sm:$0xff]   ;;  %v13250_v54 = vld [vmem:[%s16158_s25 + $0x58] sm:$0xf] }
  0xc0   : > { %14856 = vmatprep.mubr.bf16.mxu1 %v13367_v62  ;;  %v2826_v57 = vsel %vm16178_vm2, %v2821_v48, %v2825_v26  ;;  %v2862_v13 = vshrl.u32 %v13246_v60, 16  ;;  %v2865_v14 = vshll.u32 %v13246_v60, 16  ;;  %v13318_v26 = vld [vmem:[%s16158_s25 + $0x48] sm:$0xe]  ;;  %v2873_v35 = vrot.slane %v2871_v25, 5 }
  0xc1   : > { %v2831_v53 = vrot.slane %v2830_v42, 4  ;;  %v3639_v42 = vrot.slane %v13317_v20, 5  ;;  %v3637_v48 = vsel %vm16358_vm5, %v13355_v30, %v3636_v36  ;;  %v3638_v49 = vrot.slane %v3636_v36, 4  ;;  %v13252_v60 = vld [vmem:[%s16158_s25 + $0x60] sm:$0xf] }
  0xc2   : > { %v2864_v23 = vrot.slane %v2862_v13, 4  ;;  %v2867_v24 = vrot.slane %v2865_v14, 5  ;;  %v13356_v52 = vrot.slane %v13318_v26, 9  ;;  %v2899_v6 = vshrl.u32 %v13250_v54, 16  ;;  %v15754_v14 = vld [vmem:[%s20706_s1 + $0x1d0] sm:$0xff]  }
  0xc3   : > { %v2836_v62 = vsel %vm16178_vm2, %v2831_v53, %v2835_v37  ;;  %v13320_v37 = vld [vmem:[%s16158_s25 + $0x50] sm:$0x1]  ;;  %v3643_v53 = vrot.slane %v13319_v31, 5  ;;  %v2910_v13 = vshrl.u32 %v13252_v60, 16  ;;  %v13322_v20 = vld [vmem:[%s16158_s25 + $0x58] sm:$0xf] }
  0xc4   : > { %v13282_v5 = vcombine.low %v2826_v57, %v2836_v62  ;;  %v3640_v57 = vsel %vm16358_vm5, %v3638_v49, %v3639_v42  ;;  %v13323_v25 = vld [vmem:[%s16158_s25 + $0x5c] sm:$0x1]  ;;  %v2913_v27 = vshll.u32 %v13252_v60, 16  ;;  %v13324_v30 = vld [vmem:[%s16158_s25 + $0x60] sm:$0xe]  ;;  %v3650_v36 = vrot.slane %v13322_v20, 5 }
  0xc5   : > { %14809 = vmatmul.mubr.bf16.vlgmr.msra.gmra.mxu0 %v13280_v1  ;;  %v2841_v1 = vshll.u32 %v13243_v40, 16  ;;  %v2877_v40 = vrot.slane %v2875_v28, 4  ;;  %v13371_v62 = vcombine.low %v3637_v48, %v3640_v57  ;;  %v3644_v63 = vsel %vm16358_vm5, %v13356_v52, %v3643_v53  ;;  %v13325_v31 = vld [vmem:[%s16158_s25 + $0x64] sm:$0xf]  ;;  %v13255_v52 = vld [vmem:[%s16158_s25 + $0x6c] sm:$0xf] }
  0xc6   : > { %14889 = vmatpush3.bf16.msra.mxu0 %v16548_v3  ;;  %v13245_v3 = vld [vmem:[%s16158_s25 + $0x44] sm:$0x1]  ;;  %14812 = vmatprep.mubr.bf16.mxu0 %v13281_v56  ;;  %v3652_v48 = vrot.slane %v3650_v36, 4 }
  0xc7   : > { %14890 = vmatprep.subr.bf16.mxu0 %v15743_v16  ;;  %14857 = vmatmul.mubr.bf16.vlgmr.msra.gmra.mxu1 %v13368_v12  ;;  %v2857_v8 = vshll.u32 %v13245_v3, 16  ;;  %v2843_v12 = vrot.slane %v2841_v1, 5  ;;  %v2878_v3 = vor.u32 %v2877_v40, %v2873_v35  ;;  %v15753_v1 = vld [vmem:[%s20706_s1 + $0x1d8] sm:$0xff]   ;;  %v2915_v40 = vrot.slane %v2913_v27, 5  ;;  %v13329_v27 = vld [vmem:[%s16158_s25 + $0x74] sm:$0x1] }
  0xc8   : > { %14860 = vmatprep.mubr.bf16.mxu1 %v13369_v58  ;;  %14937 = vmatpush3.bf16.msra.mxu1 %v15747_v34  ;;  %v2868_v34 = vor.u32 %v2867_v24, %v2864_v23  ;;  %v3646_v58 = vrot.slane %v13320_v37, 5  ;;  %v2912_v24 = vrot.slane %v2910_v13, 4  ;;  %v15755_v37 = vld [vmem:[%s20706_s1 + $0x180] sm:$0xff]  }
  0xc9   : > { %v2859_v19 = vrot.slane %v2857_v8, 5  ;;  %14938 = vmatprep.subr.bf16.mxu1 %v15748_v4  ;;  %v2844_v22 = vor.u32 %v2843_v12, %v2840_v0  ;;  %v2879_v61 = vrot.slane %v2878_v3, 4  ;;  %v3645_v0 = vrot.slane %v3643_v53, 4  ;;  %v13254_v12 = vld [vmem:[%s16158_s25 + $0x68] sm:$0x1] }
  0xca   : > { %14891 = vmatpush3.bf16.msra.mxu0 %v15743_v16  ;;  %v13370_v16 = vcombine.low %v3630_v59, %v3633_v11  ;;  %v13251_v59 = vld [vmem:[%s16158_s25 + $0x5c] sm:$0x1]  ;;  %v13253_v11 = vld [vmem:[%s16158_s25 + $0x64] sm:$0xf]  ;;  %v3653_v3 = vrot.slane %v13323_v25, 5 }
  0xcb   : > { %14892 = vmatprep.subr.bf16.mxu0 %v15744_v47  ;;  %v2845_v33 = vrot.slane %v2844_v22, 4  ;;  %v2860_v51 = vsel %vm16178_vm2, %v2855_v39, %v2859_v19  ;;  %v2884_v8 = vsel %vm16178_vm2, %v2879_v61, %v2883_v41  ;;  %v3647_v9 = vsel %vm16358_vm5, %v3645_v0, %v3646_v58  ;;  %v13321_v19 = vld [vmem:[%s16158_s25 + $0x54] sm:$0xe]  ;;  %v13256_v53 = vld [vmem:[%s16158_s25 + $0x70] sm:$0xf] }
  0xcc   : > { %14939 = vmatpush3.bf16.msra.mxu1 %v15748_v4  ;;  %v2889_v4 = vshll.u32 %v13249_v50, 16  ;;  %v2901_v22 = vrot.slane %v2899_v6, 4  ;;  %v2919_v28 = vshll.u32 %v13253_v11, 16  ;;  %v2923_v29 = vshrl.u32 %v13253_v11, 16  ;;  %v13257_v58 = vld [vmem:[%s16158_s25 + $0x74] sm:$0x1] }
  0xcd   : > { %14813 = vmatmul.mubr.bf16.gmra.mxu0 %v13282_v5  ;;  %14940 = vmatprep.subr.bf16.mxu1 %v15750_v21  ;;  %v2850_v45 = vsel %vm16178_vm2, %v2845_v33, %v2849_v17  ;;  %v2895_v5 = vshll.u32 %v13250_v54, 16  ;;  %v2888_v17 = vrot.slane %v2886_v2, 4  ;;  %v2916_v50 = vor.u32 %v2915_v40, %v2912_v24  ;;  %v13259_v0 = vld [vmem:[%s16158_s25 + $0x7c] sm:$0xf] }
  0xce   : > { %14893 = vmatpush3.bf16.msra.mxu0 %v15744_v47  ;;  %v2869_v47 = vrot.slane %v2868_v34, 4  ;;  %v13283_v55 = vcombine.low %v2850_v45, %v2860_v51  ;;  %v2891_v18 = vrot.slane %v2889_v4, 5  ;;  %v2929_v34 = vshll.u32 %v13254_v12, 16  ;;  %v16714_v2 = vld [vmem:[%s20706_s1 + $0x238] sm:$0xff]  }
  0xcf   : > { %14894 = vmatprep.subr.bf16.mxu0 %v15745_v10  ;;  %14861 = vmatmul.mubr.bf16.gmra.mxu1 %v13370_v16  ;;  %v13372_v16 = vcombine.low %v3644_v63, %v3647_v9  ;;  %v2921_v41 = vrot.slane %v2919_v28, 5  ;;  %v2925_v42 = vrot.slane %v2923_v29, 4  ;;  %v2917_v60 = vrot.slane %v2916_v50, 4  ;;  %v13258_v63 = vld [vmem:[%s16158_s25 + $0x78] sm:$0xf] }
  0xd0   : > { %v2874_v56 = vsel %vm16178_vm2, %v2869_v47, %v2873_v35  ;;  %14941 = vmatpush3.bf16.msra.mxu1 %v15750_v21  ;;  %14816 = vmatprep.mubr.bf16.mxu0 %v13283_v55  ;;  %v2897_v21 = vrot.slane %v2895_v5, 5  ;;  %v2892_v26 = vor.u32 %v2891_v18, %v2888_v17  ;;  %v13357_v35 = vrot.slane %v13321_v19, 9  ;;  %v13327_v17 = vld [vmem:[%s16158_s25 + $0x6c] sm:$0xe]  ;;  %v13332_v50 = vld [vmem:[%s16158_s25 + $0x80] sm:$0x1] }
  0xd1   : > { %14942 = vmatprep.subr.bf16.mxu1 %v15751_v44  ;;  %14864 = vmatprep.mubr.bf16.mxu1 %v13371_v62  ;;  %v13284_v15 = vcombine.low %v2874_v56, %v2884_v8  ;;  %v2931_v45 = vrot.slane %v2929_v34, 5  ;;  %v2926_v51 = vor.u32 %v2925_v42, %v2921_v41  ;;  %v13358_v55 = vrot.slane %v13324_v30, 9 }
  0xd2   : > { %14895 = vmatpush3.bf16.msra.mxu0 %v15745_v10  ;;  %v2905_v10 = vshll.u32 %v13251_v59, 16  ;;  %v2902_v33 = vor.u32 %v2901_v22, %v2897_v21  ;;  %v2893_v39 = vrot.slane %v2892_v26, 4  ;;  %v3651_v47 = vsel %vm16358_vm5, %v13357_v35, %v3650_v36  ;;  %v13328_v22 = vld [vmem:[%s16158_s25 + $0x70] sm:$0xf] }
  0xd3   : > { %14896 = vmatprep.subr.bf16.mxu0 %v15746_v32  ;;  %v3657_v56 = vrot.slane %v13325_v31, 5  ;;  %v2927_v61 = vrot.slane %v2926_v51, 4  ;;  %v3654_v62 = vsel %vm16358_vm5, %v3652_v48, %v3653_v3  ;;  %v2922_v8 = vsel %vm16178_vm2, %v2917_v60, %v2921_v41 }
  0xd4   : > { %14943 = vmatpush3.bf16.msra.mxu1 %v15751_v44  ;;  %v2907_v23 = vrot.slane %v2905_v10, 5  ;;  %v2903_v44 = vrot.slane %v2902_v33, 4  ;;  %v2898_v49 = vsel %vm16178_vm2, %v2893_v39, %v2897_v21  ;;  %v13373_v4 = vcombine.low %v3651_v47, %v3654_v62 }
  0xd5   : > { %14944 = vmatprep.subr.bf16.mxu1 %v15753_v1  ;;  %14817 = vmatmul.mubr.bf16.gmra.mxu0 %v13284_v15  ;;  %v3658_v5 = vsel %vm16358_vm5, %v13358_v55, %v3657_v56  ;;  %v3659_v6 = vrot.slane %v3657_v56, 4  ;;  %v2932_v9 = vsel %vm16178_vm2, %v2927_v61, %v2931_v45  ;;  %v2937_v10 = vshll.u32 %v13255_v52, 16 }
  0xd6   : > { %14897 = vmatpush3.bf16.msra.mxu0 %v15746_v32  ;;  %v13326_v32 = vld [vmem:[%s16158_s25 + $0x68] sm:$0x1]  ;;  %v2908_v54 = vsel %vm16178_vm2, %v2903_v44, %v2907_v23  ;;  %v2943_v11 = vshll.u32 %v13256_v53, 16  ;;  %v13286_v12 = vcombine.low %v2922_v8, %v2932_v9  ;;  %v2947_v15 = vshrl.u32 %v13256_v53, 16 }
  0xd7   : > { %14898 = vmatprep.subr.bf16.mxu0 %v16645_v43  ;;  %14865 = vmatmul.mubr.bf16.gmra.mxu1 %v13372_v16  ;;  %v3660_v57 = vrot.slane %v13326_v32, 5  ;;  %v13285_v59 = vcombine.low %v2898_v49, %v2908_v54  ;;  %v13260_v16 = vld [vmem:[%s16158_s25 + $0x80] sm:$0x1]  ;;  %v2939_v19 = vrot.slane %v2937_v10, 5  ;;  %v2953_v21 = vshll.u32 %v13257_v58, 16 }
  0xd8   : > { %14945 = vmatpush3.bf16.msra.mxu1 %v15753_v1  ;;  %v15757_v1 = vld [vmem:[%s20706_s1 + $0x1c0] sm:$0xff]   ;;  %14868 = vmatprep.mubr.bf16.mxu1 %v13373_v4  ;;  %v2945_v20 = vrot.slane %v2943_v11, 5  ;;  %v2949_v23 = vrot.slane %v2947_v15, 4  ;;  %v2958_v24 = vshrl.u32 %v13258_v63, 16  ;;  %v2961_v25 = vshll.u32 %v13258_v63, 16 }
  0xd9   : > { %14946 = vmatprep.subr.bf16.mxu1 %v15754_v14  ;;  %14820 = vmatprep.mubr.bf16.mxu0 %v13285_v59  ;;  %v3661_v13 = vsel %vm16358_vm5, %v3659_v6, %v3660_v57  ;;  %v2967_v26 = vshll.u32 %v13259_v0, 16  ;;  %v2955_v29 = vrot.slane %v2953_v21, 5  ;;  %v2971_v30 = vshrl.u32 %v13259_v0, 16  ;;  %v13330_v32 = vld [vmem:[%s16158_s25 + $0x78] sm:$0xe] }
  0xda   : > { %14899 = vmatpush3.bf16.msra.mxu0 %v16645_v43  ;;  %v15756_v43 = vld [vmem:[%s20706_s1 + $0x1c8] sm:$0xff]   ;;  %v13374_v18 = vcombine.low %v3658_v5, %v3661_v13  ;;  %v2977_v31 = vshll.u32 %v13260_v16, 16  ;;  %v2950_v33 = vor.u32 %v2949_v23, %v2945_v20  ;;  %v2960_v34 = vrot.slane %v2958_v24, 4  ;;  %v13264_v63 = vld [vmem:[%s16158_s25 + $0x90] sm:$0xf] }
  0xdb   : > { %14900 = vmatprep.subr.bf16.mxu0 %v15752_v7  ;;  %v2963_v35 = vrot.slane %v2961_v25, 5  ;;  %v2969_v36 = vrot.slane %v2967_v26, 5  ;;  %v2973_v40 = vrot.slane %v2971_v30, 4  ;;  %v13359_v42 = vrot.slane %v13327_v17, 9  ;;  %v13262_v57 = vld [vmem:[%s16158_s25 + $0x88] sm:$0xf] }
  0xdc   : > { %14947 = vmatpush3.bf16.msra.mxu1 %v15754_v14  ;;  %v2979_v41 = vrot.slane %v2977_v31, 5  ;;  %v2951_v44 = vrot.slane %v2950_v33, 4  ;;  %v3664_v47 = vrot.slane %v13328_v22, 5  ;;  %v3667_v48 = vrot.slane %v13329_v27, 5  ;;  %v13263_v58 = vld [vmem:[%s16158_s25 + $0x8c] sm:$0x1] }
  0xdd   : > { %14948 = vmatprep.subr.bf16.mxu1 %v15756_v43  ;;  %14821 = vmatmul.mubr.bf16.gmra.mxu0 %v13286_v12  ;;  %v2964_v45 = vor.u32 %v2963_v35, %v2960_v34  ;;  %v2974_v49 = vor.u32 %v2973_v40, %v2969_v36  ;;  %v13360_v51 = vrot.slane %v13330_v32, 9  ;;  %v13265_v0 = vld [vmem:[%s16158_s25 + $0x94] sm:$0xf]  ;;  %v3674_v5 = vrot.slane %v13332_v50, 5  ;;  %v13266_v15 = vld [vmem:[%s16158_s25 + $0x98] sm:$0x1] }
  0xde   : > { %14901 = vmatpush3.bf16.msra.mxu0 %v15752_v7  ;;  %v2934_v7 = vshrl.u32 %v13255_v52, 16  ;;  %v13261_v52 = vld [vmem:[%s16158_s25 + $0x84] sm:$0xf]  ;;  %v2956_v53 = vsel %vm16178_vm2, %v2951_v44, %v2955_v29  ;;  %v3665_v55 = vsel %vm16358_vm5, %v13359_v42, %v3664_v47  ;;  %v3666_v56 = vrot.slane %v3664_v47, 4  ;;  %v13334_v21 = vld [vmem:[%s16158_s25 + $0x88] sm:$0xf] }
  0xdf   : > { %14902 = vmatprep.subr.bf16.mxu0 %v15755_v37  ;;  %14869 = vmatmul.mubr.bf16.gmra.mxu1 %v13374_v18  ;;  %v2965_v54 = vrot.slane %v2964_v45, 4  ;;  %v2975_v60 = vrot.slane %v2974_v49, 4  ;;  %v2982_v6 = vshrl.u32 %v13261_v52, 16  ;;  %v2985_v9 = vshll.u32 %v13261_v52, 16  ;;  %v13333_v16 = vld [vmem:[%s16158_s25 + $0x84] sm:$0xe] }
  0xe0   : > { %v2936_v14 = vrot.slane %v2934_v7, 4  ;;  %14949 = vmatpush3.bf16.msra.mxu1 %v15756_v43  ;;  %v3668_v4 = vsel %vm16358_vm5, %v3666_v56, %v3667_v48  ;;  %v2991_v10 = vshll.u32 %v13262_v57, 16  ;;  %v3006_v23 = vshrl.u32 %v13264_v63, 16  ;;  %v13335_v26 = vld [vmem:[%s16158_s25 + $0x8c] sm:$0x1] }
  0xe1   : > { %14950 = vmatprep.subr.bf16.mxu1 %v15757_v1  ;;  %v2980_v7 = vsel %vm16178_vm2, %v2975_v60, %v2979_v41  ;;  %v13375_v8 = vcombine.low %v3665_v55, %v3668_v4  ;;  %v2984_v13 = vrot.slane %v2982_v6, 4  ;;  %v2987_v18 = vrot.slane %v2985_v9, 5  ;;  %v13336_v31 = vld [vmem:[%s16158_s25 + $0x90] sm:$0xe]  ;;  %v13338_v49 = vld [vmem:[%s16158_s25 + $0x98] sm:$0x1] }
  0xe2   : > { %14903 = vmatpush3.bf16.msra.mxu0 %v15755_v37  ;;  %v2940_v28 = vor.u32 %v2939_v19, %v2936_v14  ;;  %v13331_v37 = vld [vmem:[%s16158_s25 + $0x7c] sm:$0xf]  ;;  %v2995_v14 = vshrl.u32 %v13262_v57, 16  ;;  %v2993_v19 = vrot.slane %v2991_v10, 5  ;;  %v3009_v24 = vshll.u32 %v13264_v63, 16 }
  0xe3   : > { %14984 = vmatprep.subr.bf16.mxu0 %v16714_v2  ;;  %v3671_v3 = vrot.slane %v13331_v37, 5  ;;  %14872 = vmatprep.mubr.bf16.mxu1 %v13375_v8  ;;  %v3015_v25 = vshll.u32 %v13265_v0, 16  ;;  %v2988_v27 = vor.u32 %v2987_v18, %v2984_v13  ;;  %v3019_v29 = vshrl.u32 %v13265_v0, 16  ;;  %v13268_v56 = vld [vmem:[%s16158_s25 + $0xa0] sm:$0xf] }
  0xe4   : > { %v2941_v39 = vrot.slane %v2940_v28, 4  ;;  %14951 = vmatpush3.bf16.msra.mxu1 %v15757_v1  ;;  %v2970_v1 = vsel %vm16178_vm2, %v2965_v54, %v2969_v36  ;;  %v2997_v22 = vrot.slane %v2995_v14, 4  ;;  %v3025_v30 = vshll.u32 %v13266_v15, 16  ;;  %v13337_v36 = vld [vmem:[%s16158_s25 + $0x94] sm:$0xf] }
  0xe5   : > { %v3672_v61 = vsel %vm16358_vm5, %v13360_v51, %v3671_v3  ;;  %v3673_v62 = vrot.slane %v3671_v3, 4  ;;  %v13288_v11 = vcombine.low %v2970_v1, %v2980_v7  ;;  %v3008_v33 = vrot.slane %v3006_v23, 4  ;;  %v13267_v3 = vld [vmem:[%s16158_s25 + $0x9c] sm:$0xf]  ;;  %v13269_v57 = vld [vmem:[%s16158_s25 + $0xa4] sm:$0x1] }
  0xe6   : > { %v2946_v43 = vsel %vm16178_vm2, %v2941_v39, %v2945_v20  ;;  %v3001_v20 = vshll.u32 %v13263_v58, 16  ;;  %v2998_v32 = vor.u32 %v2997_v22, %v2993_v19  ;;  %v3011_v34 = vrot.slane %v3009_v24, 5  ;;  %v13271_v63 = vld [vmem:[%s16158_s25 + $0xac] sm:$0xf]  ;;  %v13272_v14 = vld [vmem:[%s16158_s25 + $0xb0] sm:$0x1] }
  0xe7   : > { %v13287_v59 = vcombine.low %v2946_v43, %v2956_v53  ;;  %v3675_v12 = vsel %vm16358_vm5, %v3673_v62, %v3674_v5  ;;  %v3017_v35 = vrot.slane %v3015_v25, 5  ;;  %v2989_v37 = vrot.slane %v2988_v27, 4  ;;  %v13270_v62 = vld [vmem:[%s16158_s25 + $0xa8] sm:$0xf]  ;;  %v13339_v15 = vld [vmem:[%s16158_s25 + $0x9c] sm:$0xe] }
  0xe8   : > { %v13376_v17 = vcombine.low %v3672_v61, %v3675_v12  ;;  %v3003_v28 = vrot.slane %v3001_v20, 5  ;;  %v3021_v39 = vrot.slane %v3019_v29, 4  ;;  %v3027_v40 = vrot.slane %v3025_v30, 5  ;;  %v13340_v20 = vld [vmem:[%s16158_s25 + $0xa0] sm:$0xf] }
  0xe9   : > { %14824 = vmatprep.mubr.bf16.mxu0 %v13287_v59  ;;  %v13361_v41 = vrot.slane %v13333_v16, 9  ;;  %v2999_v42 = vrot.slane %v2998_v32, 4  ;;  %v3012_v44 = vor.u32 %v3011_v34, %v3008_v33  ;;  %v3678_v45 = vrot.slane %v13334_v21, 5  ;;  %v13341_v25 = vld [vmem:[%s16158_s25 + $0xa4] sm:$0x1] }
  0xea   : > { %14825 = vmatmul.mubr.bf16.gmra.mxu0 %v13288_v11  ;;  %14873 = vmatmul.mubr.bf16.gmra.mxu1 %v13376_v17  ;;  %v3681_v47 = vrot.slane %v13335_v26, 5  ;;  %v2994_v48 = vsel %vm16178_vm2, %v2989_v37, %v2993_v19  ;;  %v3022_v43 = vor.u32 %v3021_v39, %v3017_v35  ;;  %v13362_v50 = vrot.slane %v13336_v31, 9  ;;  %v13342_v30 = vld [vmem:[%s16158_s25 + $0xa8] sm:$0xe] }
  0xeb   : > { %v3685_v51 = vrot.slane %v13337_v36, 5  ;;  %v3004_v52 = vsel %vm16178_vm2, %v2999_v42, %v3003_v28  ;;  %v3013_v53 = vrot.slane %v3012_v44, 4  ;;  %v3679_v54 = vsel %vm16358_vm5, %v13361_v41, %v3678_v45 }
  0xec   : > { %v3680_v55 = vrot.slane %v3678_v45, 4  ;;  %v13289_v58 = vcombine.low %v2994_v48, %v3004_v52  ;;  %v3023_v59 = vrot.slane %v3022_v43, 4  ;;  %v3688_v4 = vrot.slane %v13338_v49, 5  ;;  %v13344_v43 = vld [vmem:[%s16158_s25 + $0xb0] sm:$0x1] }
  0xed   : > { %v3686_v60 = vsel %vm16358_vm5, %v13362_v50, %v3685_v51  ;;  %v3687_v61 = vrot.slane %v3685_v51, 4  ;;  %v3018_v0 = vsel %vm16178_vm2, %v3013_v53, %v3017_v35  ;;  %v3030_v5 = vshrl.u32 %v13267_v3, 16  ;;  %v13343_v35 = vld [vmem:[%s16158_s25 + $0xac] sm:$0xf]  ;;  %v13273_v51 = vld [vmem:[%s16158_s25 + $0xb4] sm:$0xf] }
  0xee   : > { %v3682_v1 = vsel %vm16358_vm5, %v3680_v55, %v3681_v47  ;;  %14828 = vmatprep.mubr.bf16.mxu0 %v13289_v58  ;;  %v3028_v6 = vsel %vm16178_vm2, %v3023_v59, %v3027_v40  ;;  %v3033_v8 = vshll.u32 %v13267_v3, 16  ;;  %v3039_v9 = vshll.u32 %v13268_v56, 16 }
  0xef   : > { %v13377_v7 = vcombine.low %v3679_v54, %v3682_v1  ;;  %v13290_v10 = vcombine.low %v3018_v0, %v3028_v6  ;;  %v3689_v11 = vsel %vm16358_vm5, %v3687_v61, %v3688_v4  ;;  %v3032_v12 = vrot.slane %v3030_v5, 4  ;;  %v13277_v0 = vld [vmem:[%s16158_s25 + $0xc4] sm:$0xf] }
  0xf0   : > { %v3043_v13 = vshrl.u32 %v13268_v56, 16  ;;  %v13378_v16 = vcombine.low %v3686_v60, %v3689_v11  ;;  %v3035_v17 = vrot.slane %v3033_v8, 5  ;;  %v3041_v18 = vrot.slane %v3039_v9, 5  ;;  %v13274_v56 = vld [vmem:[%s16158_s25 + $0xb8] sm:$0xf] }
  0xf1   : > { %14876 = vmatprep.mubr.bf16.mxu1 %v13377_v7  ;;  %v3049_v19 = vshll.u32 %v13269_v57, 16  ;;  %v3054_v22 = vshrl.u32 %v13270_v62, 16  ;;  %v3057_v23 = vshll.u32 %v13270_v62, 16  ;;  %v3063_v24 = vshll.u32 %v13271_v63, 16  ;;  %v13275_v57 = vld [vmem:[%s16158_s25 + $0xbc] sm:$0x1] }
  0xf2   : > { %14829 = vmatmul.mubr.bf16.gmra.mxu0 %v13290_v10  ;;  %v3045_v21 = vrot.slane %v3043_v13, 4  ;;  %14877 = vmatmul.mubr.bf16.gmra.mxu1 %v13378_v16  ;;  %v3036_v26 = vor.u32 %v3035_v17, %v3032_v12  ;;  %v3067_v28 = vshrl.u32 %v13271_v63, 16  ;;  %v3073_v29 = vshll.u32 %v13272_v14, 16  ;;  %v13276_v63 = vld [vmem:[%s16158_s25 + $0xc0] sm:$0xf] }
  0xf3   : > { %v3051_v27 = vrot.slane %v3049_v19, 5  ;;  %v3056_v32 = vrot.slane %v3054_v22, 4  ;;  %v3059_v33 = vrot.slane %v3057_v23, 5  ;;  %v3065_v34 = vrot.slane %v3063_v24, 5  ;;  %v13278_v8 = vld [vmem:[%s16158_s25 + $0xc8] sm:$0x1] }
  0xf4   : > { %v3046_v31 = vor.u32 %v3045_v21, %v3041_v18  ;;  %v3037_v36 = vrot.slane %v3036_v26, 4  ;;  %v3069_v37 = vrot.slane %v3067_v28, 4  ;;  %v3075_v39 = vrot.slane %v3073_v29, 5  ;;  %v13345_v19 = vld [vmem:[%s16158_s25 + $0xb4] sm:$0xe] }
  0xf5   : > { %v13363_v40 = vrot.slane %v13339_v15, 9  ;;  %v3060_v42 = vor.u32 %v3059_v33, %v3056_v32  ;;  %v3692_v44 = vrot.slane %v13340_v20, 5  ;;  %v3695_v45 = vrot.slane %v13341_v25, 5  ;;  %v13346_v25 = vld [vmem:[%s16158_s25 + $0xb8] sm:$0xf] }
  0xf6   : > { %v3047_v41 = vrot.slane %v3046_v31, 4  ;;  %v3042_v47 = vsel %vm16178_vm2, %v3037_v36, %v3041_v18  ;;  %v3070_v48 = vor.u32 %v3069_v37, %v3065_v34  ;;  %v13364_v49 = vrot.slane %v13342_v30, 9  ;;  %v13347_v26 = vld [vmem:[%s16158_s25 + $0xbc] sm:$0x1]  ;;  %v13348_v32 = vld [vmem:[%s16158_s25 + $0xc0] sm:$0xe] }
  0xf7   : > { %v3699_v50 = vrot.slane %v13343_v35, 5  ;;  %v3061_v53 = vrot.slane %v3060_v42, 4  ;;  %v3693_v54 = vsel %vm16358_vm5, %v13363_v40, %v3692_v44  ;;  %v3694_v55 = vrot.slane %v3692_v44, 4  ;;  %v13349_v33 = vld [vmem:[%s16158_s25 + $0xc4] sm:$0xf] }
  0xf8   : > { %v3052_v52 = vsel %vm16178_vm2, %v3047_v41, %v3051_v27  ;;  %v3071_v60 = vrot.slane %v3070_v48, 4  ;;  %v3702_v6 = vrot.slane %v13344_v43, 5  ;;  %v3078_v7 = vshrl.u32 %v13273_v51, 16 }
  0xf9   : > { %v13291_v59 = vcombine.low %v3042_v47, %v3052_v52  ;;  %v3700_v61 = vsel %vm16358_vm5, %v13364_v49, %v3699_v50  ;;  %v3701_v62 = vrot.slane %v3699_v50, 4  ;;  %v3066_v4 = vsel %vm16178_vm2, %v3061_v53, %v3065_v34 }
  0xfa   : > { %v3696_v5 = vsel %vm16358_vm5, %v3694_v55, %v3695_v45  ;;  %v3076_v10 = vsel %vm16178_vm2, %v3071_v60, %v3075_v39  ;;  %v3081_v12 = vshll.u32 %v13273_v51, 16  ;;  %v3087_v13 = vshll.u32 %v13274_v56, 16  ;;  %v13350_v60 = vld [vmem:[%s16158_s25 + $0xc8] sm:$0x1] }
  0xfb   : > { %14832 = vmatprep.mubr.bf16.mxu0 %v13291_v59  ;;  %v13379_v11 = vcombine.low %v3693_v54, %v3696_v5  ;;  %v13292_v15 = vcombine.low %v3066_v4, %v3076_v10  ;;  %v3703_v16 = vsel %vm16358_vm5, %v3701_v62, %v3702_v6  ;;  %v3080_v17 = vrot.slane %v3078_v7, 4  ;;  %v13449_v10 = vld [vmem:[%s16158_s25 + $0x20] sm:$0x1] }
  0xfc   : > { %v3091_v18 = vshrl.u32 %v13274_v56, 16  ;;  %v13380_v21 = vcombine.low %v3700_v61, %v3703_v16  ;;  %v3083_v22 = vrot.slane %v3081_v12, 5  ;;  %v3089_v23 = vrot.slane %v3087_v13, 5 }
  0xfd   : > { %14880 = vmatprep.mubr.bf16.mxu1 %v13379_v11  ;;  %v3097_v24 = vshll.u32 %v13275_v57, 16  ;;  %14833 = vmatmul.mubr.bf16.gmra.mxu0 %v13292_v15  ;;  %v3102_v29 = vshrl.u32 %v13276_v63, 16  ;;  %v3105_v30 = vshll.u32 %v13276_v63, 16  ;;  %v3111_v31 = vshll.u32 %v13277_v0, 16  ;;  %v13447_v63 = vld [vmem:[%s16158_s25 + $0x18] sm:$0xf] }
  0xfe   : > { %v3093_v28 = vrot.slane %v3091_v18, 4  ;;  %14881 = vmatmul.mubr.bf16.gmra.mxu1 %v13380_v21  ;;  %v3084_v35 = vor.u32 %v3083_v22, %v3080_v17  ;;  %v3115_v37 = vshrl.u32 %v13277_v0, 16  ;;  %v3121_v39 = vshll.u32 %v13278_v8, 16  ;;  %v13448_v8 = vld [vmem:[%s16158_s25 + $0x1c] sm:$0xf] }
  0xff   : > { %v3099_v36 = vrot.slane %v3097_v24, 5  ;;  %v3104_v42 = vrot.slane %v3102_v29, 4  ;;  %v3107_v44 = vrot.slane %v3105_v30, 5  ;;  %v3113_v45 = vrot.slane %v3111_v31, 5  ;;  %v13450_v17 = vld [vmem:[%s16158_s25 + $0x24] sm:$0xf] }
 0x100   : > { %v3094_v41 = vor.u32 %v3093_v28, %v3089_v23  ;;  %v3085_v48 = vrot.slane %v3084_v35, 4  ;;  %v3117_v43 = vrot.slane %v3115_v37, 4  ;;  %v3123_v49 = vrot.slane %v3121_v39, 5 }
 0x101   : > { %v13365_v50 = vrot.slane %v13345_v19, 9  ;;  %v3108_v53 = vor.u32 %v3107_v44, %v3104_v42  ;;  %v3706_v54 = vrot.slane %v13346_v25, 5  ;;  %v3709_v55 = vrot.slane %v13347_v26, 5  ;;  %v13452_v42 = vld [vmem:[%s16158_s25 + $0x2c] sm:$0x1] }
 0x102   : > { %v3095_v52 = vrot.slane %v3094_v41, 4  ;;  %v3090_v57 = vsel %vm16178_vm2, %v3085_v48, %v3089_v23  ;;  %v3118_v59 = vor.u32 %v3117_v43, %v3113_v45  ;;  %v13366_v61 = vrot.slane %v13348_v32, 9  ;;  %v15758_v23 = vld [vmem:[%s16158_s25 + $0x18] sm:$0xff]  }
 0x103   : > { %v3713_v62 = vrot.slane %v13349_v33, 5  ;;  %v3109_v5 = vrot.slane %v3108_v53, 4  ;;  %v3707_v6 = vsel %vm16358_vm5, %v13365_v50, %v3706_v54  ;;  %v3708_v7 = vrot.slane %v3706_v54, 4 }
 0x104   : > { %v3100_v4 = vsel %vm16178_vm2, %v3095_v52, %v3099_v36  ;;  %v3119_v13 = vrot.slane %v3118_v59, 4  ;;  %v3716_v22 = vrot.slane %v13350_v60, 5  ;;  %v4602_v29 = vshrl.u32 %v13447_v63, 16 }
 0x105   : > { %v16791_v3 = vpop.f32.mrf.mxu0  ;;  %v13293_v12 = vcombine.low %v3090_v57, %v3100_v4  ;;  %v3714_v15 = vsel %vm16358_vm5, %v13366_v61, %v3713_v62  ;;  %v3715_v16 = vrot.slane %v3713_v62, 4  ;;  %v3114_v19 = vsel %vm16178_vm2, %v3109_v5, %v3113_v45  ;;  %v13453_v57 = vld [vmem:[%s16158_s25 + $0x30] sm:$0xf]  ;;  %v15759_v4 = vld [vmem:[%s16158_s25 + $0x24] sm:$0xff]  }
 0x106   : > { %v16799_v58 = vpop.f32.mrf.mxu1  ;;  %v3710_v21 = vsel %vm16358_vm5, %v3708_v7, %v3709_v55  ;;  %v3124_v26 = vsel %vm16178_vm2, %v3119_v13, %v3123_v49  ;;  %v4605_v30 = vshll.u32 %v13447_v63, 16  ;;  %v4611_v35 = vshll.u32 %v13448_v8, 16 }
 0x107   : > { %v16805_v1 = vpop.f32.mrf.mxu0  ;;  %v16865_v24 = vadd.f32 %v16799_v58, %v16791_v3  ;;  %14836 = vmatprep.mubr.bf16.mxu0 %v13293_v12  ;;  %v13381_v28 = vcombine.low %v3707_v6, %v3710_v21  ;;  %v13294_v32 = vcombine.low %v3114_v19, %v3124_v26  ;;  %v3717_v33 = vsel %vm16358_vm5, %v3715_v16, %v3716_v22  ;;  %v13451_v3 = vld [vmem:[%s16158_s25 + $0x28] sm:$0xf]  ;;  %v15761_v19 = vld [vmem:[%s16158_s25 + $0x30] sm:$0xff]   ;;  %v13456_v21 = vld [vmem:[%s16158_s25 + $0x3c] sm:$0xf] }
 0x108   : > { %v16812_v9 = vpop.f32.mrf.mxu1  ;;  %v4615_v36 = vshrl.u32 %v13448_v8, 16  ;;  %v13382_v58 = vcombine.low %v3714_v15, %v3717_v33  ;;  %v4604_v37 = vrot.slane %v4602_v29, 4  ;;  %v4607_v39 = vrot.slane %v4605_v30, 5 }
 0x109   : > { %v16816_v14 = vpop.f32.mrf.mxu0  ;;  %14884 = vmatprep.mubr.bf16.mxu1 %v13381_v28  ;;  %v4621_v41 = vshll.u32 %v13449_v10, 16  ;;  %14837 = vmatmul.mubr.bf16.gmra.mxu0 %v13294_v32  ;;  %v4613_v45 = vrot.slane %v4611_v35, 5  ;;  %v16881_v43 = vadd.f32 %v16812_v9, %v16805_v1  ;;  %v4626_v49 = vshrl.u32 %v13450_v17, 16  ;;  %v13454_v9 = vld [vmem:[%s16158_s25 + $0x34] sm:$0xf] }
 0x10a   : > { %v16821_v20 = vpop.f32.mrf.mxu1  ;;  %v4617_v48 = vrot.slane %v4615_v36, 4  ;;  %14885 = vmatmul.mubr.bf16.gmra.mxu1 %v13382_v58  ;;  %14904 = vmatprep.mubr.bf16.mxu0 %v15758_v23  ;;  %v4608_v52 = vor.u32 %v4607_v39, %v4604_v37  ;;  %v4629_v54 = vshll.u32 %v13450_v17, 16  ;;  %v4635_v55 = vshll.u32 %v13451_v3, 16  ;;  %v13455_v10 = vld [vmem:[%s16158_s25 + $0x38] sm:$0x1] }
 0x10b   : > { %v16825_v27 = vpop.f32.mrf.mxu0  ;;  %v4623_v53 = vrot.slane %v4621_v41, 5  ;;  %v4628_v61 = vrot.slane %v4626_v49, 4  ;;  %v4639_v62 = vshrl.u32 %v13451_v3, 16  ;;  %v4645_v1 = vshll.u32 %v13452_v42, 16  ;;  %v13457_v42 = vld [vmem:[%s16158_s25 + $0x40] sm:$0xf] }
 0x10c   : > { %v16829_v34 = vpop.f32.mrf.mxu1  ;;  %v4618_v60 = vor.u32 %v4617_v48, %v4613_v45  ;;  %v4609_v5 = vrot.slane %v4608_v52, 4  ;;  %v4631_v6 = vrot.slane %v4629_v54, 5  ;;  %v4637_v7 = vrot.slane %v4635_v55, 5 }
 0x10d   : > { %v16831_v40 = vpop.f32.mrf.mxu0  ;;  %v16894_v8 = vadd.f32 %v16821_v20, %v16816_v14  ;;  %v4641_v15 = vrot.slane %v4639_v62, 4  ;;  %v4647_v16 = vrot.slane %v4645_v1, 5  ;;  %v16901_v17 = vadd.f32 %v16829_v34, %v16825_v27  ;;  %v15763_v20 = vld [vmem:[%s20706_s1 + $0x230] sm:$0xff]  }
 0x10e   : > { %v16833_v47 = vpop.f32.mrf.mxu1  ;;  %v4619_v13 = vrot.slane %v4618_v60, 4  ;;  %v4614_v23 = vsel %vm16178_vm2, %v4609_v5, %v4613_v45  ;;  %v4632_v26 = vor.u32 %v4631_v6, %v4628_v61  ;;  %v4650_v28 = vshrl.u32 %v13453_v57, 16  ;;  %v15762_v60 = vld [vmem:[%s16158_s25 + $0x3c] sm:$0xff]  }
 0x10f   : > { %v16835_v51 = vpop.f32.mrf.mxu0  ;;  %v16911_v14 = vadd.f32 %v16833_v47, %v16831_v40  ;;  %v4642_v34 = vor.u32 %v4641_v15, %v4637_v7  ;;  %v4653_v30 = vshll.u32 %v13453_v57, 16  ;;  %v4659_v32 = vshll.u32 %v13454_v9, 16 }
 0x110   : > { %v16837_v56 = vpop.f32.mrf.mxu1  ;;  %v4624_v27 = vsel %vm16178_vm2, %v4619_v13, %v4623_v53  ;;  %v4633_v36 = vrot.slane %v4632_v26, 4  ;;  %v4652_v40 = vrot.slane %v4650_v28, 4  ;;  %v4663_v47 = vshrl.u32 %v13454_v9, 16  ;;  %v13458_v53 = vld [vmem:[%s16158_s25 + $0x44] sm:$0x1] }
 0x111   : > { %v16843_v0 = vpop.f32.mrf.mxu0  ;;  %v13495_v35 = vcombine.low %v4614_v23, %v4624_v27  ;;  %14905 = vmatmul.mubr.bf16.vlgmr.msra.gmra.mxu0 %v15759_v4  ;;  %v4643_v58 = vrot.slane %v4642_v34, 4  ;;  %v4655_v37 = vrot.slane %v4653_v30, 5  ;;  %v4661_v39 = vrot.slane %v4659_v32, 5  ;;  %v15769_v23 = vld [vmem:[%s20706_s1 + $0x220] sm:$0xff]  }
 0x112   : > { %v16851_v11 = vpop.f32.mrf.mxu1  ;;  %v4669_v41 = vshll.u32 %v13455_v10, 16  ;;  %14985 = vmatpush3.bf16.msra.mxu0 %v16714_v2  ;;  %v4638_v48 = vsel %vm16178_vm2, %v4633_v36, %v4637_v7  ;;  %v4665_v49 = vrot.slane %v4663_v47, 4  ;;  %v16932_v52 = vadd.f32 %v16837_v56, %v16835_v51  ;;  %14908 = vmatprep.mubr.bf16.mxu0 %v15761_v19  ;;  %v15766_v51 = vld [vmem:[%s20706_s1 + $0x228] sm:$0xff]  }
 0x113   : > { %v16856_v18 = vpop.f32.mrf.mxu0  ;;  %14952 = vmatprep.mubr.bf16.mxu1 %v13495_v35  ;;  %v4674_v54 = vshrl.u32 %v13456_v21, 16  ;;  %v4648_v57 = vsel %vm16178_vm2, %v4643_v58, %v4647_v16  ;;  %14986 = vmatprep.subr.bf16.mxu0 %v15763_v20  ;;  %v4656_v2 = vor.u32 %v4655_v37, %v4652_v40  ;;  %v4677_v62 = vshll.u32 %v13456_v21, 16  ;;  %v13459_v56 = vld [vmem:[%s16158_s25 + $0x48] sm:$0xf]  ;;  %v13460_v10 = vld [vmem:[%s16158_s25 + $0x4c] sm:$0xf] }
 0x114   : > { %v16867_v25 = vpop.f32.mrf.mxu1  ;;  %v4671_v61 = vrot.slane %v4669_v41, 5  ;;  %v13496_v9 = vcombine.low %v4638_v48, %v4648_v57  ;;  %v4666_v4 = vor.u32 %v4665_v49, %v4661_v39  ;;  %v4683_v6 = vshll.u32 %v13457_v42, 16  ;;  %v15764_v7 = vld [vmem:[%s16158_s25 + $0x48] sm:$0xff]   ;;  %v13462_v49 = vld [vmem:[%s16158_s25 + $0x54] sm:$0xf] }
 0x115   : > { %v16871_v31 = vpop.f32.mrf.mxu0  ;;  %v4676_v5 = vrot.slane %v4674_v54, 4  ;;  %v4657_v15 = vrot.slane %v4656_v2, 4  ;;  %v4679_v16 = vrot.slane %v4677_v62, 5  ;;  %v4687_v19 = vshrl.u32 %v13457_v42, 16 }
 0x116   : > { %v16883_v50 = vpop.f32.mrf.mxu1  ;;  %v4693_v21 = vshll.u32 %v13458_v53, 16  ;;  %14953 = vmatmul.mubr.bf16.vlgmr.msra.gmra.mxu1 %v13496_v9  ;;  %v4667_v28 = vrot.slane %v4666_v4, 4  ;;  %14987 = vmatpush3.bf16.msra.mxu0 %v15763_v20  ;;  %v4685_v27 = vrot.slane %v4683_v6, 5  ;;  %v16957_v34 = vadd.f32 %v16851_v11, %v16843_v0  ;;  %v13461_v20 = vld [vmem:[%s16158_s25 + $0x50] sm:$0x1]  ;;  %v15765_v4 = vld [vmem:[%s16158_s25 + $0x54] sm:$0xff]  }
 0x117   : > { %v16877_v44 = vpop.f32.mrf.mxu0  ;;  %v16961_v30 = vadd.f32 %v16867_v25, %v16856_v18  ;;  %v4662_v35 = vsel %vm16178_vm2, %v4657_v15, %v4661_v39  ;;  %v4680_v36 = vor.u32 %v4679_v16, %v4676_v5  ;;  %v4689_v40 = vrot.slane %v4687_v19, 4  ;;  %14988 = vmatprep.subr.bf16.mxu0 %v15766_v51  ;;  %v13463_v53 = vld [vmem:[%s16158_s25 + $0x58] sm:$0xf]  ;;  %v15767_v19 = vld [vmem:[%s16158_s25 + $0x60] sm:$0xff]  }
 0x118   : > { %v16889_v63 = vpop.f32.mrf.mxu1  ;;  %v4695_v47 = vrot.slane %v4693_v21, 5  ;;  %v4672_v0 = vsel %vm16178_vm2, %v4667_v28, %v4671_v61  ;;  %v16974_v11 = vadd.f32 %v16883_v50, %v16871_v31  ;;  %v4698_v18 = vshrl.u32 %v13459_v56, 16  ;;  %v15772_v31 = vld [vmem:[%s20706_s1 + $0x218] sm:$0xff]  }
 0x119   : > { %v16886_v59 = vpop.f32.mrf.mxu0  ;;  %v4701_v25 = vshll.u32 %v13459_v56, 16  ;;  %14909 = vmatmul.mubr.bf16.gmra.mxu0 %v15762_v60  ;;  %v13497_v39 = vcombine.low %v4662_v35, %v4672_v0  ;;  %v4681_v41 = vrot.slane %v4680_v36, 4  ;;  %v4690_v42 = vor.u32 %v4689_v40, %v4685_v27  ;;  %v13464_v60 = vld [vmem:[%s16158_s25 + $0x5c] sm:$0x1]  ;;  %v13465_v40 = vld [vmem:[%s16158_s25 + $0x60] sm:$0xf] }
 0x11a   : > { %v16905_v22 = vpop.f32.mrf.mxu1  ;;  %v4707_v48 = vshll.u32 %v13460_v10, 16  ;;  %14912 = vmatprep.mubr.bf16.mxu0 %v15764_v7  ;;  %v4700_v50 = vrot.slane %v4698_v18, 4  ;;  %v4711_v2 = vshrl.u32 %v13460_v10, 16  ;;  %v4717_v61 = vshll.u32 %v13461_v20, 16  ;;  %14989 = vmatpush3.bf16.msra.mxu0 %v15766_v51 }
 0x11b   : > { %v16897_v12 = vpop.f32.mrf.mxu0  ;;  %v4703_v57 = vrot.slane %v4701_v25, 5  ;;  %14956 = vmatprep.mubr.bf16.mxu1 %v13497_v39  ;;  %v4686_v56 = vsel %vm16178_vm2, %v4681_v41, %v4685_v27  ;;  %v4691_v9 = vrot.slane %v4690_v42, 4  ;;  %v16993_v6 = vadd.f32 %v16889_v63, %v16877_v44  ;;  %14990 = vmatprep.subr.bf16.mxu0 %v15769_v23  ;;  %v15775_v63 = vld [vmem:[%s20706_s1 + $0x210] sm:$0xff]  }
 0x11c   : > { %v16920_v33 = vpop.f32.mrf.mxu1  ;;  %v4709_v5 = vrot.slane %v4707_v48, 5  ;;  %v4713_v51 = vrot.slane %v4711_v2, 4  ;;  %v4719_v15 = vrot.slane %v4717_v61, 5  ;;  %v4722_v16 = vshrl.u32 %v13462_v49, 16 }
 0x11d   : > { %v16916_v29 = vpop.f32.mrf.mxu0  ;;  %v4704_v10 = vor.u32 %v4703_v57, %v4700_v50  ;;  %v4696_v28 = vsel %vm16178_vm2, %v4691_v9, %v4695_v47  ;;  %v4725_v27 = vshll.u32 %v13462_v49, 16  ;;  %v4731_v35 = vshll.u32 %v13463_v53, 16  ;;  %v13466_v49 = vld [vmem:[%s16158_s25 + $0x64] sm:$0xf] }
 0x11e   : > { %v16925_v45 = vpop.f32.mrf.mxu1  ;;  %v4735_v36 = vshrl.u32 %v13463_v53, 16  ;;  %v13498_v20 = vcombine.low %v4686_v56, %v4696_v28  ;;  %v4714_v18 = vor.u32 %v4713_v51, %v4709_v5  ;;  %v4724_v25 = vrot.slane %v4722_v16, 4  ;;  %14991 = vmatpush3.bf16.msra.mxu0 %v15769_v23  ;;  %v13468_v51 = vld [vmem:[%s16158_s25 + $0x6c] sm:$0xf]  ;;  %v13469_v16 = vld [vmem:[%s16158_s25 + $0x70] sm:$0xf] }
 0x11f   : > { %v16922_v3 = vpop.f32.mrf.mxu0  ;;  %v4705_v0 = vrot.slane %v4704_v10, 4  ;;  %v4727_v41 = vrot.slane %v4725_v27, 5  ;;  %v4733_v47 = vrot.slane %v4731_v35, 5  ;;  %v4741_v48 = vshll.u32 %v13464_v60, 16  ;;  %14992 = vmatprep.subr.bf16.mxu0 %v15772_v31  ;;  %v13467_v10 = vld [vmem:[%s16158_s25 + $0x68] sm:$0x1] }
 0x120   : > { %v16944_v1 = vpop.f32.mrf.mxu1  ;;  %v4737_v42 = vrot.slane %v4735_v36, 4  ;;  %14957 = vmatmul.mubr.bf16.gmra.mxu1 %v13498_v20  ;;  %v4715_v57 = vrot.slane %v4714_v18, 4  ;;  %v17017_v23 = vadd.f32 %v16905_v22, %v16886_v59  ;;  %v17021_v2 = vadd.f32 %v16920_v33, %v16897_v12  ;;  %v13470_v20 = vld [vmem:[%s16158_s25 + $0x74] sm:$0x1] }
 0x121   : > { %v16935_v55 = vpop.f32.mrf.mxu0  ;;  %v4710_v50 = vsel %vm16178_vm2, %v4705_v0, %v4709_v5  ;;  %14913 = vmatmul.mubr.bf16.gmra.mxu0 %v15765_v4  ;;  %v4728_v60 = vor.u32 %v4727_v41, %v4724_v25  ;;  %v4743_v9 = vrot.slane %v4741_v48, 5  ;;  %v17027_v5 = vadd.f32 %v16925_v45, %v16916_v29  ;;  %v15768_v45 = vld [vmem:[%s16158_s25 + $0x6c] sm:$0xff]  }
 0x122   : > { %v16953_v26 = vpop.f32.mrf.mxu1  ;;  %v4738_v56 = vor.u32 %v4737_v42, %v4733_v47  ;;  %v4720_v59 = vsel %vm16178_vm2, %v4715_v57, %v4719_v15  ;;  %14916 = vmatprep.mubr.bf16.mxu0 %v15767_v19  ;;  %v4746_v12 = vshrl.u32 %v13465_v40, 16  ;;  %v4749_v22 = vshll.u32 %v13465_v40, 16  ;;  %14993 = vmatpush3.bf16.msra.mxu0 %v15772_v31  ;;  %v15778_v15 = vld [vmem:[%s20706_s1 + $0x208] sm:$0xff]  }
 0x123   : > { %v16948_v13 = vpop.f32.mrf.mxu0  ;;  %v4755_v33 = vshll.u32 %v13466_v49, 16  ;;  %v13499_v27 = vcombine.low %v4710_v50, %v4720_v59  ;;  %v4729_v35 = vrot.slane %v4728_v60, 4  ;;  %v4759_v36 = vshrl.u32 %v13466_v49, 16  ;;  %14994 = vmatprep.subr.bf16.mxu0 %v15775_v63  ;;  %v15770_v50 = vld [vmem:[%s16158_s25 + $0x78] sm:$0xff]  }
 0x124   : > { %v16968_v58 = vpop.f32.mrf.mxu1  ;;  %v4739_v29 = vrot.slane %v4738_v56, 4  ;;  %v4748_v19 = vrot.slane %v4746_v12, 4  ;;  %v4751_v40 = vrot.slane %v4749_v22, 5  ;;  %v4765_v31 = vshll.u32 %v13467_v10, 16 }
 0x125   : > { %v16963_v32 = vpop.f32.mrf.mxu0  ;;  %v4757_v0 = vrot.slane %v4755_v33, 5  ;;  %14960 = vmatprep.mubr.bf16.mxu1 %v13499_v27  ;;  %v4734_v41 = vsel %vm16178_vm2, %v4729_v35, %v4733_v47  ;;  %v4761_v48 = vrot.slane %v4759_v36, 4  ;;  %v17053_v49 = vadd.f32 %v16944_v1, %v16922_v3  ;;  %v15781_v3 = vld [vmem:[%s20706_s1 + $0x200] sm:$0xff]  }
 0x126   : > { %v16980_v54 = vpop.f32.mrf.mxu1  ;;  %v4744_v42 = vsel %vm16178_vm2, %v4739_v29, %v4743_v9  ;;  %v4752_v60 = vor.u32 %v4751_v40, %v4748_v19  ;;  %v4767_v56 = vrot.slane %v4765_v31, 5  ;;  %v4770_v10 = vshrl.u32 %v13468_v51, 16  ;;  %14995 = vmatpush3.bf16.msra.mxu0 %v15775_v63  ;;  %v13471_v29 = vld [vmem:[%s16158_s25 + $0x78] sm:$0xf] }
 0x127   : > { %v16976_v37 = vpop.f32.mrf.mxu0  ;;  %v13500_v57 = vcombine.low %v4734_v41, %v4744_v42  ;;  %v4762_v47 = vor.u32 %v4761_v48, %v4757_v0  ;;  %v4773_v22 = vshll.u32 %v13468_v51, 16  ;;  %v4779_v33 = vshll.u32 %v13469_v16, 16  ;;  %14996 = vmatprep.subr.bf16.mxu0 %v15778_v15  ;;  %v13472_v41 = vld [vmem:[%s16158_s25 + $0x7c] sm:$0xf] }
 0x128   : > { %20771 = vst [vmem:[#allocation12_spill] sm:$0xff] %v16976_v37  ;;  %v16995_v7 = vpop.f32.mrf.mxu1  ;;  %v4783_v9 = vshrl.u32 %v13469_v16, 16  ;;  %v4753_v1 = vrot.slane %v4752_v60, 4  ;;  %v4772_v27 = vrot.slane %v4770_v10, 4  ;;  %v4789_v35 = vshll.u32 %v13470_v20, 16 }
 0x129   : > { %v16986_v62 = vpop.f32.mrf.mxu0  ;;  %20772 = vst [vmem:[#allocation13_spill] sm:$0xff] %v16995_v7  ;;  %14961 = vmatmul.mubr.bf16.gmra.mxu1 %v13500_v57  ;;  %v17065_v63 = vadd.f32 %v16953_v26, %v16935_v55  ;;  %14917 = vmatmul.mubr.bf16.gmra.mxu0 %v15768_v45  ;;  %v4763_v16 = vrot.slane %v4762_v47, 4  ;;  %v4775_v19 = vrot.slane %v4773_v22, 5  ;;  %v4781_v40 = vrot.slane %v4779_v33, 5  ;;  %v13473_v45 = vld [vmem:[%s16158_s25 + $0x80] sm:$0x1] }
 0x12a   : > { %v17003_v44 = vpop.f32.mrf.mxu1  ;;  %v4785_v31 = vrot.slane %v4783_v9, 4  ;;  %v4758_v20 = vsel %vm16178_vm2, %v4753_v1, %v4757_v0  ;;  %v4791_v42 = vrot.slane %v4789_v35, 5  ;;  %v17077_v55 = vadd.f32 %v16968_v58, %v16948_v13  ;;  %14920 = vmatprep.mubr.bf16.mxu0 %v15770_v50  ;;  %14997 = vmatpush3.bf16.msra.mxu0 %v15778_v15  ;;  %v13474_v47 = vld [vmem:[%s16158_s25 + $0x84] sm:$0xf]  ;;  %v13476_v33 = vld [vmem:[%s16158_s25 + $0x8c] sm:$0x1] }
 0x12b   : > { %v16998_v21 = vpop.f32.mrf.mxu0  ;;  %v17081_v26 = vadd.f32 %v16980_v54, %v16963_v32  ;;  %v4768_v57 = vsel %vm16178_vm2, %v4763_v16, %v4767_v56  ;;  %v4776_v0 = vor.u32 %v4775_v19, %v4772_v27  ;;  %v4794_v10 = vshrl.u32 %v13471_v29, 16  ;;  %14998 = vmatprep.subr.bf16.mxu0 %v15781_v3  ;;  %v15771_v58 = vld [vmem:[%s16158_s25 + $0x84] sm:$0xff]  }
 0x12c   : > { %20773 = vst [vmem:[#allocation14_spill] sm:$0xff] %v16998_v21  ;;  %v17011_v53 = vpop.f32.mrf.mxu1  ;;  %v4786_v60 = vor.u32 %v4785_v31, %v4781_v40  ;;  %v13501_v13 = vcombine.low %v4758_v20, %v4768_v57  ;;  %v4797_v50 = vshll.u32 %v13471_v29, 16  ;;  %v4803_v22 = vshll.u32 %v13472_v41, 16  ;;  %v13475_v54 = vld [vmem:[%s16158_s25 + $0x88] sm:$0xf]  ;;  %v15773_v20 = vld [vmem:[%s16158_s25 + $0x90] sm:$0xff]  }
 0x12d   : > { %v17008_v39 = vpop.f32.mrf.mxu0  ;;  %20774 = vst [vmem:[#allocation15_spill] sm:$0xff] %v17011_v53  ;;  %20777 = vst [vmem:[#allocation18_spill] sm:$0xff] %v17081_v26  ;;  %v4807_v32 = vshrl.u32 %v13472_v41, 16  ;;  %v4777_v1 = vrot.slane %v4776_v0, 4  ;;  %v4796_v56 = vrot.slane %v4794_v10, 4  ;;  %v4813_v27 = vshll.u32 %v13473_v45, 16 }
 0x12e   : > { %v17034_v4 = vpop.f32.mrf.mxu1  ;;  %v4787_v35 = vrot.slane %v4786_v60, 4  ;;  %14964 = vmatprep.mubr.bf16.mxu1 %v13501_v13  ;;  %v4799_v16 = vrot.slane %v4797_v50, 5  ;;  %v4805_v19 = vrot.slane %v4803_v22, 5  ;;  %14999 = vmatpush3.bf16.msra.mxu0 %v15781_v3  ;;  %v4818_v10 = vshrl.u32 %v13474_v47, 16 }
 0x12f   : > { %v17023_v61 = vpop.f32.mrf.mxu0  ;;  %v4809_v31 = vrot.slane %v4807_v32, 4  ;;  %v4782_v41 = vsel %vm16178_vm2, %v4777_v1, %v4781_v40  ;;  %v4815_v60 = vrot.slane %v4813_v27, 5  ;;  %v4821_v22 = vshll.u32 %v13474_v47, 16  ;;  %v13477_v1 = vld [vmem:[%s16158_s25 + $0x90] sm:$0xf] }
 0x130   : > { %v17043_v18 = vpop.f32.mrf.mxu1  ;;  %v4792_v0 = vsel %vm16178_vm2, %v4787_v35, %v4791_v42  ;;  %v4800_v13 = vor.u32 %v4799_v16, %v4796_v56  ;;  %v4820_v3 = vrot.slane %v4818_v10, 4  ;;  %v4837_v40 = vshll.u32 %v13476_v33, 16  ;;  %v13478_v27 = vld [vmem:[%s16158_s25 + $0x94] sm:$0xf] }
 0x131   : > { %v17036_v28 = vpop.f32.mrf.mxu0  ;;  %v13502_v45 = vcombine.low %v4782_v41, %v4792_v0  ;;  %v4810_v50 = vor.u32 %v4809_v31, %v4805_v19  ;;  %14921 = vmatmul.mubr.bf16.gmra.mxu0 %v15771_v58  ;;  %v4823_v56 = vrot.slane %v4821_v22, 5  ;;  %v17112_v47 = vadd.f32 %v17003_v44, %v16986_v62  ;;  %v15774_v41 = vld [vmem:[%s16158_s25 + $0x9c] sm:$0xff]   ;;  %v13479_v0 = vld [vmem:[%s16158_s25 + $0x98] sm:$0x1] }
 0x132   : > { %v17056_v59 = vpop.f32.mrf.mxu1  ;;  %v4801_v42 = vrot.slane %v4800_v13, 4  ;;  %14924 = vmatprep.mubr.bf16.mxu0 %v15773_v20  ;;  %v4839_v31 = vrot.slane %v4837_v40, 5  ;;  %v17127_v44 = vadd.f32 %v17034_v4, %v17008_v39  ;;  %v13480_v20 = vld [vmem:[%s16158_s25 + $0x9c] sm:$0xf]  ;;  %v15776_v13 = vld [vmem:[%s16158_s25 + $0xa8] sm:$0xff]   ;;  %v4861_v21 = vshll.u32 %v13479_v0, 16 }
 0x133   : > { %v17045_v25 = vpop.f32.mrf.mxu0  ;;  %14965 = vmatmul.mubr.bf16.gmra.mxu1 %v13502_v45  ;;  %v4811_v35 = vrot.slane %v4810_v50, 4  ;;  %20779 = vst [vmem:[#allocation20_spill] sm:$0xff] %v17112_v47  ;;  %v4824_v62 = vor.u32 %v4823_v56, %v4820_v3  ;;  %v13481_v40 = vld [vmem:[%s16158_s25 + $0xa0] sm:$0xf] }
 0x134   : > { %20775 = vst [vmem:[#allocation16_spill] sm:$0xff] %v17045_v25  ;;  %v17068_v36 = vpop.f32.mrf.mxu1  ;;  %v4831_v25 = vshrl.u32 %v13475_v54, 16  ;;  %v4806_v10 = vsel %vm16178_vm2, %v4801_v42, %v4805_v19  ;;  %20781 = vst [vmem:[#allocation22_spill] sm:$0xff] %v17127_v44  ;;  %v4851_v19 = vshll.u32 %v13478_v27, 16  ;;  %v4855_v42 = vshrl.u32 %v13478_v27, 16 }
 0x135   : > { %v17058_v12 = vpop.f32.mrf.mxu0  ;;  %20776 = vst [vmem:[#allocation17_spill] sm:$0xff] %v17068_v36  ;;  %v4827_v36 = vshll.u32 %v13475_v54, 16  ;;  %v4816_v45 = vsel %vm16178_vm2, %v4811_v35, %v4815_v60  ;;  %v4825_v53 = vrot.slane %v4824_v62, 4  ;;  %v17138_v35 = vadd.f32 %v17043_v18, %v17023_v61  ;;  %v13489_v44 = vld [vmem:[%s16158_s25 + $0xc0] sm:$0xf] }
 0x136   : > { %v17092_v9 = vpop.f32.mrf.mxu1  ;;  %v4833_v33 = vrot.slane %v4831_v25, 4  ;;  %v13503_v50 = vcombine.low %v4806_v10, %v4816_v45  ;;  %v4845_v25 = vshll.u32 %v13477_v1, 16  ;;  %v4853_v56 = vrot.slane %v4851_v19, 5  ;;  %v13482_v45 = vld [vmem:[%s16158_s25 + $0xa4] sm:$0x1] }
 0x137   : > { %v17070_v51 = vpop.f32.mrf.mxu0  ;;  %v4829_v54 = vrot.slane %v4827_v36, 5  ;;  %v4842_v36 = vshrl.u32 %v13477_v1, 16  ;;  %20783 = vst [vmem:[#allocation24_spill] sm:$0xff] %v17138_v35  ;;  %v4863_v10 = vrot.slane %v4861_v21, 5 }
 0x138   : > { %v17097_v57 = vpop.f32.mrf.mxu1  ;;  %14968 = vmatprep.mubr.bf16.mxu1 %v13503_v50  ;;  %v4847_v4 = vrot.slane %v4845_v25, 5  ;;  %v4866_v50 = vshrl.u32 %v13480_v20, 16 }
 0x139   : > { %v17084_v48 = vpop.f32.mrf.mxu0  ;;  %v4834_v22 = vor.u32 %v4833_v33, %v4829_v54  ;;  %v4844_v39 = vrot.slane %v4842_v36, 4  ;;  %v4830_v1 = vsel %vm16178_vm2, %v4825_v53, %v4829_v54  ;;  %v4857_v33 = vrot.slane %v4855_v42, 4  ;;  %14925 = vmatmul.mubr.bf16.gmra.mxu0 %v15774_v41  ;;  %v13483_v41 = vld [vmem:[%s16158_s25 + $0xa8] sm:$0xf] }
 0x13a   : > { %v17105_v32 = vpop.f32.mrf.mxu1  ;;  %v4875_v53 = vshll.u32 %v13481_v40, 16  ;;  %v4879_v54 = vshrl.u32 %v13481_v40, 16  ;;  %14928 = vmatprep.mubr.bf16.mxu0 %v15776_v13  ;;  %v4868_v19 = vrot.slane %v4866_v50, 4  ;;  %v4885_v42 = vshll.u32 %v13482_v45, 16  ;;  %v13484_v13 = vld [vmem:[%s16158_s25 + $0xac] sm:$0xf] }
 0x13b   : > { %v17094_v15 = vpop.f32.mrf.mxu0  ;;  %v4835_v3 = vrot.slane %v4834_v22, 4  ;;  %v4848_v0 = vor.u32 %v4847_v4, %v4844_v39  ;;  %v4869_v22 = vshll.u32 %v13480_v20, 16  ;;  %v4858_v18 = vor.u32 %v4857_v33, %v4853_v56  ;;  %v13485_v50 = vld [vmem:[%s16158_s25 + $0xb0] sm:$0x1] }
 0x13c   : > { %20778 = vst [vmem:[#allocation19_spill] sm:$0xff] %v17094_v15  ;;  %v17115_v58 = vpop.f32.mrf.mxu1  ;;  %v4877_v39 = vrot.slane %v4875_v53, 5  ;;  %v4881_v4 = vrot.slane %v4879_v54, 4  ;;  %v17156_v40 = vadd.f32 %v17056_v59, %v17036_v28  ;;  %v17171_v28 = vadd.f32 %v17092_v9, %v17058_v12  ;;  %v15779_v53 = vld [vmem:[%s16158_s25 + $0xc0] sm:$0xff]  }
 0x13d   : > { %v17099_v29 = vpop.f32.mrf.mxu0  ;;  %20780 = vst [vmem:[#allocation21_spill] sm:$0xff] %v17115_v58  ;;  %v4840_v27 = vsel %vm16178_vm2, %v4835_v3, %v4839_v31  ;;  %v4849_v25 = vrot.slane %v4848_v0, 4  ;;  %v4871_v31 = vrot.slane %v4869_v22, 5  ;;  %v4859_v20 = vrot.slane %v4858_v18, 4  ;;  %v15777_v0 = vld [vmem:[%s16158_s25 + $0xb4] sm:$0xff]  }
 0x13e   : > { %v17134_v60 = vpop.f32.mrf.mxu1  ;;  %v13504_v61 = vcombine.low %v4830_v1, %v4840_v27  ;;  %20784 = vst [vmem:[#allocation25_spill] sm:$0xff] %v17156_v40  ;;  %v4887_v27 = vrot.slane %v4885_v42, 5  ;;  %v4882_v18 = vor.u32 %v4881_v4, %v4877_v39  ;;  %20786 = vst [vmem:[#allocation27_spill] sm:$0xff] %v17171_v28  ;;  %v4890_v59 = vshrl.u32 %v13483_v41, 16  ;;  %v13486_v42 = vld [vmem:[%s16158_s25 + $0xb4] sm:$0xf] }
 0x13f   : > { %v17107_v15 = vpop.f32.mrf.mxu0  ;;  %v4854_v33 = vsel %vm16178_vm2, %v4849_v25, %v4853_v56  ;;  %v4872_v45 = vor.u32 %v4871_v31, %v4868_v19  ;;  %v4893_v19 = vshll.u32 %v13483_v41, 16  ;;  %v4899_v31 = vshll.u32 %v13484_v13, 16  ;;  %v13487_v40 = vld [vmem:[%s16158_s25 + $0xb8] sm:$0xf] }
 0x140   : > { %v17143_v62 = vpop.f32.mrf.mxu1  ;;  %14969 = vmatmul.mubr.bf16.gmra.mxu1 %v13504_v61  ;;  %v4864_v61 = vsel %vm16178_vm2, %v4859_v20, %v4863_v10  ;;  %v4892_v10 = vrot.slane %v4890_v59, 4  ;;  %v4903_v20 = vshrl.u32 %v13484_v13, 16  ;;  %v4909_v4 = vshll.u32 %v13485_v50, 16 }
 0x141   : > { %v17117_v16 = vpop.f32.mrf.mxu0  ;;  %v13505_v56 = vcombine.low %v4854_v33, %v4864_v61  ;;  %v4873_v25 = vrot.slane %v4872_v45, 4  ;;  %14929 = vmatmul.mubr.bf16.gmra.mxu0 %v15777_v0  ;;  %v4895_v9 = vrot.slane %v4893_v19, 5  ;;  %v4901_v33 = vrot.slane %v4899_v31, 5  ;;  %v13488_v45 = vld [vmem:[%s16158_s25 + $0xbc] sm:$0x1] }
 0x142   : > { %v17149_v21 = vpop.f32.mrf.mxu1  ;;  %v17186_v41 = vadd.f32 %v17097_v57, %v17070_v51  ;;  %v4905_v50 = vrot.slane %v4903_v20, 4  ;;  %v4914_v59 = vshrl.u32 %v13486_v42, 16  ;;  %14932 = vmatprep.mubr.bf16.mxu0 %v15779_v53  ;;  %v4923_v51 = vshll.u32 %v13487_v40, 16 }
 0x143   : > { %v17132_v58 = vpop.f32.mrf.mxu0  ;;  %14972 = vmatprep.mubr.bf16.mxu1 %v13505_v56  ;;  %v4878_v12 = vsel %vm16178_vm2, %v4873_v25, %v4877_v39  ;;  %v4896_v0 = vor.u32 %v4895_v9, %v4892_v10  ;;  %v4917_v25 = vshll.u32 %v13486_v42, 16  ;;  %v4933_v28 = vshll.u32 %v13488_v45, 16  ;;  %v15780_v42 = vld [vmem:[%s16158_s25 + $0xcc] sm:$0xff]  }
 0x144   : > { %20782 = vst [vmem:[#allocation23_spill] sm:$0xff] %v17132_v58  ;;  %v17159_v1 = vpop.f32.mrf.mxu1  ;;  %v4883_v58 = vrot.slane %v4882_v18, 4  ;;  %20787 = vst [vmem:[#allocation28_spill] sm:$0xff] %v17186_v41  ;;  %v4911_v18 = vrot.slane %v4909_v4, 5  ;;  %v4906_v19 = vor.u32 %v4905_v50, %v4901_v33  ;;  %v4916_v31 = vrot.slane %v4914_v59, 4 }
 0x145   : > { %v17147_v36 = vpop.f32.mrf.mxu0  ;;  %20785 = vst [vmem:[#allocation26_spill] sm:$0xff] %v17159_v1  ;;  %v4927_v41 = vshrl.u32 %v13487_v40, 16  ;;  %v4919_v53 = vrot.slane %v4917_v25, 5  ;;  %v4925_v20 = vrot.slane %v4923_v51, 5  ;;  %v17202_v10 = vadd.f32 %v17105_v32, %v17084_v48  ;;  %v13490_v4 = vld [vmem:[%s16158_s25 + $0xc4] sm:$0xf] }
 0x146   : > { %v4888_v13 = vsel %vm16178_vm2, %v4883_v58, %v4887_v27  ;;  %v4897_v27 = vrot.slane %v4896_v0, 4  ;;  %v4907_v9 = vrot.slane %v4906_v19, 4  ;;  %v4935_v45 = vrot.slane %v4933_v28, 5  ;;  %v13491_v48 = vld [vmem:[%s16158_s25 + $0xc8] sm:$0x1] }
 0x147   : > { %v17152_v3 = vpop.f32.mrf.mxu0  ;;  %v17174_v54 = vpop.f32.mrf.mxu1  ;;  %v13506_v39 = vcombine.low %v4878_v12, %v4888_v13  ;;  %20789 = vst [vmem:[#allocation30_spill] sm:$0xff] %v17202_v10  ;;  %v4929_v40 = vrot.slane %v4927_v41, 4  ;;  %v4920_v59 = vor.u32 %v4919_v53, %v4916_v31  ;;  %v4938_v32 = vshrl.u32 %v13489_v44, 16  ;;  %v13492_v19 = vld [vmem:[%s16158_s25 + $0xcc] sm:$0xf] }
 0x148   : > { %v4902_v50 = vsel %vm16178_vm2, %v4897_v27, %v4901_v33  ;;  %v4912_v25 = vsel %vm16178_vm2, %v4907_v9, %v4911_v18  ;;  %v4941_v28 = vshll.u32 %v13489_v44, 16  ;;  %v4947_v51 = vshll.u32 %v13490_v4, 16  ;;  %v13493_v18 = vld [vmem:[%s16158_s25 + $0xd0] sm:$0xf] }
 0x149   : > { %v17165_v22 = vpop.f32.mrf.mxu0  ;;  %v17180_v35 = vpop.f32.mrf.mxu1  ;;  %14973 = vmatmul.mubr.bf16.gmra.mxu1 %v13506_v39  ;;  %v17214_v39 = vadd.f32 %v17134_v60, %v17099_v29  ;;  %v4930_v41 = vor.u32 %v4929_v40, %v4925_v20  ;;  %v13507_v33 = vcombine.low %v4902_v50, %v4912_v25  ;;  %v4921_v31 = vrot.slane %v4920_v59, 4  ;;  %14933 = vmatmul.mubr.bf16.gmra.mxu0 %v15780_v42 }
 0x14a   : > { %v4940_v29 = vrot.slane %v4938_v32, 4  ;;  %v4951_v60 = vshrl.u32 %v13490_v4, 16  ;;  %v4949_v10 = vrot.slane %v4947_v51, 5  ;;  %v4957_v47 = vshll.u32 %v13491_v48, 16  ;;  %v13494_v4 = vld [vmem:[%s16158_s25 + $0xd4] sm:$0x1] }
 0x14b   : > { %v17177_v1 = vpop.f32.mrf.mxu0  ;;  %v17193_v56 = vpop.f32.mrf.mxu1  ;;  %20790 = vst [vmem:[#allocation31_spill] sm:$0xff] %v17214_v39  ;;  %v4931_v53 = vrot.slane %v4930_v41, 4  ;;  %v4943_v39 = vrot.slane %v4941_v28, 5  ;;  %14976 = vmatprep.mubr.bf16.mxu1 %v13507_v33  ;;  %v4926_v44 = vsel %vm16178_vm2, %v4921_v31, %v4925_v20  ;;  %v17233_v42 = vadd.f32 %v17143_v62, %v17107_v15  ;;  %v13520_v15 = vld [vmem:[%s16158_s25 + $0x1c] sm:$0xf] }
 0x14c   : > { %v4953_v40 = vrot.slane %v4951_v60, 4  ;;  %v4962_v50 = vshrl.u32 %v13492_v19, 16  ;;  %v4959_v25 = vrot.slane %v4957_v47, 5  ;;  %v4965_v41 = vshll.u32 %v13492_v19, 16  ;;  %v13519_v60 = vld [vmem:[%s16158_s25 + $0x18] sm:$0xe] }
 0x14d   : > { %v17189_v61 = vpop.f32.mrf.mxu0  ;;  %v17198_v58 = vpop.f32.mrf.mxu1  ;;  %20791 = vst [vmem:[#allocation32_spill] sm:$0xff] %v17233_v42  ;;  %v4936_v48 = vsel %vm16178_vm2, %v4931_v53, %v4935_v45  ;;  %v4944_v32 = vor.u32 %v4943_v39, %v4940_v29  ;;  %v4971_v31 = vshll.u32 %v13493_v18, 16  ;;  %v4975_v7 = vshrl.u32 %v13493_v18, 16  ;;  %v13521_v53 = vld [vmem:[%s16158_s25 + $0x20] sm:$0x1] }
 0x14e   : > { %20788 = vst [vmem:[#allocation29_spill] sm:$0xff] %v17198_v58  ;;  %v13508_v20 = vcombine.low %v4926_v44, %v4936_v48  ;;  %v4954_v51 = vor.u32 %v4953_v40, %v4949_v10  ;;  %v4964_v33 = vrot.slane %v4962_v50, 4  ;;  %v4967_v26 = vrot.slane %v4965_v41, 5 }
 0x14f   : > { %v17195_v57 = vpop.f32.mrf.mxu0  ;;  %v17208_v13 = vpop.f32.mrf.mxu1  ;;  %v4945_v42 = vrot.slane %v4944_v32, 4  ;;  %v4981_v45 = vshll.u32 %v13494_v4, 16  ;;  %v4973_v19 = vrot.slane %v4971_v31, 5  ;;  %v17251_v29 = vadd.f32 %v17149_v21, %v17117_v16  ;;  %v13522_v4 = vld [vmem:[%s16158_s25 + $0x24] sm:$0xe] }
 0x150   : > { %v4955_v47 = vrot.slane %v4954_v51, 4  ;;  %v4968_v50 = vor.u32 %v4967_v26, %v4964_v33  ;;  %v4977_v48 = vrot.slane %v4975_v7, 4  ;;  %v13523_v32 = vld [vmem:[%s16158_s25 + $0x28] sm:$0xf]  ;;  %v13567_v51 = vrot.slane %v13519_v60, 9 }
 0x151   : > { %v17206_v12 = vpop.f32.mrf.mxu0  ;;  %v17222_v58 = vpop.f32.mrf.mxu1  ;;  %14977 = vmatmul.mubr.bf16.gmra.mxu1 %v13508_v20  ;;  %20793 = vst [vmem:[#allocation34_spill] sm:$0xff] %v17251_v29  ;;  %v4950_v40 = vsel %vm16178_vm2, %v4945_v42, %v4949_v10  ;;  %v4983_v18 = vrot.slane %v4981_v45, 5  ;;  %v5468_v31 = vrot.slane %v13520_v15, 5  ;;  %v13524_v16 = vld [vmem:[%s16158_s25 + $0x2c] sm:$0x1]  ;;  %v2181_v7 = vadd.f32 %v17147_v36, %v16865_v24 }
 0x152   : > { %v4960_v20 = vsel %vm16178_vm2, %v4955_v47, %v4959_v25  ;;  %v4969_v37 = vrot.slane %v4968_v50, 4  ;;  %v4978_v10 = vor.u32 %v4977_v48, %v4973_v19  ;;  %v13568_v33 = vrot.slane %v13522_v4, 9  ;;  %v13525_v36 = vld [vmem:[%s16158_s25 + $0x30] sm:$0xe]  ;;  %v13527_v4 = vld [vmem:[%s16158_s25 + $0x38] sm:$0x1] }
 0x153   : > { %v17217_v0 = vpop.f32.mrf.mxu0  ;;  %v17227_v9 = vpop.f32.mrf.mxu1  ;;  %v13509_v29 = vcombine.low %v4950_v40, %v4960_v20  ;;  %v5469_v42 = vsel %vm16358_vm5, %v13567_v51, %v5468_v31  ;;  %v5470_v25 = vrot.slane %v5468_v31, 4  ;;  %v5475_v60 = vrot.slane %v13523_v32, 5  ;;  %v13528_v51 = vld [vmem:[%s16158_s25 + $0x3c] sm:$0xe]  ;;  %v13529_v31 = vld [vmem:[%s16158_s25 + $0x40] sm:$0xf] }
 0x154   : > { %v4974_v45 = vsel %vm16178_vm2, %v4969_v37, %v4973_v19  ;;  %v5478_v47 = vrot.slane %v13524_v16, 5  ;;  %v2179_v24 = vadd.f32 %v17152_v3, %v16881_v43  ;;  %v17286_v37 = vadd.f32 %v17174_v54, %v2181_v7  ;;  %v13526_v19 = vld [vmem:[%s16158_s25 + $0x34] sm:$0xf] }
 0x155   : > { %v17224_v27 = vpop.f32.mrf.mxu0  ;;  %v17240_v28 = vpop.f32.mrf.mxu1  ;;  %14980 = vmatprep.mubr.bf16.mxu1 %v13509_v29  ;;  %v5476_v48 = vsel %vm16358_vm5, %v13568_v33, %v5475_v60  ;;  %v5477_v29 = vrot.slane %v5475_v60, 4  ;;  %v2182_v20 = vadd.f32 %v17165_v22, %v16894_v8  ;;  %v13569_v7 = vrot.slane %v13525_v36, 9  ;;  %v13530_v8 = vld [vmem:[%s16158_s25 + $0x44] sm:$0x1]  ;;  %v13531_v60 = vld [vmem:[%s16158_s25 + $0x48] sm:$0xe] }
 0x156   : > { %20792 = vst [vmem:[#allocation33_spill] sm:$0xff] %v17240_v28  ;;  %v5471_v28 = vrot.slane %v13521_v53, 5  ;;  %v4979_v53 = vrot.slane %v4978_v10, 4  ;;  %v5485_v33 = vrot.slane %v13527_v4, 5  ;;  %v13535_v4 = vld [vmem:[%s16158_s25 + $0x58] sm:$0xf] }
 0x157   : > { %v17236_v59 = vpop.f32.mrf.mxu0  ;;  %v17247_v39 = vpop.f32.mrf.mxu1  ;;  %v5479_v10 = vsel %vm16358_vm5, %v5477_v29, %v5478_v47  ;;  %v5489_v47 = vrot.slane %v13529_v31, 5  ;;  %v2183_v29 = vadd.f32 %v17195_v57, %v16932_v52 }
 0x158   : > { %v5472_v50 = vsel %vm16358_vm5, %v5470_v25, %v5471_v28  ;;  %v4984_v43 = vsel %vm16178_vm2, %v4979_v53, %v4983_v18  ;;  %v17297_v28 = vadd.f32 %v17180_v35, %v2179_v24  ;;  %v17307_v18 = vadd.f32 %v17177_v1, %v16901_v17  ;;  %v13533_v24 = vld [vmem:[%s16158_s25 + $0x50] sm:$0x1] }
 0x159   : > { %v17244_v62 = vpop.f32.mrf.mxu0  ;;  %v17259_v41 = vpop.f32.mrf.mxu1  ;;  %v13583_v3 = vcombine.low %v5469_v42, %v5472_v50  ;;  %v13510_v16 = vcombine.low %v4974_v45, %v4984_v43  ;;  %v13584_v35 = vcombine.low %v5476_v48, %v5479_v10  ;;  %v17313_v42 = vadd.f32 %v17193_v56, %v2182_v20  ;;  %v13532_v45 = vld [vmem:[%s16158_s25 + $0x4c] sm:$0xf] }
 0x15a   : > { %v5482_v25 = vrot.slane %v13526_v19, 5  ;;  %v2185_v17 = vadd.f32 %v17189_v61, %v16911_v14  ;;  %v13570_v1 = vrot.slane %v13528_v51, 9  ;;  %v5492_v48 = vrot.slane %v13530_v8, 5  ;;  %v13534_v19 = vld [vmem:[%s16158_s25 + $0x54] sm:$0xe] }
 0x15b   : > { %v17253_v44 = vpop.f32.mrf.mxu0  ;;  %v17268_v26 = vpop.f32.mrf.mxu1  ;;  %15000 = vmatprep.mubr.bf16.mxu0 %v13583_v3  ;;  %14981 = vmatmul.mubr.bf16.gmra.mxu1 %v13510_v16  ;;  %v5491_v61 = vrot.slane %v5489_v47, 4  ;;  %v2186_v20 = vadd.f32 %v17206_v12, %v16957_v34  ;;  %v13536_v51 = vld [vmem:[%s16158_s25 + $0x5c] sm:$0x1]  ;;  %v17345_v57 = vadd.f32 %v17222_v58, %v2183_v29  ;;  %v17349_v16 = vadd.f32 %v17217_v0, %v16961_v30  ;;  %v13538_v0 = vld [vmem:[%s16158_s25 + $0x64] sm:$0xf] }
 0x15c   : > { %15001 = vmatmul.mubr.bf16.vlgmr.msra.gmra.mxu0 %v13584_v35  ;;  %v5483_v56 = vsel %vm16358_vm5, %v13569_v7, %v5482_v25  ;;  %v5484_v50 = vrot.slane %v5482_v25, 4  ;;  %v5490_v14 = vsel %vm16358_vm5, %v13570_v1, %v5489_v47  ;;  %v17335_v3 = vadd.f32 %v17208_v13, %v2185_v17  ;;  %v13537_v35 = vld [vmem:[%s16158_s25 + $0x60] sm:$0xe]  ;;  %v13540_v29 = vld [vmem:[%s16158_s25 + $0x6c] sm:$0xe] }
 0x15d   : > { %v17264_v21 = vpop.f32.mrf.mxu0  ;;  %v17279_v40 = vpop.f32.mrf.mxu1  ;;  %v13571_v13 = vrot.slane %v13531_v60, 9  ;;  %v5493_v34 = vsel %vm16358_vm5, %v5491_v61, %v5492_v48  ;;  %v17356_v12 = vadd.f32 %v17227_v9, %v2186_v20  ;;  %v5496_v8 = vrot.slane %v13532_v45, 5  ;;  %v13539_v60 = vld [vmem:[%s16158_s25 + $0x68] sm:$0x1] }
 0x15e   : > { %v5486_v52 = vsel %vm16358_vm5, %v5484_v50, %v5485_v33  ;;  %v13586_v58 = vcombine.low %v5490_v14, %v5493_v34  ;;  %v5499_v33 = vrot.slane %v13533_v24, 5  ;;  %v2189_v30 = vadd.f32 %v17224_v27, %v16974_v11  ;;  %v13543_v34 = vld [vmem:[%s16158_s25 + $0x78] sm:$0xe] }
 0x15f   : > { %v17272_v15 = vpop.f32.mrf.mxu0  ;;  %v17301_v54 = vpop.f32.mrf.mxu1  ;;  %v13585_v7 = vcombine.low %v5483_v56, %v5486_v52  ;;  %v5497_v1 = vsel %vm16358_vm5, %v13571_v13, %v5496_v8  ;;  %v5498_v9 = vrot.slane %v5496_v8, 4  ;;  %v13572_v45 = vrot.slane %v13534_v19, 9  ;;  %v13541_v56 = vld [vmem:[%s16158_s25 + $0x70] sm:$0xf]  ;;  %v13544_v8 = vld [vmem:[%s16158_s25 + $0x7c] sm:$0xf] }
 0x160   : > { %v5503_v47 = vrot.slane %v13535_v4, 5  ;;  %v5506_v24 = vrot.slane %v13536_v51, 5  ;;  %v2187_v48 = vadd.f32 %v17236_v59, %v16993_v6  ;;  %v17375_v11 = vadd.f32 %v17247_v39, %v2189_v30  ;;  %v13542_v59 = vld [vmem:[%s16158_s25 + $0x74] sm:$0x1] }
 0x161   : > { %v17290_v32 = vpop.f32.mrf.mxu0  ;;  %v17317_v53 = vpop.f32.mrf.mxu1  ;;  %15004 = vmatprep.mubr.bf16.mxu0 %v13585_v7  ;;  %v2190_v27 = vadd.f32 %v17244_v62, %v17017_v23  ;;  %v5500_v19 = vsel %vm16358_vm5, %v5498_v9, %v5499_v33  ;;  %v17388_v6 = vadd.f32 %v17253_v44, %v17021_v2  ;;  %v13573_v51 = vrot.slane %v13537_v35, 9  ;;  %v13545_v33 = vld [vmem:[%s16158_s25 + $0x80] sm:$0x1] }
 0x162   : > { %v5504_v4 = vsel %vm16358_vm5, %v13572_v45, %v5503_v47  ;;  %v5505_v61 = vrot.slane %v5503_v47, 4  ;;  %v13587_v23 = vcombine.low %v5497_v1, %v5500_v19  ;;  %v17394_v62 = vadd.f32 %v17259_v41, %v2187_v48 }
 0x163   : > { %v17310_v22 = vpop.f32.mrf.mxu0  ;;  %v17330_v43 = vpop.f32.mrf.mxu1  ;;  %v17397_v20 = vadd.f32 %v17268_v26, %v2190_v27  ;;  %v5510_v2 = vrot.slane %v13538_v0, 5  ;;  %v5513_v44 = vrot.slane %v13539_v60, 5  ;;  %v2193_v7 = vadd.f32 %v17264_v21, %v17027_v5  ;;  %v13547_v21 = vld [vmem:[%s16158_s25 + $0x88] sm:$0xf] }
 0x164   : > { %15005 = vmatmul.mubr.bf16.gmra.mxu0 %v13586_v58  ;;  %v5507_v13 = vsel %vm16358_vm5, %v5505_v61, %v5506_v24  ;;  %v5517_v26 = vrot.slane %v13541_v56, 5  ;;  %v13574_v60 = vrot.slane %v13540_v29, 9  ;;  %v2191_v5 = vadd.f32 %v17272_v15, %v17053_v49  ;;  %v13546_v24 = vld [vmem:[%s16158_s25 + $0x84] sm:$0xe]  ;;  %v13548_v15 = vld [vmem:[%s16158_s25 + $0x8c] sm:$0x1] }
 0x165   : > { %v17322_v36 = vpop.f32.mrf.mxu0  ;;  %v17351_v10 = vpop.f32.mrf.mxu1  ;;  %15008 = vmatprep.mubr.bf16.mxu0 %v13587_v23  ;;  %v13588_v41 = vcombine.low %v5504_v4, %v5507_v13  ;;  %v5511_v30 = vsel %vm16358_vm5, %v13573_v51, %v5510_v2  ;;  %v5512_v0 = vrot.slane %v5510_v2, 4  ;;  %v5520_v45 = vrot.slane %v13542_v59, 5  ;;  %v20799_v59 = vld [vmem:[#allocation12_spill] sm:$0xff]  ;;  %v20800_v23 = vld [vmem:[#allocation13_spill] sm:$0xff]  ;;  %v20801_v13 = vld [vmem:[#allocation18_spill] sm:$0xff] }
 0x166   : > { %20794 = vst [vmem:[#allocation35_spill] sm:$0xff] %v17351_v10  ;;  %v5519_v9 = vrot.slane %v5517_v26, 4  ;;  %v17418_v47 = vadd.f32 %v17301_v54, %v2193_v7  ;;  %v2194_v56 = vadd.f32 %v17290_v32, %v17065_v63  ;;  %v17426_v29 = vadd.f32 %v17317_v53, %v2191_v5 }
 0x167   : > { %v17340_v31 = vpop.f32.mrf.mxu0  ;;  %v17365_v17 = vpop.f32.mrf.mxu1  ;;  %v5514_v27 = vsel %vm16358_vm5, %v5512_v0, %v5513_v44  ;;  %v17430_v49 = vadd.f32 %v17310_v22, %v17077_v55  ;;  %v13575_v32 = vrot.slane %v13543_v34, 9  ;;  %v5524_v4 = vrot.slane %v13544_v8, 5  ;;  %v13549_v34 = vld [vmem:[%s16158_s25 + $0x90] sm:$0xe]  ;;  %v13550_v8 = vld [vmem:[%s16158_s25 + $0x94] sm:$0xf] }
 0x168   : > { %v13589_v54 = vcombine.low %v5511_v30, %v5514_v27  ;;  %v17436_v63 = vadd.f32 %v17330_v43, %v2194_v56  ;;  %v1599_v53 = vadd.f32 %v20800_v23, %v20799_v59  ;;  %v5527_v51 = vrot.slane %v13545_v33, 5  ;;  %v17472_v23 = vld [vmem:[%s16158_s25 + $0xac] sm:$0xf] }
 0x169   : > { %v17359_v25 = vpop.f32.mrf.mxu0  ;;  %v17380_v14 = vpop.f32.mrf.mxu1  ;;  %20797 = vst [vmem:[#allocation38_spill] sm:$0xff] %v17430_v49  ;;  %v2197_v55 = vadd.f32 %v17322_v36, %v20801_v13  ;;  %v5518_v2 = vsel %vm16358_vm5, %v13574_v60, %v5517_v26  ;;  %v5521_v43 = vsel %vm16358_vm5, %v5519_v9, %v5520_v45  ;;  %v5526_v44 = vrot.slane %v5524_v4, 4  ;;  %v13551_v60 = vld [vmem:[%s16158_s25 + $0x98] sm:$0x1] }
 0x16a   : > { %v5531_v7 = vrot.slane %v13547_v21, 5  ;;  %v13576_v33 = vrot.slane %v13546_v24, 9  ;;  %v2195_v0 = vadd.f32 %v17340_v31, %v1599_v53  ;;  %v5525_v21 = vsel %vm16358_vm5, %v13575_v32, %v5524_v4  ;;  %v20804_v4 = vld [vmem:[#allocation22_spill] sm:$0xff] }
 0x16b   : > { %v17370_v50 = vpop.f32.mrf.mxu0  ;;  %v14779_v52 = vpop.f32.mrf.mxu1  ;;  %v17450_v36 = vadd.f32 %v17365_v17, %v2197_v55  ;;  %v5528_v9 = vsel %vm16358_vm5, %v5526_v44, %v5527_v51  ;;  %v5534_v56 = vrot.slane %v13548_v15, 5  ;;  %v5538_v32 = vrot.slane %v13550_v8, 5  ;;  %v13552_v51 = vld [vmem:[%s16158_s25 + $0x9c] sm:$0xe]  ;;  %v20806_v44 = vld [vmem:[#allocation24_spill] sm:$0xff] }
 0x16c   : > { %20795 = vst [vmem:[#allocation36_spill] sm:$0xff] %v17370_v50  ;;  %15009 = vmatmul.mubr.bf16.gmra.mxu0 %v13588_v41  ;;  %v20802_v41 = vld [vmem:[#allocation20_spill] sm:$0xff]  ;;  %v5533_v45 = vrot.slane %v5531_v7, 4  ;;  %v17462_v31 = vadd.f32 %v17380_v14, %v2195_v0  ;;  %v13591_v53 = vcombine.low %v5525_v21, %v5528_v9  ;;  %v5532_v14 = vsel %vm16358_vm5, %v13576_v33, %v5531_v7  ;;  %v20807_v33 = vld [vmem:[#allocation25_spill] sm:$0xff] }
 0x16d   : > { %v17391_v39 = vpop.f32.mrf.mxu0  ;;  %v17408_v35 = vpop.f32.mrf.mxu1  ;;  %15012 = vmatprep.mubr.bf16.mxu0 %v13589_v54  ;;  %v2198_v26 = vadd.f32 %v17359_v25, %v20802_v41  ;;  %v17467_v25 = vld [vmem:[%s16158_s25 + $0xa0] sm:$0xf]  ;;  %v13590_v54 = vcombine.low %v5518_v2, %v5521_v43  ;;  %v5540_v2 = vrot.slane %v5538_v32, 4  ;;  %v5541_v43 = vrot.slane %v13551_v60, 5  ;;  %v13555_v0 = vld [vmem:[%s16158_s25 + $0xa8] sm:$0xe] }
 0x16e   : > { %20796 = vst [vmem:[#allocation37_spill] sm:$0xff] %v17408_v35  ;;  %v2201_v59 = vadd.f32 %v17391_v39, %v20804_v4  ;;  %v5535_v55 = vsel %vm16358_vm5, %v5533_v45, %v5534_v56  ;;  %v13554_v39 = vld [vmem:[%s16158_s25 + $0xa4] sm:$0x1]  ;;  %v5545_v7 = vrot.slane %v17467_v25, 5  ;;  %v13557_v21 = vld [vmem:[%s16158_s25 + $0xb0] sm:$0x1] }
 0x16f   : > { %v17405_v58 = vpop.f32.mrf.mxu0  ;;  %v14782_v48 = vpop.f32.mrf.mxu1  ;;  %v17464_v17 = vadd.f32 %v14779_v52, %v2198_v26  ;;  %v13577_v52 = vrot.slane %v13549_v34, 9  ;;  %v17494_v45 = vld [vmem:[%s16158_s25 + $0xb4] sm:$0xe]  ;;  %v13592_v4 = vcombine.low %v5532_v14, %v5535_v55  ;;  %v17503_v25 = vld [vmem:[%s16158_s25 + $0xbc] sm:$0x1] }
 0x170   : > { %v2199_v8 = vadd.f32 %v17405_v58, %v20806_v44  ;;  %v17486_v34 = vadd.f32 %v14782_v48, %v2201_v59  ;;  %v17497_v58 = vld [vmem:[%s16158_s25 + $0xb8] sm:$0xf]  ;;  %v13578_v44 = vrot.slane %v13552_v51, 9  ;;  %v17511_v14 = vld [vmem:[%s16158_s25 + $0xc0] sm:$0xe] }
 0x171   : > { %v17415_v1 = vpop.f32.mrf.mxu0  ;;  %v2550_v61 = vpop.f32.mrf.mxu1  ;;  %v5559_v38 = vrot.slane %v17497_v58, 5  ;;  %v17534_v58 = vld [vmem:[%s16158_s25 + $0xd4] sm:$0x1] }
 0x172   : > { %v2202_v26 = vadd.f32 %v17415_v1, %v20807_v33  ;;  %v17491_v60 = vadd.f32 %v2550_v61, %v2199_v8  ;;  %v5552_v1 = vrot.slane %v17472_v23, 5  ;;  %v5539_v61 = vsel %vm16358_vm5, %v13577_v52, %v5538_v32  ;;  %v20808_v8 = vld [vmem:[#allocation27_spill] sm:$0xff]  ;;  %v17520_v32 = vld [vmem:[%s16158_s25 + $0xc8] sm:$0x1]  ;;  %v17523_v52 = vld [vmem:[%s16158_s25 + $0xd0] sm:$0xf] }
 0x173   : > { %v17433_v19 = vpop.f32.mrf.mxu0  ;;  %v14783_v30 = vpop.f32.mrf.mxu1  ;;  %v5547_v23 = vrot.slane %v5545_v7, 4  ;;  %v5548_v33 = vrot.slane %v13554_v39, 5  ;;  %v5561_v10 = vrot.slane %v5559_v38, 4 }
 0x174   : > { %20798 = vst [vmem:[#allocation39_spill] sm:$0xff] %v17433_v19  ;;  %15013 = vmatmul.mubr.bf16.gmra.mxu0 %v13590_v54  ;;  %v17499_v48 = vadd.f32 %v14783_v30, %v2202_v26  ;;  %v5542_v54 = vsel %vm16358_vm5, %v5540_v2, %v5541_v43  ;;  %v17514_v30 = vld [vmem:[%s16158_s25 + $0xc4] sm:$0xf]  ;;  %v13579_v26 = vrot.slane %v13555_v0, 9  ;;  %v5555_v2 = vrot.slane %v13557_v21, 5  ;;  %v20810_v43 = vld [vmem:[#allocation28_spill] sm:$0xff] }
 0x175   : > { %v14738_v22 = vpop.f32.mrf.mxu0  ;;  %v17459_v24 = vpop.f32.mrf.mxu1  ;;  %15016 = vmatprep.mubr.bf16.mxu0 %v13591_v53  ;;  %v17530_v19 = vld [vmem:[%s16158_s25 + $0xcc] sm:$0xe]  ;;  %v13593_v35 = vcombine.low %v5539_v61, %v5542_v54  ;;  %v5554_v39 = vrot.slane %v5552_v1, 4  ;;  %v13580_v0 = vrot.slane %v17494_v45, 9  ;;  %v5562_v21 = vrot.slane %v17503_v25, 5  ;;  %v20813_v45 = vld [vmem:[#allocation31_spill] sm:$0xff]  ;;  %s20649_s25 = scalar_lea.hbm %s20713_s8, %s14004_s23 }
 0x176   : > { %20803 = vst [vmem:[#allocation12_spill] sm:$0xff] %v17459_v24  ;;  %v2205_v53 = vadd.f32 %v14738_v22, %v20808_v8  ;;  %v5566_v61 = vrot.slane %v17514_v30, 5 }
 0x177   : > { %v2116_v5 = vpop.f32.mrf.mxu0  ;;  %v14786_v15 = vpop.f32.mrf.mxu1 }
 0x178   : > { %v2203_v22 = vadd.f32 %v2116_v5, %v20810_v43  ;;  %v17526_v8 = vadd.f32 %v14786_v15, %v2205_v53  ;;  %v5549_v43 = vsel %vm16358_vm5, %v5547_v23, %v5548_v33  ;;  %v5576_v23 = vrot.slane %v17534_v58, 5 }
 0x179   : > { %v14739_v27 = vpop.f32.mrf.mxu0  ;;  %v2566_v41 = vpop.f32.mrf.mxu1 }
 0x17a   : > { %v17539_v49 = vadd.f32 %v2566_v41, %v2203_v22  ;;  %v5553_v41 = vsel %vm16358_vm5, %v13579_v26, %v5552_v1  ;;  %v20815_v1 = vld [vmem:[#allocation34_spill] sm:$0xff] }
 0x17b   : > { %v17477_v13 = vpop.f32.mrf.mxu0  ;;  %v14787_v56 = vpop.f32.mrf.mxu1 }
 0x17c   : > { %20805 = vst [vmem:[#allocation13_spill] sm:$0xff] %v17477_v13  ;;  %v20811_v13 = vld [vmem:[#allocation30_spill] sm:$0xff]  ;;  %15017 = vmatmul.mubr.bf16.gmra.mxu0 %v13592_v4 }
 0x17d   : > { %v14742_v9 = vpop.f32.mrf.mxu0  ;;  %v17516_v55 = vpop.f32.mrf.mxu1  ;;  %v2206_v24 = vadd.f32 %v14739_v27, %v20811_v13  ;;  %v5546_v27 = vsel %vm16358_vm5, %v13578_v44, %v5545_v7  ;;  %v13581_v13 = vrot.slane %v17511_v14, 9  ;;  %15020 = vmatprep.mubr.bf16.mxu0 %v13593_v35  ;;  %v5556_v7 = vsel %vm16358_vm5, %v5554_v39, %v5555_v2  ;;  %v20814_v14 = vld [vmem:[#allocation32_spill] sm:$0xff] }
 0x17e   : > { %20809 = vst [vmem:[#allocation18_spill] sm:$0xff] %v17516_v55  ;;  %v2209_v54 = vadd.f32 %v14742_v9, %v20813_v45  ;;  %v5568_v44 = vrot.slane %v5566_v61, 4  ;;  %v13582_v9 = vrot.slane %v17530_v19, 9  ;;  %v13594_v39 = vcombine.low %v5546_v27, %v5549_v43 }
 0x17f   : > { %v2132_v59 = vpop.f32.mrf.mxu0  ;;  %v14790_v55 = vpop.f32.mrf.mxu1  ;;  %v17541_v5 = vadd.f32 %v14787_v56, %v2206_v24  ;;  %v5569_v24 = vrot.slane %v17520_v32, 5  ;;  %v5573_v56 = vrot.slane %v17523_v52, 5 }
 0x180   : > { %v2207_v4 = vadd.f32 %v2132_v59, %v20814_v14  ;;  %v17559_v33 = vadd.f32 %v14790_v55, %v2209_v54  ;;  %v13595_v14 = vcombine.low %v5553_v41, %v5556_v7  ;;  %v5567_v41 = vsel %vm16358_vm5, %v13581_v13, %v5566_v61 }
 0x181   : > { %v14743_v51 = vpop.f32.mrf.mxu0  ;;  %v2582_v15 = vpop.f32.mrf.mxu1  ;;  %v5575_v22 = vrot.slane %v5573_v56, 4 }
 0x182   : > { %v2210_v26 = vadd.f32 %v14743_v51, %v20815_v1  ;;  %v17564_v52 = vadd.f32 %v2582_v15, %v2207_v4 }
 0x183   : > { %v17536_v50 = vpop.f32.mrf.mxu0  ;;  %v14791_v25 = vpop.f32.mrf.mxu1 }
 0x184   : > { %20812 = vst [vmem:[#allocation20_spill] sm:$0xff] %v17536_v50  ;;  %v17567_v45 = vadd.f32 %v14791_v25, %v2210_v26  ;;  %15021 = vmatmul.mubr.bf16.gmra.mxu0 %v13594_v39  ;;  %v5570_v25 = vsel %vm16358_vm5, %v5568_v44, %v5569_v24  ;;  %v5574_v24 = vsel %vm16358_vm5, %v13582_v9, %v5573_v56 }
 0x185   : > { %v14810_v53 = vpop.f32.mrf.mxu0  ;;  %v17562_v32 = vpop.f32.mrf.mxu1  ;;  %15024 = vmatprep.mubr.bf16.mxu0 %v13595_v14 }
 0x186   : > { %20816 = vst [vmem:[#allocation22_spill] sm:$0xff] %v17562_v32  ;;  %v3448_v35 = vadd.f32 %v14810_v53, %v17286_v37  ;;  %v5563_v53 = vsel %vm16358_vm5, %v5561_v10, %v5562_v21  ;;  %v13597_v10 = vcombine.low %v5567_v41, %v5570_v25 }
 0x187   : > { %v3287_v30 = vpop.f32.mrf.mxu0  ;;  %v14858_v59 = vpop.f32.mrf.mxu1 }
 0x188   : > { %v3446_v19 = vadd.f32 %v3287_v30, %v17297_v28  ;;  %v17570_v50 = vadd.f32 %v14858_v59, %v3448_v35  ;;  %v5560_v28 = vsel %vm16358_vm5, %v13580_v0, %v5559_v38 }
 0x189   : > { %v14811_v2 = vpop.f32.mrf.mxu0  ;;  %v3880_v51 = vpop.f32.mrf.mxu1  ;;  %v13596_v30 = vcombine.low %v5560_v28, %v5563_v53 }
 0x18a   : > { %v3449_v55 = vadd.f32 %v14811_v2, %v17313_v42  ;;  %v17575_v54 = vadd.f32 %v3880_v51, %v3446_v19 }
 0x18b   : > { %v17573_v58 = vpop.f32.mrf.mxu0  ;;  %v14859_v37 = vpop.f32.mrf.mxu1 }
 0x18c   : > { %v17582_v43 = vadd.f32 %v14859_v37, %v3449_v55  ;;  %15025 = vmatmul.mubr.bf16.gmra.mxu0 %v13596_v30  ;;  %v336_v30 = vld [vmem:[#allocation3 + $0x18] sm:$0x1] }
 0x18d   : > { %v14814_v15 = vpop.f32.mrf.mxu0  ;;  %v17588_v7 = vpop.f32.mrf.mxu1  ;;  %15028 = vmatprep.mubr.bf16.mxu0 %v13597_v10  ;;  %v20820_v10 = vmov 0 }
 0x18e   : > { %v3452_v27 = vadd.f32 %v14814_v15, %v17335_v3  ;;  %v20821_v10 = vsel %vm17646_vm10, 4294967295, %v20820_v10 }
 0x18f   : > { %v3303_v42 = vpop.f32.mrf.mxu0  ;;  %v14862_v38 = vpop.f32.mrf.mxu1  ;;  %20822 = vst [vmem:[#allocation25_spill] sm:$0xff] %v20821_v10 }
 0x190   : > { %v17591_v3 = vadd.f32 %v3303_v42, %v17345_v57  ;;  %v17594_v21 = vadd.f32 %v14862_v38, %v3452_v27  ;;  %v5577_v57 = vsel %vm16358_vm5, %v5575_v22, %v5576_v23 }
 0x191   : > { %v14815_v4 = vpop.f32.mrf.mxu0  ;;  %v17596_v1 = vpop.f32.mrf.mxu1 }
 0x192   : > { %v3453_v0 = vadd.f32 %v14815_v4, %v17356_v12  ;;  %v13598_v12 = vcombine.low %v5574_v24, %v5577_v57  ;;  %v392_v24 = vld [vmem:[#allocation3 + $0x20] sm:$0x1] }
 0x193   : > { %v17598_v13 = vpop.f32.mrf.mxu0  ;;  %v14863_v61 = vpop.f32.mrf.mxu1  ;;  %v393_v57 = vsel %vm17646_vm10, 0, %v392_v24 }
 0x194   : > { %v17604_v44 = vadd.f32 %v14863_v61, %v3453_v0  ;;  %15029 = vmatmul.mubr.bf16.gmra.mxu0 %v13598_v12  ;;  %v389_v12 = vld [vmem:[#allocation3 + $0x14] sm:$0x1]  ;;  %394 = vst [vmem:[#allocation3 + $0x20] sm:$0x1] %v393_v57 }
 0x195   : > { %v17606_v26 = vpop.f32.mrf.mxu1  ;;  %v14818_v35 = vpop.f32.mrf.mxu0 }
 0x196   : > { %v3456_v39 = vadd.f32 %v14818_v35, %v17375_v11  ;;  %v390_v35 = vsel %vm17646_vm10, 0, %v389_v12  ;;  %v348_v12 = vld [vmem:[#allocation3 + $0x48] sm:$0x1] }
 0x197   : > { %v14866_v2 = vpop.f32.mrf.mxu1  ;;  %v3319_v19 = vpop.f32.mrf.mxu0  ;;  %391 = vst [vmem:[#allocation3 + $0x14] sm:$0x1] %v390_v35  ;;  %v345_v35 = vld [vmem:[#allocation3 + $0x3c] sm:$0x1] }
 0x198   : > { %v17612_v14 = vadd.f32 %v3319_v19, %v17394_v62  ;;  %v17614_v55 = vadd.f32 %v14866_v2, %v3456_v39 }
 0x199   : > { %v17609_v59 = vpop.f32.mrf.mxu1  ;;  %v14819_v56 = vpop.f32.mrf.mxu0 }
 0x19a   : > { %v3457_v22 = vadd.f32 %v14819_v56, %v17397_v20 }
 0x19b   : > { %v14867_v9 = vpop.f32.mrf.mxu1  ;;  %v17617_v23 = vpop.f32.mrf.mxu0 }
 0x19c   : > { %v17619_v51 = vadd.f32 %v14867_v9, %v3457_v22  ;;  %v342_v9 = vld [vmem:[#allocation3 + $0x30] sm:$0x1]  ;;  %v339_v22 = vld [vmem:[#allocation3 + $0x24] sm:$0x1] }
 0x19d   : > { %v17621_v15 = vpop.f32.mrf.mxu1  ;;  %v14822_v11 = vpop.f32.mrf.mxu0 }
 0x19e   : > { %v3460_v37 = vadd.f32 %v14822_v11, %v17418_v47  ;;  %v20817_v47 = vmov 0 }
 0x19f   : > { %v14870_v27 = vpop.f32.mrf.mxu1  ;;  %v3335_v28 = vpop.f32.mrf.mxu0  ;;  %v20818_v47 = vsel %vm17637_vm8, 4294967295, %v20817_v47 }
 0x1a0   : > { %v17625_v62 = vadd.f32 %v3335_v28, %v17426_v29  ;;  %v17627_v53 = vadd.f32 %v14870_v27, %v3460_v37  ;;  %20819 = vst [vmem:[#allocation24_spill] sm:$0xff] %v20818_v47  ;;  %v333_v29 = vld [vmem:[#allocation3 + $0xc] sm:$0x1]  ;;  %v343_v28 = vsel %vm17637_vm8, 0, %v342_v9  ;;  %v431_v47 = vld [vmem:[#allocation3 + $0xbc] sm:$0x1] }
 0x1a1   : > { %v17629_v42 = vpop.f32.mrf.mxu1  ;;  %v14823_v41 = vpop.f32.mrf.mxu0  ;;  %v334_v61 = vsel %vm17637_vm8, 0, %v333_v29  ;;  %344 = vst [vmem:[#allocation3 + $0x30] sm:$0x1] %v343_v28  ;;  %v395_v29 = vld [vmem:[#allocation3 + $0x2c] sm:$0x1]  ;;  %v17687_v28 = vld [vmem:[%s20712_s7 + $0x78] sm:$0xff] }
 0x1a2   : > { %v3461_v20 = vadd.f32 %v14823_v41, %v17436_v63  ;;  %v337_v63 = vsel %vm17637_vm8, 0, %v336_v30  ;;  %335 = vst [vmem:[#allocation3 + $0xc] sm:$0x1] %v334_v61  ;;  %v340_v41 = vsel %vm17637_vm8, 0, %v339_v22  ;;  %v398_v30 = vld [vmem:[#allocation3 + $0x38] sm:$0x1] }
 0x1a3   : > { %v14871_v25 = vpop.f32.mrf.mxu1  ;;  %v17634_v38 = vpop.f32.mrf.mxu0  ;;  %338 = vst [vmem:[#allocation3 + $0x18] sm:$0x1] %v337_v63  ;;  %341 = vst [vmem:[#allocation3 + $0x24] sm:$0x1] %v340_v41  ;;  %v399_v63 = vsel %vm17646_vm10, 0, %v398_v30  ;;  %v396_v61 = vsel %vm17646_vm10, 0, %v395_v29 }
 0x1a4   : > { %v17632_v4 = vadd.f32 %v14871_v25, %v3461_v20  ;;  %400 = vst [vmem:[#allocation3 + $0x38] sm:$0x1] %v399_v63  ;;  %397 = vst [vmem:[#allocation3 + $0x2c] sm:$0x1] %v396_v61  ;;  %v404_v22 = vld [vmem:[#allocation3 + $0x50] sm:$0x1] }
 0x1a5   : > { %v17641_v0 = vpop.f32.mrf.mxu1  ;;  %20824 = vst [vmem:[#allocation28_spill] sm:$0xff] %v17687_v28  ;;  %v401_v41 = vld [vmem:[#allocation3 + $0x44] sm:$0x1]  ;;  %v20738_v30 = vmov 0.0  }
 0x1a6   : > { %15032 = vmatprep.subr.mxu1 %v20738_v30  ;;  %v402_v29 = vsel %vm17646_vm10, 0, %v401_v41  ;;  %v407_v41 = vld [vmem:[#allocation3 + $0x5c] sm:$0x1]  ;;  %15064 = vmatprep.mubr.msk.f32.mxu1 %vm16004_vm11, %v20738_v30 }
 0x1a7   : > { %15033 = vmatpush3.msra.mxu1 %v17687_v28  ;;  %403 = vst [vmem:[#allocation3 + $0x44] sm:$0x1] %v402_v29  ;;  %v408_v29 = vsel %vm17646_vm10, 0, %v407_v41 }
 0x1a8   : > { %15034 = vmatprep.subr.mxu1 %v20738_v30  ;;  %409 = vst [vmem:[#allocation3 + $0x5c] sm:$0x1] %v408_v29 }
 0x1aa   : > { %v14826_v2 = vpop.f32.mrf.mxu0  ;;  %v14874_v19 = vpop.f32.mrf.mxu1 }
 0x1ab   : > { %v3464_v39 = vadd.f32 %v14826_v2, %v17450_v36  ;;  %v346_v2 = vsel %vm17637_vm8, 0, %v345_v35  ;;  %v17707_v35 = vld [vmem:[%s20712_s7 + $0x70] sm:$0xff] }
 0x1ac   : > { %v3351_v56 = vpop.f32.mrf.mxu0  ;;  %v17662_v27 = vpop.f32.mrf.mxu1  ;;  %347 = vst [vmem:[#allocation3 + $0x3c] sm:$0x1] %v346_v2  ;;  %20827 = vst [vmem:[#allocation32_spill] sm:$0xff] %v17707_v35  ;;  %15035 = vmatpush3.msra.mxu1 %v17707_v35  ;;  %v17784_v35 = vld [vmem:[%s20712_s7 + $0x48] sm:$0xff] }
 0x1ad   : > { %v17658_v11 = vadd.f32 %v3351_v56, %v17462_v31  ;;  %v17660_v37 = vadd.f32 %v14874_v19, %v3464_v39  ;;  %15036 = vmatprep.subr.mxu1 %v20738_v30  ;;  %20838 = vst [vmem:[#allocation49_spill] sm:$0xff] %v17784_v35 }
 0x1ae   : > { %v14827_v20 = vpop.f32.mrf.mxu0  ;;  %v14875_v25 = vpop.f32.mrf.mxu1 }
 0x1af   : > { %v3465_v36 = vadd.f32 %v14827_v20, %v17464_v17  ;;  %v349_v17 = vsel %vm17637_vm8, 0, %v348_v12  ;;  %v354_v12 = vld [vmem:[#allocation3 + $0x60] sm:$0x1] }
 0x1b0   : > { %v17675_v24 = vpop.f32.mrf.mxu0  ;;  %v17677_v57 = vpop.f32.mrf.mxu1  ;;  %350 = vst [vmem:[#allocation3 + $0x48] sm:$0x1] %v349_v17  ;;  %v351_v17 = vld [vmem:[#allocation3 + $0x54] sm:$0x1] }
 0x1b1   : > { %v17669_v31 = vadd.f32 %v14875_v25, %v3465_v36  ;;  %20823 = vst [vmem:[#allocation27_spill] sm:$0xff] %v17677_v57 }
 0x1b2   : > { %v14830_v39 = vpop.f32.mrf.mxu0  ;;  %v14878_v56 = vpop.f32.mrf.mxu1 }
 0x1b3   : > { %v3468_v19 = vadd.f32 %v14830_v39, %v17486_v34  ;;  %v405_v34 = vsel %vm17646_vm10, 0, %v404_v22  ;;  %v355_v39 = vsel %vm17637_vm8, 0, %v354_v12  ;;  %v17724_v22 = vld [vmem:[%s20712_s7 + $0x68] sm:$0xff] }
 0x1b4   : > { %v3367_v9 = vpop.f32.mrf.mxu0  ;;  %v17694_v25 = vpop.f32.mrf.mxu1  ;;  %406 = vst [vmem:[#allocation3 + $0x50] sm:$0x1] %v405_v34  ;;  %356 = vst [vmem:[#allocation3 + $0x60] sm:$0x1] %v355_v39  ;;  %15037 = vmatpush3.msra.mxu1 %v17724_v22  ;;  %v17736_v39 = vld [vmem:[%s20712_s7 + $0x60] sm:$0xff] }
 0x1b5   : > { %v17690_v20 = vadd.f32 %v3367_v9, %v17491_v60  ;;  %v17692_v36 = vadd.f32 %v14878_v56, %v3468_v19  ;;  %20826 = vst [vmem:[#allocation31_spill] sm:$0xff] %v17694_v25  ;;  %v410_v9 = vld [vmem:[#allocation3 + $0x68] sm:$0x1]  ;;  %20830 = vst [vmem:[#allocation41_spill] sm:$0xff] %v17724_v22  ;;  %15038 = vmatprep.subr.mxu1 %v20738_v30  ;;  %v422_v22 = vld [vmem:[#allocation3 + $0x98] sm:$0x1] }
 0x1b6   : > { %v14831_v63 = vpop.f32.mrf.mxu0  ;;  %v14879_v61 = vpop.f32.mrf.mxu1  ;;  %v411_v34 = vsel %vm17646_vm10, 0, %v410_v9  ;;  %20831 = vst [vmem:[#allocation42_spill] sm:$0xff] %v17736_v39  ;;  %15039 = vmatpush3.msra.mxu1 %v17736_v39 }
 0x1b7   : > { %20825 = vst [vmem:[#allocation30_spill] sm:$0xff] %v17690_v20  ;;  %v3469_v60 = vadd.f32 %v14831_v63, %v17499_v48  ;;  %v352_v48 = vsel %vm17637_vm8, 0, %v351_v17  ;;  %412 = vst [vmem:[#allocation3 + $0x68] sm:$0x1] %v411_v34  ;;  %v360_v17 = vld [vmem:[#allocation3 + $0x78] sm:$0x1]  ;;  %15040 = vmatprep.subr.mxu1 %v20738_v30 }
 0x1b8   : > { %v17716_v19 = vpop.f32.mrf.mxu0  ;;  %353 = vst [vmem:[#allocation3 + $0x54] sm:$0x1] %v352_v48  ;;  %v17719_v56 = vpop.f32.mrf.mxu1  ;;  %v357_v48 = vld [vmem:[#allocation3 + $0x6c] sm:$0x1]  ;;  %v361_v29 = vsel %vm17637_vm8, 0, %v360_v17 }
 0x1b9   : > { %v17709_v2 = vadd.f32 %v14879_v61, %v3469_v60  ;;  %20828 = vst [vmem:[#allocation34_spill] sm:$0xff] %v17716_v19  ;;  %20829 = vst [vmem:[#allocation40_spill] sm:$0xff] %v17719_v56  ;;  %v413_v17 = vld [vmem:[#allocation3 + $0x74] sm:$0x1] }
 0x1ba   : > { %362 = vst [vmem:[#allocation3 + $0x78] sm:$0x1] %v361_v29  ;;  %v414_v29 = vsel %vm17646_vm10, 0, %v413_v17 }
 0x1bb   : > { %415 = vst [vmem:[#allocation3 + $0x74] sm:$0x1] %v414_v29 }
 0x1bd   : > { %v14834_v63 = vpop.f32.mrf.mxu0 }
 0x1be   : > { %v3472_v60 = vadd.f32 %v14834_v63, %v17526_v8  ;;  %v14882_v61 = vpop.f32.mrf.mxu1  ;;  %v358_v8 = vsel %vm17637_vm8, 0, %v357_v48 }
 0x1bf   : > { %v3383_v12 = vpop.f32.mrf.mxu0  ;;  %359 = vst [vmem:[#allocation3 + $0x6c] sm:$0x1] %v358_v8 }
 0x1c0   : > { %v17739_v9 = vadd.f32 %v3383_v12, %v17539_v49  ;;  %v17741_v41 = vadd.f32 %v14882_v61, %v3472_v60  ;;  %v17743_v34 = vpop.f32.mrf.mxu1  ;;  %v416_v60 = vld [vmem:[#allocation3 + $0x80] sm:$0x1]  ;;  %v17755_v61 = vld [vmem:[%s20712_s7 + $0x58] sm:$0xff] }
 0x1c1   : > { %20833 = vst [vmem:[#allocation44_spill] sm:$0xff] %v17743_v34  ;;  %v14835_v63 = vpop.f32.mrf.mxu0  ;;  %20834 = vst [vmem:[#allocation45_spill] sm:$0xff] %v17755_v61  ;;  %v417_v48 = vsel %vm17646_vm10, 0, %v416_v60  ;;  %15041 = vmatpush3.msra.mxu1 %v17755_v61 }
 0x1c2   : > { %20832 = vst [vmem:[#allocation43_spill] sm:$0xff] %v17739_v9  ;;  %v3473_v49 = vadd.f32 %v14835_v63, %v17541_v5  ;;  %v14883_v12 = vpop.f32.mrf.mxu1  ;;  %418 = vst [vmem:[#allocation3 + $0x80] sm:$0x1] %v417_v48  ;;  %15042 = vmatprep.subr.mxu1 %v20738_v30  ;;  %v366_v63 = vld [vmem:[#allocation3 + $0x90] sm:$0x1] }
 0x1c3   : > { %v17764_v8 = vpop.f32.mrf.mxu0  ;;  %v367_v60 = vsel %vm17637_vm8, 0, %v366_v63  ;;  %v419_v63 = vld [vmem:[#allocation3 + $0x8c] sm:$0x1] }
 0x1c4   : > { %v17757_v46 = vadd.f32 %v14883_v12, %v3473_v49  ;;  %20835 = vst [vmem:[#allocation46_spill] sm:$0xff] %v17764_v8  ;;  %v17767_v5 = vpop.f32.mrf.mxu1  ;;  %v17772_v49 = vld [vmem:[%s20712_s7 + $0x50] sm:$0xff]  ;;  %v363_v12 = vld [vmem:[#allocation3 + $0x84] sm:$0x1]  ;;  %368 = vst [vmem:[#allocation3 + $0x90] sm:$0x1] %v367_v60 }
 0x1c5   : > { %20836 = vst [vmem:[#allocation47_spill] sm:$0xff] %v17767_v5  ;;  %20837 = vst [vmem:[#allocation48_spill] sm:$0xff] %v17772_v49  ;;  %15043 = vmatpush3.msra.mxu1 %v17772_v49  ;;  %v364_v17 = vsel %vm17637_vm8, 0, %v363_v12  ;;  %v17920_v5 = vld [vmem:[%s20712_s7 + $0x8] sm:$0xff] }
 0x1c6   : > { %365 = vst [vmem:[#allocation3 + $0x84] sm:$0x1] %v364_v17  ;;  %15044 = vmatprep.subr.mxu1 %v20738_v30  ;;  %v423_v17 = vsel %vm17646_vm10, 0, %v422_v22  ;;  %v17805_v22 = vld [vmem:[%s20712_s7 + $0x40] sm:$0xff]  ;;  %20850 = vst [vmem:[#allocation61_spill] sm:$0xff] %v17920_v5 }
 0x1c7   : > { %15045 = vmatpush3.msra.mxu1 %v17784_v35  ;;  %424 = vst [vmem:[#allocation3 + $0x98] sm:$0x1] %v423_v17  ;;  %20842 = vst [vmem:[#allocation53_spill] sm:$0xff] %v17805_v22  ;;  %v369_v35 = vld [vmem:[#allocation3 + $0x9c] sm:$0x1] }
 0x1c8   : > { %15046 = vmatprep.subr.mxu1 %v20738_v30 }
 0x1c9   : > { %v14838_v48 = vpop.f32.mrf.mxu0  ;;  %15047 = vmatpush3.msra.mxu1 %v17805_v22  ;;  %v425_v22 = vld [vmem:[#allocation3 + $0xa4] sm:$0x1] }
 0x1ca   : > { %v3476_v29 = vadd.f32 %v14838_v48, %v17559_v33  ;;  %v14886_v61 = vpop.f32.mrf.mxu1  ;;  %v420_v33 = vsel %vm17646_vm10, 0, %v419_v63  ;;  %15048 = vmatprep.subr.mxu1 %v20738_v30 }
 0x1cb   : > { %v3399_v39 = vpop.f32.mrf.mxu0  ;;  %421 = vst [vmem:[#allocation3 + $0x8c] sm:$0x1] %v420_v33 }
 0x1cc   : > { %v17787_v49 = vadd.f32 %v3399_v39, %v17564_v52  ;;  %v17789_v12 = vadd.f32 %v14886_v61, %v3476_v29  ;;  %v17791_v60 = vpop.f32.mrf.mxu1  ;;  %v372_v29 = vld [vmem:[#allocation3 + $0xa8] sm:$0x1] }
 0x1cd   : > { %20840 = vst [vmem:[#allocation51_spill] sm:$0xff] %v17791_v60  ;;  %v14839_v48 = vpop.f32.mrf.mxu0  ;;  %v373_v63 = vsel %vm17637_vm8, 0, %v372_v29  ;;  %v17823_v29 = vld [vmem:[%s20712_s7 + $0x38] sm:$0xff] }
 0x1ce   : > { %20839 = vst [vmem:[#allocation50_spill] sm:$0xff] %v17787_v49  ;;  %v3477_v52 = vadd.f32 %v14839_v48, %v17567_v45  ;;  %v14887_v39 = vpop.f32.mrf.mxu1  ;;  %v370_v45 = vsel %vm17637_vm8, 0, %v369_v35  ;;  %374 = vst [vmem:[#allocation3 + $0xa8] sm:$0x1] %v373_v63  ;;  %15049 = vmatpush3.msra.mxu1 %v17823_v29  ;;  %v434_v49 = vld [vmem:[#allocation3 + $0xc8] sm:$0x1] }
 0x1cf   : > { %v17800_v61 = vpop.f32.mrf.mxu0  ;;  %371 = vst [vmem:[#allocation3 + $0x9c] sm:$0x1] %v370_v45  ;;  %20844 = vst [vmem:[#allocation55_spill] sm:$0xff] %v17823_v29  ;;  %15050 = vmatprep.subr.mxu1 %v20738_v30  ;;  %v375_v29 = vld [vmem:[#allocation3 + $0xb4] sm:$0x1] }
 0x1d0   : > { %20841 = vst [vmem:[#allocation52_spill] sm:$0xff] %v17800_v61  ;;  %v17807_v28 = vadd.f32 %v14887_v39, %v3477_v52  ;;  %v17818_v48 = vpop.f32.mrf.mxu1  ;;  %v428_v39 = vld [vmem:[#allocation3 + $0xb0] sm:$0x1] }
 0x1d1   : > { %v14906_v17 = vpop.f32.mrf.mxu0  ;;  %20843 = vst [vmem:[#allocation54_spill] sm:$0xff] %v17818_v48  ;;  %v429_v63 = vsel %vm17646_vm10, 0, %v428_v39  ;;  %v17844_v39 = vld [vmem:[%s20712_s7 + $0x30] sm:$0xff] }
 0x1d2   : > { %v17816_v33 = vadd.f32 %v14906_v17, %v17570_v50  ;;  %v426_v50 = vsel %vm17646_vm10, 0, %v425_v22  ;;  %430 = vst [vmem:[#allocation3 + $0xb0] sm:$0x1] %v429_v63  ;;  %20845 = vst [vmem:[#allocation56_spill] sm:$0xff] %v17844_v39  ;;  %15051 = vmatpush3.msra.mxu1 %v17844_v39 }
 0x1d3   : > { %v4330_v52 = vpop.f32.mrf.mxu0  ;;  %427 = vst [vmem:[#allocation3 + $0xa4] sm:$0x1] %v426_v50  ;;  %15052 = vmatprep.subr.mxu1 %v20738_v30 }
 0x1d4   : > { %v17826_v35 = vadd.f32 %v4330_v52, %v17575_v54  ;;  %v378_v52 = vld [vmem:[#allocation3 + $0xc0] sm:$0x1] }
 0x1d5   : > { %v14907_v45 = vpop.f32.mrf.mxu0  ;;  %v379_v22 = vsel %vm17637_vm8, 0, %v378_v52  ;;  %v17862_v52 = vld [vmem:[%s20712_s7 + $0x28] sm:$0xff] }
 0x1d6   : > { %v17835_v17 = vadd.f32 %v14907_v45, %v17582_v43  ;;  %v17837_v48 = vpop.f32.mrf.mxu1  ;;  %v376_v43 = vsel %vm17637_vm8, 0, %v375_v29  ;;  %380 = vst [vmem:[#allocation3 + $0xc0] sm:$0x1] %v379_v22  ;;  %20846 = vst [vmem:[#allocation57_spill] sm:$0xff] %v17862_v52  ;;  %v435_v29 = vsel %vm17646_vm10, 0, %v434_v49  ;;  %15053 = vmatpush3.msra.mxu1 %v17862_v52 }
 0x1d7   : > { %v17839_v54 = vpop.f32.mrf.mxu0  ;;  %377 = vst [vmem:[#allocation3 + $0xb4] sm:$0x1] %v376_v43  ;;  %436 = vst [vmem:[#allocation3 + $0xc8] sm:$0x1] %v435_v29  ;;  %15054 = vmatprep.subr.mxu1 %v20738_v30 }
 0x1d8   : > { %v17855_v45 = vpop.f32.mrf.mxu1 }
 0x1d9   : > { %v14910_v63 = vpop.f32.mrf.mxu0 }
 0x1da   : > { %v17853_v50 = vadd.f32 %v14910_v63, %v17594_v21  ;;  %v432_v21 = vsel %vm17646_vm10, 0, %v431_v47  ;;  %v17873_v63 = vpop.f32.mrf.mxu1 }
 0x1db   : > { %v17857_v60 = vpop.f32.mrf.mxu0  ;;  %433 = vst [vmem:[#allocation3 + $0xbc] sm:$0x1] %v432_v21 }
 0x1dc   : > { %v17880_v52 = vpop.f32.mrf.mxu1 }
 0x1dd   : > { %v14911_v22 = vpop.f32.mrf.mxu0 }
 0x1de   : > { %v17871_v43 = vadd.f32 %v14911_v22, %v17604_v44  ;;  %v17894_v22 = vld [vmem:[%s20712_s7 + $0x20] sm:$0xff] }
 0x1df   : > { %v17875_v39 = vpop.f32.mrf.mxu0  ;;  %20847 = vst [vmem:[#allocation58_spill] sm:$0xff] %v17894_v22  ;;  %15055 = vmatpush3.msra.mxu1 %v17894_v22  ;;  %v17915_v22 = vld [vmem:[%s20712_s7 + $0x10] sm:$0xff] }
 0x1e0   : > { %v17887_v21 = vpop.f32.mrf.mxu1  ;;  %15056 = vmatprep.subr.mxu1 %v20738_v30  ;;  %20849 = vst [vmem:[#allocation60_spill] sm:$0xff] %v17915_v22 }
 0x1e1   : > { %v14914_v61 = vpop.f32.mrf.mxu0 }
 0x1e2   : > { %v17878_v49 = vadd.f32 %v14914_v61, %v17614_v55  ;;  %v17901_v61 = vld [vmem:[%s20712_s7 + $0x18] sm:$0xff] }
 0x1e3   : > { %v17882_v10 = vpop.f32.mrf.mxu0  ;;  %20848 = vst [vmem:[#allocation59_spill] sm:$0xff] %v17901_v61  ;;  %15057 = vmatpush3.msra.mxu1 %v17901_v61 }
 0x1e4   : > { %15058 = vmatprep.subr.mxu1 %v20738_v30 }
 0x1e5   : > { %v14915_v47 = vpop.f32.mrf.mxu0  ;;  %15059 = vmatpush3.msra.mxu1 %v17915_v22 }
 0x1e6   : > { %v17885_v29 = vadd.f32 %v14915_v47, %v17619_v51  ;;  %v17907_v47 = vpop.f32.mrf.mxu1  ;;  %15060 = vmatprep.subr.mxu1 %v20738_v30 }
 0x1e7   : > { %v17889_v44 = vpop.f32.mrf.mxu0  ;;  %15061 = vmatpush3.msra.mxu1 %v17920_v5 }
 0x1e8   : > { %v17935_v34 = vpop.f32.mrf.mxu1  ;;  %15062 = vmatprep.subr.mxu1 %v20738_v30 }
 0x1e9   : > { %v14918_v55 = vpop.f32.mrf.mxu0 }
 0x1ea   : > { %v17904_v51 = vadd.f32 %v14918_v55, %v17627_v53  ;;  %v17929_v55 = vld [vmem:[%s20712_s7] sm:$0xff]  ;;  %v17945_v56 = vpop.f32.mrf.mxu1 }
 0x1eb   : > { %v17909_v32 = vpop.f32.mrf.mxu0  ;;  %20851 = vst [vmem:[#allocation62_spill] sm:$0xff] %v17929_v55  ;;  %15063 = vmatpush3.msra.mxu1 %v17929_v55 }
 0x1ec   : > { %15067 = vmatprep.subr.mxu1 %v20738_v30  ;;  %v17952_v19 = vpop.f32.mrf.mxu1 }
 0x1ed   : > { %v14919_v53 = vpop.f32.mrf.mxu0 }
 0x1ee   : > { %v17932_v61 = vadd.f32 %v14919_v53, %v17632_v4  ;;  %v17959_v30 = vpop.f32.mrf.mxu1 }
 0x1ef   : > { %v17937_v22 = vpop.f32.mrf.mxu0 }
 0x1f0   : > { %20852 = vst [vmem:[#allocation63_spill] sm:$0xff] %v17932_v61  ;;  %v17966_v61 = vpop.f32.mrf.mxu1 }
 0x1f1   : > { %v14922_v9 = vpop.f32.mrf.mxu0 }
 0x1f2   : > { %v17943_v8 = vadd.f32 %v14922_v9, %v17660_v37 }
 0x1f3   : > { %v17947_v4 = vpop.f32.mrf.mxu0 }
 0x1f4   : > { %20853 = vst [vmem:[#allocation64_spill] sm:$0xff] %v17943_v8 }
 0x1f5   : > { %v14923_v53 = vpop.f32.mrf.mxu0 }
 0x1f6   : > { %v17950_v5 = vadd.f32 %v14923_v53, %v17669_v31 }
 0x1f7   : > { %v17954_v25 = vpop.f32.mrf.mxu0 }
 0x1f8   : > { %20854 = vst [vmem:[#allocation65_spill] sm:$0xff] %v17950_v5  ;;  %20855 = vst [vmem:[#allocation66_spill] sm:$0xff] %v17954_v25  ;;  %v17973_v25 = vpop.f32.mrf.mxu1 }
 0x1f9   : > { %v14926_v20 = vpop.f32.mrf.mxu0 }
 0x1fa   : > { %v17957_v55 = vadd.f32 %v14926_v20, %v17692_v36 }
 0x1fb   : > { %v17961_v37 = vpop.f32.mrf.mxu0 }
 0x1fc   : > { %20856 = vst [vmem:[#allocation67_spill] sm:$0xff] %v17957_v55  ;;  %20857 = vst [vmem:[#allocation68_spill] sm:$0xff] %v17961_v37  ;;  %v17980_v37 = vpop.f32.mrf.mxu1 }
 0x1fd   : > { %v14927_v9 = vpop.f32.mrf.mxu0 }
 0x1fe   : > { %v17964_v8 = vadd.f32 %v14927_v9, %v17709_v2 }
 0x1ff   : > { %v17968_v31 = vpop.f32.mrf.mxu0 }
 0x200   : > { %20858 = vst [vmem:[#allocation69_spill] sm:$0xff] %v17964_v8  ;;  %20859 = vst [vmem:[#allocation70_spill] sm:$0xff] %v17968_v31  ;;  %v17987_v31 = vpop.f32.mrf.mxu1 }
 0x201   : > { %v14930_v53 = vpop.f32.mrf.mxu0 }
 0x202   : > { %v17971_v5 = vadd.f32 %v14930_v53, %v17741_v41 }
 0x203   : > { %v17975_v20 = vpop.f32.mrf.mxu0 }
 0x204   : > { %20860 = vst [vmem:[#allocation71_spill] sm:$0xff] %v17971_v5  ;;  %20861 = vst [vmem:[#allocation72_spill] sm:$0xff] %v17975_v20  ;;  %v17994_v20 = vpop.f32.mrf.mxu1 }
 0x205   : > { %v14931_v36 = vpop.f32.mrf.mxu0 }
 0x206   : > { %v17978_v55 = vadd.f32 %v14931_v36, %v17757_v46  ;;  %v20867_v46 = vld [vmem:[#allocation29_spill] sm:$0xff] }
 0x207   : > { %v17982_v2 = vpop.f32.mrf.mxu0  ;;  %v2630_v36 = vadd.f32 %v20867_v46, %v17307_v18  ;;  %v4043_v18 = vadd.f32 %v17596_v1, %v17591_v3 }
 0x208   : > { %20862 = vst [vmem:[#allocation73_spill] sm:$0xff] %v17978_v55  ;;  %20863 = vst [vmem:[#allocation74_spill] sm:$0xff] %v17982_v2  ;;  %v17998_v55 = vpop.f32.mrf.mxu1 }
 0x209   : > { %v14934_v9 = vpop.f32.mrf.mxu0  ;;  %v3447_v2 = vadd.f32 %v17573_v58, %v2630_v36  ;;  %v5306_v36 = vadd.f32 %v17855_v45, %v17826_v35 }
 0x20a   : > { %v17985_v8 = vadd.f32 %v14934_v9, %v17789_v12  ;;  %v18003_v12 = vpop.f32.mrf.mxu1 }
 0x20b   : > { %v17989_v41 = vpop.f32.mrf.mxu0  ;;  %v4040_v9 = vadd.f32 %v17588_v7, %v3447_v2 }
 0x20c   : > { %20864 = vst [vmem:[#allocation75_spill] sm:$0xff] %v17985_v8  ;;  %20865 = vst [vmem:[#allocation76_spill] sm:$0xff] %v17989_v41  ;;  %v20869_v8 = vld [vmem:[#allocation33_spill] sm:$0xff] }
 0x20d   : > { %v14935_v53 = vpop.f32.mrf.mxu0  ;;  %v2634_v41 = vadd.f32 %v20869_v8, %v17349_v16  ;;  %v5308_v16 = vadd.f32 %v17837_v48, %v17816_v33 }
 0x20e   : > { %v17992_v5 = vadd.f32 %v14935_v53, %v17807_v28  ;;  %v4490_v53 = vadd.f32 %v17839_v54, %v4040_v9 }
 0x20f   : > { %v18001_v57 = vpop.f32.mrf.mxu0  ;;  %v3451_v46 = vadd.f32 %v17598_v13, %v2634_v41  ;;  %v5309_v13 = vadd.f32 %v17873_v63, %v17835_v17 }
 0x210   : > { %20866 = vst [vmem:[#allocation77_spill] sm:$0xff] %v17992_v5  ;;  %20868 = vst [vmem:[#allocation29_spill] sm:$0xff] %v18001_v57  ;;  %v18009_v5 = vpop.f32.mrf.mxu1  ;;  %v4493_v57 = vadd.f32 %v17857_v60, %v4043_v18  ;;  %v5307_v8 = vadd.f32 %v17880_v52, %v4490_v53  ;;  %v2638_v60 = vadd.f32 %v17279_v40, %v17388_v6 }
 0x211   : > { %v4044_v3 = vadd.f32 %v17606_v26, %v3451_v46  ;;  %v4047_v40 = vadd.f32 %v17609_v59, %v17612_v14  ;;  %v5312_v18 = vadd.f32 %v17887_v21, %v17853_v50 }
 0x212   : > { %v18020_v54 = vpop.f32.mrf.mxu1  ;;  %v5310_v33 = vadd.f32 %v17907_v47, %v4493_v57  ;;  %v3455_v6 = vadd.f32 %v17617_v23, %v2638_v60  ;;  %v20871_v60 = vld [vmem:[#allocation35_spill] sm:$0xff] }
 0x213   : > { %v4494_v48 = vadd.f32 %v17875_v39, %v4044_v3  ;;  %v4497_v46 = vadd.f32 %v17882_v10, %v4047_v40  ;;  %v20872_v40 = vld [vmem:[#allocation14_spill] sm:$0xff] }
 0x214   : > { %v18035_v52 = vpop.f32.mrf.mxu1 }
 0x216   : > { %v18057_v59 = vpop.f32.mrf.mxu1 }
 0x21c   : > { %v15002_v28 = vpop.f32.mrf.mxu0 }
 0x21d   : > { %v18027_v41 = vadd.f32 %v15002_v28, %v5308_v16  ;;  %v4048_v16 = vadd.f32 %v17621_v15, %v3455_v6  ;;  %v20873_v6 = vld [vmem:[#allocation15_spill] sm:$0xff] }
 0x21e   : > { %v5740_v58 = vpop.f32.mrf.mxu0 }
 0x21f   : > { %v18022_v2 = vadd.f32 %v5740_v58, %v5306_v36  ;;  %v6034_v39 = vmul.f32 %v18027_v41, %v18027_v41  ;;  %v5311_v36 = vadd.f32 %v17945_v56, %v4494_v48  ;;  %v5314_v48 = vadd.f32 %v17959_v30, %v4497_v46 }
 0x220   : > { %v15003_v7 = vpop.f32.mrf.mxu0  ;;  %v4498_v15 = vadd.f32 %v17889_v44, %v4048_v16 }
 0x221   : > { %v6032_v26 = vmul.f32 %v18022_v2, %v18022_v2  ;;  %v18039_v9 = vadd.f32 %v15003_v7, %v5309_v13  ;;  %v20870_v13 = vld [vmem:[#allocation38_spill] sm:$0xff] }
 0x222   : > { %v5743_v1 = vpop.f32.mrf.mxu0 }
 0x223   : > { %v18029_v35 = vadd.f32 %v5743_v1, %v5307_v8  ;;  %v6035_v14 = vmul.f32 %v18039_v9, %v18039_v9  ;;  %v5313_v8 = vadd.f32 %v17935_v34, %v17871_v43  ;;  %v18076_v34 = vpop.f32.mrf.mxu1 }
 0x224   : > { %v15006_v45 = vpop.f32.mrf.mxu0 }
 0x225   : > { %v5995_v17 = vadd.f32 %v18029_v35, %v18022_v2  ;;  %v6033_v63 = vmul.f32 %v18029_v35, %v18029_v35  ;;  %v18065_v3 = vadd.f32 %v15006_v45, %v5312_v18 }
 0x226   : > { %v5756_v57 = vpop.f32.mrf.mxu0 }
 0x227   : > { %v5996_v47 = vadd.f32 %v5995_v17, %v18027_v41  ;;  %v6064_v28 = vadd.f32 %v6033_v63, %v6032_v26  ;;  %v18051_v53 = vadd.f32 %v5756_v57, %v5310_v33  ;;  %v2642_v33 = vadd.f32 %v20871_v60, %v20870_v13  ;;  %v20875_v13 = vld [vmem:[#allocation37_spill] sm:$0xff] }
 0x228   : > { %v15007_v58 = vpop.f32.mrf.mxu0  ;;  %v1600_v57 = vadd.f32 %v20873_v6, %v20872_v40  ;;  %v4055_v6 = vadd.f32 %v17662_v27, %v17658_v11 }
 0x229   : > { %v6065_v23 = vadd.f32 %v6064_v28, %v6034_v39  ;;  %v5997_v7 = vadd.f32 %v5996_v47, %v18039_v9  ;;  %v6036_v56 = vmul.f32 %v18051_v53, %v18051_v53  ;;  %v18078_v45 = vadd.f32 %v15007_v58, %v5313_v8  ;;  %v20874_v58 = vld [vmem:[#allocation36_spill] sm:$0xff] }
 0x22a   : > { %v5759_v50 = vpop.f32.mrf.mxu0  ;;  %v4051_v39 = vadd.f32 %v17629_v42, %v17625_v62  ;;  %v3459_v30 = vadd.f32 %v17634_v38, %v2642_v33  ;;  %v6038_v47 = vmul.f32 %v18065_v3, %v18065_v3  ;;  %v5315_v62 = vadd.f32 %v17973_v25, %v4498_v15  ;;  %v18098_v42 = vpop.f32.mrf.mxu1 }
 0x22b   : > { %v5998_v10 = vadd.f32 %v5997_v7, %v18051_v53  ;;  %v6066_v21 = vadd.f32 %v6065_v23, %v6035_v14  ;;  %v18070_v1 = vadd.f32 %v5759_v50, %v5311_v36  ;;  %v2196_v36 = vadd.f32 %v20874_v58, %v1600_v57 }
 0x22c   : > { %v15010_v26 = vpop.f32.mrf.mxu0  ;;  %v5316_v14 = vadd.f32 %v17952_v19, %v17878_v49  ;;  %v4501_v23 = vadd.f32 %v17909_v32, %v4051_v39  ;;  %v6039_v38 = vmul.f32 %v18078_v45, %v18078_v45  ;;  %v4052_v50 = vadd.f32 %v17641_v0, %v3459_v30  ;;  %v18116_v15 = vpop.f32.mrf.mxu1 }
 0x22d   : > { %v6067_v43 = vadd.f32 %v6066_v21, %v6036_v56  ;;  %v5999_v17 = vadd.f32 %v5998_v10, %v18070_v1  ;;  %v6037_v63 = vmul.f32 %v18070_v1, %v18070_v1  ;;  %v5317_v10 = vadd.f32 %v17966_v61, %v17885_v29 }
 0x22e   : > { %v5772_v44 = vpop.f32.mrf.mxu0  ;;  %v18106_v56 = vadd.f32 %v15010_v26, %v5316_v14  ;;  %v2646_v60 = vadd.f32 %v20875_v13, %v2196_v36  ;;  %v5318_v33 = vadd.f32 %v17987_v31, %v4501_v23  ;;  %v4502_v0 = vadd.f32 %v17937_v22, %v4052_v50  ;;  %v18138_v27 = vpop.f32.mrf.mxu1 }
 0x22f   : > { %v6000_v28 = vadd.f32 %v5999_v17, %v18065_v3  ;;  %v6068_v18 = vadd.f32 %v6067_v43, %v6037_v63  ;;  %v18091_v46 = vadd.f32 %v5772_v44, %v5314_v48  ;;  %v20876_v17 = vld [vmem:[#allocation16_spill] sm:$0xff]  ;;  %v20877_v63 = vld [vmem:[#allocation17_spill] sm:$0xff]  ;;  %v4505_v58 = vadd.f32 %v17947_v4, %v4055_v6 }
 0x230   : > { %v15011_v7 = vpop.f32.mrf.mxu0  ;;  %v1604_v40 = vadd.f32 %v20877_v63, %v20876_v17  ;;  %v3463_v31 = vadd.f32 %v17675_v24, %v2646_v60  ;;  %v6042_v57 = vmul.f32 %v18106_v56, %v18106_v56  ;;  %v5319_v11 = vadd.f32 %v17998_v55, %v4502_v0  ;;  %v18156_v60 = vpop.f32.mrf.mxu1  ;;  %v20885_v17 = vld [vmem:[#allocation30_spill] sm:$0xff]  ;;  %v20886_v63 = vld [vmem:[#allocation31_spill] sm:$0xff] }
 0x231   : > { %v6069_v16 = vadd.f32 %v6068_v18, %v6038_v47  ;;  %v6001_v8 = vadd.f32 %v6000_v28, %v18078_v45  ;;  %v6040_v25 = vmul.f32 %v18091_v46, %v18091_v46  ;;  %v18118_v61 = vadd.f32 %v15011_v7, %v5317_v10  ;;  %v20878_v47 = vld [vmem:[#allocation39_spill] sm:$0xff]  ;;  %v20881_v10 = vld [vmem:[#allocation12_spill] sm:$0xff] }
 0x232   : > { %v5775_v19 = vpop.f32.mrf.mxu0  ;;  %v2200_v28 = vadd.f32 %v20878_v47, %v1604_v40  ;;  %v5320_v18 = vadd.f32 %v17980_v37, %v17904_v51  ;;  %v20879_v7 = vld [vmem:[#allocation27_spill] sm:$0xff]  ;;  %v4059_v40 = vadd.f32 %v20886_v63, %v20885_v17  ;;  %v20888_v47 = vld [vmem:[#allocation13_spill] sm:$0xff] }
 0x233   : > { %v6002_v32 = vadd.f32 %v6001_v8, %v18091_v46  ;;  %v6070_v49 = vadd.f32 %v6069_v16, %v6039_v38  ;;  %v18111_v21 = vadd.f32 %v5775_v19, %v5315_v62  ;;  %v6043_v24 = vmul.f32 %v18118_v61, %v18118_v61  ;;  %v20880_v38 = vld [vmem:[#allocation63_spill] sm:$0xff] }
 0x234   : > { %v15014_v48 = vpop.f32.mrf.mxu0  ;;  %v4056_v62 = vadd.f32 %v20879_v7, %v3463_v31  ;;  %v5321_v16 = vadd.f32 %v17994_v20, %v20880_v38  ;;  %v2650_v19 = vadd.f32 %v20881_v10, %v2200_v28  ;;  %v20895_v63 = vld [vmem:[#allocation23_spill] sm:$0xff] }
 0x235   : > { %v6071_v29 = vadd.f32 %v6070_v49, %v6040_v25  ;;  %v6003_v26 = vadd.f32 %v6002_v32, %v18111_v21  ;;  %v6041_v43 = vmul.f32 %v18111_v21, %v18111_v21  ;;  %v18146_v8 = vadd.f32 %v15014_v48, %v5320_v18  ;;  %v20882_v25 = vld [vmem:[#allocation66_spill] sm:$0xff]  ;;  %v20889_v18 = vld [vmem:[#allocation64_spill] sm:$0xff] }
 0x236   : > { %v5788_v22 = vpop.f32.mrf.mxu0  ;;  %v5322_v32 = vadd.f32 %v18009_v5, %v4505_v58  ;;  %v4506_v49 = vadd.f32 %v20882_v25, %v4056_v62  ;;  %v20887_v5 = vld [vmem:[#allocation34_spill] sm:$0xff]  ;;  %v5324_v58 = vadd.f32 %v18003_v12, %v20889_v18 }
 0x237   : > { %v6004_v39 = vadd.f32 %v6003_v26, %v18106_v56  ;;  %v6072_v30 = vadd.f32 %v6071_v29, %v6041_v43  ;;  %v18131_v44 = vadd.f32 %v5788_v22, %v5318_v33  ;;  %v20883_v29 = vld [vmem:[#allocation19_spill] sm:$0xff]  ;;  %v20884_v26 = vld [vmem:[#allocation21_spill] sm:$0xff]  ;;  %v3467_v6 = vadd.f32 %v20887_v5, %v2650_v19  ;;  %v20893_v25 = vld [vmem:[#allocation18_spill] sm:$0xff] }
 0x238   : > { %v15015_v36 = vpop.f32.mrf.mxu0  ;;  %v1608_v43 = vadd.f32 %v20884_v26, %v20883_v29  ;;  %v6046_v22 = vmul.f32 %v18146_v8, %v18146_v8 }
 0x239   : > { %v6073_v14 = vadd.f32 %v6072_v30, %v6042_v57  ;;  %v6005_v23 = vadd.f32 %v6004_v39, %v18118_v61  ;;  %v6044_v55 = vmul.f32 %v18131_v44, %v18131_v44  ;;  %v18158_v33 = vadd.f32 %v15015_v36, %v5321_v16  ;;  %v20890_v36 = vld [vmem:[#allocation68_spill] sm:$0xff] }
 0x23a   : > { %v5791_v51 = vpop.f32.mrf.mxu0  ;;  %v2204_v28 = vadd.f32 %v20888_v47, %v1608_v43  ;;  %v20891_v16 = vld [vmem:[#allocation40_spill] sm:$0xff] }
 0x23b   : > { %v6006_v4 = vadd.f32 %v6005_v23, %v18131_v44  ;;  %v6074_v37 = vadd.f32 %v6073_v14, %v6043_v24  ;;  %v18151_v50 = vadd.f32 %v5791_v51, %v5319_v11  ;;  %v4509_v11 = vadd.f32 %v20890_v36, %v4059_v40  ;;  %v18178_v23 = vpop.f32.mrf.mxu1  ;;  %v20896_v40 = vld [vmem:[#allocation26_spill] sm:$0xff]  ;;  %v20900_v36 = vld [vmem:[#allocation44_spill] sm:$0xff] }
 0x23c   : > { %v15018_v13 = vpop.f32.mrf.mxu0  ;;  %v5323_v14 = vadd.f32 %v18035_v52, %v4506_v49  ;;  %v6047_v7 = vmul.f32 %v18158_v33, %v18158_v33  ;;  %v4060_v51 = vadd.f32 %v20891_v16, %v3467_v6  ;;  %v2654_v49 = vadd.f32 %v20893_v25, %v2204_v28  ;;  %v20897_v6 = vld [vmem:[#allocation46_spill] sm:$0xff]  ;;  %v20898_v28 = vld [vmem:[#allocation20_spill] sm:$0xff] }
 0x23d   : > { %v6075_v20 = vadd.f32 %v6074_v37, %v6044_v55  ;;  %v6007_v0 = vadd.f32 %v6006_v4, %v18151_v50  ;;  %v6045_v48 = vmul.f32 %v18151_v50, %v18151_v50  ;;  %v20892_v4 = vld [vmem:[#allocation65_spill] sm:$0xff]  ;;  %v18186_v37 = vadd.f32 %v15018_v13, %v5324_v58  ;;  %v5246_v26 = vpop.f32.mrf.mxu1  ;;  %v20899_v58 = vld [vmem:[#allocation43_spill] sm:$0xff] }
 0x23e   : > { %v5804_v31 = vpop.f32.mrf.mxu0  ;;  %v5325_v55 = vadd.f32 %v18020_v54, %v20892_v4  ;;  %v1612_v5 = vadd.f32 %v20896_v40, %v20895_v63  ;;  %v20906_v63 = vld [vmem:[#allocation69_spill] sm:$0xff] }
 0x23f   : > { %v6008_v57 = vadd.f32 %v6007_v0, %v18146_v8  ;;  %v6076_v39 = vadd.f32 %v6075_v20, %v6045_v48  ;;  %v18171_v30 = vadd.f32 %v5804_v31, %v5322_v32  ;;  %v5326_v20 = vadd.f32 %v18076_v34, %v4509_v11  ;;  %v20894_v0 = vld [vmem:[#allocation70_spill] sm:$0xff] }
 0x240   : > { %v15019_v24 = vpop.f32.mrf.mxu0  ;;  %v4510_v48 = vadd.f32 %v20894_v0, %v4060_v51  ;;  %v3471_v31 = vadd.f32 %v20897_v6, %v2654_v49  ;;  %v6050_v34 = vmul.f32 %v18186_v37, %v18186_v37  ;;  %v2208_v18 = vadd.f32 %v20898_v28, %v1612_v5  ;;  %v20904_v0 = vld [vmem:[#allocation22_spill] sm:$0xff] }
 0x241   : > { %v6077_v62 = vadd.f32 %v6076_v39, %v6046_v22  ;;  %v6009_v38 = vadd.f32 %v6008_v57, %v18158_v33  ;;  %v6048_v52 = vmul.f32 %v18171_v30, %v18171_v30  ;;  %v18196_v13 = vadd.f32 %v15019_v24, %v5325_v55  ;;  %v20901_v24 = vld [vmem:[#allocation67_spill] sm:$0xff] }
 0x242   : > { %v5807_v12 = vpop.f32.mrf.mxu0  ;;  %v4063_v11 = vadd.f32 %v20900_v36, %v20899_v58  ;;  %v20902_v55 = vld [vmem:[#allocation47_spill] sm:$0xff]  ;;  %v5329_v40 = vadd.f32 %v18098_v42, %v20906_v63  ;;  %v20908_v36 = vld [vmem:[#allocation50_spill] sm:$0xff] }
 0x243   : > { %v6010_v10 = vadd.f32 %v6009_v38, %v18171_v30  ;;  %v6078_v19 = vadd.f32 %v6077_v62, %v6047_v7  ;;  %v18191_v32 = vadd.f32 %v5807_v12, %v5323_v14  ;;  %v5328_v14 = vadd.f32 %v18057_v59, %v20901_v24  ;;  %v14982_v38 = vpop.f32.mrf.mxu1 }
 0x244   : > { %v15022_v29 = vpop.f32.mrf.mxu0  ;;  %v5327_v62 = vadd.f32 %v18116_v15, %v4510_v48  ;;  %v6051_v16 = vmul.f32 %v18196_v13, %v18196_v13  ;;  %v4064_v12 = vadd.f32 %v20902_v55, %v3471_v31  ;;  %v2658_v48 = vadd.f32 %v20904_v0, %v2208_v18  ;;  %v20910_v55 = vld [vmem:[#allocation54_spill] sm:$0xff]  ;;  %v20913_v0 = vld [vmem:[#allocation29_spill] sm:$0xff] }
 0x245   : > { %v6079_v54 = vadd.f32 %v6078_v19, %v6048_v52  ;;  %v6011_v43 = vadd.f32 %v6010_v10, %v18191_v32  ;;  %v6049_v17 = vmul.f32 %v18191_v32, %v18191_v32  ;;  %v20903_v10 = vld [vmem:[#allocation72_spill] sm:$0xff]  ;;  %v18220_v19 = vadd.f32 %v15022_v29, %v5328_v14  ;;  %v5259_v5 = vpop.f32.mrf.mxu1 }
 0x246   : > { %v5820_v22 = vpop.f32.mrf.mxu0  ;;  %v4513_v52 = vadd.f32 %v20903_v10, %v4063_v11  ;;  %v20909_v11 = vld [vmem:[#allocation51_spill] sm:$0xff]  ;;  %v20911_v10 = vld [vmem:[#allocation76_spill] sm:$0xff] }
 0x247   : > { %v6012_v57 = vadd.f32 %v6011_v43, %v18186_v37  ;;  %v6080_v39 = vadd.f32 %v6079_v54, %v6049_v17  ;;  %v18207_v47 = vadd.f32 %v5820_v22, %v5326_v20  ;;  %v20905_v54 = vld [vmem:[#allocation74_spill] sm:$0xff]  ;;  %v20907_v22 = vld [vmem:[#allocation52_spill] sm:$0xff]  ;;  %v6054_v28 = vmul.f32 %v18220_v19, %v18220_v19 }
 0x248   : > { %v15023_v7 = vpop.f32.mrf.mxu0  ;;  %v4514_v43 = vadd.f32 %v20905_v54, %v4064_v12  ;;  %v4067_v24 = vadd.f32 %v20909_v11, %v20908_v36 }
 0x249   : > { %v6081_v51 = vadd.f32 %v6080_v39, %v6050_v34  ;;  %v6013_v4 = vadd.f32 %v6012_v57, %v18196_v13  ;;  %v6052_v59 = vmul.f32 %v18207_v47, %v18207_v47  ;;  %v3475_v34 = vadd.f32 %v20907_v22, %v2658_v48 }
 0x24a   : > { %v5823_v25 = vpop.f32.mrf.mxu0  ;;  %v5330_v57 = vadd.f32 %v18156_v60, %v4513_v52  ;;  %v18238_v18 = vadd.f32 %v15023_v7, %v5329_v40  ;;  %v4517_v52 = vadd.f32 %v20911_v10, %v4067_v24  ;;  %v20915_v24 = vld [vmem:[#allocation75_spill] sm:$0xff] }
 0x24b   : > { %v6014_v49 = vadd.f32 %v6013_v4, %v18207_v47  ;;  %v6082_v15 = vadd.f32 %v6081_v51, %v6051_v16  ;;  %v18225_v20 = vadd.f32 %v5823_v25, %v5327_v62  ;;  %v5331_v62 = vadd.f32 %v5246_v26, %v4514_v43  ;;  %v14983_v16 = vpop.f32.mrf.mxu1  ;;  %v20912_v25 = vld [vmem:[#allocation71_spill] sm:$0xff]  ;;  %v20914_v43 = vld [vmem:[#allocation73_spill] sm:$0xff] }
 0x24c   : > { %v15026_v17 = vpop.f32.mrf.mxu0  ;;  %v4068_v12 = vadd.f32 %v20910_v55, %v3475_v34  ;;  %v5333_v63 = vadd.f32 %v18178_v23, %v20914_v43  ;;  %v5334_v22 = vadd.f32 %v5259_v5, %v4517_v52  ;;  %v5336_v5 = vadd.f32 %v14982_v38, %v20915_v24  ;;  %v20922_v24 = vld [vmem:[#allocation45_spill] sm:$0xff] }
 0x24d   : > { %v6083_v29 = vadd.f32 %v6082_v15, %v6052_v59  ;;  %v6015_v6 = vadd.f32 %v6014_v49, %v18225_v20  ;;  %v6053_v31 = vmul.f32 %v18225_v20, %v18225_v20  ;;  %v5332_v49 = vadd.f32 %v18138_v27, %v20912_v25  ;;  %v5262_v40 = vpop.f32.mrf.mxu1 }
 0x24e   : > { %v5836_v39 = vpop.f32.mrf.mxu0  ;;  %v6055_v59 = vmul.f32 %v18238_v18, %v18238_v18  ;;  %v4518_v48 = vadd.f32 %v20913_v0, %v4068_v12 }
 0x24f   : > { %v6016_v58 = vadd.f32 %v6015_v6, %v18220_v19  ;;  %v6084_v42 = vadd.f32 %v6083_v29, %v6053_v31  ;;  %v18243_v4 = vadd.f32 %v5836_v39, %v5330_v57  ;;  %v18258_v29 = vadd.f32 %v15026_v17, %v5332_v49 }
 0x250   : > { %v15027_v14 = vpop.f32.mrf.mxu0 }
 0x251   : > { %v6085_v51 = vadd.f32 %v6084_v42, %v6054_v28  ;;  %v6017_v60 = vadd.f32 %v6016_v58, %v18238_v18  ;;  %v6056_v34 = vmul.f32 %v18243_v4, %v18243_v4  ;;  %v18263_v57 = vadd.f32 %v15027_v14, %v5333_v63  ;;  %v20916_v14 = vld [vmem:[#allocation77_spill] sm:$0xff] }
 0x252   : > { %v5839_v7 = vpop.f32.mrf.mxu0  ;;  %v5335_v28 = vadd.f32 %v5262_v40, %v4518_v48  ;;  %v6058_v52 = vmul.f32 %v18258_v29, %v18258_v29 }
 0x253   : > { %v6018_v15 = vadd.f32 %v6017_v60, %v18243_v4  ;;  %v18253_v26 = vadd.f32 %v5839_v7, %v5331_v62  ;;  %v6086_v6 = vadd.f32 %v6085_v51, %v6055_v59  ;;  %v5337_v60 = vadd.f32 %v14983_v16, %v20916_v14  ;;  %v20924_v14 = vld [vmem:[#allocation49_spill] sm:$0xff] }
 0x254   : > { %v15030_v54 = vpop.f32.mrf.mxu0  ;;  %v6059_v59 = vmul.f32 %v18263_v57, %v18263_v57 }
 0x255   : > { %v6019_v31 = vadd.f32 %v6018_v15, %v18253_v26  ;;  %v6087_v42 = vadd.f32 %v6086_v6, %v6056_v34  ;;  %v6057_v23 = vmul.f32 %v18253_v26, %v18253_v26  ;;  %v18276_v12 = vadd.f32 %v15030_v54, %v5336_v5  ;;  %v20917_v34 = vld [vmem:[#allocation28_spill] sm:$0xff] }
 0x256   : > { %v5852_v27 = vpop.f32.mrf.mxu0 }
 0x257   : > { %v6020_v39 = vadd.f32 %v6019_v31, %v18258_v29  ;;  %v18268_v17 = vadd.f32 %v5852_v27, %v5334_v22  ;;  %v6088_v55 = vadd.f32 %v6087_v42, %v6057_v23  ;;  %v6062_v22 = vmul.f32 %v18276_v12, %v18276_v12  ;;  %v20920_v23 = vld [vmem:[#allocation41_spill] sm:$0xff] }
 0x258   : > { %v15031_v58 = vpop.f32.mrf.mxu0 }
 0x259   : > { %v6021_v36 = vadd.f32 %v6020_v39, %v18263_v57  ;;  %v18281_v7 = vadd.f32 %v15031_v58, %v5337_v60  ;;  %v6089_v49 = vadd.f32 %v6088_v55, %v6058_v52  ;;  %v6060_v48 = vmul.f32 %v18268_v17, %v18268_v17  ;;  %v20919_v58 = vld [vmem:[#allocation32_spill] sm:$0xff]  ;;  %v20925_v55 = vld [vmem:[#allocation53_spill] sm:$0xff] }
 0x25a   : > { %v5855_v11 = vpop.f32.mrf.mxu0  ;;  %v20918_v39 = vmov 0.0  }
 0x25b   : > { %v6022_v62 = vadd.f32 %v6021_v36, %v18268_v17  ;;  %v18273_v51 = vadd.f32 %v5855_v11, %v5335_v28  ;;  %v6090_v16 = vadd.f32 %v6089_v49, %v6059_v59  ;;  %v6063_v42 = vmul.f32 %v18281_v7, %v18281_v7  ;;  %v20921_v11 = vld [vmem:[#allocation42_spill] sm:$0xff]  ;;  %v20928_v49 = vld [vmem:[#allocation57_spill] sm:$0xff] }
 0x25c   : > { %v20929_v59 = vld [vmem:[#allocation58_spill] sm:$0xff] }
 0x25d   : > { %v6023_v10 = vadd.f32 %v6022_v62, %v18273_v51  ;;  %v6091_v43 = vadd.f32 %v6090_v16, %v6060_v48  ;;  %v6061_v40 = vmul.f32 %v18273_v51, %v18273_v51  ;;  %v20923_v62 = vld [vmem:[#allocation48_spill] sm:$0xff]  ;;  %v20932_v48 = vld [vmem:[#allocation61_spill] sm:$0xff] }
 0x25f   : > { %v6024_v25 = vadd.f32 %v6023_v10, %v18276_v12  ;;  %v6092_v27 = vadd.f32 %v6091_v43, %v6061_v40  ;;  %v20926_v10 = vld [vmem:[#allocation55_spill] sm:$0xff]  ;;  %v20933_v43 = vld [vmem:[#allocation62_spill] sm:$0xff]  ;;  %v15783_v40 = vld [vmem:[#allocation4 + $0x30] sm:$0xff]  }
 0x261   : > { %v6025_v38 = vadd.f32 %v6024_v25, %v18281_v7  ;;  %v6093_v28 = vadd.f32 %v6092_v27, %v6062_v22  ;;  %v20927_v25 = vld [vmem:[#allocation56_spill] sm:$0xff]  ;;  %v15785_v22 = vld [vmem:[#allocation4 + $0x20] sm:$0xff]  }
 0x263   : > { %v6026_v15 = vrot.slane %v6025_v38, 4  ;;  %v6094_v36 = vadd.f32 %v6093_v28, %v6063_v42  ;;  %v15789_v28 = vld [vmem:[#allocation4 + $0x70] sm:$0xff]   ;;  %v15786_v42 = vld [vmem:[#allocation4 + $0x18] sm:$0xff]  }
 0x265   : > { %v6027_v0 = vadd.f32 %v6026_v15, %v6025_v38  ;;  %v6095_v5 = vrot.slane %v6094_v36, 4  ;;  %v20930_v15 = vld [vmem:[#allocation59_spill] sm:$0xff] }
 0x267   : > { %v6028_v54 = vrot.slane %v6027_v0, 2  ;;  %v6096_v60 = vadd.f32 %v6095_v5, %v6094_v36  ;;  %v15787_v36 = vld [vmem:[#allocation4 + $0x10] sm:$0xff]  }
 0x269   : > { %v6029_v63 = vadd.f32 %v6028_v54, %v6027_v0  ;;  %v6097_v52 = vrot.slane %v6096_v60, 2  ;;  %v20931_v0 = vld [vmem:[#allocation60_spill] sm:$0xff] }
 0x26b   : > { %v6030_v6 = vrot.slane %v6029_v63, 1  ;;  %v6098_v38 = vadd.f32 %v6097_v52, %v6096_v60  ;;  %v15793_v60 = vld [vmem:[#allocation4] sm:$0xff]  }
 0x26d   : > { %v6031_v31 = vadd.f32 %v6030_v6, %v6029_v63  ;;  %v6099_v16 = vrot.slane %v6098_v38, 1  ;;  %v15782_v63 = vld [vmem:[#allocation4 + $0x38] sm:$0xff]   ;;  %v15784_v6 = vld [vmem:[#allocation4 + $0x28] sm:$0xff]  }
 0x26e   : > { %15102 = vmatprep.subr.bf16.mxu0 %v15782_v63 }
 0x26f   : > { %15065 = vmatmul.mubr.f32.vlgmr.msra.gmra.mxu1 %v6031_v31  ;;  %v6100_v54 = vadd.f32 %v6099_v16, %v6098_v38  ;;  %15103 = vmatpush3.bf16.msra.mxu0 %v15782_v63  ;;  %v15788_v31 = vld [vmem:[#allocation4 + $0x78] sm:$0xff]  }
 0x270   : > { %15068 = vmatpush3.msra.mxu1 %v20917_v34  ;;  %15099 = vmatprep.mubr.msk.f32.mxu1 %vm16004_vm11, %v20918_v39 }
 0x271   : > { %15069 = vmatprep.subr.mxu1 %v20918_v39  ;;  %15104 = vmatprep.subr.bf16.mxu0 %v15783_v40 }
 0x272   : > { %15070 = vmatpush3.msra.mxu1 %v20919_v58  ;;  %v16005_v58 = vmov 0  }
 0x273   : > { %15071 = vmatprep.subr.mxu1 %v20918_v39  ;;  %15105 = vmatpush3.bf16.msra.mxu0 %v15783_v40  ;;  %320 = vst [vmem:[#allocation3] sm:$0xf] %v16005_v58  ;;  %321 = vst [vmem:[#allocation3 + $0x4] sm:$0xf] %v16005_v58  ;;  %v15801_v40 = vld [vmem:[#allocation4 + $0x40] sm:$0xff]  }
 0x274   : > { %15072 = vmatpush3.msra.mxu1 %v20920_v23  ;;  %15106 = vmatprep.subr.bf16.mxu0 %v15784_v6  ;;  %322 = vst [vmem:[#allocation3 + $0x8] sm:$0x1] %v16005_v58  ;;  %324 = vst [vmem:[#allocation3 + $0xcc] sm:$0xf] %v16005_v58  ;;  %v15791_v23 = vld [vmem:[#allocation4 + $0x68] sm:$0xff]  }
 0x275   : > { %15073 = vmatprep.subr.mxu1 %v20918_v39  ;;  %325 = vst [vmem:[#allocation3 + $0xd0] sm:$0xf] %v16005_v58  ;;  %326 = vst [vmem:[#allocation3 + $0xd4] sm:$0x1] %v16005_v58 }
 0x276   : > { %15074 = vmatpush3.msra.mxu1 %v20921_v11  ;;  %v15792_v11 = vld [vmem:[#allocation4 + $0x60] sm:$0xff]  }
 0x277   : > { %15075 = vmatprep.subr.mxu1 %v20918_v39  ;;  %15107 = vmatpush3.bf16.msra.mxu0 %v15784_v6 }
 0x278   : > { %15076 = vmatpush3.msra.mxu1 %v20922_v24  ;;  %15108 = vmatprep.subr.bf16.mxu0 %v15785_v22 }
 0x279   : > { %15077 = vmatprep.subr.mxu1 %v20918_v39 }
 0x27a   : > { %15078 = vmatpush3.msra.mxu1 %v20923_v62  ;;  %v330_v24 = vld [vmem:[#allocation3] sm:$0x1] }
 0x27b   : > { %15079 = vmatprep.subr.mxu1 %v20918_v39  ;;  %15109 = vmatpush3.bf16.msra.mxu0 %v15785_v22  ;;  %v331_v62 = vsel %vm17637_vm8, 0, %v330_v24  ;;  %v386_v52 = vld [vmem:[#allocation3 + $0x8] sm:$0x1] }
 0x27c   : > { %15080 = vmatpush3.msra.mxu1 %v20924_v14  ;;  %15110 = vmatprep.subr.bf16.mxu0 %v15786_v42  ;;  %v15790_v14 = vld [vmem:[#allocation4 + $0x8] sm:$0xff]   ;;  %332 = vst [vmem:[#allocation3] sm:$0x1] %v331_v62  ;;  %v387_v38 = vsel %vm17646_vm10, 0, %v386_v52 }
 0x27d   : > { %15081 = vmatprep.subr.mxu1 %v20918_v39  ;;  %388 = vst [vmem:[#allocation3 + $0x8] sm:$0x1] %v387_v38 }
 0x27e   : > { %15082 = vmatpush3.msra.mxu1 %v20925_v55  ;;  %v15794_v55 = vld [vmem:[#allocation4 + $0x58] sm:$0xff]  }
 0x27f   : > { %15083 = vmatprep.subr.mxu1 %v20918_v39  ;;  %15111 = vmatpush3.bf16.msra.mxu0 %v15786_v42 }
 0x280   : > { %15084 = vmatpush3.msra.mxu1 %v20926_v10  ;;  %15112 = vmatprep.subr.bf16.mxu0 %v15787_v36  ;;  %v15795_v10 = vld [vmem:[#allocation4 + $0x50] sm:$0xff]  }
 0x281   : > { %15085 = vmatprep.subr.mxu1 %v20918_v39 }
 0x282   : > { %15086 = vmatpush3.msra.mxu1 %v20927_v25  ;;  %v15798_v25 = vld [vmem:[#allocation4 + $0xb8] sm:$0xff]  }
 0x283   : > { %15087 = vmatprep.subr.mxu1 %v20918_v39  ;;  %15113 = vmatpush3.bf16.msra.mxu0 %v15787_v36  ;;  %v7293_v16 = vld [vmem:[#allocation3] sm:$0xf] }
 0x284   : > { %15088 = vmatpush3.msra.mxu1 %v20928_v49  ;;  %15114 = vmatprep.subr.bf16.mxu0 %v15790_v14 }
 0x285   : > { %15089 = vmatprep.subr.mxu1 %v20918_v39 }
 0x286   : > { %15090 = vmatpush3.msra.mxu1 %v20929_v59  ;;  %v15800_v59 = vld [vmem:[#allocation4 + $0x48] sm:$0xff]  }
 0x287   : > { %15091 = vmatprep.subr.mxu1 %v20918_v39  ;;  %15115 = vmatpush3.bf16.msra.mxu0 %v15790_v14 }
 0x288   : > { %15092 = vmatpush3.msra.mxu1 %v20930_v15  ;;  %15116 = vmatprep.subr.bf16.mxu0 %v15793_v60  ;;  %v15796_v15 = vld [vmem:[#allocation3] sm:$0xff]  }
 0x289   : > { %15093 = vmatprep.subr.mxu1 %v20918_v39  ;;  %15118 = vmatprep.mubr.bf16.mxu0 %v15796_v15 }
 0x28a   : > { %15094 = vmatpush3.msra.mxu1 %v20931_v0  ;;  %v7294_v0 = vld [vmem:[#allocation3 + $0x4] sm:$0xf] }
 0x28b   : > { %15095 = vmatprep.subr.mxu1 %v20918_v39  ;;  %15117 = vmatpush3.bf16.msra.mxu0 %v15793_v60  ;;  %v7355_v63 = vshrl.u32 %v7294_v0, 16 }
 0x28c   : > { %15096 = vmatpush3.msra.mxu1 %v20932_v48  ;;  %15198 = vmatprep.subr.bf16.mxu0 %v15798_v25  ;;  %v7342_v48 = vshrl.u32 %v7293_v16, 16 }
 0x28d   : > { %15097 = vmatprep.subr.mxu1 %v20918_v39  ;;  %v6854_v39 = vld [vmem:[#allocation3 + $0x74] sm:$0x1] }
 0x28e   : > { %15098 = vmatpush3.msra.mxu1 %v20933_v43  ;;  %v7351_v43 = vshll.u32 %v7294_v0, 16  ;;  %v7344_v6 = vrot.slane %v7342_v48, 4  ;;  %v6267_v0 = vlaneseq }
 0x28f   : > { %15100 = vmatmul.mubr.f32.vlgmr.msra.gmra.mxu1 %v6100_v54  ;;  %15150 = vmatprep.subr.bf16.mxu1 %v15788_v31  ;;  %v7345_v54 = vshll.u32 %v7293_v16, 16 }
 0x290   : > { %15151 = vmatpush3.bf16.msra.mxu1 %v15788_v31  ;;  %v7353_v22 = vrot.slane %v7351_v43, 5  ;;  %v6268_v48 = vshrl.u32 %v6267_v0, 7 }
 0x291   : > { %15152 = vmatprep.subr.bf16.mxu1 %v15789_v28  ;;  %v7347_v31 = vrot.slane %v7345_v54, 5 }
 0x292   : > { %v18342_v54 = vsub.s32 0, %v6268_v48 }
 0x293   : > { %v7348_v58 = vor.u32 %v7347_v31, %v7344_v6 }
 0x294   : > { %15153 = vmatpush3.bf16.msra.mxu1 %v15789_v28  ;;  %v7295_v28 = vld [vmem:[#allocation3 + $0x8] sm:$0x1]  ;;  %20937 = vst [vmem:[#allocation33_spill] sm:$0xff] %v18342_v54 }
 0x295   : > { %15154 = vmatprep.subr.bf16.mxu1 %v15791_v23  ;;  %v7349_v36 = vrot.slane %v7348_v58, 4 }
 0x297   : > { %v7354_v60 = vsel %vm16178_vm2, %v7349_v36, %v7353_v22 }
 0x298   : > { %15155 = vmatpush3.bf16.msra.mxu1 %v15791_v23  ;;  %v7361_v23 = vshll.u32 %v7295_v28, 16 }
 0x299   : > { %15156 = vmatprep.subr.bf16.mxu1 %v15792_v11 }
 0x29a   : > { %v7363_v24 = vrot.slane %v7361_v23, 5 }
 0x29c   : > { %15157 = vmatpush3.bf16.msra.mxu1 %v15792_v11 }
 0x29d   : > { %15158 = vmatprep.subr.bf16.mxu1 %v15794_v55 }
 0x2a0   : > { %15159 = vmatpush3.bf16.msra.mxu1 %v15794_v55 }
 0x2a1   : > { %15160 = vmatprep.subr.bf16.mxu1 %v15795_v10 }
 0x2a4   : > { %15161 = vmatpush3.bf16.msra.mxu1 %v15795_v10 }
 0x2a5   : > { %15162 = vmatprep.subr.bf16.mxu1 %v15800_v59 }
 0x2a8   : > { %15163 = vmatpush3.bf16.msra.mxu1 %v15800_v59 }
 0x2a9   : > { %15164 = vmatprep.subr.bf16.mxu1 %v15801_v40 }
 0x2ac   : > { %15165 = vmatpush3.bf16.msra.mxu1 %v15801_v40  ;;  %v441_v40 = vld [vmem:[%s20709_s4] sm:$0x1] }
 0x32f   : > { %v18328_v27 = vpop.f32.mrf.mxu1 }
 0x330   : > { %v6188_v62 = vmul.f32 0.001953125, %v18328_v27  ;;  %v440_v27 = vld [vmem:[%s20708_s3] sm:$0x1] }
 0x331   : > { %v15066_v34 = vpop.f32.mrf.mxu1 }
 0x332   : > { %v7357_v34 = vrot.slane %v7355_v63, 4  ;;  %v6260_v25 = vmul.f32 %v6188_v62, %v6188_v62 }
 0x334   : > { %v7358_v42 = vor.u32 %v7357_v34, %v7353_v22 }
 0x336   : > { %v7359_v11 = vrot.slane %v7358_v42, 4 }
 0x338   : > { %v7364_v55 = vsel %vm16178_vm2, %v7359_v11, %v7363_v24 }
 0x339   : > { %v13663_v10 = vcombine.low %v7354_v60, %v7364_v55  ;;  %v15817_v55 = vld [vmem:[#allocation4 + $0xf8] sm:$0xff]  }
 0x33a   : > { %15246 = vmatprep.subr.bf16.mxu1 %v15817_v55 }
 0x33b   : > { %15166 = vmatprep.mubr.bf16.mxu1 %v13663_v10 }
 0x34f   : > { %v6255_v52 = vpop.f32.mrf.mxu1 }
 0x350   : > { %v6259_v38 = vmul.f32 0.001953125, %v6255_v52 }
 0x351   : > { %v15101_v59 = vpop.f32.mrf.mxu1 }
 0x352   : > { %v6261_v15 = vsub.f32 %v6259_v38, %v6260_v25 }
 0x354   : > { %v6262_v16 = vadd.f32 1e-05, %v6261_v15 }
 0x356   : > { %15902 = vrsqrt.f32 %v6262_v16 }
 0x363   : > { %v15903_v43 = vpop.eup %15902 }
 0x364   : > { %v6264_v63 = vmul.f32 %v15903_v43, %v440_v27 }
 0x366   : > { %v6265_v6 = vmul.f32 %v6264_v63, %v6188_v62  ;;  %v6270_v31 = vrot.slane %v6264_v63, %v18342_v54 }
 0x368   : > { %v6266_v22 = vsub.f32 %v441_v40, %v6265_v6  ;;  %v6271_v34 = vmul.f32 %v6270_v31, %v18022_v2  ;;  %v6272_v28 = vmul.f32 %v6270_v31, %v18029_v35  ;;  %v6273_v58 = vmul.f32 %v6270_v31, %v18027_v41 }
 0x369   : > { %v6274_v42 = vmul.f32 %v6270_v31, %v18039_v9  ;;  %v6275_v23 = vmul.f32 %v6270_v31, %v18051_v53  ;;  %v6276_v36 = vmul.f32 %v6270_v31, %v18070_v1  ;;  %v6277_v11 = vmul.f32 %v6270_v31, %v18065_v3 }
 0x36a   : > { %v6307_v24 = vrot.slane %v6266_v22, %v18342_v54  ;;  %v6278_v62 = vmul.f32 %v6270_v31, %v18078_v45  ;;  %v6279_v60 = vmul.f32 %v6270_v31, %v18091_v46  ;;  %v6280_v2 = vmul.f32 %v6270_v31, %v18111_v21 }
 0x36b   : > { %v6281_v35 = vmul.f32 %v6270_v31, %v18106_v56  ;;  %v6282_v41 = vmul.f32 %v6270_v31, %v18118_v61  ;;  %v6283_v9 = vmul.f32 %v6270_v31, %v18131_v44  ;;  %v6284_v53 = vmul.f32 %v6270_v31, %v18151_v50 }
 0x36c   : > { %v6285_v1 = vmul.f32 %v6270_v31, %v18146_v8  ;;  %v6286_v3 = vmul.f32 %v6270_v31, %v18158_v33  ;;  %v6287_v10 = vmul.f32 %v6270_v31, %v18171_v30  ;;  %v6288_v45 = vmul.f32 %v6270_v31, %v18191_v32 }
 0x36d   : > { %v6289_v46 = vmul.f32 %v6270_v31, %v18186_v37  ;;  %v6290_v21 = vmul.f32 %v6270_v31, %v18196_v13  ;;  %v6291_v56 = vmul.f32 %v6270_v31, %v18207_v47  ;;  %v6292_v61 = vmul.f32 %v6270_v31, %v18225_v20 }
 0x36e   : > { %v6293_v44 = vmul.f32 %v6270_v31, %v18220_v19  ;;  %v6294_v50 = vmul.f32 %v6270_v31, %v18238_v18  ;;  %v6295_v8 = vmul.f32 %v6270_v31, %v18243_v4  ;;  %v6296_v33 = vmul.f32 %v6270_v31, %v18253_v26 }
 0x36f   : > { %v6297_v30 = vmul.f32 %v6270_v31, %v18258_v29  ;;  %v6298_v32 = vmul.f32 %v6270_v31, %v18263_v57  ;;  %v6299_v37 = vmul.f32 %v6270_v31, %v18268_v17  ;;  %v6300_v13 = vmul.f32 %v6270_v31, %v18273_v51 }
 0x370   : > { %v6301_v47 = vmul.f32 %v6270_v31, %v18276_v12  ;;  %v6302_v20 = vmul.f32 %v6270_v31, %v18281_v7  ;;  %v18381_v52 = vadd.f32 %v6307_v24, %v6271_v34  ;;  %v18383_v19 = vadd.f32 %v6307_v24, %v6272_v28 }
 0x371   : > { %v18385_v18 = vadd.f32 %v6307_v24, %v6273_v58  ;;  %v18387_v4 = vadd.f32 %v6307_v24, %v6274_v42  ;;  %v18389_v26 = vadd.f32 %v6307_v24, %v6275_v23  ;;  %v18391_v29 = vadd.f32 %v6307_v24, %v6276_v36 }
 0x372   : > { %v18393_v57 = vadd.f32 %v6307_v24, %v6277_v11  ;;  %v18395_v17 = vadd.f32 %v6307_v24, %v6278_v62  ;;  %v18397_v51 = vadd.f32 %v6307_v24, %v6279_v60  ;;  %v18399_v12 = vadd.f32 %v6307_v24, %v6280_v2 }
 0x373   : > { %v18401_v7 = vadd.f32 %v6307_v24, %v6281_v35  ;;  %v18403_v25 = vadd.f32 %v6307_v24, %v6282_v41  ;;  %v18405_v38 = vadd.f32 %v6307_v24, %v6283_v9  ;;  %v18407_v59 = vadd.f32 %v6307_v24, %v6284_v53 }
 0x374   : > { %v18409_v15 = vadd.f32 %v6307_v24, %v6285_v1  ;;  %v18411_v16 = vadd.f32 %v6307_v24, %v6286_v3  ;;  %v18413_v0 = vadd.f32 %v6307_v24, %v6287_v10  ;;  %v18415_v48 = vadd.f32 %v6307_v24, %v6288_v45 }
 0x375   : > { %v18417_v27 = vadd.f32 %v6307_v24, %v6289_v46  ;;  %v18419_v43 = vadd.f32 %v6307_v24, %v6290_v21  ;;  %v18421_v63 = vadd.f32 %v6307_v24, %v6291_v56  ;;  %v18423_v40 = vadd.f32 %v6307_v24, %v6292_v61 }
 0x376   : > { %v18425_v6 = vadd.f32 %v6307_v24, %v6293_v44  ;;  %v18427_v31 = vadd.f32 %v6307_v24, %v6294_v50  ;;  %v18429_v22 = vadd.f32 %v6307_v24, %v6295_v8  ;;  %v18431_v34 = vadd.f32 %v6307_v24, %v6296_v33 }
 0x377   : > { %v18433_v28 = vadd.f32 %v6307_v24, %v6297_v30  ;;  %v18435_v58 = vadd.f32 %v6307_v24, %v6298_v32  ;;  %v18437_v42 = vadd.f32 %v6307_v24, %v6299_v37  ;;  %v18439_v23 = vadd.f32 %v6307_v24, %v6300_v13 }
 0x378   : > { %v18441_v36 = vadd.f32 %v6307_v24, %v6301_v47  ;;  %v18443_v11 = vadd.f32 %v6307_v24, %v6302_v20  ;;  %v6341_v62 = vmax.f32 %v18381_v52, 0.0  ;;  %v6342_v60 = vmax.f32 %v18383_v19, 0.0 }
 0x379   : > { %v6343_v2 = vmax.f32 %v18385_v18, 0.0  ;;  %v6344_v55 = vmax.f32 %v18387_v4, 0.0  ;;  %v6345_v35 = vmax.f32 %v18389_v26, 0.0  ;;  %v6346_v41 = vmax.f32 %v18391_v29, 0.0 }
 0x37a   : > { %v6347_v9 = vmax.f32 %v18393_v57, 0.0  ;;  %v6348_v53 = vmax.f32 %v18395_v17, 0.0  ;;  %v6349_v1 = vmax.f32 %v18397_v51, 0.0  ;;  %v6350_v24 = vmax.f32 %v18399_v12, 0.0 }
 0x37b   : > { %v6351_v3 = vmax.f32 %v18401_v7, 0.0  ;;  %v6352_v10 = vmax.f32 %v18403_v25, 0.0  ;;  %v6353_v45 = vmax.f32 %v18405_v38, 0.0  ;;  %v6354_v46 = vmax.f32 %v18407_v59, 0.0 }
 0x37c   : > { %v6355_v21 = vmax.f32 %v18409_v15, 0.0  ;;  %v6356_v56 = vmax.f32 %v18411_v16, 0.0  ;;  %v6357_v61 = vmax.f32 %v18413_v0, 0.0  ;;  %v6358_v44 = vmax.f32 %v18415_v48, 0.0 }
 0x37d   : > { %v6359_v50 = vmax.f32 %v18417_v27, 0.0  ;;  %v6360_v8 = vmax.f32 %v18419_v43, 0.0  ;;  %v6361_v33 = vmax.f32 %v18421_v63, 0.0  ;;  %v6362_v30 = vmax.f32 %v18423_v40, 0.0 }
 0x37e   : > { %v6363_v32 = vmax.f32 %v18425_v6, 0.0  ;;  %v6364_v37 = vmax.f32 %v18427_v31, 0.0  ;;  %v6365_v13 = vmax.f32 %v18429_v22, 0.0  ;;  %v6366_v47 = vmax.f32 %v18431_v34, 0.0 }
 0x37f   : > { %v6367_v20 = vmax.f32 %v18433_v28, 0.0  ;;  %v6368_v52 = vmax.f32 %v18435_v58, 0.0  ;;  %v6369_v19 = vmax.f32 %v18437_v42, 0.0  ;;  %v6370_v18 = vmax.f32 %v18439_v23, 0.0 }
 0x380   : > { %v6371_v4 = vmax.f32 %v18441_v36, 0.0  ;;  %v6372_v26 = vmax.f32 %v18443_v11, 0.0  ;;  %v13940_v29 = vpack.c.bf16 %v6341_v62, %v6341_v62  ;;  %v13941_v57 = vpack.c.bf16 %v6342_v60, %v6342_v60 }
 0x381   : > { %v13942_v17 = vpack.c.bf16 %v6343_v2, %v6343_v2  ;;  %v13943_v51 = vpack.c.bf16 %v6344_v55, %v6344_v55  ;;  %v13944_v12 = vpack.c.bf16 %v6345_v35, %v6345_v35  ;;  %v18477_v7 = vpack.c.bf16 %v6346_v41, %v6346_v41 }
 0x382   : > { %v18479_v25 = vpack.c.bf16 %v6347_v9, %v6347_v9  ;;  %v18481_v38 = vpack.c.bf16 %v6348_v53, %v6348_v53  ;;  %v18483_v59 = vpack.c.bf16 %v6349_v1, %v6349_v1  ;;  %v18485_v15 = vpack.c.bf16 %v6350_v24, %v6350_v24 }
 0x383   : > { %v18487_v16 = vpack.c.bf16 %v6351_v3, %v6351_v3  ;;  %v18489_v0 = vpack.c.bf16 %v6352_v10, %v6352_v10  ;;  %v18491_v48 = vpack.c.bf16 %v6353_v45, %v6353_v45  ;;  %v18493_v27 = vpack.c.bf16 %v6354_v46, %v6354_v46 }
 0x384   : > { %v18495_v43 = vpack.c.bf16 %v6355_v21, %v6355_v21  ;;  %v18497_v63 = vpack.c.bf16 %v6356_v56, %v6356_v56  ;;  %v18499_v40 = vpack.c.bf16 %v6357_v61, %v6357_v61  ;;  %v18501_v6 = vpack.c.bf16 %v6358_v44, %v6358_v44 }
 0x385   : > { %v18503_v31 = vpack.c.bf16 %v6359_v50, %v6359_v50  ;;  %v18505_v22 = vpack.c.bf16 %v6360_v8, %v6360_v8  ;;  %v18507_v34 = vpack.c.bf16 %v6361_v33, %v6361_v33  ;;  %v18509_v28 = vpack.c.bf16 %v6362_v30, %v6362_v30  ;;  %v6896_v8 = vld [vmem:[#allocation3 + $0xbc] sm:$0x1] }
 0x386   : > { %v18511_v58 = vpack.c.bf16 %v6363_v32, %v6363_v32  ;;  %v18513_v42 = vpack.c.bf16 %v6364_v37, %v6364_v37  ;;  %v18515_v23 = vpack.c.bf16 %v6365_v13, %v6365_v13  ;;  %v18517_v36 = vpack.c.bf16 %v6366_v47, %v6366_v47 }
 0x387   : > { %v18519_v11 = vpack.c.bf16 %v6367_v20, %v6367_v20  ;;  %v18521_v62 = vpack.c.bf16 %v6368_v52, %v6368_v52  ;;  %v18523_v60 = vpack.c.bf16 %v6369_v19, %v6369_v19  ;;  %v18525_v2 = vpack.c.bf16 %v6370_v18, %v6370_v18  ;;  %v6822_v18 = vld [vmem:[#allocation3 + $0x3c] sm:$0xf] }
 0x388   : > { %v18527_v55 = vpack.c.bf16 %v6371_v4, %v6371_v4  ;;  %v18529_v35 = vpack.c.bf16 %v6372_v26, %v6372_v26  ;;  %v6472_v41 = vshrl.u32 %v13940_v29, 16  ;;  %v6475_v9 = vshll.u32 %v13940_v29, 16 }
 0x389   : > { %v6480_v53 = vshrl.u32 %v13941_v57, 16  ;;  %v6483_v1 = vshll.u32 %v13941_v57, 16  ;;  %v6489_v24 = vshrl.u32 %v13942_v17, 16  ;;  %v6492_v3 = vshll.u32 %v13942_v17, 16 }
 0x38a   : > { %v6474_v10 = vrot.slane %v6472_v41, 7  ;;  %v6497_v45 = vshrl.u32 %v13943_v51, 16  ;;  %v6500_v46 = vshll.u32 %v13943_v51, 16  ;;  %v6506_v21 = vshrl.u32 %v13944_v12, 16 }
 0x38b   : > { %v18531_v56 = vrot.slane %v6480_v53, 7  ;;  %v6491_v61 = vrot.slane %v6489_v24, 7  ;;  %v6509_v44 = vshll.u32 %v13944_v12, 16  ;;  %v6514_v50 = vshrl.u32 %v18477_v7, 16  ;;  %v6829_v24 = vld [vmem:[#allocation3 + $0x48] sm:$0xf] }
 0x38c   : > { %v18540_v33 = vor.u32 %v6475_v9, %v6474_v10  ;;  %v6478_v30 = vrot.slane %v6474_v10, 4  ;;  %v18542_v32 = vrot.slane %v6497_v45, 7  ;;  %v6508_v37 = vrot.slane %v6506_v21, 7 }
 0x38d   : > { %v6485_v13 = vor.u32 %v6483_v1, %v18531_v56  ;;  %v18546_v20 = vor.u32 %v6492_v3, %v6491_v61  ;;  %v6495_v52 = vrot.slane %v6491_v61, 4  ;;  %v18554_v57 = vrot.slane %v6514_v50, 7 }
 0x38e   : > { %v6502_v19 = vor.u32 %v6500_v46, %v18542_v32  ;;  %v18550_v4 = vor.u32 %v6509_v44, %v6508_v37  ;;  %v6512_v26 = vrot.slane %v6508_v37, 4  ;;  %v6517_v17 = vshll.u32 %v18477_v7, 16 }
 0x38f   : > { %v6486_v29 = vsel %vm18536_vm13, %v6478_v30, %v6485_v13  ;;  %v6523_v51 = vshrl.u32 %v18479_v25, 16  ;;  %v6526_v41 = vshll.u32 %v18479_v25, 16  ;;  %v6531_v9 = vshrl.u32 %v18481_v38, 16  ;;  %v6819_v30 = vld [vmem:[#allocation3 + $0x38] sm:$0x1] }
 0x390   : > { %v6503_v12 = vsel %vm18536_vm13, %v6495_v52, %v6502_v19  ;;  %v6534_v53 = vshll.u32 %v18481_v38, 16  ;;  %6797 = vst [vmem:[#allocation3 + $0x10] sm:$0xf] %v6486_v29  ;;  %v6519_v1 = vor.u32 %v6517_v17, %v18554_v57  ;;  %v6540_v10 = vshrl.u32 %v18483_v59, 16 }
 0x391   : > { %v6525_v3 = vrot.slane %v6523_v51, 7  ;;  %6804 = vst [vmem:[#allocation3 + $0x1c] sm:$0xf] %v6503_v12  ;;  %v18566_v7 = vrot.slane %v6531_v9, 7  ;;  %v6543_v45 = vshll.u32 %v18483_v59, 16  ;;  %v6548_v46 = vshrl.u32 %v18485_v15, 16 }
 0x392   : > { %v6551_v25 = vshll.u32 %v18485_v15, 16  ;;  %v6520_v38 = vsel %vm18536_vm13, %v6512_v26, %v6519_v1  ;;  %v6542_v44 = vrot.slane %v6540_v10, 7  ;;  %v6557_v13 = vshrl.u32 %v18487_v16, 16 }
 0x393   : > { %v18573_v21 = vor.u32 %v6526_v41, %v6525_v3  ;;  %v6529_v61 = vrot.slane %v6525_v3, 4  ;;  %v6536_v50 = vor.u32 %v6534_v53, %v18566_v7  ;;  %v18577_v37 = vrot.slane %v6548_v46, 7  ;;  %6811 = vst [vmem:[#allocation3 + $0x28] sm:$0xf] %v6520_v38 }
 0x394   : > { %v18580_v59 = vor.u32 %v6543_v45, %v6542_v44  ;;  %v6546_v52 = vrot.slane %v6542_v44, 4  ;;  %v6560_v15 = vshll.u32 %v18487_v16, 16  ;;  %v6565_v19 = vshrl.u32 %v18489_v0, 16 }
 0x395   : > { %v6537_v26 = vsel %vm18536_vm13, %v6529_v61, %v6536_v50  ;;  %v6553_v29 = vor.u32 %v6551_v25, %v18577_v37  ;;  %v6559_v51 = vrot.slane %v6557_v13, 7  ;;  %v6568_v41 = vshll.u32 %v18489_v0, 16 }
 0x396   : > { %v18588_v12 = vrot.slane %v6565_v19, 7  ;;  %v6574_v9 = vshrl.u32 %v18491_v48, 16  ;;  %v6577_v53 = vshll.u32 %v18491_v48, 16  ;;  %6818 = vst [vmem:[#allocation3 + $0x34] sm:$0xf] %v6537_v26  ;;  %v6582_v10 = vshrl.u32 %v18493_v27, 16 }
 0x397   : > { %v6554_v16 = vsel %vm18536_vm13, %v6546_v52, %v6553_v29  ;;  %v18595_v1 = vor.u32 %v6560_v15, %v6559_v51  ;;  %v6563_v3 = vrot.slane %v6559_v51, 4  ;;  %v6585_v0 = vshll.u32 %v18493_v27, 16 }
 0x398   : > { %v6570_v45 = vor.u32 %v6568_v41, %v18588_v12  ;;  %v6576_v25 = vrot.slane %v6574_v9, 7  ;;  %6825 = vst [vmem:[#allocation3 + $0x40] sm:$0xf] %v6554_v16  ;;  %v18601_v38 = vrot.slane %v6582_v10, 7  ;;  %v6591_v48 = vshrl.u32 %v18495_v43, 16 }
 0x399   : > { %v6594_v61 = vshll.u32 %v18495_v43, 16  ;;  %v6599_v44 = vshrl.u32 %v18497_v63, 16  ;;  %v6602_v15 = vshll.u32 %v18497_v63, 16  ;;  %v6608_v43 = vshrl.u32 %v18499_v40, 16 }
 0x39a   : > { %v6571_v50 = vsel %vm18536_vm13, %v6563_v3, %v6570_v45  ;;  %v18608_v13 = vor.u32 %v6577_v53, %v6576_v25  ;;  %v6580_v52 = vrot.slane %v6576_v25, 4  ;;  %v6587_v19 = vor.u32 %v6585_v0, %v18601_v38 }
 0x39b   : > { %v6593_v26 = vrot.slane %v6591_v48, 7  ;;  %v18613_v29 = vrot.slane %v6599_v44, 7  ;;  %6832 = vst [vmem:[#allocation3 + $0x4c] sm:$0xf] %v6571_v50  ;;  %v6611_v51 = vshll.u32 %v18499_v40, 16  ;;  %v6616_v41 = vshrl.u32 %v18501_v6, 16 }
 0x39c   : > { %v6619_v9 = vshll.u32 %v18501_v6, 16  ;;  %v6588_v53 = vsel %vm18536_vm13, %v6580_v52, %v6587_v19  ;;  %v6610_v45 = vrot.slane %v6608_v43, 7  ;;  %v6625_v0 = vshrl.u32 %v18503_v31, 16 }
 0x39d   : > { %v18621_v63 = vor.u32 %v6594_v61, %v6593_v26  ;;  %v6597_v16 = vrot.slane %v6593_v26, 4  ;;  %v6604_v3 = vor.u32 %v6602_v15, %v18613_v29  ;;  %v18625_v25 = vrot.slane %v6616_v41, 7  ;;  %6839 = vst [vmem:[#allocation3 + $0x58] sm:$0xf] %v6588_v53 }
 0x39e   : > { %v6628_v6 = vshll.u32 %v18503_v31, 16  ;;  %v6633_v48 = vshrl.u32 %v18505_v22, 16  ;;  %v6636_v61 = vshll.u32 %v18505_v22, 16  ;;  %v18633_v44 = vor.u32 %v6611_v51, %v6610_v45 }
 0x39f   : > { %v6605_v40 = vsel %vm18536_vm13, %v6597_v16, %v6604_v3  ;;  %v6614_v50 = vrot.slane %v6610_v45, 4  ;;  %v6621_v52 = vor.u32 %v6619_v9, %v18625_v25  ;;  %v6627_v19 = vrot.slane %v6625_v0, 7 }
 0x3a0   : > { %6846 = vst [vmem:[#allocation3 + $0x64] sm:$0xf] %v6605_v40  ;;  %v18637_v26 = vrot.slane %v6633_v48, 7  ;;  %v6642_v43 = vshrl.u32 %v18507_v34, 16  ;;  %v6645_v41 = vshll.u32 %v18507_v34, 16  ;;  %v6650_v22 = vshrl.u32 %v18509_v28, 16 }
 0x3a1   : > { %v6622_v31 = vsel %vm18536_vm13, %v6614_v50, %v6621_v52  ;;  %v6653_v51 = vshll.u32 %v18509_v28, 16  ;;  %v6659_v53 = vshrl.u32 %v18511_v58, 16  ;;  %v18646_v9 = vor.u32 %v6628_v6, %v6627_v19 }
 0x3a2   : > { %v6631_v16 = vrot.slane %v6627_v19, 4  ;;  %v6638_v3 = vor.u32 %v6636_v61, %v18637_v26  ;;  %6853 = vst [vmem:[#allocation3 + $0x70] sm:$0xf] %v6622_v31  ;;  %v6644_v0 = vrot.slane %v6642_v43, 7  ;;  %v18650_v34 = vrot.slane %v6650_v22, 7 }
 0x3a3   : > { %v6661_v40 = vrot.slane %v6659_v53, 7  ;;  %v6662_v48 = vshll.u32 %v18511_v58, 16  ;;  %v6667_v50 = vshrl.u32 %v18513_v42, 16  ;;  %v6670_v6 = vshll.u32 %v18513_v42, 16  ;;  %v6794_v43 = vld [vmem:[#allocation3 + $0xc] sm:$0xf] }
 0x3a4   : > { %v6639_v28 = vsel %vm18536_vm13, %v6631_v16, %v6638_v3  ;;  %v6676_v52 = vshrl.u32 %v18515_v23, 16  ;;  %v18658_v19 = vor.u32 %v6645_v41, %v6644_v0  ;;  %v6648_v61 = vrot.slane %v6644_v0, 4 }
 0x3a5   : > { %v6655_v31 = vor.u32 %v6653_v51, %v18650_v34  ;;  %6860 = vst [vmem:[#allocation3 + $0x7c] sm:$0xf] %v6639_v28  ;;  %v18662_v22 = vor.u32 %v6662_v48, %v6661_v40  ;;  %v6665_v58 = vrot.slane %v6661_v40, 4  ;;  %v18664_v53 = vrot.slane %v6667_v50, 7 }
 0x3a6   : > { %v6678_v16 = vrot.slane %v6676_v52, 7  ;;  %v6679_v42 = vshll.u32 %v18515_v23, 16  ;;  %v6684_v41 = vshrl.u32 %v18517_v36, 16  ;;  %v6687_v0 = vshll.u32 %v18517_v36, 16 }
 0x3a7   : > { %v6656_v3 = vsel %vm18536_vm13, %v6648_v61, %v6655_v31  ;;  %v6672_v51 = vor.u32 %v6670_v6, %v18664_v53  ;;  %v6693_v48 = vshrl.u32 %v18519_v11, 16  ;;  %v6696_v52 = vshll.u32 %v18519_v11, 16  ;;  %v6801_v11 = vld [vmem:[#allocation3 + $0x18] sm:$0xf] }
 0x3a8   : > { %v6682_v28 = vrot.slane %v6678_v16, 4  ;;  %6867 = vst [vmem:[#allocation3 + $0x88] sm:$0xf] %v6656_v3  ;;  %v18674_v40 = vor.u32 %v6679_v42, %v6678_v16  ;;  %v18676_v50 = vrot.slane %v6684_v41, 7  ;;  %v6701_v23 = vshrl.u32 %v18521_v62, 16 }
 0x3a9   : > { %v6673_v61 = vsel %vm18536_vm13, %v6665_v58, %v6672_v51  ;;  %v6695_v36 = vrot.slane %v6693_v48, 7  ;;  %v6704_v6 = vshll.u32 %v18521_v62, 16  ;;  %v6710_v31 = vshrl.u32 %v18523_v60, 16  ;;  %v6805_v41 = vld [vmem:[#allocation3 + $0x20] sm:$0x1] }
 0x3aa   : > { %v6689_v45 = vor.u32 %v6687_v0, %v18676_v50  ;;  %v18686_v3 = vrot.slane %v6701_v23, 7  ;;  %v6713_v42 = vshll.u32 %v18523_v60, 16  ;;  %6874 = vst [vmem:[#allocation3 + $0x94] sm:$0xf] %v6673_v61  ;;  %v6718_v62 = vshrl.u32 %v18525_v2, 16  ;;  %v15806_v48 = vld [vmem:[#allocation4 + $0xa8] sm:$0xff]  }
 0x3ab   : > { %v18689_v15 = vor.u32 %v6696_v52, %v6695_v36  ;;  %v6699_v58 = vrot.slane %v6695_v36, 4  ;;  %v6712_v51 = vrot.slane %v6710_v31, 7  ;;  %v6798_v0 = vld [vmem:[#allocation3 + $0x14] sm:$0x1]  ;;  %v6808_v23 = vld [vmem:[#allocation3 + $0x24] sm:$0xf]  ;;  %v6795_v49 = vsel %vm18694_vm15, %v18540_v33, %v6794_v43 }
 0x3ac   : > { %v6690_v60 = vsel %vm18536_vm13, %v6682_v28, %v6689_v45  ;;  %v6706_v61 = vor.u32 %v6704_v6, %v18686_v3  ;;  %v6721_v36 = vshll.u32 %v18525_v2, 16  ;;  %v6815_v31 = vld [vmem:[#allocation3 + $0x30] sm:$0xf]  ;;  %v6812_v16 = vld [vmem:[#allocation3 + $0x2c] sm:$0x1]  ;;  %v18705_v46 = vrot.slane %v6718_v62, 7 }
 0x3ad   : > { %v18703_v10 = vor.u32 %v6713_v42, %v6712_v51  ;;  %v6716_v27 = vrot.slane %v6712_v51, 4  ;;  %v6727_v17 = vshrl.u32 %v18527_v55, 16  ;;  %6881 = vst [vmem:[#allocation3 + $0xa0] sm:$0xf] %v6690_v60  ;;  %v6826_v45 = vld [vmem:[#allocation3 + $0x44] sm:$0x1] }
 0x3ae   : > { %20943 = vst [vmem:[#allocation35_spill] sm:$0xff] %v18705_v46  ;;  %v6707_v28 = vsel %vm18536_vm13, %v6699_v58, %v6706_v61  ;;  %v6730_v6 = vshll.u32 %v18527_v55, 16  ;;  %v6735_v2 = vshrl.u32 %v18529_v35, 16  ;;  %v6738_v42 = vshll.u32 %v18529_v35, 16  ;;  %v6833_v52 = vld [vmem:[#allocation3 + $0x50] sm:$0x1] }
 0x3af   : > { %20942 = vst [vmem:[#allocation38_spill] sm:$0xff] %v18703_v10  ;;  %v6836_v51 = vld [vmem:[#allocation3 + $0x54] sm:$0xf]  ;;  %v6840_v62 = vld [vmem:[#allocation3 + $0x5c] sm:$0x1]  ;;  %v6723_v47 = vor.u32 %v6721_v36, %v18705_v46  ;;  %v6729_v54 = vrot.slane %v6727_v17, 7  ;;  %v6802_v17 = vsel %vm18694_vm15, %v18546_v20, %v6801_v11 }
 0x3b0   : > { %6888 = vst [vmem:[#allocation3 + $0xac] sm:$0xf] %v6707_v28  ;;  %v6843_v58 = vld [vmem:[#allocation3 + $0x60] sm:$0xf]  ;;  %v6847_v61 = vld [vmem:[#allocation3 + $0x68] sm:$0x1] }
 0x3b1   : > { %v6850_v55 = vld [vmem:[#allocation3 + $0x6c] sm:$0xf]  ;;  %v18718_v14 = vrot.slane %v6735_v2, 7  ;;  %6796 = vst [vmem:[#allocation3 + $0xc] sm:$0xf] %v6795_v49  ;;  %v20944_v35 = vrot.slane %v18531_v56, 4  ;;  %v6724_v49 = vsel %vm18536_vm13, %v6716_v27, %v6723_v47  ;;  %v18733_v56 = vor.u32 %v6730_v6, %v6729_v54 }
 0x3b2   : > { %v20945_v60 = vrot.slane %v18542_v32, 4  ;;  %v6857_v43 = vld [vmem:[#allocation3 + $0x78] sm:$0xf]  ;;  %v6861_v28 = vld [vmem:[#allocation3 + $0x80] sm:$0x1]  ;;  %v6733_v10 = vrot.slane %v6729_v54, 4  ;;  %v6809_v32 = vsel %vm18694_vm15, %v18550_v4, %v6808_v23  ;;  %v6816_v27 = vsel %vm18694_vm15, %v18573_v21, %v6815_v31 }
 0x3b3   : > { %v6799_v36 = vsel %vm17637_vm8, %v20944_v35, %v6798_v0  ;;  %v6864_v46 = vld [vmem:[#allocation3 + $0x84] sm:$0xf]  ;;  %v6868_v2 = vld [vmem:[#allocation3 + $0x8c] sm:$0x1]  ;;  %6803 = vst [vmem:[#allocation3 + $0x18] sm:$0xf] %v6802_v17  ;;  %v6740_v0 = vor.u32 %v6738_v42, %v18718_v14  ;;  %v6830_v31 = vsel %vm18694_vm15, %v18595_v1, %v6829_v24 }
 0x3b4   : > { %v6806_v33 = vsel %vm17637_vm8, %v20945_v60, %v6805_v41  ;;  %6800 = vst [vmem:[#allocation3 + $0x14] sm:$0x1] %v6799_v36  ;;  %v6871_v20 = vld [vmem:[#allocation3 + $0x90] sm:$0xf]  ;;  %v6875_v11 = vld [vmem:[#allocation3 + $0x98] sm:$0x1] }
 0x3b5   : > { %6807 = vst [vmem:[#allocation3 + $0x20] sm:$0x1] %v6806_v33  ;;  %v6878_v41 = vld [vmem:[#allocation3 + $0x9c] sm:$0xf]  ;;  %v6742_v60 = vrot.slane %v18718_v14, 4  ;;  %v20946_v47 = vrot.slane %v18554_v57, 4  ;;  %v6823_v57 = vsel %vm18694_vm15, %v18580_v59, %v6822_v18 }
 0x3b6   : > { %6810 = vst [vmem:[#allocation3 + $0x24] sm:$0xf] %v6809_v32  ;;  %6895 = vst [vmem:[#allocation3 + $0xb8] sm:$0xf] %v6724_v49  ;;  %v6885_v6 = vld [vmem:[#allocation3 + $0xa8] sm:$0xf] }
 0x3b7   : > { %v6813_v54 = vsel %vm17637_vm8, %v20946_v47, %v6812_v16  ;;  %v6889_v4 = vld [vmem:[#allocation3 + $0xb0] sm:$0x1]  ;;  %v6882_v23 = vld [vmem:[#allocation3 + $0xa4] sm:$0x1]  ;;  %v6892_v35 = vld [vmem:[#allocation3 + $0xb4] sm:$0xf] }
 0x3b8   : > { %6814 = vst [vmem:[#allocation3 + $0x2c] sm:$0x1] %v6813_v54  ;;  %6817 = vst [vmem:[#allocation3 + $0x30] sm:$0xf] %v6816_v27  ;;  %v20947_v42 = vrot.slane %v18566_v7, 4  ;;  %v20948_v16 = vrot.slane %v18577_v37, 4  ;;  %v6741_v7 = vsel %vm18536_vm13, %v6733_v10, %v6740_v0  ;;  %v6837_v37 = vsel %vm18694_vm15, %v18608_v13, %v6836_v51 }
 0x3b9   : > { %v6899_v17 = vld [vmem:[#allocation3 + $0xc0] sm:$0xf]  ;;  %v6903_v33 = vld [vmem:[#allocation3 + $0xc8] sm:$0x1]  ;;  %6824 = vst [vmem:[#allocation3 + $0x3c] sm:$0xf] %v6823_v57 }
 0x3ba   : > { %v6820_v36 = vsel %vm17637_vm8, %v20947_v42, %v6819_v30  ;;  %v6827_v21 = vsel %vm17637_vm8, %v20948_v16, %v6826_v45  ;;  %6831 = vst [vmem:[#allocation3 + $0x48] sm:$0xf] %v6830_v31  ;;  %v20949_v18 = vrot.slane %v18588_v12, 4  ;;  %v20950_v24 = vrot.slane %v18601_v38, 4  ;;  %6838 = vst [vmem:[#allocation3 + $0x54] sm:$0xf] %v6837_v37 }
 0x3bb   : > { %6821 = vst [vmem:[#allocation3 + $0x38] sm:$0x1] %v6820_v36  ;;  %6828 = vst [vmem:[#allocation3 + $0x44] sm:$0x1] %v6827_v21  ;;  %v6844_v12 = vsel %vm18694_vm15, %v18621_v63, %v6843_v58  ;;  %v20951_v1 = vrot.slane %v18613_v29, 4  ;;  %v6851_v38 = vsel %vm18694_vm15, %v18633_v44, %v6850_v55  ;;  %v20952_v13 = vrot.slane %v18625_v25, 4 }
 0x3bc   : > { %v6834_v30 = vsel %vm17637_vm8, %v20949_v18, %v6833_v52  ;;  %v6841_v59 = vsel %vm17637_vm8, %v20950_v24, %v6840_v62  ;;  %6902 = vst [vmem:[#allocation3 + $0xc4] sm:$0xf] %v6741_v7  ;;  %6845 = vst [vmem:[#allocation3 + $0x60] sm:$0xf] %v6844_v12  ;;  %v6858_v29 = vsel %vm18694_vm15, %v18646_v9, %v6857_v43  ;;  %v20953_v63 = vrot.slane %v18637_v26, 4  ;;  %v15803_v51 = vld [vmem:[#allocation4 + $0xb0] sm:$0xff]  }
 0x3bd   : > { %6835 = vst [vmem:[#allocation3 + $0x50] sm:$0x1] %v6834_v30  ;;  %6842 = vst [vmem:[#allocation3 + $0x5c] sm:$0x1] %v6841_v59  ;;  %v6848_v10 = vsel %vm17637_vm8, %v20951_v1, %v6847_v61  ;;  %v6855_v52 = vsel %vm17637_vm8, %v20952_v13, %v6854_v39  ;;  %v6865_v25 = vsel %vm18694_vm15, %v18658_v19, %v6864_v46  ;;  %v20954_v39 = vrot.slane %v18650_v34, 4  ;;  %v15797_v61 = vld [vmem:[#allocation3 + $0xc] sm:$0xff]  }
 0x3be   : > { %6849 = vst [vmem:[#allocation3 + $0x68] sm:$0x1] %v6848_v10  ;;  %6852 = vst [vmem:[#allocation3 + $0x6c] sm:$0xf] %v6851_v38  ;;  %v6862_v45 = vsel %vm17637_vm8, %v20953_v63, %v6861_v28  ;;  %v7297_v62 = vld [vmem:[#allocation3 + $0x10] sm:$0xf]  ;;  %v6872_v26 = vsel %vm18694_vm15, %v18662_v22, %v6871_v20  ;;  %v6879_v34 = vsel %vm18694_vm15, %v18674_v40, %v6878_v41  ;;  %15119 = vmatmul.mubr.bf16.vlgmr.msra.gmra.mxu0 %v15797_v61 }
 0x3bf   : > { %6856 = vst [vmem:[#allocation3 + $0x74] sm:$0x1] %v6855_v52  ;;  %v6869_v44 = vsel %vm17637_vm8, %v20954_v39, %v6868_v2  ;;  %6859 = vst [vmem:[#allocation3 + $0x78] sm:$0xf] %v6858_v29  ;;  %v20955_v9 = vrot.slane %v18664_v53, 4  ;;  %v20956_v19 = vrot.slane %v18676_v50, 4  ;;  %v6886_v22 = vsel %vm18694_vm15, %v18689_v15, %v6885_v6 }
 0x3c0   : > { %6863 = vst [vmem:[#allocation3 + $0x80] sm:$0x1] %v6862_v45  ;;  %6866 = vst [vmem:[#allocation3 + $0x84] sm:$0xf] %v6865_v25  ;;  %v7296_v55 = vld [vmem:[#allocation3 + $0xc] sm:$0xf]  ;;  %v6900_v15 = vsel %vm18694_vm15, %v18733_v56, %v6899_v17 }
 0x3c1   : > { %6870 = vst [vmem:[#allocation3 + $0x8c] sm:$0x1] %v6869_v44  ;;  %v6876_v46 = vsel %vm17637_vm8, %v20955_v9, %v6875_v11  ;;  %v6883_v58 = vsel %vm17637_vm8, %v20956_v19, %v6882_v23  ;;  %6873 = vst [vmem:[#allocation3 + $0x90] sm:$0xf] %v6872_v26  ;;  %v20957_v53 = vrot.slane %v18686_v3, 4  ;;  %v20958_v43 = vld [vmem:[#allocation38_spill] sm:$0xff]  ;;  %v6904_v3 = vsel %vm17637_vm8, %v6742_v60, %v6903_v33 }
 0x3c2   : > { %6877 = vst [vmem:[#allocation3 + $0x98] sm:$0x1] %v6876_v46  ;;  %6880 = vst [vmem:[#allocation3 + $0x9c] sm:$0xf] %v6879_v34  ;;  %v6893_v50 = vsel %vm18694_vm15, %v20958_v43, %v6892_v35  ;;  %v20959_v28 = vld [vmem:[#allocation35_spill] sm:$0xff]  ;;  %v15799_v32 = vld [vmem:[#allocation3 + $0x18] sm:$0xff]  }
 0x3c3   : > { %6884 = vst [vmem:[#allocation3 + $0xa4] sm:$0x1] %v6883_v58  ;;  %v6890_v40 = vsel %vm17637_vm8, %v20957_v53, %v6889_v4  ;;  %v20960_v2 = vrot.slane %v20959_v28, 4  ;;  %v7298_v20 = vld [vmem:[#allocation3 + $0x14] sm:$0x1]  ;;  %v7366_v41 = vshrl.u32 %v7296_v55, 16  ;;  %15122 = vmatprep.mubr.bf16.mxu0 %v15799_v32 }
 0x3c4   : > { %v7300_v11 = vld [vmem:[#allocation3 + $0x1c] sm:$0xf]  ;;  %6887 = vst [vmem:[#allocation3 + $0xa8] sm:$0xf] %v6886_v22  ;;  %6891 = vst [vmem:[#allocation3 + $0xb0] sm:$0x1] %v6890_v40 }
 0x3c5   : > { %v6897_v49 = vsel %vm17637_vm8, %v20960_v2, %v6896_v8  ;;  %6894 = vst [vmem:[#allocation3 + $0xb4] sm:$0xf] %v6893_v50  ;;  %v7369_v0 = vshll.u32 %v7296_v55, 16  ;;  %v18837_v47 = vld [vmem:[#allocation3 + $0x28] sm:$0xf]  ;;  %v15906_v54 = vld [vmem:[#allocation4 + $0xb8] sm:$0xff]  }
 0x3c6   : > { %6898 = vst [vmem:[#allocation3 + $0xbc] sm:$0x1] %v6897_v49  ;;  %6901 = vst [vmem:[#allocation3 + $0xc0] sm:$0xf] %v6900_v15  ;;  %15199 = vmatpush3.bf16.msra.mxu0 %v15906_v54  ;;  %v7375_v27 = vshll.u32 %v7297_v62, 16  ;;  %v7379_v6 = vshrl.u32 %v7297_v62, 16 }
 0x3c7   : > { %6905 = vst [vmem:[#allocation3 + $0xc8] sm:$0x1] %v6904_v3  ;;  %v7385_v4 = vshll.u32 %v7298_v20, 16  ;;  %15200 = vmatprep.subr.bf16.mxu0 %v15803_v51  ;;  %v7368_v56 = vrot.slane %v7366_v41, 4  ;;  %v7371_v14 = vrot.slane %v7369_v0, 5  ;;  %v7399_v31 = vshll.u32 %v7300_v11, 16 }
 0x3c8   : > { %v7299_v23 = vld [vmem:[#allocation3 + $0x18] sm:$0xf]  ;;  %v7301_v35 = vld [vmem:[#allocation3 + $0x20] sm:$0x1]  ;;  %v7377_v60 = vrot.slane %v7375_v27, 5  ;;  %v7381_v42 = vrot.slane %v7379_v6, 4 }
 0x3c9   : > { %v7387_v36 = vrot.slane %v7385_v4, 5  ;;  %v7390_v57 = vshrl.u32 %v7299_v23, 16  ;;  %v7372_v16 = vor.u32 %v7371_v14, %v7368_v56  ;;  %v7393_v21 = vshll.u32 %v7299_v23, 16  ;;  %v7302_v30 = vld [vmem:[#allocation3 + $0x24] sm:$0xf]  ;;  %v15809_v24 = vld [vmem:[#allocation4 + $0xa0] sm:$0xff]  }
 0x3ca   : > { %v7403_v17 = vshrl.u32 %v7300_v11, 16  ;;  %v7382_v33 = vor.u32 %v7381_v42, %v7377_v60  ;;  %15201 = vmatpush3.bf16.msra.mxu0 %v15803_v51  ;;  %v7409_v18 = vshll.u32 %v7301_v35, 16  ;;  %v7423_v37 = vshll.u32 %v18837_v47, 16  ;;  %v15802_v59 = vld [vmem:[#allocation3 + $0x24] sm:$0xff]   ;;  %v15804_v8 = vld [vmem:[#allocation3 + $0x30] sm:$0xff]   ;;  %v15805_v56 = vld [vmem:[#allocation3 + $0x3c] sm:$0xff]  }
 0x3cb   : > { %v7392_v7 = vrot.slane %v7390_v57, 4  ;;  %v7373_v12 = vrot.slane %v7372_v16, 4  ;;  %v7395_v1 = vrot.slane %v7393_v21, 5  ;;  %v7401_v10 = vrot.slane %v7399_v31, 5  ;;  %15202 = vmatprep.subr.bf16.mxu0 %v15806_v48  ;;  %v7304_v29 = vld [vmem:[#allocation3 + $0x2c] sm:$0x1]  ;;  %15123 = vmatmul.mubr.bf16.gmra.mxu0 %v15802_v59 }
 0x3cc   : > { %v7405_v38 = vrot.slane %v7403_v17, 4  ;;  %v7383_v13 = vrot.slane %v7382_v33, 4  ;;  %v7411_v52 = vrot.slane %v7409_v18, 5  ;;  %v7414_v63 = vshrl.u32 %v7302_v30, 16  ;;  %v7306_v25 = vld [vmem:[#allocation3 + $0x34] sm:$0xf]  ;;  %15126 = vmatprep.mubr.bf16.mxu0 %v15804_v8 }
 0x3cd   : > { %v7417_v45 = vshll.u32 %v7302_v30, 16  ;;  %v7378_v44 = vsel %vm16178_vm2, %v7373_v12, %v7377_v60  ;;  %v7396_v51 = vor.u32 %v7395_v1, %v7392_v7  ;;  %v18842_v26 = vrot.slane %v7423_v37, 5  ;;  %v7305_v9 = vld [vmem:[#allocation3 + $0x30] sm:$0xf]  ;;  %v15818_v43 = vld [vmem:[#allocation4 + $0xf0] sm:$0xff]   ;;  %v15822_v42 = vld [vmem:[#allocation4 + $0xe8] sm:$0xff]  }
 0x3ce   : > { %v7406_v62 = vor.u32 %v7405_v38, %v7401_v10  ;;  %v7388_v46 = vsel %vm16178_vm2, %v7383_v13, %v7387_v36  ;;  %v7416_v34 = vrot.slane %v7414_v63, 4  ;;  %v7427_v58 = vshrl.u32 %v18837_v47, 16  ;;  %15203 = vmatpush3.bf16.msra.mxu0 %v15806_v48  ;;  %v15812_v40 = vld [vmem:[#allocation4 + $0x98] sm:$0xff]   ;;  %v7307_v2 = vld [vmem:[#allocation3 + $0x38] sm:$0x1]  ;;  %v15815_v47 = vld [vmem:[#allocation4 + $0x90] sm:$0xff]  }
 0x3cf   : > { %v7419_v19 = vrot.slane %v7417_v45, 5  ;;  %v13664_v61 = vcombine.low %v7378_v44, %v7388_v46  ;;  %v7397_v55 = vrot.slane %v7396_v51, 4  ;;  %v7433_v53 = vshll.u32 %v7304_v29, 16  ;;  %15204 = vmatprep.subr.bf16.mxu0 %v15809_v24  ;;  %v7308_v41 = vld [vmem:[#allocation3 + $0x3c] sm:$0xf]  ;;  %v15907_v48 = vld [vmem:[#allocation4 + $0xf8] sm:$0xff]  }
 0x3d0   : > { %v7407_v22 = vrot.slane %v7406_v62, 4  ;;  %v7429_v28 = vrot.slane %v7427_v58, 4  ;;  %v7438_v49 = vshrl.u32 %v7305_v9, 16  ;;  %v7441_v32 = vshll.u32 %v7305_v9, 16  ;;  %v7309_v0 = vld [vmem:[#allocation3 + $0x40] sm:$0xf] }
 0x3d1   : > { %v7420_v50 = vor.u32 %v7419_v19, %v7416_v34  ;;  %15167 = vmatmul.mubr.bf16.vlgmr.msra.gmra.mxu1 %v13664_v61  ;;  %v7402_v20 = vsel %vm16178_vm2, %v7397_v55, %v7401_v10  ;;  %v7435_v15 = vrot.slane %v7433_v53, 5  ;;  %v7447_v3 = vshll.u32 %v7306_v25, 16  ;;  %v15807_v36 = vld [vmem:[#allocation3 + $0x48] sm:$0xff]   ;;  %v7310_v21 = vld [vmem:[#allocation3 + $0x44] sm:$0x1]  ;;  %v15823_v51 = vld [vmem:[#allocation4 + $0xe0] sm:$0xff]  }
 0x3d2   : > { %v7412_v11 = vsel %vm16178_vm2, %v7407_v22, %v7411_v52  ;;  %v7430_v6 = vor.u32 %v7429_v28, %v18842_v26  ;;  %v7440_v4 = vrot.slane %v7438_v49, 4  ;;  %15205 = vmatpush3.bf16.msra.mxu0 %v15809_v24  ;;  %15247 = vmatpush3.bf16.msra.mxu1 %v15907_v48  ;;  %v7443_v14 = vrot.slane %v7441_v32, 5  ;;  %v7311_v37 = vld [vmem:[#allocation3 + $0x48] sm:$0xf]  ;;  %v7312_v1 = vld [vmem:[#allocation3 + $0x4c] sm:$0xf] }
 0x3d3   : > { %v13665_v54 = vcombine.low %v7402_v20, %v7412_v11  ;;  %v7421_v27 = vrot.slane %v7420_v50, 4  ;;  %v18852_v23 = vrot.slane %v7447_v3, 5  ;;  %v7451_v35 = vshrl.u32 %v7306_v25, 16  ;;  %15206 = vmatprep.subr.bf16.mxu0 %v15812_v40  ;;  %15248 = vmatprep.subr.bf16.mxu1 %v15818_v43  ;;  %v15820_v10 = vld [vmem:[#allocation4 + $0x88] sm:$0xff]   ;;  %v7313_v9 = vld [vmem:[#allocation3 + $0x50] sm:$0x1] }
 0x3d4   : > { %v7457_v60 = vshll.u32 %v7307_v2, 16  ;;  %v7431_v16 = vrot.slane %v7430_v6, 4  ;;  %v7462_v31 = vshrl.u32 %v7308_v41, 16  ;;  %v7465_v17 = vshll.u32 %v7308_v41, 16  ;;  %15127 = vmatmul.mubr.bf16.gmra.mxu0 %v15805_v56  ;;  %v7315_v19 = vld [vmem:[#allocation3 + $0x58] sm:$0xf] }
 0x3d5   : > { %15170 = vmatprep.mubr.bf16.mxu1 %v13665_v54  ;;  %v7426_v57 = vsel %vm16178_vm2, %v7421_v27, %v18842_v26  ;;  %v7444_v33 = vor.u32 %v7443_v14, %v7440_v4  ;;  %v7453_v7 = vrot.slane %v7451_v35, 4  ;;  %v7471_v30 = vshll.u32 %v7309_v0, 16  ;;  %15130 = vmatprep.mubr.bf16.mxu0 %v15807_v36  ;;  %v7314_v53 = vld [vmem:[#allocation3 + $0x54] sm:$0xf]  ;;  %v15810_v28 = vld [vmem:[#allocation3 + $0x60] sm:$0xff]  }
 0x3d6   : > { %v7459_v18 = vrot.slane %v7457_v60, 5  ;;  %v7436_v24 = vsel %vm16178_vm2, %v7431_v16, %v7435_v15  ;;  %v7464_v59 = vrot.slane %v7462_v31, 4  ;;  %v7467_v8 = vrot.slane %v7465_v17, 5  ;;  %15207 = vmatpush3.bf16.msra.mxu0 %v15812_v40  ;;  %15249 = vmatpush3.bf16.msra.mxu1 %v15818_v43  ;;  %v15825_v40 = vld [vmem:[#allocation4 + $0x80] sm:$0xff]   ;;  %v15826_v20 = vld [vmem:[#allocation4 + $0xd8] sm:$0xff]   ;;  %v15827_v16 = vld [vmem:[#allocation4 + $0xd0] sm:$0xff]  }
 0x3d7   : > { %v7475_v12 = vshrl.u32 %v7309_v0, 16  ;;  %v13666_v38 = vcombine.low %v7426_v57, %v7436_v24  ;;  %v7445_v13 = vrot.slane %v7444_v33, 4  ;;  %v7454_v52 = vor.u32 %v7453_v7, %v18852_v23  ;;  %15208 = vmatprep.subr.bf16.mxu0 %v15815_v47  ;;  %15250 = vmatprep.subr.bf16.mxu1 %v15822_v42  ;;  %v15808_v50 = vld [vmem:[#allocation3 + $0x54] sm:$0xff]   ;;  %v7316_v54 = vld [vmem:[#allocation3 + $0x5c] sm:$0x1] }
 0x3d8   : > { %v7473_v29 = vrot.slane %v7471_v30, 5  ;;  %v7468_v63 = vor.u32 %v7467_v8, %v7464_v59  ;;  %v7481_v25 = vshll.u32 %v7310_v21, 16  ;;  %v7486_v44 = vshrl.u32 %v7311_v37, 16  ;;  %v7318_v57 = vld [vmem:[#allocation3 + $0x64] sm:$0xf]  ;;  %v18869_v21 = vld [vmem:[#allocation4 + $0x138] sm:$0xff]  }
 0x3d9   : > { %v7477_v45 = vrot.slane %v7475_v12, 4  ;;  %15171 = vmatmul.mubr.bf16.gmra.mxu1 %v13666_v38  ;;  %v7450_v62 = vsel %vm16178_vm2, %v7445_v13, %v18852_v23  ;;  %v7455_v26 = vrot.slane %v7454_v52, 4  ;;  %v7489_v46 = vshll.u32 %v7311_v37, 16  ;;  %v7317_v23 = vld [vmem:[#allocation3 + $0x60] sm:$0xf]  ;;  %v15811_v52 = vld [vmem:[#allocation3 + $0x6c] sm:$0xff]  }
 0x3da   : > { %v7495_v34 = vshll.u32 %v7312_v1, 16  ;;  %v7469_v58 = vrot.slane %v7468_v63, 4  ;;  %v7483_v55 = vrot.slane %v7481_v25, 5  ;;  %v7488_v22 = vrot.slane %v7486_v44, 4  ;;  %15209 = vmatpush3.bf16.msra.mxu0 %v15815_v47  ;;  %15251 = vmatpush3.bf16.msra.mxu1 %v15822_v42  ;;  %v7320_v38 = vld [vmem:[#allocation3 + $0x6c] sm:$0xf] }
 0x3db   : > { %v7478_v61 = vor.u32 %v7477_v45, %v7473_v29  ;;  %v7460_v43 = vsel %vm16178_vm2, %v7455_v26, %v7459_v18  ;;  %v7491_v2 = vrot.slane %v7489_v46, 5  ;;  %v7499_v32 = vshrl.u32 %v7312_v1, 16  ;;  %15210 = vmatprep.subr.bf16.mxu0 %v15820_v10  ;;  %15252 = vmatprep.subr.bf16.mxu1 %v15823_v51  ;;  %v7319_v1 = vld [vmem:[#allocation3 + $0x68] sm:$0x1]  ;;  %v7321_v25 = vld [vmem:[#allocation3 + $0x70] sm:$0xf] }
 0x3dc   : > { %v7497_v49 = vrot.slane %v7495_v34, 5  ;;  %v13667_v11 = vcombine.low %v7450_v62, %v7460_v43  ;;  %v7474_v15 = vsel %vm16178_vm2, %v7469_v58, %v7473_v29  ;;  %v7505_v41 = vshll.u32 %v7313_v9, 16  ;;  %15131 = vmatmul.mubr.bf16.gmra.mxu0 %v15808_v50  ;;  %v15829_v46 = vld [vmem:[#allocation4 + $0xc8] sm:$0xff]   ;;  %v7323_v50 = vld [vmem:[#allocation3 + $0x78] sm:$0xf] }
 0x3dd   : > { %v7479_v3 = vrot.slane %v7478_v61, 4  ;;  %v7492_v0 = vor.u32 %v7491_v2, %v7488_v22  ;;  %v7501_v47 = vrot.slane %v7499_v32, 4  ;;  %v7510_v27 = vshrl.u32 %v7314_v53, 16  ;;  %15134 = vmatprep.mubr.bf16.mxu0 %v15810_v28 }
 0x3de   : > { %v7513_v6 = vshll.u32 %v7314_v53, 16  ;;  %15174 = vmatprep.mubr.bf16.mxu1 %v13667_v11  ;;  %v7507_v48 = vrot.slane %v7505_v41, 5  ;;  %v7519_v56 = vshll.u32 %v7315_v19, 16  ;;  %v7523_v14 = vshrl.u32 %v7315_v19, 16  ;;  %15211 = vmatpush3.bf16.msra.mxu0 %v15820_v10  ;;  %v7322_v53 = vld [vmem:[#allocation3 + $0x74] sm:$0x1] }
 0x3df   : > { %v7484_v4 = vsel %vm16178_vm2, %v7479_v3, %v7483_v55  ;;  %v7493_v60 = vrot.slane %v7492_v0, 4  ;;  %v7502_v42 = vor.u32 %v7501_v47, %v7497_v49  ;;  %v7512_v36 = vrot.slane %v7510_v27, 4  ;;  %15253 = vmatpush3.bf16.msra.mxu1 %v15823_v51  ;;  %15212 = vmatprep.subr.bf16.mxu0 %v15825_v40  ;;  %v15813_v51 = vld [vmem:[#allocation3 + $0x78] sm:$0xff]   ;;  %v7325_v47 = vld [vmem:[#allocation3 + $0x80] sm:$0x1] }
 0x3e0   : > { %v13668_v35 = vcombine.low %v7474_v15, %v7484_v4  ;;  %v7515_v31 = vrot.slane %v7513_v6, 5  ;;  %v7521_v17 = vrot.slane %v7519_v56, 5  ;;  %v7525_v33 = vrot.slane %v7523_v14, 4  ;;  %15254 = vmatprep.subr.bf16.mxu1 %v15826_v20  ;;  %v15831_v11 = vld [vmem:[#allocation4 + $0xc0] sm:$0xff]  }
 0x3e1   : > { %v7529_v7 = vshll.u32 %v7316_v54, 16  ;;  %v7498_v18 = vsel %vm16178_vm2, %v7493_v60, %v7497_v49  ;;  %v7503_v30 = vrot.slane %v7502_v42, 4  ;;  %v7534_v37 = vshrl.u32 %v7317_v23, 16  ;;  %v15814_v42 = vld [vmem:[#allocation3 + $0x84] sm:$0xff]  }
 0x3e2   : > { %15175 = vmatmul.mubr.bf16.gmra.mxu1 %v13668_v35  ;;  %v7537_v24 = vshll.u32 %v7317_v23, 16  ;;  %v7516_v59 = vor.u32 %v7515_v31, %v7512_v36  ;;  %v7526_v8 = vor.u32 %v7525_v33, %v7521_v17  ;;  %v7543_v10 = vshll.u32 %v7318_v57, 16  ;;  %15213 = vmatpush3.bf16.msra.mxu0 %v15825_v40 }
 0x3e3   : > { %v7531_v12 = vrot.slane %v7529_v7, 5  ;;  %v7508_v13 = vsel %vm16178_vm2, %v7503_v30, %v7507_v48  ;;  %v7536_v29 = vrot.slane %v7534_v37, 4  ;;  %v7547_v45 = vshrl.u32 %v7318_v57, 16  ;;  %15255 = vmatpush3.bf16.msra.mxu1 %v15826_v20  ;;  %15294 = vmatprep.subr.bf16.mxu0 %v18869_v21  ;;  %v7324_v20 = vld [vmem:[#allocation3 + $0x7c] sm:$0xf]  ;;  %v18884_v37 = vld [vmem:[#allocation4 + $0x178] sm:$0xff]  }
 0x3e4   : > { %v7539_v63 = vrot.slane %v7537_v24, 5  ;;  %v13669_v44 = vcombine.low %v7498_v18, %v7508_v13  ;;  %v7517_v62 = vrot.slane %v7516_v59, 4  ;;  %v7527_v26 = vrot.slane %v7526_v8, 4  ;;  %15256 = vmatprep.subr.bf16.mxu1 %v15827_v16  ;;  %15135 = vmatmul.mubr.bf16.gmra.mxu0 %v15811_v52  ;;  %v7326_v48 = vld [vmem:[#allocation3 + $0x84] sm:$0xf] }
 0x3e5   : > { %v7545_v9 = vrot.slane %v7543_v10, 5  ;;  %v7549_v19 = vrot.slane %v7547_v45, 4  ;;  %v7553_v58 = vshll.u32 %v7319_v1, 16  ;;  %v7558_v61 = vshrl.u32 %v7320_v38, 16  ;;  %15138 = vmatprep.mubr.bf16.mxu0 %v15813_v51  ;;  %v7327_v30 = vld [vmem:[#allocation3 + $0x88] sm:$0xf] }
 0x3e6   : > { %v7540_v34 = vor.u32 %v7539_v63, %v7536_v29  ;;  %15178 = vmatprep.mubr.bf16.mxu1 %v13669_v44  ;;  %v7522_v55 = vsel %vm16178_vm2, %v7517_v62, %v7521_v17  ;;  %v7532_v22 = vsel %vm16178_vm2, %v7527_v26, %v7531_v12  ;;  %v7561_v40 = vshll.u32 %v7320_v38, 16  ;;  %v15816_v17 = vld [vmem:[#allocation3 + $0x90] sm:$0xff]   ;;  %v7328_v12 = vld [vmem:[#allocation3 + $0x8c] sm:$0x1] }
 0x3e7   : > { %v7567_v43 = vshll.u32 %v7321_v25, 16  ;;  %v13670_v28 = vcombine.low %v7522_v55, %v7532_v22  ;;  %v7550_v49 = vor.u32 %v7549_v19, %v7545_v9  ;;  %v7555_v32 = vrot.slane %v7553_v58, 5  ;;  %15257 = vmatpush3.bf16.msra.mxu1 %v15827_v16  ;;  %v7329_v44 = vld [vmem:[#allocation3 + $0x90] sm:$0xf]  ;;  %v7331_v55 = vld [vmem:[#allocation3 + $0x98] sm:$0x1] }
 0x3e8   : > { %v7541_v2 = vrot.slane %v7540_v34, 4  ;;  %v7560_v15 = vrot.slane %v7558_v61, 4  ;;  %v7563_v3 = vrot.slane %v7561_v40, 5  ;;  %v7571_v0 = vshrl.u32 %v7321_v25, 16  ;;  %15258 = vmatprep.subr.bf16.mxu1 %v15829_v46 }
 0x3e9   : > { %v7569_v41 = vrot.slane %v7567_v43, 5  ;;  %v7551_v27 = vrot.slane %v7550_v49, 4  ;;  %v7577_v6 = vshll.u32 %v7322_v53, 16  ;;  %v7582_v4 = vshrl.u32 %v7323_v50, 16 }
 0x3ea   : > { %15179 = vmatmul.mubr.bf16.gmra.mxu1 %v13670_v28  ;;  %v7546_v54 = vsel %vm16178_vm2, %v7541_v2, %v7545_v9  ;;  %v7564_v56 = vor.u32 %v7563_v3, %v7560_v15  ;;  %v7573_v14 = vrot.slane %v7571_v0, 4  ;;  %v7585_v23 = vshll.u32 %v7323_v50, 16  ;;  %v7332_v50 = vld [vmem:[#allocation3 + $0x9c] sm:$0xf]  ;;  %v15821_v15 = vld [vmem:[#allocation3 + $0xa8] sm:$0xff]  }
 0x3eb   : > { %v7591_v35 = vshll.u32 %v7324_v20, 16  ;;  %v7556_v60 = vsel %vm16178_vm2, %v7551_v27, %v7555_v32  ;;  %v7579_v36 = vrot.slane %v7577_v6, 5  ;;  %v7584_v57 = vrot.slane %v7582_v4, 4  ;;  %15259 = vmatpush3.bf16.msra.mxu1 %v15829_v46  ;;  %v7330_v46 = vld [vmem:[#allocation3 + $0x94] sm:$0xf]  ;;  %v15819_v2 = vld [vmem:[#allocation3 + $0x9c] sm:$0xff]  }
 0x3ec   : > { %v7595_v16 = vshrl.u32 %v7324_v20, 16  ;;  %v13671_v31 = vcombine.low %v7546_v54, %v7556_v60  ;;  %v7565_v33 = vrot.slane %v7564_v56, 4  ;;  %v7574_v7 = vor.u32 %v7573_v14, %v7569_v41  ;;  %15260 = vmatprep.subr.bf16.mxu1 %v15831_v11  ;;  %15139 = vmatmul.mubr.bf16.gmra.mxu0 %v15814_v42  ;;  %v7335_v60 = vld [vmem:[#allocation3 + $0xa8] sm:$0xf]  ;;  %v7336_v42 = vld [vmem:[#allocation3 + $0xac] sm:$0xf] }
 0x3ed   : > { %v7587_v18 = vrot.slane %v7585_v23, 5  ;;  %v7593_v24 = vrot.slane %v7591_v35, 5  ;;  %v7601_v8 = vshll.u32 %v7325_v47, 16  ;;  %v7606_v1 = vshrl.u32 %v7326_v48, 16  ;;  %15142 = vmatprep.mubr.bf16.mxu0 %v15816_v17  ;;  %v7333_v47 = vld [vmem:[#allocation3 + $0xa0] sm:$0xf] }
 0x3ee   : > { %v7597_v59 = vrot.slane %v7595_v16, 4  ;;  %15182 = vmatprep.mubr.bf16.mxu1 %v13671_v31  ;;  %v7570_v10 = vsel %vm16178_vm2, %v7565_v33, %v7569_v41  ;;  %v7575_v38 = vrot.slane %v7574_v7, 4  ;;  %v7609_v52 = vshll.u32 %v7326_v48, 16  ;;  %v7334_v48 = vld [vmem:[#allocation3 + $0xa4] sm:$0x1] }
 0x3ef   : > { %v7588_v13 = vor.u32 %v7587_v18, %v7584_v57  ;;  %v7603_v63 = vrot.slane %v7601_v8, 5  ;;  %v7608_v45 = vrot.slane %v7606_v1, 4  ;;  %v7615_v25 = vshll.u32 %v7327_v30, 16  ;;  %15261 = vmatpush3.bf16.msra.mxu1 %v15831_v11 }
 0x3f0   : > { %v7598_v29 = vor.u32 %v7597_v59, %v7593_v24  ;;  %v7580_v51 = vsel %vm16178_vm2, %v7575_v38, %v7579_v36  ;;  %v7611_v26 = vrot.slane %v7609_v52, 5  ;;  %v7619_v9 = vshrl.u32 %v7327_v30, 16  ;;  %15342 = vmatprep.subr.bf16.mxu1 %v18884_v37  ;;  %v7337_v38 = vld [vmem:[#allocation3 + $0xb0] sm:$0x1]  ;;  %v8110_v52 = vld [vmem:[#allocation3] sm:$0xe] }
 0x3f1   : > { %v7589_v62 = vrot.slane %v7588_v13, 4  ;;  %v13672_v34 = vcombine.low %v7570_v10, %v7580_v51  ;;  %v7617_v58 = vrot.slane %v7615_v25, 5  ;;  %v7625_v61 = vshll.u32 %v7328_v12, 16  ;;  %v15824_v25 = vld [vmem:[#allocation3 + $0xb4] sm:$0xff]  }
 0x3f2   : > { %v7599_v19 = vrot.slane %v7598_v29, 4  ;;  %v7612_v53 = vor.u32 %v7611_v26, %v7608_v45  ;;  %v7621_v40 = vrot.slane %v7619_v9, 4  ;;  %v7630_v43 = vshrl.u32 %v7329_v44, 16  ;;  %v8111_v29 = vld [vmem:[#allocation3 + $0x4] sm:$0xf] }
 0x3f3   : > { %v7594_v22 = vsel %vm16178_vm2, %v7589_v62, %v7593_v24  ;;  %15183 = vmatmul.mubr.bf16.gmra.mxu1 %v13672_v34  ;;  %v7627_v49 = vrot.slane %v7625_v61, 5  ;;  %v7633_v32 = vshll.u32 %v7329_v44, 16  ;;  %v7639_v20 = vshll.u32 %v7330_v46, 16  ;;  %v8112_v62 = vld [vmem:[#allocation3 + $0x8] sm:$0x1] }
 0x3f4   : > { %v7604_v28 = vsel %vm16178_vm2, %v7599_v19, %v7603_v63  ;;  %v7613_v3 = vrot.slane %v7612_v53, 4  ;;  %v7622_v41 = vor.u32 %v7621_v40, %v7617_v58  ;;  %v7632_v0 = vrot.slane %v7630_v43, 4  ;;  %15143 = vmatmul.mubr.bf16.gmra.mxu0 %v15819_v2  ;;  %v8113_v26 = vld [vmem:[#allocation3 + $0xc] sm:$0xe]  ;;  %v8115_v2 = vld [vmem:[#allocation3 + $0x14] sm:$0x1] }
 0x3f5   : > { %v13673_v11 = vcombine.low %v7594_v22, %v7604_v28  ;;  %v7635_v54 = vrot.slane %v7633_v32, 5  ;;  %v7641_v27 = vrot.slane %v7639_v20, 5  ;;  %v7643_v6 = vshrl.u32 %v7330_v46, 16  ;;  %15146 = vmatprep.mubr.bf16.mxu0 %v15821_v15  ;;  %v8114_v28 = vld [vmem:[#allocation3 + $0x10] sm:$0xf] }
 0x3f6   : > { %v7649_v4 = vshll.u32 %v7331_v55, 16  ;;  %v7618_v56 = vsel %vm16178_vm2, %v7613_v3, %v7617_v58  ;;  %v7623_v14 = vrot.slane %v7622_v41, 4  ;;  %v7654_v23 = vshrl.u32 %v7332_v50, 16  ;;  %v7338_v15 = vld [vmem:[#allocation3 + $0xb4] sm:$0xf] }
 0x3f7   : > { %15186 = vmatprep.mubr.bf16.mxu1 %v13673_v11  ;;  %v7657_v35 = vshll.u32 %v7332_v50, 16  ;;  %v7636_v36 = vor.u32 %v7635_v54, %v7632_v0  ;;  %v7645_v57 = vrot.slane %v7643_v6, 4  ;;  %v7663_v31 = vshll.u32 %v7333_v47, 16  ;;  %v7339_v54 = vld [vmem:[#allocation3 + $0xb8] sm:$0xf] }
 0x3f8   : > { %v7651_v16 = vrot.slane %v7649_v4, 5  ;;  %v7628_v17 = vsel %vm16178_vm2, %v7623_v14, %v7627_v49  ;;  %v7656_v33 = vrot.slane %v7654_v23, 4  ;;  %v7667_v18 = vshrl.u32 %v7333_v47, 16 }
 0x3f9   : > { %v7659_v7 = vrot.slane %v7657_v35, 5  ;;  %v13674_v30 = vcombine.low %v7618_v56, %v7628_v17  ;;  %v7637_v24 = vrot.slane %v7636_v36, 4  ;;  %v7646_v59 = vor.u32 %v7645_v57, %v7641_v27 }
 0x3fa   : > { %v7665_v8 = vrot.slane %v7663_v31, 5  ;;  %v7669_v1 = vrot.slane %v7667_v18, 4  ;;  %v7673_v10 = vshll.u32 %v7334_v48, 16  ;;  %v7678_v13 = vshrl.u32 %v7335_v60, 16 }
 0x3fb   : > { %v7660_v12 = vor.u32 %v7659_v7, %v7656_v33  ;;  %15187 = vmatmul.mubr.bf16.gmra.mxu1 %v13674_v30  ;;  %v7642_v63 = vsel %vm16178_vm2, %v7637_v24, %v7641_v27  ;;  %v7647_v45 = vrot.slane %v7646_v59, 4  ;;  %v7681_v44 = vshll.u32 %v7335_v60, 16  ;;  %v8116_v24 = vld [vmem:[#allocation3 + $0x18] sm:$0xe]  ;;  %v8119_v59 = vld [vmem:[#allocation3 + $0x24] sm:$0xe] }
 0x3fc   : > { %v7687_v51 = vshll.u32 %v7336_v42, 16  ;;  %v7670_v46 = vor.u32 %v7669_v1, %v7665_v8  ;;  %v7675_v34 = vrot.slane %v7673_v10, 5  ;;  %v7680_v19 = vrot.slane %v7678_v13, 4  ;;  %15147 = vmatmul.mubr.bf16.gmra.mxu0 %v15824_v25  ;;  %v15832_v13 = vld [vmem:[#allocation4 + $0x130] sm:$0xff]  }
 0x3fd   : > { %v7661_v9 = vrot.slane %v7660_v12, 4  ;;  %v7652_v58 = vsel %vm16178_vm2, %v7647_v45, %v7651_v16  ;;  %v7683_v61 = vrot.slane %v7681_v44, 5  ;;  %v7691_v22 = vshrl.u32 %v7336_v42, 16  ;;  %v8117_v42 = vld [vmem:[#allocation3 + $0x1c] sm:$0xf] }
 0x3fe   : > { %v7689_v55 = vrot.slane %v7687_v51, 5  ;;  %v13675_v53 = vcombine.low %v7642_v63, %v7652_v58  ;;  %v7671_v43 = vrot.slane %v7670_v46, 4  ;;  %v7697_v50 = vshll.u32 %v7337_v38, 16  ;;  %v7340_v16 = vld [vmem:[#allocation3 + $0xbc] sm:$0x1] }
 0x3ff   : > { %v7666_v40 = vsel %vm16178_vm2, %v7661_v9, %v7665_v8  ;;  %v7684_v49 = vor.u32 %v7683_v61, %v7680_v19  ;;  %v7693_v32 = vrot.slane %v7691_v22, 4  ;;  %v13687_v20 = vrot.slane %v8110_v52, 9  ;;  %v8120_v8 = vld [vmem:[#allocation3 + $0x28] sm:$0xf]  ;;  %v8123_v52 = vld [vmem:[#allocation3 + $0x34] sm:$0xf] }
 0x400   : > { %v8208_v11 = vrot.slane %v8111_v29, 5  ;;  %15190 = vmatprep.mubr.bf16.mxu1 %v13675_v53  ;;  %v7676_v3 = vsel %vm16178_vm2, %v7671_v43, %v7675_v34  ;;  %v7699_v41 = vrot.slane %v7697_v50, 5  ;;  %v8211_v0 = vrot.slane %v8112_v62, 5  ;;  %v8118_v44 = vld [vmem:[#allocation3 + $0x20] sm:$0x1] }
 0x401   : > { %v13688_v47 = vrot.slane %v8113_v26, 9  ;;  %v13676_v27 = vcombine.low %v7666_v40, %v7676_v3  ;;  %v7685_v6 = vrot.slane %v7684_v49, 4  ;;  %v7694_v4 = vor.u32 %v7693_v32, %v7689_v55  ;;  %v8121_v46 = vld [vmem:[#allocation3 + $0x2c] sm:$0x1]  ;;  %v8122_v34 = vld [vmem:[#allocation3 + $0x30] sm:$0xe] }
 0x402   : > { %v8209_v56 = vsel %vm16358_vm5, %v13687_v20, %v8208_v11  ;;  %v8210_v14 = vrot.slane %v8208_v11, 4  ;;  %v8215_v23 = vrot.slane %v8114_v28, 5  ;;  %v8218_v35 = vrot.slane %v8115_v2, 5  ;;  %v18919_v50 = vld [vmem:[#allocation4 + $0x128] sm:$0xff]   ;;  %v8124_v49 = vld [vmem:[#allocation3 + $0x38] sm:$0x1] }
 0x403   : > { %v7702_v60 = vshrl.u32 %v7338_v15, 16  ;;  %15191 = vmatmul.mubr.bf16.gmra.mxu1 %v13676_v27  ;;  %v7690_v36 = vsel %vm16178_vm2, %v7685_v6, %v7689_v55  ;;  %v7695_v57 = vrot.slane %v7694_v4, 4  ;;  %v7705_v31 = vshll.u32 %v7338_v15, 16  ;;  %v8126_v55 = vld [vmem:[#allocation3 + $0x40] sm:$0xf] }
 0x404   : > { %v7711_v17 = vshll.u32 %v7339_v54, 16  ;;  %v8212_v33 = vsel %vm16358_vm5, %v8210_v14, %v8211_v0  ;;  %v8216_v7 = vsel %vm16358_vm5, %v13688_v47, %v8215_v23  ;;  %v8217_v18 = vrot.slane %v8215_v23, 4  ;;  %v8125_v11 = vld [vmem:[#allocation3 + $0x3c] sm:$0xe]  ;;  %v8127_v47 = vld [vmem:[#allocation3 + $0x44] sm:$0x1] }
 0x405   : > { %v7704_v30 = vrot.slane %v7702_v60, 4  ;;  %v7700_v12 = vsel %vm16178_vm2, %v7695_v57, %v7699_v41  ;;  %v13703_v1 = vcombine.low %v8209_v56, %v8212_v33  ;;  %v7707_v10 = vrot.slane %v7705_v31, 5  ;;  %v8129_v27 = vld [vmem:[#allocation3 + $0x4c] sm:$0xf]  ;;  %v8130_v14 = vld [vmem:[#allocation3 + $0x50] sm:$0x1] }
 0x406   : > { %v7713_v38 = vrot.slane %v7711_v17, 5  ;;  %v13677_v29 = vcombine.low %v7690_v36, %v7700_v12  ;;  %v8219_v63 = vsel %vm16358_vm5, %v8217_v18, %v8218_v35  ;;  %v7715_v45 = vshrl.u32 %v7339_v54, 16  ;;  %v8128_v54 = vld [vmem:[#allocation3 + $0x48] sm:$0xe]  ;;  %v8132_v23 = vld [vmem:[#allocation3 + $0x58] sm:$0xf] }
 0x407   : > { %v7721_v25 = vshll.u32 %v7340_v16, 16  ;;  %15214 = vmatprep.mubr.bf16.mxu0 %v13703_v1  ;;  %v13704_v51 = vcombine.low %v8216_v7, %v8219_v63  ;;  %v7708_v62 = vor.u32 %v7707_v10, %v7704_v30  ;;  %v13689_v26 = vrot.slane %v8116_v24, 9  ;;  %v8131_v57 = vld [vmem:[#allocation3 + $0x54] sm:$0xe]  ;;  %v8135_v16 = vld [vmem:[#allocation3 + $0x64] sm:$0xf] }
 0x408   : > { %v8222_v9 = vrot.slane %v8117_v42, 5  ;;  %15194 = vmatprep.mubr.bf16.mxu1 %v13677_v29  ;;  %v7717_v19 = vrot.slane %v7715_v45, 4  ;;  %v13690_v61 = vrot.slane %v8119_v59, 9  ;;  %v8225_v40 = vrot.slane %v8118_v44, 5  ;;  %v8133_v18 = vld [vmem:[#allocation3 + $0x5c] sm:$0x1] }
 0x409   : > { %v7723_v58 = vrot.slane %v7721_v25, 5  ;;  %15215 = vmatmul.mubr.bf16.vlgmr.msra.gmra.mxu0 %v13704_v51  ;;  %v7709_v22 = vrot.slane %v7708_v62, 4  ;;  %v8229_v43 = vrot.slane %v8120_v8, 5  ;;  %v13691_v32 = vrot.slane %v8122_v34, 9  ;;  %v8134_v30 = vld [vmem:[#allocation3 + $0x60] sm:$0xe] }
 0x40a   : > { %v8224_v53 = vrot.slane %v8222_v9, 4  ;;  %v7718_v28 = vor.u32 %v7717_v19, %v7713_v38  ;;  %v8223_v2 = vsel %vm16358_vm5, %v13689_v26, %v8222_v9  ;;  %15295 = vmatpush3.bf16.msra.mxu0 %v18869_v21  ;;  %v8236_v20 = vrot.slane %v8123_v52, 5  ;;  %v8138_v1 = vld [vmem:[#allocation3 + $0x70] sm:$0xf]  ;;  %v15838_v63 = vld [vmem:[#allocation4 + $0x120] sm:$0xff]  }
 0x40b   : > { %v7714_v15 = vsel %vm16178_vm2, %v7709_v22, %v7713_v38  ;;  %v8231_v41 = vrot.slane %v8229_v43, 4  ;;  %v8232_v0 = vrot.slane %v8121_v46, 5  ;;  %15296 = vmatprep.subr.bf16.mxu0 %v15832_v13  ;;  %v8230_v21 = vsel %vm16358_vm5, %v13690_v61, %v8229_v43  ;;  %v15830_v10 = vld [vmem:[#allocation3 + $0xc] sm:$0xff]   ;;  %v8136_v62 = vld [vmem:[#allocation3 + $0x68] sm:$0x1] }
 0x40c   : > { %v8226_v3 = vsel %vm16358_vm5, %v8224_v53, %v8225_v40  ;;  %v7719_v6 = vrot.slane %v7718_v28, 4  ;;  %v8238_v56 = vrot.slane %v8236_v20, 4  ;;  %v8239_v60 = vrot.slane %v8124_v49, 5  ;;  %v8137_v45 = vld [vmem:[#allocation3 + $0x6c] sm:$0xe] }
 0x40d   : > { %v13705_v4 = vcombine.low %v8223_v2, %v8226_v3  ;;  %v8233_v35 = vsel %vm16358_vm5, %v8231_v41, %v8232_v0  ;;  %v13692_v42 = vrot.slane %v8125_v11, 9  ;;  %v8243_v36 = vrot.slane %v8126_v55, 5  ;;  %v8141_v61 = vld [vmem:[#allocation3 + $0x7c] sm:$0xf]  ;;  %v8140_v43 = vld [vmem:[#allocation3 + $0x78] sm:$0xe] }
 0x40e   : > { %v7724_v31 = vsel %vm16178_vm2, %v7719_v6, %v7723_v58  ;;  %v13706_v17 = vcombine.low %v8230_v21, %v8233_v35  ;;  %v8237_v33 = vsel %vm16358_vm5, %v13691_v32, %v8236_v20  ;;  %15297 = vmatpush3.bf16.msra.mxu0 %v15832_v13  ;;  %v8246_v7 = vrot.slane %v8127_v47, 5  ;;  %v8139_v58 = vld [vmem:[#allocation3 + $0x74] sm:$0x1]  ;;  %v8144_v28 = vld [vmem:[#allocation3 + $0x88] sm:$0xf] }
 0x40f   : > { %15218 = vmatprep.mubr.bf16.mxu0 %v13705_v4  ;;  %v13678_v24 = vcombine.low %v7714_v15, %v7724_v31  ;;  %v8240_v59 = vsel %vm16358_vm5, %v8238_v56, %v8239_v60  ;;  %v8245_v8 = vrot.slane %v8243_v36, 4  ;;  %15298 = vmatprep.subr.bf16.mxu0 %v18919_v50  ;;  %v13693_v12 = vrot.slane %v8128_v54, 9  ;;  %v15841_v11 = vld [vmem:[#allocation4 + $0x118] sm:$0xff]   ;;  %v8143_v15 = vld [vmem:[#allocation3 + $0x84] sm:$0xe]  ;;  %v15833_v60 = vld [vmem:[#allocation3 + $0x18] sm:$0xff]  }
 0x410   : > { %v13707_v38 = vcombine.low %v8237_v33, %v8240_v59  ;;  %v18941_v52 = vsel %vm16358_vm5, %v13692_v42, %v8243_v36  ;;  %v8250_v29 = vrot.slane %v8129_v27, 5  ;;  %v13694_v13 = vrot.slane %v8131_v57, 9  ;;  %v8147_v3 = vld [vmem:[#allocation3 + $0x94] sm:$0xf]  ;;  %v8142_v54 = vld [vmem:[#allocation3 + $0x80] sm:$0x1] }
 0x411   : > { %15195 = vmatmul.mubr.bf16.gmra.mxu1 %v13678_v24  ;;  %15219 = vmatmul.mubr.bf16.gmra.mxu0 %v13706_v17  ;;  %v8247_v25 = vsel %vm16358_vm5, %v8245_v8, %v8246_v7  ;;  %v8253_v44 = vrot.slane %v8130_v14, 5  ;;  %v8257_v51 = vrot.slane %v8132_v23, 5  ;;  %v13695_v26 = vrot.slane %v8134_v30, 9  ;;  %v8146_v27 = vld [vmem:[#allocation3 + $0x90] sm:$0xe]  ;;  %v15844_v23 = vld [vmem:[#allocation4 + $0x110] sm:$0xff]  }
 0x412   : > { %15262 = vmatprep.mubr.bf16.mxu1 %v15830_v10  ;;  %15222 = vmatprep.mubr.bf16.mxu0 %v13707_v38  ;;  %v13708_v9 = vcombine.low %v18941_v52, %v8247_v25  ;;  %v8252_v46 = vrot.slane %v8250_v29, 4  ;;  %v8260_v34 = vrot.slane %v8133_v18, 5  ;;  %v8264_v19 = vrot.slane %v8135_v16, 5  ;;  %v8145_v14 = vld [vmem:[#allocation3 + $0x8c] sm:$0x1]  ;;  %v15834_v33 = vld [vmem:[#allocation3 + $0x24] sm:$0xff]  }
 0x413   : > { %v8251_v55 = vsel %vm16358_vm5, %v13693_v12, %v8250_v29  ;;  %15299 = vmatpush3.bf16.msra.mxu0 %v18919_v50  ;;  %v18951_v22 = vsel %vm16358_vm5, %v13694_v13, %v8257_v51  ;;  %v8259_v53 = vrot.slane %v8257_v51, 4  ;;  %v13696_v40 = vrot.slane %v8137_v45, 9  ;;  %v8150_v35 = vld [vmem:[#allocation3 + $0xa0] sm:$0xf]  ;;  %v15848_v31 = vld [vmem:[#allocation4 + $0x170] sm:$0xff]  }
 0x414   : > { %v8254_v2 = vsel %vm16358_vm5, %v8252_v46, %v8253_v44  ;;  %15300 = vmatprep.subr.bf16.mxu0 %v15838_v63  ;;  %v8266_v49 = vrot.slane %v8264_v19, 4  ;;  %v8267_v32 = vrot.slane %v8136_v62, 5  ;;  %v8271_v20 = vrot.slane %v8138_v1, 5  ;;  %v8149_v17 = vld [vmem:[#allocation3 + $0x9c] sm:$0xe]  ;;  %v15849_v46 = vld [vmem:[#allocation4 + $0x108] sm:$0xff]  }
 0x415   : > { %v13709_v41 = vcombine.low %v8251_v55, %v8254_v2  ;;  %v18957_v50 = vsel %vm16358_vm5, %v8259_v53, %v8260_v34  ;;  %v18961_v0 = vsel %vm16358_vm5, %v13695_v26, %v8264_v19  ;;  %v8274_v47 = vrot.slane %v8139_v58, 5  ;;  %v8148_v24 = vld [vmem:[#allocation3 + $0x98] sm:$0x1]  ;;  %v8151_v38 = vld [vmem:[#allocation3 + $0xa4] sm:$0x1] }
 0x416   : > { %v13710_v6 = vcombine.low %v18951_v22, %v18957_v50  ;;  %v18967_v4 = vsel %vm16358_vm5, %v8266_v49, %v8267_v32  ;;  %v8273_v21 = vrot.slane %v8271_v20, 4  ;;  %v13697_v56 = vrot.slane %v8140_v43, 9  ;;  %v8153_v52 = vld [vmem:[#allocation3 + $0xac] sm:$0xf]  ;;  %v8152_v25 = vld [vmem:[#allocation3 + $0xa8] sm:$0xe] }
 0x417   : > { %v13711_v42 = vcombine.low %v18961_v0, %v18967_v4  ;;  %15301 = vmatpush3.bf16.msra.mxu0 %v15838_v63  ;;  %v18973_v36 = vsel %vm16358_vm5, %v13696_v40, %v8271_v20  ;;  %v8278_v57 = vrot.slane %v8141_v61, 5  ;;  %v13698_v16 = vrot.slane %v8143_v15, 9  ;;  %v8154_v44 = vld [vmem:[#allocation3 + $0xb0] sm:$0x1]  ;;  %v8155_v34 = vld [vmem:[#allocation3 + $0xb4] sm:$0xe] }
 0x418   : > { %v18977_v7 = vsel %vm16358_vm5, %v8273_v21, %v8274_v47  ;;  %15302 = vmatprep.subr.bf16.mxu0 %v15841_v11  ;;  %v8281_v18 = vrot.slane %v8142_v54, 5  ;;  %v8285_v30 = vrot.slane %v8144_v28, 5  ;;  %v13699_v59 = vrot.slane %v8146_v27, 9  ;;  %v15851_v53 = vld [vmem:[#allocation4 + $0x168] sm:$0xff]   ;;  %v8156_v40 = vld [vmem:[#allocation3 + $0xb8] sm:$0xf] }
 0x419   : > { %15263 = vmatmul.mubr.bf16.vlgmr.msra.gmra.mxu1 %v15833_v60  ;;  %15223 = vmatmul.mubr.bf16.gmra.mxu0 %v13708_v9  ;;  %v13712_v8 = vcombine.low %v18973_v36, %v18977_v7  ;;  %v8280_v12 = vrot.slane %v8278_v57, 4  ;;  %v8288_v1 = vrot.slane %v8145_v14, 5  ;;  %v8292_v10 = vrot.slane %v8147_v3, 5  ;;  %v8157_v32 = vld [vmem:[#allocation3 + $0xbc] sm:$0x1]  ;;  %v15836_v20 = vld [vmem:[#allocation3 + $0x30] sm:$0xff]  }
 0x41a   : > { %15266 = vmatprep.mubr.bf16.mxu1 %v15834_v33  ;;  %15226 = vmatprep.mubr.bf16.mxu0 %v13709_v41  ;;  %v18983_v29 = vsel %vm16358_vm5, %v13697_v56, %v8278_v57  ;;  %v18987_v13 = vsel %vm16358_vm5, %v13698_v16, %v8285_v30  ;;  %v8287_v63 = vrot.slane %v8285_v30, 4  ;;  %v13700_v45 = vrot.slane %v8149_v17, 9  ;;  %v9153_v54 = vld [vmem:[#allocation3 + $0x10] sm:$0xf]  ;;  %v15853_v56 = vld [vmem:[#allocation4 + $0x160] sm:$0xff]  }
 0x41b   : > { %v18991_v51 = vsel %vm16358_vm5, %v8280_v12, %v8281_v18  ;;  %15303 = vmatpush3.bf16.msra.mxu0 %v15841_v11  ;;  %v8294_v62 = vrot.slane %v8292_v10, 4  ;;  %v8295_v26 = vrot.slane %v8148_v24, 5  ;;  %15343 = vmatpush3.bf16.msra.mxu1 %v18884_v37  ;;  %v8299_v9 = vrot.slane %v8150_v35, 5  ;;  %v9152_v37 = vld [vmem:[#allocation3 + $0xc] sm:$0xf]  ;;  %v15837_v11 = vld [vmem:[#allocation3 + $0x3c] sm:$0xff]  }
 0x41c   : > { %v13713_v19 = vcombine.low %v18983_v29, %v18991_v51  ;;  %v18998_v58 = vsel %vm16358_vm5, %v8287_v63, %v8288_v1  ;;  %15304 = vmatprep.subr.bf16.mxu0 %v15844_v23  ;;  %v19002_v61 = vsel %vm16358_vm5, %v13699_v59, %v8292_v10  ;;  %15344 = vmatprep.subr.bf16.mxu1 %v15848_v31  ;;  %v8302_v55 = vrot.slane %v8151_v38, 5  ;;  %v9154_v35 = vld [vmem:[#allocation3 + $0x14] sm:$0x1]  ;;  %v15854_v33 = vld [vmem:[#allocation4 + $0x100] sm:$0xff]   ;;  %v9157_v10 = vld [vmem:[#allocation3 + $0x20] sm:$0x1] }
 0x41d   : > { %v13714_v43 = vcombine.low %v18987_v13, %v18998_v58  ;;  %v19008_v28 = vsel %vm16358_vm5, %v8294_v62, %v8295_v26  ;;  %v8301_v2 = vrot.slane %v8299_v9, 4  ;;  %v13701_v49 = vrot.slane %v8152_v25, 9  ;;  %v9156_v1 = vld [vmem:[#allocation3 + $0x1c] sm:$0xf]  ;;  %v15856_v62 = vld [vmem:[#allocation4 + $0x158] sm:$0xff]   ;;  %v15861_v29 = vld [vmem:[#allocation4 + $0x148] sm:$0xff]  }
 0x41e   : > { %v13715_v15 = vcombine.low %v19002_v61, %v19008_v28  ;;  %v19014_v3 = vsel %vm16358_vm5, %v13700_v45, %v8299_v9  ;;  %v8306_v41 = vrot.slane %v8153_v52, 5  ;;  %v13702_v47 = vrot.slane %v8155_v34, 9  ;;  %v9158_v52 = vld [vmem:[#allocation3 + $0x24] sm:$0xf]  ;;  %v19048_v26 = vld [vmem:[#allocation4 + $0x1b8] sm:$0xff]   ;;  %v15839_v9 = vld [vmem:[#allocation3 + $0x48] sm:$0xff]  }
 0x41f   : > { %15305 = vmatpush3.bf16.msra.mxu0 %v15844_v23  ;;  %15345 = vmatpush3.bf16.msra.mxu1 %v15848_v31  ;;  %v19018_v27 = vsel %vm16358_vm5, %v8301_v2, %v8302_v55  ;;  %v8309_v21 = vrot.slane %v8154_v44, 5  ;;  %v8313_v14 = vrot.slane %v8156_v40, 5  ;;  %v9201_v60 = vshrl.u32 %v9152_v37, 16  ;;  %v9155_v23 = vld [vmem:[#allocation3 + $0x18] sm:$0xf] }
 0x420   : > { %v13716_v57 = vcombine.low %v19014_v3, %v19018_v27  ;;  %15306 = vmatprep.subr.bf16.mxu0 %v15849_v46  ;;  %v8308_v16 = vrot.slane %v8306_v41, 4  ;;  %15346 = vmatprep.subr.bf16.mxu1 %v15851_v53  ;;  %v8316_v17 = vrot.slane %v8157_v32, 5  ;;  %v9204_v18 = vshll.u32 %v9152_v37, 16  ;;  %v15840_v40 = vld [vmem:[#allocation3 + $0x54] sm:$0xff]   ;;  %v9159_v32 = vld [vmem:[#allocation3 + $0x28] sm:$0xf] }
 0x421   : > { %15267 = vmatmul.mubr.bf16.gmra.mxu1 %v15836_v20  ;;  %15227 = vmatmul.mubr.bf16.gmra.mxu0 %v13710_v6  ;;  %v19027_v31 = vsel %vm16358_vm5, %v13701_v49, %v8306_v41  ;;  %v8315_v30 = vrot.slane %v8313_v14, 4  ;;  %v9203_v24 = vrot.slane %v9201_v60, 4  ;;  %v9210_v59 = vshll.u32 %v9153_v54, 16 }
 0x422   : > { %15270 = vmatprep.mubr.bf16.mxu1 %v15837_v11  ;;  %15230 = vmatprep.mubr.bf16.mxu0 %v13711_v42  ;;  %v19034_v12 = vsel %vm16358_vm5, %v8308_v16, %v8309_v21  ;;  %v19038_v22 = vsel %vm16358_vm5, %v13702_v47, %v8313_v14  ;;  %v9206_v50 = vrot.slane %v9204_v18, 5  ;;  %v9214_v6 = vshrl.u32 %v9153_v54, 16  ;;  %v9160_v54 = vld [vmem:[#allocation3 + $0x2c] sm:$0x1]  ;;  %v9969_v18 = vld [vmem:[#allocation3 + $0xc] sm:$0xe] }
 0x423   : > { %15307 = vmatpush3.bf16.msra.mxu0 %v15849_v46  ;;  %15347 = vmatpush3.bf16.msra.mxu1 %v15851_v53  ;;  %v19042_v38 = vsel %vm16358_vm5, %v8315_v30, %v8316_v17  ;;  %v9212_v0 = vrot.slane %v9210_v59, 5  ;;  %v9220_v4 = vshll.u32 %v9154_v35, 16  ;;  %v9225_v42 = vshrl.u32 %v9155_v23, 16  ;;  %v15858_v16 = vld [vmem:[#allocation4 + $0x150] sm:$0xff]  }
 0x424   : > { %v13717_v63 = vcombine.low %v19027_v31, %v19034_v12  ;;  %15348 = vmatprep.subr.bf16.mxu1 %v15853_v56  ;;  %v13718_v45 = vcombine.low %v19038_v22, %v19042_v38  ;;  %15308 = vmatprep.subr.bf16.mxu0 %v15854_v33  ;;  %v9207_v25 = vor.u32 %v9206_v50, %v9203_v24  ;;  %v9216_v44 = vrot.slane %v9214_v6, 4  ;;  %v9970_v24 = vld [vmem:[#allocation3 + $0x10] sm:$0xf]  ;;  %v9983_v22 = vld [vmem:[#allocation3 + $0x44] sm:$0x1] }
 0x425   : > { %v9227_v46 = vrot.slane %v9225_v42, 4  ;;  %v9228_v34 = vshll.u32 %v9155_v23, 16  ;;  %v9234_v55 = vshll.u32 %v9156_v1, 16  ;;  %v9238_v53 = vshrl.u32 %v9156_v1, 16 }
 0x426   : > { %v9208_v37 = vrot.slane %v9207_v25, 4  ;;  %v9217_v2 = vor.u32 %v9216_v44, %v9212_v0  ;;  %v9244_v49 = vshll.u32 %v9157_v10, 16  ;;  %v9249_v20 = vshrl.u32 %v9158_v52, 16  ;;  %v9971_v10 = vld [vmem:[#allocation3 + $0x14] sm:$0x1] }
 0x427   : > { %15349 = vmatpush3.bf16.msra.mxu1 %v15853_v56  ;;  %15309 = vmatpush3.bf16.msra.mxu0 %v15854_v33  ;;  %v9230_v11 = vrot.slane %v9228_v34, 5  ;;  %v9236_v41 = vrot.slane %v9234_v55, 5  ;;  %v9240_v47 = vrot.slane %v9238_v53, 4  ;;  %v9252_v21 = vshll.u32 %v9158_v52, 16  ;;  %v9163_v34 = vld [vmem:[#allocation3 + $0x38] sm:$0x1] }
 0x428   : > { %v9213_v14 = vsel %vm16178_vm2, %v9208_v37, %v9212_v0  ;;  %v9218_v35 = vrot.slane %v9217_v2, 4  ;;  %v9222_v60 = vrot.slane %v9220_v4, 5  ;;  %15350 = vmatprep.subr.bf16.mxu1 %v15856_v62  ;;  %15390 = vmatprep.subr.bf16.mxu0 %v19048_v26  ;;  %v9251_v17 = vrot.slane %v9249_v20, 4  ;;  %v9161_v4 = vld [vmem:[#allocation3 + $0x30] sm:$0xf]  ;;  %v15842_v55 = vld [vmem:[#allocation3 + $0x60] sm:$0xff]  }
 0x429   : > { %15271 = vmatmul.mubr.bf16.gmra.mxu1 %v15839_v9  ;;  %15231 = vmatmul.mubr.bf16.gmra.mxu0 %v13712_v8  ;;  %v9231_v56 = vor.u32 %v9230_v11, %v9227_v46  ;;  %v9241_v33 = vor.u32 %v9240_v47, %v9236_v41  ;;  %v9254_v23 = vrot.slane %v9252_v21, 5  ;;  %v9258_v30 = vshll.u32 %v9159_v32, 16  ;;  %v9164_v47 = vld [vmem:[#allocation3 + $0x3c] sm:$0xf] }
 0x42a   : > { %15274 = vmatprep.mubr.bf16.mxu1 %v15840_v40  ;;  %15234 = vmatprep.mubr.bf16.mxu0 %v13713_v19  ;;  %v9223_v59 = vsel %vm16178_vm2, %v9218_v35, %v9222_v60  ;;  %v9246_v50 = vrot.slane %v9244_v49, 5  ;;  %v9262_v6 = vshrl.u32 %v9159_v32, 16  ;;  %v9268_v1 = vshll.u32 %v9160_v54, 16  ;;  %v9162_v19 = vld [vmem:[#allocation3 + $0x34] sm:$0xf]  ;;  %v15843_v49 = vld [vmem:[#allocation3 + $0x6c] sm:$0xff]  }
 0x42b   : > { %15351 = vmatpush3.bf16.msra.mxu1 %v15856_v62  ;;  %v9232_v36 = vrot.slane %v9231_v56, 4  ;;  %v9242_v7 = vrot.slane %v9241_v33, 4  ;;  %v9255_v8 = vor.u32 %v9254_v23, %v9251_v17  ;;  %v13775_v0 = vrot.slane %v9969_v18, 9  ;;  %v9165_v17 = vld [vmem:[#allocation3 + $0x40] sm:$0xf] }
 0x42c   : > { %v19061_v42 = vcombine.low %v9213_v14, %v9223_v59  ;;  %15352 = vmatprep.subr.bf16.mxu1 %v15858_v16  ;;  %v9260_v52 = vrot.slane %v9258_v30, 5  ;;  %v9264_v25 = vrot.slane %v9262_v6, 4  ;;  %v10067_v51 = vrot.slane %v9970_v24, 5  ;;  %v15862_v14 = vld [vmem:[#allocation4 + $0x140] sm:$0xff]   ;;  %v9166_v23 = vld [vmem:[#allocation3 + $0x44] sm:$0x1] }
 0x42d   : > { %v9237_v44 = vsel %vm16178_vm2, %v9232_v36, %v9236_v41  ;;  %v9247_v9 = vsel %vm16178_vm2, %v9242_v7, %v9246_v50  ;;  %v9256_v62 = vrot.slane %v9255_v8, 4  ;;  %v9270_v46 = vrot.slane %v9268_v1, 5  ;;  %v19089_v8 = vld [vmem:[#allocation4 + $0x1f8] sm:$0xff]  }
 0x42e   : > { %v19067_v53 = vcombine.low %v9237_v44, %v9247_v9  ;;  %v9265_v40 = vor.u32 %v9264_v25, %v9260_v52  ;;  %v10069_v37 = vrot.slane %v10067_v51, 4  ;;  %v10070_v2 = vrot.slane %v9971_v10, 5  ;;  %v9973_v10 = vld [vmem:[#allocation3 + $0x1c] sm:$0xf] }
 0x42f   : > { %15353 = vmatpush3.bf16.msra.mxu1 %v15858_v16  ;;  %v19071_v32 = vsel %vm16358_vm5, %v13775_v0, %v10067_v51  ;;  %v9273_v20 = vshrl.u32 %v9161_v4, 16  ;;  %v9276_v11 = vshll.u32 %v9161_v4, 16  ;;  %v9282_v41 = vshll.u32 %v9162_v19, 16  ;;  %v9975_v51 = vld [vmem:[#allocation3 + $0x24] sm:$0xe] }
 0x430   : > { %v9266_v54 = vrot.slane %v9265_v40, 4  ;;  %15354 = vmatprep.subr.bf16.mxu1 %v15861_v29  ;;  %v19075_v21 = vsel %vm16358_vm5, %v10069_v37, %v10070_v2  ;;  %v9286_v35 = vshrl.u32 %v9162_v19, 16  ;;  %v9292_v60 = vshll.u32 %v9163_v34, 16  ;;  %v9167_v2 = vld [vmem:[#allocation3 + $0x48] sm:$0xf] }
 0x431   : > { %15275 = vmatmul.mubr.bf16.gmra.mxu1 %v15842_v55  ;;  %15235 = vmatmul.mubr.bf16.gmra.mxu0 %v13714_v43  ;;  %v9261_v16 = vsel %vm16178_vm2, %v9256_v62, %v9260_v52  ;;  %v9275_v18 = vrot.slane %v9273_v20, 4  ;;  %v9278_v56 = vrot.slane %v9276_v11, 5  ;;  %v9284_v33 = vrot.slane %v9282_v41, 5  ;;  %v9972_v43 = vld [vmem:[#allocation3 + $0x18] sm:$0xe] }
 0x432   : > { %15278 = vmatprep.mubr.bf16.mxu1 %v15843_v49  ;;  %15238 = vmatprep.mubr.bf16.mxu0 %v13715_v15  ;;  %v9271_v30 = vsel %vm16178_vm2, %v9266_v54, %v9270_v46  ;;  %v13791_v24 = vcombine.low %v19071_v32, %v19075_v21  ;;  %v9288_v13 = vrot.slane %v9286_v35, 4  ;;  %v9297_v58 = vshrl.u32 %v9164_v47, 16  ;;  %v9974_v15 = vld [vmem:[#allocation3 + $0x20] sm:$0x1]  ;;  %v9976_v62 = vld [vmem:[#allocation3 + $0x28] sm:$0xf] }
 0x433   : > { %15355 = vmatpush3.bf16.msra.mxu1 %v15861_v29  ;;  %v9279_v59 = vor.u32 %v9278_v56, %v9275_v18  ;;  %v9294_v50 = vrot.slane %v9292_v60, 5  ;;  %v9300_v6 = vshll.u32 %v9164_v47, 16  ;;  %v9306_v1 = vshll.u32 %v9165_v17, 16  ;;  %v15845_v46 = vld [vmem:[#allocation3 + $0x78] sm:$0xff]   ;;  %v15847_v49 = vld [vmem:[#allocation3 + $0x84] sm:$0xff]  }
 0x434   : > { %15356 = vmatprep.subr.bf16.mxu1 %v15862_v14  ;;  %v9289_v36 = vor.u32 %v9288_v13, %v9284_v33  ;;  %v9299_v7 = vrot.slane %v9297_v58, 4  ;;  %v9310_v61 = vshrl.u32 %v9165_v17, 16  ;;  %v9316_v28 = vshll.u32 %v9166_v23, 16  ;;  %v9977_v47 = vld [vmem:[#allocation3 + $0x2c] sm:$0x1] }
 0x435   : > { %v9280_v0 = vrot.slane %v9279_v59, 4  ;;  %v9302_v4 = vrot.slane %v9300_v6, 5  ;;  %v9308_v52 = vrot.slane %v9306_v1, 5  ;;  %v13776_v25 = vrot.slane %v9972_v43, 9  ;;  %v9169_v13 = vld [vmem:[#allocation3 + $0x50] sm:$0x1] }
 0x436   : > { %v19091_v19 = vcombine.low %v9261_v16, %v9271_v30  ;;  %v9290_v29 = vrot.slane %v9289_v36, 4  ;;  %v9312_v44 = vrot.slane %v9310_v61, 4  ;;  %v10074_v9 = vrot.slane %v9973_v10, 5  ;;  %v9168_v16 = vld [vmem:[#allocation3 + $0x4c] sm:$0xf]  ;;  %v15850_v61 = vld [vmem:[#allocation3 + $0x90] sm:$0xff]  }
 0x437   : > { %15357 = vmatpush3.bf16.msra.mxu1 %v15862_v14  ;;  %v9285_v34 = vsel %vm16178_vm2, %v9280_v0, %v9284_v33  ;;  %v9303_v55 = vor.u32 %v9302_v4, %v9299_v7  ;;  %v9318_v40 = vrot.slane %v9316_v28, 5  ;;  %v10077_v37 = vrot.slane %v9974_v15, 5  ;;  %v9170_v58 = vld [vmem:[#allocation3 + $0x54] sm:$0xf]  ;;  %v9171_v59 = vld [vmem:[#allocation3 + $0x58] sm:$0xf] }
 0x438   : > { %v9295_v20 = vsel %vm16178_vm2, %v9290_v29, %v9294_v50  ;;  %v9313_v11 = vor.u32 %v9312_v44, %v9308_v52  ;;  %v10076_v41 = vrot.slane %v10074_v9, 4  ;;  %v13777_v54 = vrot.slane %v9975_v51, 9  ;;  %15438 = vmatprep.subr.bf16.mxu1 %v19089_v8  ;;  %v9172_v36 = vld [vmem:[#allocation3 + $0x5c] sm:$0x1]  ;;  %v9978_v7 = vld [vmem:[#allocation3 + $0x30] sm:$0xe] }
 0x439   : > { %15279 = vmatmul.mubr.bf16.gmra.mxu1 %v15845_v46  ;;  %15239 = vmatmul.mubr.bf16.gmra.mxu0 %v13716_v57  ;;  %v19101_v14 = vcombine.low %v9285_v34, %v9295_v20  ;;  %v9304_v35 = vrot.slane %v9303_v55, 4  ;;  %v19105_v60 = vsel %vm16358_vm5, %v13776_v25, %v10074_v9  ;;  %v10081_v17 = vrot.slane %v9976_v62, 5  ;;  %v15852_v25 = vld [vmem:[#allocation3 + $0x9c] sm:$0xff]   ;;  %v9980_v62 = vld [vmem:[#allocation3 + $0x38] sm:$0x1] }
 0x43a   : > { %15282 = vmatprep.mubr.bf16.mxu1 %v15847_v49  ;;  %15242 = vmatprep.mubr.bf16.mxu0 %v13717_v63  ;;  %v9314_v18 = vrot.slane %v9313_v11, 4  ;;  %v19112_v56 = vsel %vm16358_vm5, %v10076_v41, %v10077_v37  ;;  %v9321_v3 = vshrl.u32 %v9167_v2, 16  ;;  %v9324_v27 = vshll.u32 %v9167_v2, 16  ;;  %v9981_v37 = vld [vmem:[#allocation3 + $0x3c] sm:$0xe] }
 0x43b   : > { %v9309_v57 = vsel %vm16178_vm2, %v9304_v35, %v9308_v52  ;;  %v13792_v33 = vcombine.low %v19105_v60, %v19112_v56  ;;  %v10083_v23 = vrot.slane %v10081_v17, 4  ;;  %v10084_v30 = vrot.slane %v9977_v47, 5  ;;  %v9979_v52 = vld [vmem:[#allocation3 + $0x34] sm:$0xf]  ;;  %v9982_v41 = vld [vmem:[#allocation3 + $0x40] sm:$0xf] }
 0x43c   : > { %v9319_v31 = vsel %vm16178_vm2, %v9314_v18, %v9318_v40  ;;  %v9323_v12 = vrot.slane %v9321_v3, 4  ;;  %v9326_v63 = vrot.slane %v9324_v27, 5  ;;  %v9330_v43 = vshll.u32 %v9168_v16, 16  ;;  %v19216_v60 = vld [vmem:[#allocation4 + $0x188] sm:$0xff]  }
 0x43d   : > { %v19120_v50 = vcombine.low %v9309_v57, %v9319_v31  ;;  %v19124_v6 = vsel %vm16358_vm5, %v13777_v54, %v10081_v17  ;;  %v19128_v1 = vsel %vm16358_vm5, %v10083_v23, %v10084_v30  ;;  %v9334_v10 = vshrl.u32 %v9168_v16, 16  ;;  %v9173_v16 = vld [vmem:[#allocation3 + $0x60] sm:$0xf]  ;;  %v9174_v31 = vld [vmem:[#allocation3 + $0x64] sm:$0xf] }
 0x43e   : > { %v9327_v28 = vor.u32 %v9326_v63, %v9323_v12  ;;  %v9332_v15 = vrot.slane %v9330_v43, 5  ;;  %v9340_v0 = vshll.u32 %v9169_v13, 16  ;;  %v9345_v4 = vshrl.u32 %v9170_v58, 16  ;;  %v19218_v56 = vld [vmem:[#allocation4 + $0x1e8] sm:$0xff]  }
 0x43f   : > { %v13793_v51 = vcombine.low %v19124_v6, %v19128_v1  ;;  %v9336_v29 = vrot.slane %v9334_v10, 4  ;;  %v9348_v44 = vshll.u32 %v9170_v58, 16  ;;  %v9354_v9 = vshll.u32 %v9171_v59, 16  ;;  %v9995_v6 = vld [vmem:[#allocation3 + $0x74] sm:$0x1] }
 0x440   : > { %v9328_v46 = vrot.slane %v9327_v28, 4  ;;  %v9347_v34 = vrot.slane %v9345_v4, 4  ;;  %v9358_v55 = vshrl.u32 %v9171_v59, 16  ;;  %v9364_v40 = vshll.u32 %v9172_v36, 16  ;;  %v9175_v36 = vld [vmem:[#allocation3 + $0x68] sm:$0x1] }
 0x441   : > { %15283 = vmatmul.mubr.bf16.gmra.mxu1 %v15850_v61  ;;  %15243 = vmatmul.mubr.bf16.gmra.mxu0 %v13718_v45  ;;  %v9337_v2 = vor.u32 %v9336_v29, %v9332_v15  ;;  %v9350_v49 = vrot.slane %v9348_v44, 5  ;;  %v9356_v20 = vrot.slane %v9354_v9, 5  ;;  %v13778_v11 = vrot.slane %v9978_v7, 9  ;;  %v9176_v7 = vld [vmem:[#allocation3 + $0x6c] sm:$0xf]  ;;  %v15857_v28 = vld [vmem:[#allocation3 + $0xb4] sm:$0xff]  }
 0x442   : > { %15286 = vmatprep.mubr.bf16.mxu1 %v15852_v25  ;;  %15310 = vmatprep.mubr.bf16.mxu0 %v19061_v42  ;;  %v9333_v47 = vsel %vm16178_vm2, %v9328_v46, %v9332_v15  ;;  %v9342_v54 = vrot.slane %v9340_v0, 5  ;;  %v9360_v35 = vrot.slane %v9358_v55, 4  ;;  %v10088_v17 = vrot.slane %v9979_v52, 5  ;;  %v15855_v61 = vld [vmem:[#allocation3 + $0xa8] sm:$0xff]   ;;  %v9177_v25 = vld [vmem:[#allocation3 + $0x70] sm:$0xf] }
 0x443   : > { %v9338_v18 = vrot.slane %v9337_v2, 4  ;;  %v9351_v3 = vor.u32 %v9350_v49, %v9347_v34  ;;  %v9366_v27 = vrot.slane %v9364_v40, 5  ;;  %v13779_v38 = vrot.slane %v9981_v37, 9  ;;  %v15863_v29 = vld [vmem:[#allocation4 + $0x1b0] sm:$0xff]   ;;  %v9178_v34 = vld [vmem:[#allocation3 + $0x74] sm:$0x1] }
 0x444   : > { %v9361_v45 = vor.u32 %v9360_v35, %v9356_v20  ;;  %v10090_v57 = vrot.slane %v10088_v17, 4  ;;  %v10091_v23 = vrot.slane %v9980_v62, 5  ;;  %v10095_v30 = vrot.slane %v9982_v41, 5  ;;  %v9984_v49 = vld [vmem:[#allocation3 + $0x48] sm:$0xe] }
 0x445   : > { %v9343_v13 = vsel %vm16178_vm2, %v9338_v18, %v9342_v54  ;;  %v9352_v42 = vrot.slane %v9351_v3, 4  ;;  %v19142_v58 = vsel %vm16358_vm5, %v13778_v11, %v10088_v17  ;;  %v9369_v12 = vshrl.u32 %v9173_v16, 16  ;;  %v15864_v11 = vld [vmem:[#allocation4 + $0x1a8] sm:$0xff]   ;;  %v9986_v35 = vld [vmem:[#allocation3 + $0x50] sm:$0x1] }
 0x446   : > { %v19144_v63 = vcombine.low %v9333_v47, %v9343_v13  ;;  %v9362_v43 = vrot.slane %v9361_v45, 4  ;;  %v19148_v59 = vsel %vm16358_vm5, %v10090_v57, %v10091_v23  ;;  %v10098_v10 = vrot.slane %v9983_v22, 5  ;;  %v9987_v45 = vld [vmem:[#allocation3 + $0x54] sm:$0xe]  ;;  %v15860_v57 = vld [vmem:[#allocation3 + $0xc0] sm:$0xff]  }
 0x447   : > { %v9357_v15 = vsel %vm16178_vm2, %v9352_v42, %v9356_v20  ;;  %v19154_v0 = vsel %vm16358_vm5, %v13779_v38, %v10095_v30  ;;  %v10097_v4 = vrot.slane %v10095_v30, 4  ;;  %v9371_v52 = vrot.slane %v9369_v12, 4  ;;  %v9985_v20 = vld [vmem:[#allocation3 + $0x4c] sm:$0xf]  ;;  %v9185_v1 = vld [vmem:[#allocation3 + $0x90] sm:$0xf] }
 0x448   : > { %v9367_v44 = vsel %vm16178_vm2, %v9362_v43, %v9366_v27  ;;  %v9372_v9 = vshll.u32 %v9173_v16, 16  ;;  %v9378_v62 = vshll.u32 %v9174_v31, 16  ;;  %v9382_v46 = vshrl.u32 %v9174_v31, 16  ;;  %v9988_v31 = vld [vmem:[#allocation3 + $0x58] sm:$0xf] }
 0x449   : > { %15287 = vmatmul.mubr.bf16.gmra.mxu1 %v15855_v61  ;;  %15311 = vmatmul.mubr.bf16.vlgmr.msra.gmra.mxu0 %v19067_v53  ;;  %v19159_v55 = vcombine.low %v9357_v15, %v9367_v44  ;;  %v13794_v40 = vcombine.low %v19142_v58, %v19148_v59  ;;  %v9388_v37 = vshll.u32 %v9175_v36, 16  ;;  %v9393_v2 = vshrl.u32 %v9176_v7, 16  ;;  %v9179_v36 = vld [vmem:[#allocation3 + $0x78] sm:$0xf] }
 0x44a   : > { %15290 = vmatprep.mubr.bf16.mxu1 %v15857_v28  ;;  %15314 = vmatprep.mubr.bf16.mxu0 %v19091_v19  ;;  %v19166_v41 = vsel %vm16358_vm5, %v10097_v4, %v10098_v10  ;;  %v9374_v47 = vrot.slane %v9372_v9, 5  ;;  %v9380_v54 = vrot.slane %v9378_v62, 5  ;;  %v9384_v53 = vrot.slane %v9382_v46, 4  ;;  %v9180_v62 = vld [vmem:[#allocation3 + $0x7c] sm:$0xf] }
 0x44b   : > { %15391 = vmatpush3.bf16.msra.mxu0 %v19048_v26  ;;  %v9390_v17 = vrot.slane %v9388_v37, 5  ;;  %v9395_v16 = vrot.slane %v9393_v2, 4  ;;  %v9396_v18 = vshll.u32 %v9176_v7, 16  ;;  %v9402_v3 = vshll.u32 %v9177_v25, 16 }
 0x44c   : > { %15392 = vmatprep.subr.bf16.mxu0 %v15863_v29  ;;  %v9375_v27 = vor.u32 %v9374_v47, %v9371_v52  ;;  %v9385_v22 = vor.u32 %v9384_v53, %v9380_v54  ;;  %v9406_v38 = vshrl.u32 %v9177_v25, 16  ;;  %v9412_v19 = vshll.u32 %v9178_v34, 16  ;;  %v15865_v25 = vld [vmem:[#allocation4 + $0x1a0] sm:$0xff]  }
 0x44d   : > { %v9398_v23 = vrot.slane %v9396_v18, 5  ;;  %v9404_v30 = vrot.slane %v9402_v3, 5  ;;  %v13780_v13 = vrot.slane %v9984_v49, 9  ;;  %v10102_v42 = vrot.slane %v9985_v20, 5  ;;  %v9181_v49 = vld [vmem:[#allocation3 + $0x80] sm:$0x1] }
 0x44e   : > { %v9376_v12 = vrot.slane %v9375_v27, 4  ;;  %v9386_v43 = vrot.slane %v9385_v22, 4  ;;  %v9408_v10 = vrot.slane %v9406_v38, 4  ;;  %v9414_v26 = vrot.slane %v9412_v19, 5  ;;  %v9182_v20 = vld [vmem:[#allocation3 + $0x84] sm:$0xf] }
 0x44f   : > { %15393 = vmatpush3.bf16.msra.mxu0 %v15863_v29  ;;  %v13795_v7 = vcombine.low %v19154_v0, %v19166_v41  ;;  %v9399_v61 = vor.u32 %v9398_v23, %v9395_v16  ;;  %v10104_v28 = vrot.slane %v10102_v42, 4  ;;  %v10105_v15 = vrot.slane %v9986_v35, 5  ;;  %v9989_v29 = vld [vmem:[#allocation3 + $0x5c] sm:$0x1]  ;;  %v9183_v35 = vld [vmem:[#allocation3 + $0x88] sm:$0xf] }
 0x450   : > { %15394 = vmatprep.subr.bf16.mxu0 %v15864_v11  ;;  %v9381_v4 = vsel %vm16178_vm2, %v9376_v12, %v9380_v54  ;;  %v9391_v52 = vsel %vm16178_vm2, %v9386_v43, %v9390_v17  ;;  %v9409_v44 = vor.u32 %v9408_v10, %v9404_v30  ;;  %v19177_v9 = vsel %vm16358_vm5, %v13780_v13, %v10102_v42  ;;  %v9184_v27 = vld [vmem:[#allocation3 + $0x8c] sm:$0x1]  ;;  %v15866_v22 = vld [vmem:[#allocation4 + $0x198] sm:$0xff]   ;;  %v9990_v38 = vld [vmem:[#allocation3 + $0x60] sm:$0xe] }
 0x451   : > { %15291 = vmatmul.mubr.bf16.gmra.mxu1 %v15860_v57  ;;  %15315 = vmatmul.mubr.bf16.gmra.mxu0 %v19101_v14  ;;  %v9400_v46 = vrot.slane %v9399_v61, 4  ;;  %v19182_v34 = vsel %vm16358_vm5, %v10104_v28, %v10105_v15  ;;  %v13781_v37 = vrot.slane %v9987_v45, 9  ;;  %v10109_v2 = vrot.slane %v9988_v31, 5  ;;  %v15867_v31 = vld [vmem:[#allocation4 + $0x190] sm:$0xff]   ;;  %v19263_v0 = vld [vmem:[#allocation4 + $0x238] sm:$0xff]  }
 0x452   : > { %15358 = vmatprep.mubr.bf16.mxu1 %v13791_v24  ;;  %15318 = vmatprep.mubr.bf16.mxu0 %v19120_v50  ;;  %v19188_v47 = vcombine.low %v9381_v4, %v9391_v52  ;;  %v9410_v54 = vrot.slane %v9409_v44, 4  ;;  %v13796_v14 = vcombine.low %v19177_v9, %v19182_v34  ;;  %v9417_v53 = vshrl.u32 %v9179_v36, 16  ;;  %v9992_v52 = vld [vmem:[#allocation3 + $0x68] sm:$0x1] }
 0x453   : > { %15395 = vmatpush3.bf16.msra.mxu0 %v15864_v11  ;;  %v9405_v17 = vsel %vm16178_vm2, %v9400_v46, %v9404_v30  ;;  %v10111_v16 = vrot.slane %v10109_v2, 4  ;;  %v10112_v18 = vrot.slane %v9989_v29, 5  ;;  %v9420_v3 = vshll.u32 %v9179_v36, 16  ;;  %v9991_v36 = vld [vmem:[#allocation3 + $0x64] sm:$0xf]  ;;  %v15869_v44 = vld [vmem:[#allocation4 + $0x1f0] sm:$0xff]  }
 0x454   : > { %15396 = vmatprep.subr.bf16.mxu0 %v15865_v25  ;;  %v9415_v32 = vsel %vm16178_vm2, %v9410_v54, %v9414_v26  ;;  %v9419_v21 = vrot.slane %v9417_v53, 4  ;;  %v9426_v24 = vshll.u32 %v9180_v62, 16  ;;  %v9430_v50 = vshrl.u32 %v9180_v62, 16  ;;  %v9994_v53 = vld [vmem:[#allocation3 + $0x70] sm:$0xf] }
 0x455   : > { %v19196_v19 = vcombine.low %v9405_v17, %v9415_v32  ;;  %v19200_v11 = vsel %vm16358_vm5, %v13781_v37, %v10109_v2  ;;  %v19204_v45 = vsel %vm16358_vm5, %v10111_v16, %v10112_v18  ;;  %v9422_v57 = vrot.slane %v9420_v3, 5  ;;  %v9993_v37 = vld [vmem:[#allocation3 + $0x6c] sm:$0xe]  ;;  %v9186_v3 = vld [vmem:[#allocation3 + $0x94] sm:$0xf] }
 0x456   : > { %v9428_v23 = vrot.slane %v9426_v24, 5  ;;  %v9432_v30 = vrot.slane %v9430_v50, 4  ;;  %v9436_v13 = vshll.u32 %v9181_v49, 16  ;;  %v9441_v42 = vshrl.u32 %v9182_v20, 16  ;;  %v9187_v50 = vld [vmem:[#allocation3 + $0x98] sm:$0x1] }
 0x457   : > { %15397 = vmatpush3.bf16.msra.mxu0 %v15865_v25  ;;  %v13797_v12 = vcombine.low %v19200_v11, %v19204_v45  ;;  %v9423_v43 = vor.u32 %v9422_v57, %v9419_v21  ;;  %v9444_v10 = vshll.u32 %v9182_v20, 16  ;;  %v9450_v26 = vshll.u32 %v9183_v35, 16  ;;  %v9196_v45 = vld [vmem:[#allocation3 + $0xbc] sm:$0x1] }
 0x458   : > { %v9433_v61 = vor.u32 %v9432_v30, %v9428_v23  ;;  %15398 = vmatprep.subr.bf16.mxu0 %v15866_v22  ;;  %v9443_v28 = vrot.slane %v9441_v42, 4  ;;  %v9454_v15 = vshrl.u32 %v9183_v35, 16  ;;  %v9460_v4 = vshll.u32 %v9184_v27, 16  ;;  %v15872_v30 = vld [vmem:[#allocation4 + $0x1e0] sm:$0xff]  }
 0x459   : > { %15359 = vmatmul.mubr.bf16.vlgmr.msra.gmra.mxu1 %v13792_v33  ;;  %15319 = vmatmul.mubr.bf16.gmra.mxu0 %v19144_v63  ;;  %v9424_v25 = vrot.slane %v9423_v43, 4  ;;  %v9446_v29 = vrot.slane %v9444_v10, 5  ;;  %v9452_v62 = vrot.slane %v9450_v26, 5  ;;  %v13782_v46 = vrot.slane %v9990_v38, 9  ;;  %v9189_v26 = vld [vmem:[#allocation3 + $0xa0] sm:$0xf] }
 0x45a   : > { %15362 = vmatprep.mubr.bf16.mxu1 %v13793_v51  ;;  %15322 = vmatprep.mubr.bf16.mxu0 %v19159_v55  ;;  %v9434_v2 = vrot.slane %v9433_v61, 4  ;;  %v9438_v49 = vrot.slane %v9436_v13, 5  ;;  %v9456_v20 = vrot.slane %v9454_v15, 4  ;;  %v10116_v54 = vrot.slane %v9991_v36, 5 }
 0x45b   : > { %v9429_v33 = vsel %vm16178_vm2, %v9424_v25, %v9428_v23  ;;  %v9447_v63 = vor.u32 %v9446_v29, %v9443_v28  ;;  %v9462_v35 = vrot.slane %v9460_v4, 5  ;;  %v10119_v17 = vrot.slane %v9992_v52, 5  ;;  %15399 = vmatpush3.bf16.msra.mxu0 %v15866_v22  ;;  %15439 = vmatpush3.bf16.msra.mxu1 %v19089_v8  ;;  %v9188_v22 = vld [vmem:[#allocation3 + $0x9c] sm:$0xf]  ;;  %v9190_v4 = vld [vmem:[#allocation3 + $0xa4] sm:$0x1] }
 0x45c   : > { %v9439_v51 = vsel %vm16178_vm2, %v9434_v2, %v9438_v49  ;;  %v9457_v55 = vor.u32 %v9456_v20, %v9452_v62  ;;  %v10118_v16 = vrot.slane %v10116_v54, 4  ;;  %v13783_v18 = vrot.slane %v9993_v37, 9  ;;  %15400 = vmatprep.subr.bf16.mxu0 %v15867_v31  ;;  %15440 = vmatprep.subr.bf16.mxu1 %v15869_v44  ;;  %v15873_v52 = vld [vmem:[#allocation4 + $0x180] sm:$0xff]   ;;  %v9999_v37 = vld [vmem:[#allocation3 + $0x84] sm:$0xe]  ;;  %v15875_v2 = vld [vmem:[#allocation4 + $0x1d8] sm:$0xff]  }
 0x45d   : > { %v19225_v27 = vcombine.low %v9429_v33, %v9439_v51  ;;  %v9448_v32 = vrot.slane %v9447_v63, 4  ;;  %v19229_v21 = vsel %vm16358_vm5, %v13782_v46, %v10116_v54  ;;  %v10123_v24 = vrot.slane %v9994_v53, 5  ;;  %v9997_v46 = vld [vmem:[#allocation3 + $0x7c] sm:$0xf]  ;;  %v9998_v33 = vld [vmem:[#allocation3 + $0x80] sm:$0x1] }
 0x45e   : > { %v9458_v8 = vrot.slane %v9457_v55, 4  ;;  %v19233_v38 = vsel %vm16358_vm5, %v10118_v16, %v10119_v17  ;;  %v9465_v57 = vshrl.u32 %v9185_v1, 16  ;;  %v9468_v23 = vshll.u32 %v9185_v1, 16  ;;  %v10000_v63 = vld [vmem:[#allocation3 + $0x88] sm:$0xf] }
 0x45f   : > { %v9453_v13 = vsel %vm16178_vm2, %v9448_v32, %v9452_v62  ;;  %v13798_v42 = vcombine.low %v19229_v21, %v19233_v38  ;;  %v10125_v43 = vrot.slane %v10123_v24, 4  ;;  %v10126_v10 = vrot.slane %v9995_v6, 5  ;;  %15401 = vmatpush3.bf16.msra.mxu0 %v15867_v31  ;;  %15441 = vmatpush3.bf16.msra.mxu1 %v15869_v44  ;;  %v9996_v62 = vld [vmem:[#allocation3 + $0x78] sm:$0xe]  ;;  %v9191_v17 = vld [vmem:[#allocation3 + $0xa8] sm:$0xf] }
 0x460   : > { %v9463_v36 = vsel %vm16178_vm2, %v9458_v8, %v9462_v35  ;;  %v9467_v61 = vrot.slane %v9465_v57, 4  ;;  %v9470_v28 = vrot.slane %v9468_v23, 5  ;;  %v9474_v15 = vshll.u32 %v9186_v3, 16  ;;  %15402 = vmatprep.subr.bf16.mxu0 %v19216_v60  ;;  %15442 = vmatprep.subr.bf16.mxu1 %v19218_v56 }
 0x461   : > { %15363 = vmatmul.mubr.bf16.gmra.mxu1 %v13794_v40  ;;  %15323 = vmatmul.mubr.bf16.gmra.mxu0 %v19188_v47  ;;  %v13761_v31 = vcombine.low %v9453_v13, %v9463_v36  ;;  %v19249_v44 = vsel %vm16358_vm5, %v13783_v18, %v10123_v24  ;;  %v19253_v25 = vsel %vm16358_vm5, %v10125_v43, %v10126_v10  ;;  %v9478_v29 = vshrl.u32 %v9186_v3, 16  ;;  %v15876_v43 = vld [vmem:[#allocation4 + $0x1d0] sm:$0xff]  }
 0x462   : > { %15366 = vmatprep.mubr.bf16.mxu1 %v13795_v7  ;;  %15326 = vmatprep.mubr.bf16.mxu0 %v19196_v19  ;;  %v9471_v58 = vor.u32 %v9470_v28, %v9467_v61  ;;  %v9476_v59 = vrot.slane %v9474_v15, 5  ;;  %v9484_v40 = vshll.u32 %v9187_v50, 16  ;;  %v9489_v47 = vshrl.u32 %v9188_v22, 16  ;;  %v10001_v50 = vld [vmem:[#allocation3 + $0x8c] sm:$0x1] }
 0x463   : > { %v13799_v49 = vcombine.low %v19249_v44, %v19253_v25  ;;  %v9480_v20 = vrot.slane %v9478_v29, 4  ;;  %v9492_v54 = vshll.u32 %v9188_v22, 16  ;;  %v9498_v53 = vshll.u32 %v9189_v26, 16  ;;  %15403 = vmatpush3.bf16.msra.mxu0 %v19216_v60  ;;  %15443 = vmatpush3.bf16.msra.mxu1 %v19218_v56  ;;  %v9192_v36 = vld [vmem:[#allocation3 + $0xac] sm:$0xf] }
 0x464   : > { %v9472_v41 = vrot.slane %v9471_v58, 4  ;;  %v9491_v7 = vrot.slane %v9489_v47, 4  ;;  %v9502_v19 = vshrl.u32 %v9189_v26, 16  ;;  %v9508_v35 = vshll.u32 %v9190_v4, 16  ;;  %15444 = vmatprep.subr.bf16.mxu1 %v15872_v30  ;;  %15404 = vmatprep.subr.bf16.mxu0 %v15873_v52  ;;  %v9193_v61 = vld [vmem:[#allocation3 + $0xb0] sm:$0x1] }
 0x465   : > { %v9481_v6 = vor.u32 %v9480_v20, %v9476_v59  ;;  %v9494_v1 = vrot.slane %v9492_v54, 5  ;;  %v9500_v51 = vrot.slane %v9498_v53, 5  ;;  %v13784_v55 = vrot.slane %v9996_v62, 9  ;;  %v9194_v15 = vld [vmem:[#allocation3 + $0xb4] sm:$0xf] }
 0x466   : > { %v9477_v16 = vsel %vm16178_vm2, %v9472_v41, %v9476_v59  ;;  %v9486_v18 = vrot.slane %v9484_v40, 5  ;;  %v9504_v60 = vrot.slane %v9502_v19, 4  ;;  %v10130_v3 = vrot.slane %v9997_v46, 5  ;;  %v9195_v4 = vld [vmem:[#allocation3 + $0xb8] sm:$0xf]  ;;  %v15880_v59 = vld [vmem:[#allocation4 + $0x1c8] sm:$0xff]  }
 0x467   : > { %v9482_v56 = vrot.slane %v9481_v6, 4  ;;  %v9495_v32 = vor.u32 %v9494_v1, %v9491_v7  ;;  %v9510_v24 = vrot.slane %v9508_v35, 5  ;;  %v13785_v22 = vrot.slane %v9999_v37, 9  ;;  %15445 = vmatpush3.bf16.msra.mxu1 %v15872_v30  ;;  %15405 = vmatpush3.bf16.msra.mxu0 %v15873_v52  ;;  %v10002_v54 = vld [vmem:[#allocation3 + $0x90] sm:$0xe]  ;;  %v15881_v7 = vld [vmem:[#allocation4 + $0x1c0] sm:$0xff]  }
 0x468   : > { %v9505_v8 = vor.u32 %v9504_v60, %v9500_v51  ;;  %v10132_v57 = vrot.slane %v10130_v3, 4  ;;  %v10133_v23 = vrot.slane %v9998_v33, 5  ;;  %v10137_v13 = vrot.slane %v10000_v63, 5  ;;  %15446 = vmatprep.subr.bf16.mxu1 %v15875_v2  ;;  %15486 = vmatprep.subr.bf16.mxu0 %v19263_v0  ;;  %v10003_v41 = vld [vmem:[#allocation3 + $0x94] sm:$0xf] }
 0x469   : > { %15367 = vmatmul.mubr.bf16.gmra.mxu1 %v13796_v14  ;;  %15327 = vmatmul.mubr.bf16.gmra.mxu0 %v19225_v27  ;;  %v9487_v10 = vsel %vm16178_vm2, %v9482_v56, %v9486_v18  ;;  %v9496_v26 = vrot.slane %v9495_v32, 4  ;;  %v19276_v30 = vsel %vm16358_vm5, %v13784_v55, %v10130_v3  ;;  %v9513_v28 = vshrl.u32 %v9191_v17, 16  ;;  %v10004_v1 = vld [vmem:[#allocation3 + $0x98] sm:$0x1]  ;;  %v19299_v60 = vld [vmem:[#allocation3 + $0x9c] sm:$0xe] }
 0x46a   : > { %15370 = vmatprep.mubr.bf16.mxu1 %v13797_v12  ;;  %15330 = vmatprep.mubr.bf16.mxu0 %v13761_v31  ;;  %v13762_v9 = vcombine.low %v9477_v16, %v9487_v10  ;;  %v9506_v34 = vrot.slane %v9505_v8, 4  ;;  %v19283_v14 = vsel %vm16358_vm5, %v10132_v57, %v10133_v23  ;;  %v10140_v27 = vrot.slane %v10001_v50, 5  ;;  %v10006_v3 = vld [vmem:[#allocation3 + $0xa0] sm:$0xf] }
 0x46b   : > { %v9501_v52 = vsel %vm16178_vm2, %v9496_v26, %v9500_v51  ;;  %v19289_v29 = vsel %vm16358_vm5, %v13785_v22, %v10137_v13  ;;  %v10139_v62 = vrot.slane %v10137_v13, 4  ;;  %v9515_v11 = vrot.slane %v9513_v28, 4  ;;  %15447 = vmatpush3.bf16.msra.mxu1 %v15875_v2  ;;  %v9197_v22 = vld [vmem:[#allocation3 + $0xc0] sm:$0xf] }
 0x46c   : > { %v9511_v12 = vsel %vm16178_vm2, %v9506_v34, %v9510_v24  ;;  %v9516_v31 = vshll.u32 %v9191_v17, 16  ;;  %v9522_v46 = vshll.u32 %v9192_v36, 16  ;;  %v9526_v58 = vshrl.u32 %v9192_v36, 16  ;;  %15448 = vmatprep.subr.bf16.mxu1 %v15876_v43  ;;  %v9198_v36 = vld [vmem:[#allocation3 + $0xc4] sm:$0xf] }
 0x46d   : > { %v13763_v40 = vcombine.low %v9501_v52, %v9511_v12  ;;  %v13800_v47 = vcombine.low %v19276_v30, %v19283_v14  ;;  %v9532_v37 = vshll.u32 %v9193_v61, 16  ;;  %v9537_v20 = vshrl.u32 %v9194_v15, 16  ;;  %v10015_v14 = vld [vmem:[#allocation3 + $0xc4] sm:$0xf] }
 0x46e   : > { %v19297_v53 = vsel %vm16358_vm5, %v10139_v62, %v10140_v27  ;;  %v9518_v2 = vrot.slane %v9516_v31, 5  ;;  %v9524_v33 = vrot.slane %v9522_v46, 5  ;;  %v9528_v63 = vrot.slane %v9526_v58, 4  ;;  %v9199_v27 = vld [vmem:[#allocation3 + $0xc8] sm:$0x1] }
 0x46f   : > { %v9534_v19 = vrot.slane %v9532_v37, 5  ;;  %v9539_v35 = vrot.slane %v9537_v20, 4  ;;  %v9540_v17 = vshll.u32 %v9194_v15, 16  ;;  %v9546_v6 = vshll.u32 %v9195_v4, 16  ;;  %15449 = vmatpush3.bf16.msra.mxu1 %v15876_v43  ;;  %v10008_v62 = vld [vmem:[#allocation3 + $0xa8] sm:$0xe] }
 0x470   : > { %v9519_v51 = vor.u32 %v9518_v2, %v9515_v11  ;;  %v9529_v55 = vor.u32 %v9528_v63, %v9524_v33  ;;  %v9550_v16 = vshrl.u32 %v9195_v4, 16  ;;  %v9556_v18 = vshll.u32 %v9196_v45, 16  ;;  %15450 = vmatprep.subr.bf16.mxu1 %v15880_v59  ;;  %v10009_v11 = vld [vmem:[#allocation3 + $0xac] sm:$0xf]  ;;  %v10010_v58 = vld [vmem:[#allocation3 + $0xb0] sm:$0x1] }
 0x471   : > { %15371 = vmatmul.mubr.bf16.gmra.mxu1 %v13798_v42  ;;  %15331 = vmatmul.mubr.bf16.gmra.mxu0 %v13762_v9  ;;  %v9542_v56 = vrot.slane %v9540_v17, 5  ;;  %v9548_v32 = vrot.slane %v9546_v6, 5  ;;  %v13786_v24 = vrot.slane %v10002_v54, 9  ;;  %v10144_v50 = vrot.slane %v10003_v41, 5  ;;  %v10013_v2 = vld [vmem:[#allocation3 + $0xbc] sm:$0x1] }
 0x472   : > { %15374 = vmatprep.mubr.bf16.mxu1 %v13799_v49  ;;  %15334 = vmatprep.mubr.bf16.mxu0 %v13763_v40  ;;  %v9520_v8 = vrot.slane %v9519_v51, 4  ;;  %v9530_v57 = vrot.slane %v9529_v55, 4  ;;  %v9552_v23 = vrot.slane %v9550_v16, 4  ;;  %v9558_v13 = vrot.slane %v9556_v18, 5  ;;  %v10007_v49 = vld [vmem:[#allocation3 + $0xa4] sm:$0x1] }
 0x473   : > { %v13801_v43 = vcombine.low %v19289_v29, %v19297_v53  ;;  %v9543_v21 = vor.u32 %v9542_v56, %v9539_v35  ;;  %v10146_v38 = vrot.slane %v10144_v50, 4  ;;  %v10147_v42 = vrot.slane %v10004_v1, 5  ;;  %15451 = vmatpush3.bf16.msra.mxu1 %v15880_v59  ;;  %v10011_v59 = vld [vmem:[#allocation3 + $0xb4] sm:$0xe]  ;;  %v10012_v40 = vld [vmem:[#allocation3 + $0xb8] sm:$0xf] }
 0x474   : > { %v9525_v10 = vsel %vm16178_vm2, %v9520_v8, %v9524_v33  ;;  %v9535_v26 = vsel %vm16178_vm2, %v9530_v57, %v9534_v19  ;;  %v9553_v44 = vor.u32 %v9552_v23, %v9548_v32  ;;  %v19315_v25 = vsel %vm16358_vm5, %v13786_v24, %v10144_v50  ;;  %15452 = vmatprep.subr.bf16.mxu1 %v15881_v7  ;;  %v10014_v33 = vld [vmem:[#allocation3 + $0xc0] sm:$0xe]  ;;  %v10016_v8 = vld [vmem:[#allocation3 + $0xc8] sm:$0x1] }
 0x475   : > { %v9544_v61 = vrot.slane %v9543_v21, 4  ;;  %v19319_v28 = vsel %vm16358_vm5, %v10146_v38, %v10147_v42  ;;  %v13787_v9 = vrot.slane %v19299_v60, 9  ;;  %v10151_v34 = vrot.slane %v10006_v3, 5 }
 0x476   : > { %v13764_v15 = vcombine.low %v9525_v10, %v9535_v26  ;;  %v9554_v4 = vrot.slane %v9553_v44, 4  ;;  %v13802_v52 = vcombine.low %v19315_v25, %v19319_v28  ;;  %v9561_v29 = vshrl.u32 %v9197_v22, 16  ;;  %v11013_v26 = vld [vmem:[#allocation3 + $0x1c] sm:$0xf]  ;;  %v11015_v28 = vld [vmem:[#allocation3 + $0x24] sm:$0xf] }
 0x477   : > { %v9549_v45 = vsel %vm16178_vm2, %v9544_v61, %v9548_v32  ;;  %v10153_v12 = vrot.slane %v10151_v34, 4  ;;  %v10154_v31 = vrot.slane %v10007_v49, 5  ;;  %v9564_v46 = vshll.u32 %v9197_v22, 16  ;;  %15453 = vmatpush3.bf16.msra.mxu1 %v15881_v7  ;;  %v11012_v32 = vld [vmem:[#allocation3 + $0x18] sm:$0xf] }
 0x478   : > { %v9559_v37 = vsel %vm16178_vm2, %v9554_v4, %v9558_v13  ;;  %v9563_v20 = vrot.slane %v9561_v29, 4  ;;  %v9570_v54 = vshll.u32 %v9198_v36, 16  ;;  %v9574_v53 = vshrl.u32 %v9198_v36, 16 }
 0x479   : > { %v20963_v63 = vmov 0.0   ;;  %15375 = vmatmul.mubr.bf16.gmra.mxu1 %v13800_v47  ;;  %15335 = vmatmul.mubr.bf16.gmra.mxu0 %v13764_v15  ;;  %v13765_v41 = vcombine.low %v9549_v45, %v9559_v37  ;;  %v10155_v19 = vsel %vm16358_vm5, %v10153_v12, %v10154_v31  ;;  %v9566_v7 = vrot.slane %v9564_v46, 5  ;;  %v11017_v46 = vld [vmem:[#allocation3 + $0x2c] sm:$0x1]  ;;  %v11018_v37 = vld [vmem:[#allocation3 + $0x30] sm:$0xf] }
 0x47a   : > { %15534 = vmatprep.subr.mxu1 %v20963_v63  ;;  %v9580_v35 = vshll.u32 %v9199_v27, 16  ;;  %15378 = vmatprep.mubr.bf16.mxu1 %v13801_v43  ;;  %v10152_v17 = vsel %vm16358_vm5, %v13787_v9, %v10151_v34  ;;  %v9572_v6 = vrot.slane %v9570_v54, 5  ;;  %v9576_v1 = vrot.slane %v9574_v53, 4  ;;  %v11016_v9 = vld [vmem:[#allocation3 + $0x28] sm:$0xf]  ;;  %v15874_v27 = vld [vmem:[#allocation3 + $0x18] sm:$0xff]  }
 0x47b   : > { %v13788_v51 = vrot.slane %v10008_v62, 9  ;;  %15338 = vmatprep.mubr.bf16.mxu0 %v13765_v41  ;;  %v13803_v55 = vcombine.low %v10152_v17, %v10155_v19  ;;  %v9567_v16 = vor.u32 %v9566_v7, %v9563_v20  ;;  %v10158_v30 = vrot.slane %v10009_v11, 5  ;;  %v11014_v62 = vld [vmem:[#allocation3 + $0x20] sm:$0x1] }
 0x47c   : > { %v9582_v18 = vrot.slane %v9580_v35, 5  ;;  %v9577_v47 = vor.u32 %v9576_v1, %v9572_v6  ;;  %v10161_v60 = vrot.slane %v10010_v58, 5  ;;  %v13789_v3 = vrot.slane %v10011_v59, 9 }
 0x47d   : > { %v10165_v56 = vrot.slane %v10012_v40, 5  ;;  %v9568_v24 = vrot.slane %v9567_v16, 4  ;;  %v10160_v50 = vrot.slane %v10158_v30, 4  ;;  %v10168_v22 = vrot.slane %v10013_v2, 5  ;;  %v15877_v16 = vld [vmem:[#allocation3 + $0x24] sm:$0xff]  }
 0x47e   : > { %v13790_v57 = vrot.slane %v10014_v33, 9  ;;  %v9578_v23 = vrot.slane %v9577_v47, 4  ;;  %v10159_v13 = vsel %vm16358_vm5, %v13788_v51, %v10158_v30  ;;  %v10172_v21 = vrot.slane %v10015_v14, 5  ;;  %v11019_v33 = vld [vmem:[#allocation3 + $0x34] sm:$0xf]  ;;  %v19356_v41 = vpop.f32.mrf.mxu0  ;;  %v15883_v30 = vld [vmem:[#allocation4 + $0x230] sm:$0xff]  }
 0x47f   : > { %v10167_v43 = vrot.slane %v10165_v56, 4  ;;  %v9573_v38 = vsel %vm16178_vm2, %v9568_v24, %v9572_v6  ;;  %v10162_v42 = vsel %vm16358_vm5, %v10160_v50, %v10161_v60  ;;  %v10166_v10 = vsel %vm16358_vm5, %v13789_v3, %v10165_v56 }
 0x480   : > { %v11061_v44 = vshrl.u32 %v11012_v32, 16  ;;  %v9583_v25 = vsel %vm16178_vm2, %v9578_v23, %v9582_v18  ;;  %v13804_v49 = vcombine.low %v10159_v13, %v10162_v42  ;;  %v10175_v61 = vrot.slane %v10016_v8, 5  ;;  %v19362_v18 = vpop.f32.mrf.mxu0 }
 0x481   : > { %v10169_v36 = vsel %vm16358_vm5, %v10167_v43, %v10168_v22  ;;  %15379 = vmatmul.mubr.bf16.gmra.mxu1 %v13802_v52  ;;  %v13766_v34 = vcombine.low %v9573_v38, %v9583_v25  ;;  %v19350_v4 = vsel %vm16358_vm5, %v13790_v57, %v10172_v21  ;;  %v10174_v29 = vrot.slane %v10172_v21, 4  ;;  %v11020_v22 = vld [vmem:[#allocation3 + $0x38] sm:$0x1]  ;;  %v11021_v21 = vld [vmem:[#allocation3 + $0x3c] sm:$0xf]  ;;  %v15879_v38 = vld [vmem:[#allocation3 + $0x30] sm:$0xff]  }
 0x482   : > { %v13805_v15 = vcombine.low %v10166_v10, %v10169_v36  ;;  %15382 = vmatprep.mubr.bf16.mxu1 %v13803_v55  ;;  %v11063_v11 = vrot.slane %v11061_v44, 4  ;;  %v11064_v45 = vshll.u32 %v11012_v32, 16  ;;  %v11070_v12 = vshll.u32 %v11013_v26, 16  ;;  %v19364_v8 = vpop.f32.mrf.mxu0  ;;  %v11022_v25 = vld [vmem:[#allocation3 + $0x40] sm:$0xf] }
 0x483   : > { %v11074_v31 = vshrl.u32 %v11013_v26, 16  ;;  %15339 = vmatmul.mubr.bf16.gmra.mxu0 %v13766_v34  ;;  %v19354_v58 = vsel %vm16358_vm5, %v10174_v29, %v10175_v61  ;;  %v11085_v52 = vshrl.u32 %v11015_v28, 16  ;;  %v11088_v59 = vshll.u32 %v11015_v28, 16 }
 0x484   : > { %v11094_v40 = vshll.u32 %v11016_v9, 16  ;;  %15406 = vmatprep.mubr.bf16.mxu0 %v15874_v27  ;;  %v11066_v20 = vrot.slane %v11064_v45, 5  ;;  %v11072_v54 = vrot.slane %v11070_v12, 5  ;;  %v11080_v2 = vshll.u32 %v11014_v62, 16  ;;  %v19373_v36 = vpop.f32.mrf.mxu0 }
 0x485   : > { %v11076_v53 = vrot.slane %v11074_v31, 4  ;;  %v13806_v19 = vcombine.low %v19350_v4, %v19354_v58  ;;  %v11087_v7 = vrot.slane %v11085_v52, 4  ;;  %v11090_v35 = vrot.slane %v11088_v59, 5  ;;  %v15886_v31 = vld [vmem:[#allocation4 + $0x228] sm:$0xff]   ;;  %v11024_v59 = vld [vmem:[#allocation3 + $0x48] sm:$0xf] }
 0x486   : > { %v19360_v17 = vrot.slane %v11094_v40, 5  ;;  %v11067_v6 = vor.u32 %v11066_v20, %v11063_v11  ;;  %v11098_v51 = vshrl.u32 %v11016_v9, 16  ;;  %v11104_v55 = vshll.u32 %v11017_v46, 16 }
 0x487   : > { %v11077_v1 = vor.u32 %v11076_v53, %v11072_v54  ;;  %v11091_v14 = vor.u32 %v11090_v35, %v11087_v7  ;;  %v11109_v47 = vshrl.u32 %v11018_v37, 16  ;;  %v11112_v60 = vshll.u32 %v11018_v37, 16 }
 0x488   : > { %v11118_v3 = vshll.u32 %v11019_v33, 16  ;;  %v11068_v56 = vrot.slane %v11067_v6, 4  ;;  %v11082_v24 = vrot.slane %v11080_v2, 5  ;;  %v11100_v50 = vrot.slane %v11098_v51, 4 }
 0x489   : > { %v11078_v32 = vrot.slane %v11077_v1, 4  ;;  %15383 = vmatmul.mubr.bf16.gmra.mxu1 %v13804_v49  ;;  %v11092_v57 = vrot.slane %v11091_v14, 4  ;;  %v11111_v23 = vrot.slane %v11109_v47, 4  ;;  %v11114_v13 = vrot.slane %v11112_v60, 5 }
 0x48a   : > { %v19366_v43 = vrot.slane %v11118_v3, 5  ;;  %15386 = vmatprep.mubr.bf16.mxu1 %v13805_v15  ;;  %v11073_v42 = vsel %vm16178_vm2, %v11068_v56, %v11072_v54  ;;  %v11101_v26 = vor.u32 %v11100_v50, %v19360_v17  ;;  %v11122_v44 = vshrl.u32 %v11019_v33, 16  ;;  %v11023_v15 = vld [vmem:[#allocation3 + $0x44] sm:$0x1]  ;;  %v11025_v54 = vld [vmem:[#allocation3 + $0x4c] sm:$0xf] }
 0x48b   : > { %v11083_v10 = vsel %vm16178_vm2, %v11078_v32, %v11082_v24  ;;  %15407 = vmatmul.mubr.bf16.vlgmr.msra.gmra.mxu0 %v15877_v16  ;;  %v11106_v61 = vrot.slane %v11104_v55, 5  ;;  %v11115_v28 = vor.u32 %v11114_v13, %v11111_v23  ;;  %v11128_v9 = vshll.u32 %v11020_v22, 16  ;;  %v19376_v11 = vpop.f32.mrf.mxu0  ;;  %v15882_v55 = vld [vmem:[#allocation3 + $0x3c] sm:$0xff]   ;;  %v15884_v24 = vld [vmem:[#allocation3 + $0x48] sm:$0xff]   ;;  %v11027_v22 = vld [vmem:[#allocation3 + $0x54] sm:$0xf] }
 0x48c   : > { %v13839_v49 = vcombine.low %v11073_v42, %v11083_v10  ;;  %15410 = vmatprep.mubr.bf16.mxu0 %v15879_v38  ;;  %15487 = vmatpush3.bf16.msra.mxu0 %v19263_v0  ;;  %v11102_v34 = vrot.slane %v11101_v26, 4  ;;  %v11124_v27 = vrot.slane %v11122_v44, 4  ;;  %v11133_v29 = vshrl.u32 %v11021_v21, 16  ;;  %v15889_v32 = vld [vmem:[#allocation4 + $0x220] sm:$0xff]  }
 0x48d   : > { %v11136_v62 = vshll.u32 %v11021_v21, 16  ;;  %15488 = vmatprep.subr.bf16.mxu0 %v15883_v30  ;;  %v11097_v45 = vsel %vm16178_vm2, %v11092_v57, %v19360_v17  ;;  %v11116_v12 = vrot.slane %v11115_v28, 4  ;;  %v11142_v46 = vshll.u32 %v11022_v25, 16  ;;  %v19384_v2 = vpop.f32.mrf.mxu0  ;;  %v11028_v44 = vld [vmem:[#allocation3 + $0x58] sm:$0xf] }
 0x48e   : > { %v11146_v52 = vshrl.u32 %v11022_v25, 16  ;;  %v11125_v40 = vor.u32 %v11124_v27, %v19366_v43  ;;  %v11130_v0 = vrot.slane %v11128_v9, 5  ;;  %v11135_v37 = vrot.slane %v11133_v29, 4  ;;  %v15892_v27 = vld [vmem:[#allocation4 + $0x218] sm:$0xff]  }
 0x48f   : > { %v11138_v20 = vrot.slane %v11136_v62, 5  ;;  %v11107_v53 = vsel %vm16178_vm2, %v11102_v34, %v11106_v61  ;;  %v11121_v33 = vsel %vm16178_vm2, %v11116_v12, %v19366_v43  ;;  %v19389_v7 = vrot.slane %v11142_v46, 5  ;;  %v19394_v14 = vpop.f32.mrf.mxu0  ;;  %v11029_v62 = vld [vmem:[#allocation3 + $0x5c] sm:$0x1]  ;;  %v11030_v12 = vld [vmem:[#allocation3 + $0x60] sm:$0xf] }
 0x490   : > { %v11148_v35 = vrot.slane %v11146_v52, 4  ;;  %15489 = vmatpush3.bf16.msra.mxu0 %v15883_v30  ;;  %v11126_v17 = vrot.slane %v11125_v40, 4  ;;  %v11152_v1 = vshll.u32 %v11023_v15, 16  ;;  %v11157_v51 = vshrl.u32 %v11024_v59, 16 }
 0x491   : > { %v11139_v6 = vor.u32 %v11138_v20, %v11135_v37  ;;  %15387 = vmatmul.mubr.bf16.gmra.mxu1 %v13806_v19  ;;  %v15168_v16 = vpop.f32.mrf.mxu1  ;;  %15490 = vmatprep.subr.bf16.mxu0 %v15886_v31  ;;  %v11160_v60 = vshll.u32 %v11024_v59, 16  ;;  %v11166_v3 = vshll.u32 %v11025_v54, 16  ;;  %v11170_v56 = vshrl.u32 %v11025_v54, 16  ;;  %v11026_v19 = vld [vmem:[#allocation3 + $0x50] sm:$0x1]  ;;  %v19404_v23 = vpop.f32.mrf.mxu0  ;;  %v15885_v20 = vld [vmem:[#allocation3 + $0x54] sm:$0xff]  }
 0x492   : > { %v11149_v47 = vor.u32 %v11148_v35, %v19389_v7  ;;  %15454 = vmatprep.mubr.bf16.mxu1 %v13839_v49  ;;  %v19398_v30 = vadd.f32 %v15168_v16, %v19356_v41  ;;  %v13840_v50 = vcombine.low %v11097_v45, %v11107_v53  ;;  %v11131_v4 = vsel %vm16178_vm2, %v11126_v17, %v11130_v0  ;;  %v15887_v16 = vld [vmem:[#allocation3 + $0x60] sm:$0xff]  }
 0x493   : > { %v19402_v58 = vrot.slane %v11139_v6, 4  ;;  %15411 = vmatmul.mubr.bf16.gmra.mxu0 %v15882_v55  ;;  %v7887_v57 = vpop.f32.mrf.mxu1  ;;  %v11154_v43 = vrot.slane %v11152_v1, 5  ;;  %v11159_v21 = vrot.slane %v11157_v51, 4  ;;  %v11162_v38 = vrot.slane %v11160_v60, 5  ;;  %v11031_v1 = vld [vmem:[#allocation3 + $0x64] sm:$0xf] }
 0x494   : > { %v11150_v13 = vrot.slane %v11149_v47, 4  ;;  %15414 = vmatprep.mubr.bf16.mxu0 %v15884_v24  ;;  %v13841_v41 = vcombine.low %v11121_v33, %v11131_v4  ;;  %v19407_v42 = vadd.f32 %v7887_v57, %v19362_v18  ;;  %15491 = vmatpush3.bf16.msra.mxu0 %v15886_v31  ;;  %v11168_v10 = vrot.slane %v11166_v3, 5  ;;  %v19409_v49 = vpop.f32.mrf.mxu0 }
 0x495   : > { %v11172_v26 = vrot.slane %v11170_v56, 4  ;;  %v15169_v25 = vpop.f32.mrf.mxu1  ;;  %v11145_v61 = vsel %vm16178_vm2, %v19402_v58, %v19389_v7  ;;  %v11163_v28 = vor.u32 %v11162_v38, %v11159_v21  ;;  %v11176_v9 = vshll.u32 %v11026_v19, 16  ;;  %15492 = vmatprep.subr.bf16.mxu0 %v15889_v32  ;;  %v11032_v56 = vld [vmem:[#allocation3 + $0x68] sm:$0x1]  ;;  %v15898_v21 = vld [vmem:[#allocation4 + $0x208] sm:$0xff]  }
 0x496   : > { %v11181_v34 = vshrl.u32 %v11027_v22, 16  ;;  %v19416_v18 = vadd.f32 %v15169_v25, %v19364_v8  ;;  %v11155_v15 = vsel %vm16178_vm2, %v11150_v13, %v11154_v43  ;;  %v11184_v45 = vshll.u32 %v11027_v22, 16  ;;  %v19420_v46 = vpop.f32.mrf.mxu0  ;;  %v11034_v25 = vld [vmem:[#allocation3 + $0x70] sm:$0xf] }
 0x497   : > { %v11173_v29 = vor.u32 %v11172_v26, %v11168_v10  ;;  %v7890_v31 = vpop.f32.mrf.mxu1  ;;  %v11164_v52 = vrot.slane %v11163_v28, 4  ;;  %v11178_v59 = vrot.slane %v11176_v9, 5  ;;  %v11190_v0 = vshll.u32 %v11028_v44, 16 }
 0x498   : > { %v11183_v40 = vrot.slane %v11181_v34, 4  ;;  %v19423_v37 = vadd.f32 %v7890_v31, %v19373_v36  ;;  %v11186_v54 = vrot.slane %v11184_v45, 5  ;;  %v11194_v53 = vshrl.u32 %v11028_v44, 16  ;;  %15493 = vmatpush3.bf16.msra.mxu0 %v15889_v32  ;;  %v19427_v35 = vpop.f32.mrf.mxu0  ;;  %v15895_v36 = vld [vmem:[#allocation4 + $0x210] sm:$0xff]  }
 0x499   : > { %v11174_v8 = vrot.slane %v11173_v29, 4  ;;  %15455 = vmatmul.mubr.bf16.vlgmr.msra.gmra.mxu1 %v13840_v50  ;;  %v15172_v33 = vpop.f32.mrf.mxu1  ;;  %v11169_v7 = vsel %vm16178_vm2, %v11164_v52, %v11168_v10  ;;  %v19429_v17 = vrot.slane %v11190_v0, 5  ;;  %v11200_v6 = vshll.u32 %v11029_v62, 16  ;;  %15494 = vmatprep.subr.bf16.mxu0 %v15892_v27  ;;  %v11033_v32 = vld [vmem:[#allocation3 + $0x6c] sm:$0xf] }
 0x49a   : > { %v11205_v51 = vshrl.u32 %v11030_v12, 16  ;;  %15458 = vmatprep.mubr.bf16.mxu1 %v13841_v41  ;;  %v19432_v55 = vadd.f32 %v15172_v33, %v19376_v11  ;;  %v11187_v60 = vor.u32 %v11186_v54, %v11183_v40  ;;  %v11196_v3 = vrot.slane %v11194_v53, 4  ;;  %v19436_v58 = vpop.f32.mrf.mxu0  ;;  %v11036_v0 = vld [vmem:[#allocation3 + $0x78] sm:$0xf] }
 0x49b   : > { %v11179_v47 = vsel %vm16178_vm2, %v11174_v8, %v11178_v59  ;;  %15415 = vmatmul.mubr.bf16.gmra.mxu0 %v15885_v20  ;;  %v13842_v24 = vcombine.low %v11145_v61, %v11155_v15  ;;  %v7903_v4 = vpop.f32.mrf.mxu1  ;;  %v11208_v22 = vshll.u32 %v11030_v12, 16  ;;  %v11214_v43 = vshll.u32 %v11031_v1, 16  ;;  %v11035_v12 = vld [vmem:[#allocation3 + $0x74] sm:$0x1]  ;;  %v15888_v20 = vld [vmem:[#allocation3 + $0x6c] sm:$0xff]  }
 0x49c   : > { %v13843_v50 = vcombine.low %v11169_v7, %v11179_v47  ;;  %v11207_v19 = vrot.slane %v11205_v51, 4  ;;  %15418 = vmatprep.mubr.bf16.mxu0 %v15887_v16  ;;  %v19439_v11 = vadd.f32 %v7903_v4, %v19384_v2  ;;  %v11188_v57 = vrot.slane %v11187_v60, 4  ;;  %15495 = vmatpush3.bf16.msra.mxu0 %v15892_v27  ;;  %v19442_v41 = vpop.f32.mrf.mxu0  ;;  %v11037_v47 = vld [vmem:[#allocation3 + $0x7c] sm:$0xf] }
 0x49d   : > { %v11197_v13 = vor.u32 %v11196_v3, %v19429_v17  ;;  %v15173_v38 = vpop.f32.mrf.mxu1  ;;  %v11210_v10 = vrot.slane %v11208_v22, 5  ;;  %v11218_v26 = vshrl.u32 %v11031_v1, 16  ;;  %v11224_v44 = vshll.u32 %v11032_v56, 16  ;;  %15496 = vmatprep.subr.bf16.mxu0 %v15895_v36  ;;  %v15890_v1 = vld [vmem:[#allocation3 + $0x78] sm:$0xff]   ;;  %v11038_v22 = vld [vmem:[#allocation3 + $0x80] sm:$0x1] }
 0x49e   : > { %v11229_v61 = vshrl.u32 %v11033_v32, 16  ;;  %v19445_v28 = vadd.f32 %v15173_v38, %v19394_v14  ;;  %v11202_v9 = vrot.slane %v11200_v6, 5  ;;  %v19447_v34 = vrot.slane %v11214_v43, 5  ;;  %v19452_v29 = vpop.f32.mrf.mxu0 }
 0x49f   : > { %v11198_v2 = vrot.slane %v11197_v13, 4  ;;  %v7906_v15 = vpop.f32.mrf.mxu1  ;;  %v11193_v27 = vsel %vm16178_vm2, %v11188_v57, %v19429_v17  ;;  %v11211_v62 = vor.u32 %v11210_v10, %v11207_v19  ;;  %v11220_v45 = vrot.slane %v11218_v26, 4 }
 0x4a0   : > { %v11231_v31 = vrot.slane %v11229_v61, 4  ;;  %v19455_v52 = vadd.f32 %v7906_v15, %v19404_v23  ;;  %v11232_v59 = vshll.u32 %v11033_v32, 16  ;;  %v11238_v40 = vshll.u32 %v11034_v25, 16  ;;  %15497 = vmatpush3.bf16.msra.mxu0 %v15895_v36  ;;  %v19460_v7 = vpop.f32.mrf.mxu0  ;;  %v15901_v23 = vld [vmem:[#allocation4 + $0x200] sm:$0xff]  }
 0x4a1   : > { %v11203_v14 = vsel %vm16178_vm2, %v11198_v2, %v11202_v9  ;;  %15459 = vmatmul.mubr.bf16.gmra.mxu1 %v13842_v24  ;;  %v11212_v54 = vrot.slane %v11211_v62, 4  ;;  %v11221_v53 = vor.u32 %v11220_v45, %v19447_v34  ;;  %v11226_v33 = vrot.slane %v11224_v44, 5  ;;  %15498 = vmatprep.subr.bf16.mxu0 %v15898_v21 }
 0x4a2   : > { %v15176_v8 = vpop.f32.mrf.mxu1  ;;  %v11242_v17 = vshrl.u32 %v11034_v25, 16  ;;  %15462 = vmatprep.mubr.bf16.mxu1 %v13843_v50  ;;  %v11234_v51 = vrot.slane %v11232_v59, 5  ;;  %v19465_v16 = vrot.slane %v11238_v40, 5  ;;  %v11248_v36 = vshll.u32 %v11035_v12, 16  ;;  %v19467_v32 = vpop.f32.mrf.mxu0  ;;  %v11039_v25 = vld [vmem:[#allocation3 + $0x84] sm:$0xf] }
 0x4a3   : > { %v19463_v6 = vadd.f32 %v15176_v8, %v19409_v49  ;;  %15419 = vmatmul.mubr.bf16.gmra.mxu0 %v15888_v20  ;;  %v13844_v60 = vcombine.low %v11193_v27, %v11203_v14  ;;  %v11222_v3 = vrot.slane %v11221_v53, 4  ;;  %v11253_v4 = vshrl.u32 %v11036_v0, 16  ;;  %v15891_v14 = vld [vmem:[#allocation3 + $0x84] sm:$0xff]  }
 0x4a4   : > { %v7919_v56 = vpop.f32.mrf.mxu1  ;;  %v11244_v24 = vrot.slane %v11242_v17, 4  ;;  %15422 = vmatprep.mubr.bf16.mxu0 %v15890_v1  ;;  %v11217_v49 = vsel %vm16178_vm2, %v11212_v54, %v19447_v34  ;;  %v11235_v19 = vor.u32 %v11234_v51, %v11231_v31  ;;  %v11256_v57 = vshll.u32 %v11036_v0, 16  ;;  %15499 = vmatpush3.bf16.msra.mxu0 %v15898_v21  ;;  %v19477_v38 = vpop.f32.mrf.mxu0  ;;  %v11040_v40 = vld [vmem:[#allocation3 + $0x88] sm:$0xf]  ;;  %v11042_v17 = vld [vmem:[#allocation3 + $0x90] sm:$0xf] }
 0x4a5   : > { %v19473_v50 = vadd.f32 %v7919_v56, %v19420_v46  ;;  %v11227_v13 = vsel %vm16178_vm2, %v11222_v3, %v11226_v33  ;;  %v11255_v26 = vrot.slane %v11253_v4, 4  ;;  %v11262_v44 = vshll.u32 %v11037_v47, 16  ;;  %15500 = vmatprep.subr.bf16.mxu0 %v15901_v23  ;;  %v11041_v33 = vld [vmem:[#allocation3 + $0x8c] sm:$0x1] }
 0x4a6   : > { %v15177_v43 = vpop.f32.mrf.mxu1  ;;  %v11245_v10 = vor.u32 %v11244_v24, %v19465_v16  ;;  %v11236_v46 = vrot.slane %v11235_v19, 4  ;;  %v11250_v2 = vrot.slane %v11248_v36, 5  ;;  %v11258_v9 = vrot.slane %v11256_v57, 5  ;;  %v19483_v15 = vpop.f32.mrf.mxu0 }
 0x4a7   : > { %v19481_v61 = vadd.f32 %v15177_v43, %v19427_v35  ;;  %v11264_v27 = vrot.slane %v11262_v44, 5  ;;  %v11266_v62 = vshrl.u32 %v11037_v47, 16  ;;  %v11272_v45 = vshll.u32 %v11038_v22, 16  ;;  %v11043_v22 = vld [vmem:[#allocation3 + $0x94] sm:$0xf] }
 0x4a8   : > { %v7922_v34 = vpop.f32.mrf.mxu1  ;;  %v11246_v21 = vrot.slane %v11245_v10, 4  ;;  %v13845_v12 = vcombine.low %v11217_v49, %v11227_v13  ;;  %v11259_v59 = vor.u32 %v11258_v9, %v11255_v26  ;;  %v11277_v0 = vshrl.u32 %v11039_v25, 16  ;;  %15501 = vmatpush3.bf16.msra.mxu0 %v15901_v23  ;;  %v19493_v53 = vpop.f32.mrf.mxu0  ;;  %v15893_v23 = vld [vmem:[#allocation3 + $0x90] sm:$0xff]   ;;  %v11044_v9 = vld [vmem:[#allocation3 + $0x98] sm:$0x1] }
 0x4a9   : > { %v19486_v31 = vadd.f32 %v7922_v34, %v19436_v58  ;;  %15463 = vmatmul.mubr.bf16.gmra.mxu1 %v13844_v60  ;;  %v11241_v20 = vsel %vm16178_vm2, %v11236_v46, %v19465_v16  ;;  %v11268_v54 = vrot.slane %v11266_v62, 4  ;;  %v11280_v58 = vshll.u32 %v11039_v25, 16 }
 0x4aa   : > { %v15180_v35 = vpop.f32.mrf.mxu1  ;;  %v11251_v8 = vsel %vm16178_vm2, %v11246_v21, %v11250_v2  ;;  %15466 = vmatprep.mubr.bf16.mxu1 %v13845_v12  ;;  %v11260_v51 = vrot.slane %v11259_v59, 4  ;;  %v11274_v36 = vrot.slane %v11272_v45, 5  ;;  %v11279_v47 = vrot.slane %v11277_v0, 4  ;;  %v19498_v3 = vpop.f32.mrf.mxu0  ;;  %v11045_v59 = vld [vmem:[#allocation3 + $0x9c] sm:$0xf] }
 0x4ab   : > { %v19496_v1 = vadd.f32 %v15180_v35, %v19442_v41  ;;  %15423 = vmatmul.mubr.bf16.gmra.mxu0 %v15891_v14  ;;  %v11269_v60 = vor.u32 %v11268_v54, %v11264_v27  ;;  %v11282_v56 = vrot.slane %v11280_v58, 5  ;;  %v11286_v24 = vshll.u32 %v11040_v40, 16 }
 0x4ac   : > { %v7935_v16 = vpop.f32.mrf.mxu1  ;;  %v11290_v4 = vshrl.u32 %v11040_v40, 16  ;;  %15426 = vmatprep.mubr.bf16.mxu0 %v15893_v23  ;;  %v11265_v49 = vsel %vm16178_vm2, %v11260_v51, %v11264_v27  ;;  %v11296_v41 = vshll.u32 %v11041_v33, 16  ;;  %v11301_v57 = vshrl.u32 %v11042_v17, 16  ;;  %v19505_v10 = vpop.f32.mrf.mxu0  ;;  %v15896_v51 = vld [vmem:[#allocation3 + $0xa8] sm:$0xff]  }
 0x4ad   : > { %v19503_v19 = vadd.f32 %v7935_v16, %v19452_v29  ;;  %v11270_v13 = vrot.slane %v11269_v60, 4  ;;  %v11283_v26 = vor.u32 %v11282_v56, %v11279_v47  ;;  %v11288_v44 = vrot.slane %v11286_v24, 5 }
 0x4ae   : > { %v15181_v43 = vpop.f32.mrf.mxu1  ;;  %v11292_v25 = vrot.slane %v11290_v4, 4  ;;  %v13846_v46 = vcombine.low %v11241_v20, %v11251_v8  ;;  %v11303_v34 = vrot.slane %v11301_v57, 4  ;;  %v11304_v21 = vshll.u32 %v11042_v17, 16  ;;  %v19512_v12 = vpop.f32.mrf.mxu0  ;;  %v11046_v20 = vld [vmem:[#allocation3 + $0xa0] sm:$0xf] }
 0x4af   : > { %v19508_v2 = vadd.f32 %v15181_v43, %v19460_v7  ;;  %v11275_v29 = vsel %vm16178_vm2, %v11270_v13, %v11274_v36  ;;  %v11284_v62 = vrot.slane %v11283_v26, 4  ;;  %v11310_v14 = vshll.u32 %v11043_v22, 16  ;;  %v15894_v8 = vld [vmem:[#allocation3 + $0x9c] sm:$0xff]  }
 0x4b0   : > { %v7938_v27 = vpop.f32.mrf.mxu1  ;;  %v11293_v45 = vor.u32 %v11292_v25, %v11288_v44  ;;  %v13847_v40 = vcombine.low %v11265_v49, %v11275_v29  ;;  %v11306_v35 = vrot.slane %v11304_v21, 5  ;;  %v11314_v7 = vshrl.u32 %v11043_v22, 16  ;;  %v19517_v23 = vpop.f32.mrf.mxu0  ;;  %v11047_v49 = vld [vmem:[#allocation3 + $0xa4] sm:$0x1]  ;;  %v11048_v25 = vld [vmem:[#allocation3 + $0xa8] sm:$0xf] }
 0x4b1   : > { %v19515_v0 = vadd.f32 %v7938_v27, %v19467_v32  ;;  %15467 = vmatmul.mubr.bf16.gmra.mxu1 %v13846_v46  ;;  %v11298_v33 = vrot.slane %v11296_v41, 5  ;;  %v11312_v58 = vrot.slane %v11310_v14, 5  ;;  %v11320_v17 = vshll.u32 %v11044_v9, 16  ;;  %v11049_v27 = vld [vmem:[#allocation3 + $0xac] sm:$0xf] }
 0x4b2   : > { %v11294_v54 = vrot.slane %v11293_v45, 4  ;;  %15470 = vmatprep.mubr.bf16.mxu1 %v13847_v40  ;;  %v11307_v36 = vor.u32 %v11306_v35, %v11303_v34  ;;  %v11316_v47 = vrot.slane %v11314_v7, 4  ;;  %v11325_v60 = vshrl.u32 %v11045_v59, 16  ;;  %v19523_v4 = vpop.f32.mrf.mxu0 }
 0x4b3   : > { %v11328_v16 = vshll.u32 %v11045_v59, 16  ;;  %15427 = vmatmul.mubr.bf16.gmra.mxu0 %v15894_v8  ;;  %v15184_v32 = vpop.f32.mrf.mxu1  ;;  %v11289_v56 = vsel %vm16178_vm2, %v11284_v62, %v11288_v44  ;;  %v11334_v41 = vshll.u32 %v11046_v20, 16  ;;  %v11338_v22 = vshrl.u32 %v11046_v20, 16 }
 0x4b4   : > { %v11299_v24 = vsel %vm16178_vm2, %v11294_v54, %v11298_v33  ;;  %v19526_v57 = vadd.f32 %v15184_v32, %v19477_v38  ;;  %15430 = vmatprep.mubr.bf16.mxu0 %v15896_v51  ;;  %v11308_v13 = vrot.slane %v11307_v36, 4  ;;  %v11317_v43 = vor.u32 %v11316_v47, %v11312_v58  ;;  %v19530_v9 = vpop.f32.mrf.mxu0  ;;  %v11050_v51 = vld [vmem:[#allocation3 + $0xb0] sm:$0x1]  ;;  %v381_v47 = vld [vmem:[#allocation3 + $0xcc] sm:$0x1] }
 0x4b5   : > { %v11322_v26 = vrot.slane %v11320_v17, 5  ;;  %v19528_v46 = vpop.f32.mrf.mxu1  ;;  %v11327_v44 = vrot.slane %v11325_v60, 4  ;;  %v11330_v34 = vrot.slane %v11328_v16, 5  ;;  %v11336_v21 = vrot.slane %v11334_v41, 5  ;;  %v15897_v16 = vld [vmem:[#allocation3 + $0xb4] sm:$0xff]  }
 0x4b6   : > { %v11340_v29 = vrot.slane %v11338_v22, 4  ;;  %v13848_v62 = vcombine.low %v11289_v56, %v11299_v24  ;;  %v11313_v45 = vsel %vm16178_vm2, %v11308_v13, %v11312_v58  ;;  %v11318_v38 = vrot.slane %v11317_v43, 4  ;;  %v19534_v7 = vpop.f32.mrf.mxu0  ;;  %v11051_v41 = vld [vmem:[#allocation3 + $0xb4] sm:$0xf]  ;;  %v15899_v22 = vld [vmem:[#allocation3 + $0xc0] sm:$0xff]  }
 0x4b7   : > { %v11344_v14 = vshll.u32 %v11047_v49, 16  ;;  %v15185_v59 = vpop.f32.mrf.mxu1  ;;  %v11331_v40 = vor.u32 %v11330_v34, %v11327_v44  ;;  %v11349_v20 = vshrl.u32 %v11048_v25, 16  ;;  %v11352_v8 = vshll.u32 %v11048_v25, 16 }
 0x4b8   : > { %v11341_v35 = vor.u32 %v11340_v29, %v11336_v21  ;;  %v11323_v54 = vsel %vm16178_vm2, %v11318_v38, %v11322_v26  ;;  %v19539_v33 = vadd.f32 %v15185_v59, %v19493_v53  ;;  %v11358_v36 = vshll.u32 %v11049_v27, 16  ;;  %v19543_v49 = vpop.f32.mrf.mxu0  ;;  %v11052_v26 = vld [vmem:[#allocation3 + $0xb8] sm:$0xf] }
 0x4b9   : > { %v11346_v17 = vrot.slane %v11344_v14, 5  ;;  %15471 = vmatmul.mubr.bf16.gmra.mxu1 %v13848_v62  ;;  %v13849_v58 = vcombine.low %v11313_v45, %v11323_v54  ;;  %v19541_v60 = vpop.f32.mrf.mxu1  ;;  %v11332_v32 = vrot.slane %v11331_v40, 4  ;;  %v11351_v24 = vrot.slane %v11349_v20, 4  ;;  %v11053_v40 = vld [vmem:[#allocation3 + $0xbc] sm:$0x1] }
 0x4ba   : > { %v11342_v56 = vrot.slane %v11341_v35, 4  ;;  %v11354_v13 = vrot.slane %v11352_v8, 5  ;;  %v11360_v43 = vrot.slane %v11358_v36, 5  ;;  %v11362_v53 = vshrl.u32 %v11049_v27, 16  ;;  %v19549_v62 = vpop.f32.mrf.mxu0 }
 0x4bb   : > { %15474 = vmatprep.mubr.bf16.mxu1 %v13849_v58  ;;  %15431 = vmatmul.mubr.bf16.gmra.mxu0 %v15897_v16  ;;  %v15188_v25 = vpop.f32.mrf.mxu1  ;;  %v11337_v44 = vsel %vm16178_vm2, %v11332_v32, %v11336_v21  ;;  %v11368_v29 = vshll.u32 %v11050_v51, 16  ;;  %v382_v45 = vsel %vm17637_vm8, 0, %v381_v47  ;;  %v11373_v8 = vshrl.u32 %v11051_v41, 16  ;;  %v11829_v47 = vld [vmem:[#allocation3 + $0x18] sm:$0xe] }
 0x4bc   : > { %v11347_v34 = vsel %vm16178_vm2, %v11342_v56, %v11346_v17  ;;  %v19554_v38 = vadd.f32 %v15188_v25, %v19505_v10  ;;  %15434 = vmatprep.mubr.bf16.mxu0 %v15899_v22  ;;  %v11355_v14 = vor.u32 %v11354_v13, %v11351_v24  ;;  %v11364_v59 = vrot.slane %v11362_v53, 4  ;;  %383 = vst [vmem:[#allocation3 + $0xcc] sm:$0x1] %v382_v45  ;;  %v19556_v20 = vpop.f32.mrf.mxu0  ;;  %v11830_v58 = vld [vmem:[#allocation3 + $0x1c] sm:$0xf] }
 0x4bd   : > { %v13850_v27 = vcombine.low %v11337_v44, %v11347_v34  ;;  %v11370_v35 = vrot.slane %v11368_v29, 5  ;;  %v7967_v21 = vpop.f32.mrf.mxu1  ;;  %v11376_v54 = vshll.u32 %v11051_v41, 16  ;;  %v11382_v17 = vshll.u32 %v11052_v26, 16  ;;  %v11831_v13 = vld [vmem:[#allocation3 + $0x20] sm:$0x1] }
 0x4be   : > { %v11356_v51 = vrot.slane %v11355_v14, 4  ;;  %v11365_v36 = vor.u32 %v11364_v59, %v11360_v43  ;;  %v19559_v5 = vadd.f32 %v7967_v21, %v19512_v12  ;;  %v11386_v10 = vshrl.u32 %v11052_v26, 16  ;;  %v19561_v53 = vpop.f32.mrf.mxu0  ;;  %v11054_v59 = vld [vmem:[#allocation3 + $0xc0] sm:$0xf] }
 0x4bf   : > { %v15189_v16 = vpop.f32.mrf.mxu1  ;;  %v11375_v32 = vrot.slane %v11373_v8, 4  ;;  %v11378_v56 = vrot.slane %v11376_v54, 5  ;;  %v11384_v24 = vrot.slane %v11382_v17, 5  ;;  %v11392_v22 = vshll.u32 %v11053_v40, 16 }
 0x4c0   : > { %v11361_v41 = vsel %vm16178_vm2, %v11356_v51, %v11360_v43  ;;  %v11366_v25 = vrot.slane %v11365_v36, 4  ;;  %v19566_v44 = vadd.f32 %v15189_v16, %v19517_v23  ;;  %v11388_v12 = vrot.slane %v11386_v10, 4  ;;  %v19568_v21 = vpop.f32.mrf.mxu0  ;;  %v11055_v23 = vld [vmem:[#allocation3 + $0xc4] sm:$0xf] }
 0x4c1   : > { %15475 = vmatmul.mubr.bf16.gmra.mxu1 %v13850_v27  ;;  %v7970_v26 = vpop.f32.mrf.mxu1  ;;  %v11379_v34 = vor.u32 %v11378_v56, %v11375_v32  ;;  %v11394_v29 = vrot.slane %v11392_v22, 5  ;;  %v13863_v45 = vrot.slane %v11829_v47, 9  ;;  %v11927_v14 = vrot.slane %v11830_v58, 5  ;;  %v11056_v32 = vld [vmem:[#allocation3 + $0xc8] sm:$0x1] }
 0x4c2   : > { %v11371_v40 = vsel %vm16178_vm2, %v11366_v25, %v11370_v35  ;;  %v19573_v8 = vadd.f32 %v7970_v26, %v19523_v4  ;;  %v11389_v43 = vor.u32 %v11388_v12, %v11384_v24  ;;  %v11930_v54 = vrot.slane %v11831_v13, 5  ;;  %v19584_v12 = vpop.f32.mrf.mxu0  ;;  %v11832_v26 = vld [vmem:[#allocation3 + $0x24] sm:$0xe] }
 0x4c3   : > { %v13851_v17 = vcombine.low %v11361_v41, %v11371_v40  ;;  %v15900_v51 = vld [vmem:[#allocation3 + $0xcc] sm:$0xff]   ;;  %v15192_v27 = vpop.f32.mrf.mxu1  ;;  %v11380_v36 = vrot.slane %v11379_v34, 4  ;;  %v11928_v10 = vsel %vm16358_vm5, %v13863_v45, %v11927_v14  ;;  %v11929_v47 = vrot.slane %v11927_v14, 4 }
 0x4c4   : > { %v19578_v58 = vadd.f32 %v15192_v27, %v19530_v9  ;;  %v11390_v16 = vrot.slane %v11389_v43, 4  ;;  %v11397_v35 = vshrl.u32 %v11054_v59, 16  ;;  %v11400_v56 = vshll.u32 %v11054_v59, 16  ;;  %15435 = vmatmul.mubr.bf16.gmra.mxu0 %v15900_v51  ;;  %v11833_v59 = vld [vmem:[#allocation3 + $0x28] sm:$0xf] }
 0x4c5   : > { %15478 = vmatprep.mubr.bf16.mxu1 %v13851_v17  ;;  %v11385_v4 = vsel %vm16178_vm2, %v11380_v36, %v11384_v24  ;;  %v11931_v22 = vsel %vm16358_vm5, %v11929_v47, %v11930_v54  ;;  %v11406_v13 = vshll.u32 %v11055_v23, 16  ;;  %v11410_v41 = vshrl.u32 %v11055_v23, 16  ;;  %v7983_v25 = vpop.f32.mrf.mxu1  ;;  %v11834_v40 = vld [vmem:[#allocation3 + $0x2c] sm:$0x1]  ;;  %v437_v54 = vld [vmem:[#allocation3 + $0xd4] sm:$0x1] }
 0x4c6   : > { %v11395_v9 = vsel %vm16178_vm2, %v11390_v16, %v11394_v29  ;;  %v13879_v34 = vcombine.low %v11928_v10, %v11931_v22  ;;  %v11399_v45 = vrot.slane %v11397_v35, 4  ;;  %v11402_v14 = vrot.slane %v11400_v56, 5  ;;  %v11057_v10 = vld [vmem:[#allocation3 + $0xcc] sm:$0xf] }
 0x4c7   : > { %v13852_v43 = vcombine.low %v11385_v4, %v11395_v9  ;;  %v11408_v17 = vrot.slane %v11406_v13, 5  ;;  %v11412_v24 = vrot.slane %v11410_v41, 4  ;;  %v11416_v51 = vshll.u32 %v11056_v32, 16  ;;  %v15193_v27 = vpop.f32.mrf.mxu1  ;;  %v11058_v32 = vld [vmem:[#allocation3 + $0xd0] sm:$0xf] }
 0x4c8   : > { %15502 = vmatprep.mubr.bf16.mxu0 %v13879_v34  ;;  %v11403_v23 = vor.u32 %v11402_v14, %v11399_v45  ;;  %v19589_v36 = vadd.f32 %v7983_v25, %v19534_v7  ;;  %v19592_v47 = vadd.f32 %v15193_v27, %v19543_v49  ;;  %v13864_v29 = vrot.slane %v11832_v26, 9  ;;  %v11835_v26 = vld [vmem:[#allocation3 + $0x30] sm:$0xe] }
 0x4c9   : > { %15479 = vmatmul.mubr.bf16.gmra.mxu1 %v13852_v43  ;;  %v11413_v16 = vor.u32 %v11412_v24, %v11408_v17  ;;  %v11418_v35 = vrot.slane %v11416_v51, 5  ;;  %v7986_v56 = vpop.f32.mrf.mxu1  ;;  %v15216_v4 = vpop.f32.mrf.mxu0  ;;  %v11934_v22 = vrot.slane %v11833_v59, 5  ;;  %v11937_v13 = vrot.slane %v11834_v40, 5 }
 0x4ca   : > { %20964 = vst [vmem:[#allocation14_spill] sm:$0xff] %v19592_v47  ;;  %v11404_v41 = vrot.slane %v11403_v23, 4  ;;  %v19595_v9 = vadd.f32 %v7986_v56, %v19549_v62  ;;  %v19598_v7 = vadd.f32 %v15216_v4, %v19398_v30  ;;  %v438_v49 = vsel %vm17646_vm10, 0, %v437_v54  ;;  %v11836_v30 = vld [vmem:[#allocation3 + $0x34] sm:$0xf] }
 0x4cb   : > { %v11414_v34 = vrot.slane %v11413_v16, 4  ;;  %v11935_v45 = vsel %vm16358_vm5, %v13864_v29, %v11934_v22  ;;  %v11936_v14 = vrot.slane %v11934_v22, 4  ;;  %439 = vst [vmem:[#allocation3 + $0xd4] sm:$0x1] %v438_v49  ;;  %v11421_v59 = vshrl.u32 %v11057_v10, 16  ;;  %v8480_v40 = vpop.f32.mrf.mxu0 }
 0x4cc   : > { %20965 = vst [vmem:[#allocation15_spill] sm:$0xff] %v19595_v9  ;;  %v11409_v43 = vsel %vm16178_vm2, %v11404_v41, %v11408_v17  ;;  %v11424_v62 = vshll.u32 %v11057_v10, 16  ;;  %v11430_v24 = vshll.u32 %v11058_v32, 16  ;;  %v11434_v51 = vshrl.u32 %v11058_v32, 16  ;;  %v11838_v56 = vld [vmem:[#allocation3 + $0x3c] sm:$0xe] }
 0x4cd   : > { %v11419_v27 = vsel %vm16178_vm2, %v11414_v34, %v11418_v35  ;;  %v11938_v54 = vsel %vm16358_vm5, %v11936_v14, %v11937_v13  ;;  %v11423_v23 = vrot.slane %v11421_v59, 4  ;;  %v13865_v16 = vrot.slane %v11835_v26, 9  ;;  %v15217_v29 = vpop.f32.mrf.mxu0  ;;  %v11837_v9 = vld [vmem:[#allocation3 + $0x38] sm:$0x1]  ;;  %v11839_v17 = vld [vmem:[#allocation3 + $0x40] sm:$0xf] }
 0x4ce   : > { %v13853_v4 = vcombine.low %v11409_v43, %v11419_v27  ;;  %v13880_v22 = vcombine.low %v11935_v45, %v11938_v54  ;;  %v11426_v25 = vrot.slane %v11424_v62, 5  ;;  %v11432_v49 = vrot.slane %v11430_v24, 5  ;;  %v11840_v34 = vld [vmem:[#allocation3 + $0x44] sm:$0x1] }
 0x4cf   : > { %v11436_v10 = vrot.slane %v11434_v51, 4  ;;  %v11941_v41 = vrot.slane %v11836_v30, 5  ;;  %v19611_v32 = vadd.f32 %v8480_v40, %v19407_v42  ;;  %v8483_v47 = vpop.f32.mrf.mxu0  ;;  %v19614_v13 = vadd.f32 %v15217_v29, %v19416_v18  ;;  %v11841_v42 = vld [vmem:[#allocation3 + $0x48] sm:$0xe] }
 0x4d0   : > { %15482 = vmatprep.mubr.bf16.mxu1 %v13853_v4  ;;  %15503 = vmatmul.mubr.bf16.vlgmr.msra.gmra.mxu0 %v13880_v22  ;;  %v11427_v35 = vor.u32 %v11426_v25, %v11423_v23  ;;  %v19617_v26 = vadd.f32 %v8483_v47, %v19423_v37  ;;  %v13866_v45 = vrot.slane %v11838_v56, 9  ;;  %v11944_v62 = vrot.slane %v11837_v9, 5  ;;  %v11842_v47 = vld [vmem:[#allocation3 + $0x4c] sm:$0xf] }
 0x4d1   : > { %v15196_v14 = vpop.f32.mrf.mxu1  ;;  %v11437_v59 = vor.u32 %v11436_v10, %v11432_v49  ;;  %v11943_v43 = vrot.slane %v11941_v41, 4  ;;  %v15220_v24 = vpop.f32.mrf.mxu0  ;;  %v11948_v51 = vrot.slane %v11839_v17, 5  ;;  %v11942_v18 = vsel %vm16358_vm5, %v13865_v16, %v11941_v41  ;;  %v11843_v17 = vld [vmem:[#allocation3 + $0x50] sm:$0x1] }
 0x4d2   : > { %v19620_v40 = vadd.f32 %v15196_v14, %v19556_v20  ;;  %v11059_v30 = vld [vmem:[#allocation3 + $0xd4] sm:$0x1]  ;;  %v11428_v27 = vrot.slane %v11427_v35, 4  ;;  %v19625_v37 = vadd.f32 %v15220_v24, %v19432_v55  ;;  %v11951_v56 = vrot.slane %v11840_v34, 5 }
 0x4d3   : > { %v11438_v54 = vrot.slane %v11437_v59, 4  ;;  %v11440_v23 = vshll.u32 %v11059_v30, 16  ;;  %v11945_v9 = vsel %vm16358_vm5, %v11943_v43, %v11944_v62  ;;  %v7999_v29 = vpop.f32.mrf.mxu1  ;;  %v8496_v4 = vpop.f32.mrf.mxu0  ;;  %v11949_v25 = vsel %vm16358_vm5, %v13866_v45, %v11948_v51  ;;  %v11844_v62 = vld [vmem:[#allocation3 + $0x54] sm:$0xe] }
 0x4d4   : > { %v13881_v22 = vcombine.low %v11942_v18, %v11945_v9  ;;  %v19630_v20 = vadd.f32 %v7999_v29, %v19561_v53  ;;  %v11950_v16 = vrot.slane %v11948_v51, 4  ;;  %v11433_v55 = vsel %vm16178_vm2, %v11428_v27, %v11432_v49  ;;  %v11845_v49 = vld [vmem:[#allocation3 + $0x58] sm:$0xf]  ;;  %v11848_v18 = vld [vmem:[#allocation3 + $0x64] sm:$0xf] }
 0x4d5   : > { %v11442_v10 = vrot.slane %v11440_v23, 5  ;;  %v15197_v41 = vpop.f32.mrf.mxu1  ;;  %v13867_v35 = vrot.slane %v11841_v42, 9  ;;  %v11955_v14 = vrot.slane %v11842_v47, 5  ;;  %v15221_v59 = vpop.f32.mrf.mxu0  ;;  %v19642_v43 = vadd.f32 %v8496_v4, %v19439_v11  ;;  %v11847_v9 = vld [vmem:[#allocation3 + $0x60] sm:$0xe] }
 0x4d6   : > { %15506 = vmatprep.mubr.bf16.mxu0 %v13881_v22  ;;  %v19637_v34 = vadd.f32 %v15197_v41, %v19568_v21  ;;  %v11952_v53 = vsel %vm16358_vm5, %v11950_v16, %v11951_v56  ;;  %v19645_v45 = vadd.f32 %v15221_v59, %v19445_v28  ;;  %v11958_v27 = vrot.slane %v11843_v17, 5  ;;  %v11846_v28 = vld [vmem:[#allocation3 + $0x5c] sm:$0x1] }
 0x4d7   : > { %v11443_v24 = vsel %vm16178_vm2, %v11438_v54, %v11442_v10  ;;  %v8002_v51 = vpop.f32.mrf.mxu1  ;;  %v13882_v42 = vcombine.low %v11949_v25, %v11952_v53  ;;  %v11957_v30 = vrot.slane %v11955_v14, 4  ;;  %v8499_v21 = vpop.f32.mrf.mxu0  ;;  %v11956_v39 = vsel %vm16358_vm5, %v13867_v35, %v11955_v14  ;;  %v11849_v25 = vld [vmem:[#allocation3 + $0x68] sm:$0x1] }
 0x4d8   : > { %v13854_v47 = vcombine.low %v11433_v55, %v11443_v24  ;;  %v19650_v23 = vadd.f32 %v8002_v51, %v19584_v12  ;;  %v19653_v11 = vadd.f32 %v8499_v21, %v19455_v52  ;;  %v13868_v4 = vrot.slane %v11844_v62, 9  ;;  %v11851_v55 = vld [vmem:[#allocation3 + $0x70] sm:$0xf] }
 0x4d9   : > { %15507 = vmatmul.mubr.bf16.gmra.mxu0 %v13882_v42  ;;  %v15264_v29 = vpop.f32.mrf.mxu1  ;;  %v11959_v54 = vsel %vm16358_vm5, %v11957_v30, %v11958_v27  ;;  %v15224_v56 = vpop.f32.mrf.mxu0  ;;  %v11962_v22 = vrot.slane %v11845_v49, 5  ;;  %v11969_v17 = vrot.slane %v11848_v18, 5  ;;  %v11965_v35 = vrot.slane %v11846_v28, 5 }
 0x4da   : > { %15483 = vmatmul.mubr.bf16.gmra.mxu1 %v13854_v47  ;;  %v19660_v12 = vadd.f32 %v15264_v29, %v19598_v7  ;;  %v13883_v52 = vcombine.low %v11956_v39, %v11959_v54  ;;  %v19663_v16 = vadd.f32 %v15224_v56, %v19463_v6  ;;  %v13869_v14 = vrot.slane %v11847_v9, 9  ;;  %v11854_v6 = vld [vmem:[#allocation3 + $0x7c] sm:$0xf]  ;;  %v11850_v29 = vld [vmem:[#allocation3 + $0x6c] sm:$0xe] }
 0x4db   : > { %v8929_v10 = vpop.f32.mrf.mxu1  ;;  %v11964_v41 = vrot.slane %v11962_v22, 4  ;;  %v8512_v59 = vpop.f32.mrf.mxu0  ;;  %15566 = vmatprep.mubr.msk.f32.mxu1 %vm16004_vm11, %v20963_v63  ;;  %v11971_v7 = vrot.slane %v11969_v17, 4  ;;  %v11972_v62 = vrot.slane %v11849_v25, 5  ;;  %v11976_v30 = vrot.slane %v11851_v55, 5  ;;  %v11852_v39 = vld [vmem:[#allocation3 + $0x74] sm:$0x1] }
 0x4dc   : > { %15510 = vmatprep.mubr.bf16.mxu0 %v13883_v52  ;;  %v19668_v53 = vadd.f32 %v8929_v10, %v19611_v32  ;;  %v19671_v49 = vadd.f32 %v8512_v59, %v19473_v50  ;;  %v11963_v21 = vsel %vm16358_vm5, %v13868_v4, %v11962_v22  ;;  %v11970_v28 = vsel %vm16358_vm5, %v13869_v14, %v11969_v17  ;;  %v11853_v25 = vld [vmem:[#allocation3 + $0x78] sm:$0xe]  ;;  %v11860_v59 = vld [vmem:[#allocation3 + $0x94] sm:$0xf] }
 0x4dd   : > { %v15265_v24 = vpop.f32.mrf.mxu1  ;;  %v11966_v51 = vsel %vm16358_vm5, %v11964_v41, %v11965_v35  ;;  %v15225_v42 = vpop.f32.mrf.mxu0  ;;  %v11973_v32 = vsel %vm16358_vm5, %v11971_v7, %v11972_v62  ;;  %v11983_v54 = vrot.slane %v11854_v6, 5  ;;  %v11978_v22 = vrot.slane %v11976_v30, 4  ;;  %v11857_v41 = vld [vmem:[#allocation3 + $0x88] sm:$0xf] }
 0x4de   : > { %v19676_v27 = vadd.f32 %v15265_v24, %v19614_v13  ;;  %v19683_v18 = vadd.f32 %v15225_v42, %v19481_v61  ;;  %v13884_v47 = vcombine.low %v11963_v21, %v11966_v51  ;;  %v13885_v56 = vcombine.low %v11970_v28, %v11973_v32  ;;  %v11855_v61 = vld [vmem:[#allocation3 + $0x80] sm:$0x1] }
 0x4df   : > { %v8932_v50 = vpop.f32.mrf.mxu1  ;;  %v8515_v9 = vpop.f32.mrf.mxu0  ;;  %v11985_v10 = vrot.slane %v11983_v54, 4  ;;  %v11979_v14 = vrot.slane %v11852_v39, 5  ;;  %v13871_v7 = vrot.slane %v11853_v25, 9  ;;  %v11986_v62 = vrot.slane %v11855_v61, 5 }
 0x4e0   : > { %v19688_v13 = vadd.f32 %v8932_v50, %v19617_v26  ;;  %v19691_v4 = vadd.f32 %v8515_v9, %v19486_v31  ;;  %v13870_v26 = vrot.slane %v11850_v29, 9  ;;  %v11990_v42 = vrot.slane %v11857_v41, 5 }
 0x4e1   : > { %15511 = vmatmul.mubr.bf16.gmra.mxu0 %v13884_v47  ;;  %v15268_v52 = vpop.f32.mrf.mxu1  ;;  %v15228_v55 = vpop.f32.mrf.mxu0  ;;  %v11980_v51 = vsel %vm16358_vm5, %v11978_v22, %v11979_v14  ;;  %v11997_v50 = vrot.slane %v11860_v59, 5  ;;  %v11858_v22 = vld [vmem:[#allocation3 + $0x8c] sm:$0x1] }
 0x4e2   : > { %v19694_v17 = vadd.f32 %v15268_v52, %v19625_v37  ;;  %15514 = vmatprep.mubr.bf16.mxu0 %v13885_v56  ;;  %v19697_v35 = vadd.f32 %v15228_v55, %v19496_v1  ;;  %v11987_v1 = vsel %vm16358_vm5, %v11985_v10, %v11986_v62  ;;  %v11856_v56 = vld [vmem:[#allocation3 + $0x84] sm:$0xe]  ;;  %v11992_v52 = vrot.slane %v11990_v42, 4  ;;  %v11861_v55 = vld [vmem:[#allocation3 + $0x98] sm:$0x1] }
 0x4e3   : > { %v8945_v31 = vpop.f32.mrf.mxu1  ;;  %v8528_v6 = vpop.f32.mrf.mxu0  ;;  %v11993_v59 = vrot.slane %v11858_v22, 5 }
 0x4e4   : > { %v19700_v24 = vadd.f32 %v8945_v31, %v19642_v43  ;;  %v19705_v37 = vadd.f32 %v8528_v6, %v19503_v19  ;;  %v11977_v43 = vsel %vm16358_vm5, %v13870_v26, %v11976_v30  ;;  %v11984_v19 = vsel %vm16358_vm5, %v13871_v7, %v11983_v54  ;;  %v11859_v30 = vld [vmem:[#allocation3 + $0x90] sm:$0xe]  ;;  %v11863_v26 = vld [vmem:[#allocation3 + $0xa0] sm:$0xf]  ;;  %v11866_v31 = vld [vmem:[#allocation3 + $0xac] sm:$0xf] }
 0x4e5   : > { %v15269_v21 = vpop.f32.mrf.mxu1  ;;  %v15229_v32 = vpop.f32.mrf.mxu0  ;;  %v13886_v29 = vcombine.low %v11977_v43, %v11980_v51  ;;  %v13887_v61 = vcombine.low %v11984_v19, %v11987_v1  ;;  %v11999_v54 = vrot.slane %v11997_v50, 4  ;;  %v13873_v62 = vrot.slane %v11859_v30, 9  ;;  %v11864_v30 = vld [vmem:[#allocation3 + $0xa4] sm:$0x1] }
 0x4e6   : > { %v19710_v47 = vadd.f32 %v15269_v21, %v19645_v45  ;;  %v19715_v28 = vadd.f32 %v15229_v32, %v19508_v2  ;;  %v8062_v2 = vadd.f32 %v19528_v46, %v19483_v15  ;;  %v12000_v6 = vrot.slane %v11861_v55, 5 }
 0x4e7   : > { %v8948_v9 = vpop.f32.mrf.mxu1  ;;  %v8531_v39 = vpop.f32.mrf.mxu0  ;;  %v11994_v46 = vsel %vm16358_vm5, %v11992_v52, %v11993_v59  ;;  %v12011_v43 = vrot.slane %v11866_v31, 5  ;;  %v11998_v22 = vsel %vm16358_vm5, %v13873_v62, %v11997_v50  ;;  %v11862_v52 = vld [vmem:[#allocation3 + $0x9c] sm:$0xe]  ;;  %v11872_v59 = vld [vmem:[#allocation3 + $0xc4] sm:$0xf] }
 0x4e8   : > { %v19720_v25 = vadd.f32 %v8948_v9, %v19653_v11  ;;  %v19723_v45 = vadd.f32 %v8531_v39, %v19515_v0  ;;  %v13872_v0 = vrot.slane %v11856_v56, 9  ;;  %v8063_v9 = vadd.f32 %v19541_v60, %v19498_v3 }
 0x4e9   : > { %15515 = vmatmul.mubr.bf16.gmra.mxu0 %v13886_v29  ;;  %v15272_v10 = vpop.f32.mrf.mxu1  ;;  %v15232_v41 = vpop.f32.mrf.mxu0 }
 0x4ea   : > { %v19728_v14 = vadd.f32 %v15272_v10, %v19663_v16  ;;  %15518 = vmatprep.mubr.bf16.mxu0 %v13887_v61  ;;  %v19731_v11 = vadd.f32 %v15232_v41, %v19526_v57  ;;  %v12004_v16 = vrot.slane %v11863_v26, 5  ;;  %v12001_v57 = vsel %vm16358_vm5, %v11999_v54, %v12000_v6  ;;  %v11869_v54 = vld [vmem:[#allocation3 + $0xb8] sm:$0xf] }
 0x4eb   : > { %v8961_v7 = vpop.f32.mrf.mxu1  ;;  %v8544_v51 = vpop.f32.mrf.mxu0  ;;  %v13889_v3 = vcombine.low %v11998_v22, %v12001_v57  ;;  %v12013_v41 = vrot.slane %v12011_v43, 4 }
 0x4ec   : > { %v19734_v15 = vadd.f32 %v8961_v7, %v19671_v49  ;;  %v19738_v21 = vadd.f32 %v8544_v51, %v8062_v2  ;;  %v11991_v49 = vsel %vm16358_vm5, %v13872_v0, %v11990_v42  ;;  %v11865_v2 = vld [vmem:[#allocation3 + $0xa8] sm:$0xe]  ;;  %v11867_v42 = vld [vmem:[#allocation3 + $0xb0] sm:$0x1]  ;;  %v12007_v0 = vrot.slane %v11864_v30, 5 }
 0x4ed   : > { %v15273_v1 = vpop.f32.mrf.mxu1  ;;  %v15233_v32 = vpop.f32.mrf.mxu0  ;;  %v13888_v56 = vcombine.low %v11991_v49, %v11994_v46  ;;  %v13875_v7 = vrot.slane %v11865_v2, 9  ;;  %v12014_v62 = vrot.slane %v11867_v42, 5  ;;  %v11870_v30 = vld [vmem:[#allocation3 + $0xbc] sm:$0x1] }
 0x4ee   : > { %v19745_v29 = vadd.f32 %v15273_v1, %v19683_v18  ;;  %v19750_v19 = vadd.f32 %v15233_v32, %v19539_v33  ;;  %v12006_v18 = vrot.slane %v12004_v16, 4  ;;  %v12018_v1 = vrot.slane %v11869_v54, 5 }
 0x4ef   : > { %v8964_v39 = vpop.f32.mrf.mxu1  ;;  %v8547_v61 = vpop.f32.mrf.mxu0 }
 0x4f0   : > { %v19755_v55 = vadd.f32 %v8964_v39, %v19691_v4  ;;  %v19757_v60 = vadd.f32 %v8547_v61, %v8063_v9  ;;  %v13874_v4 = vrot.slane %v11862_v52, 9  ;;  %v12008_v46 = vsel %vm16358_vm5, %v12006_v18, %v12007_v0 }
 0x4f1   : > { %15519 = vmatmul.mubr.bf16.gmra.mxu0 %v13888_v56  ;;  %v15276_v33 = vpop.f32.mrf.mxu1  ;;  %v15236_v10 = vpop.f32.mrf.mxu0  ;;  %v12025_v9 = vrot.slane %v11872_v59, 5  ;;  %v11868_v56 = vld [vmem:[#allocation3 + $0xb4] sm:$0xe]  ;;  %v12012_v61 = vsel %vm16358_vm5, %v13875_v7, %v12011_v43  ;;  %v12020_v42 = vrot.slane %v12018_v1, 4  ;;  %v12021_v0 = vrot.slane %v11870_v30, 5 }
 0x4f2   : > { %v19760_v26 = vadd.f32 %v15276_v33, %v19697_v35  ;;  %15522 = vmatprep.mubr.bf16.mxu0 %v13889_v3  ;;  %v19763_v50 = vadd.f32 %v15236_v10, %v19554_v38  ;;  %v12015_v38 = vsel %vm16358_vm5, %v12013_v41, %v12014_v62  ;;  %v11875_v3 = vld [vmem:[#allocation3 + $0xd0] sm:$0xf]  ;;  %v11873_v33 = vld [vmem:[#allocation3 + $0xc8] sm:$0x1]  ;;  %v13876_v41 = vrot.slane %v11868_v56, 9 }
 0x4f3   : > { %v8977_v31 = vpop.f32.mrf.mxu1  ;;  %v8560_v6 = vpop.f32.mrf.mxu0  ;;  %v12027_v54 = vrot.slane %v12025_v9, 4  ;;  %v12032_v59 = vrot.slane %v11875_v3, 5 }
 0x4f4   : > { %v19766_v51 = vadd.f32 %v8977_v31, %v19705_v37  ;;  %v19771_v35 = vadd.f32 %v8560_v6, %v19559_v5  ;;  %v12005_v37 = vsel %vm16358_vm5, %v13874_v4, %v12004_v16  ;;  %v11871_v16 = vld [vmem:[#allocation3 + $0xc0] sm:$0xe]  ;;  %v11876_v6 = vld [vmem:[#allocation3 + $0xd4] sm:$0x1] }
 0x4f5   : > { %v15277_v57 = vpop.f32.mrf.mxu1  ;;  %v15237_v32 = vpop.f32.mrf.mxu0  ;;  %v13890_v5 = vcombine.low %v12005_v37, %v12008_v46  ;;  %v13877_v7 = vrot.slane %v11871_v16, 9  ;;  %v20968_v16 = vld [vmem:[#allocation15_spill] sm:$0xff] }
 0x4f6   : > { %v19776_v49 = vadd.f32 %v15277_v57, %v19715_v28  ;;  %v19781_v39 = vadd.f32 %v15237_v32, %v19566_v44  ;;  %v13891_v28 = vcombine.low %v12012_v61, %v12015_v38  ;;  %v12022_v57 = vsel %vm16358_vm5, %v12020_v42, %v12021_v0 }
 0x4f7   : > { %v8980_v22 = vpop.f32.mrf.mxu1  ;;  %v8563_v52 = vpop.f32.mrf.mxu0  ;;  %v12034_v61 = vrot.slane %v12032_v59, 4 }
 0x4f8   : > { %v19786_v18 = vadd.f32 %v8980_v22, %v19723_v45  ;;  %v8660_v2 = vadd.f32 %v8563_v52, %v19573_v8  ;;  %v11874_v45 = vld [vmem:[#allocation3 + $0xcc] sm:$0xe]  ;;  %v12028_v8 = vrot.slane %v11873_v33, 5  ;;  %v12035_v52 = vrot.slane %v11876_v6, 5 }
 0x4f9   : > { %15523 = vmatmul.mubr.bf16.gmra.mxu0 %v13890_v5  ;;  %v15280_v44 = vpop.f32.mrf.mxu1  ;;  %v15240_v10 = vpop.f32.mrf.mxu0  ;;  %v13878_v56 = vrot.slane %v11874_v45, 9  ;;  %v20967_v5 = vld [vmem:[#allocation14_spill] sm:$0xff] }
 0x4fa   : > { %v19790_v4 = vadd.f32 %v15280_v44, %v19731_v11  ;;  %15526 = vmatprep.mubr.bf16.mxu0 %v13891_v28  ;;  %v8665_v43 = vadd.f32 %v15240_v10, %v19578_v58  ;;  %v12019_v58 = vsel %vm16358_vm5, %v13876_v41, %v12018_v1  ;;  %v12029_v32 = vsel %vm16358_vm5, %v12027_v54, %v12028_v8 }
 0x4fb   : > { %v8993_v31 = vpop.f32.mrf.mxu1  ;;  %v8576_v62 = vpop.f32.mrf.mxu0  ;;  %v13892_v3 = vcombine.low %v12019_v58, %v12022_v57  ;;  %v12033_v54 = vsel %vm16358_vm5, %v13878_v56, %v12032_v59 }
 0x4fc   : > { %v19794_v46 = vadd.f32 %v8993_v31, %v19738_v21  ;;  %v8663_v11 = vadd.f32 %v8576_v62, %v19589_v36  ;;  %v12026_v36 = vsel %vm16358_vm5, %v13877_v7, %v12025_v9  ;;  %v12036_v9 = vsel %vm16358_vm5, %v12034_v61, %v12035_v52 }
 0x4fd   : > { %v15281_v38 = vpop.f32.mrf.mxu1  ;;  %v15241_v37 = vpop.f32.mrf.mxu0  ;;  %v13893_v42 = vcombine.low %v12026_v36, %v12029_v32  ;;  %v13894_v8 = vcombine.low %v12033_v54, %v12036_v9 }
 0x4fe   : > { %v19804_v22 = vadd.f32 %v15281_v38, %v19750_v19  ;;  %v8666_v21 = vadd.f32 %v15241_v37, %v20967_v5 }
 0x4ff   : > { %v8996_v30 = vpop.f32.mrf.mxu1  ;;  %v8579_v28 = vpop.f32.mrf.mxu0 }
 0x500   : > { %v19810_v1 = vadd.f32 %v8996_v30, %v19757_v60  ;;  %v8664_v33 = vadd.f32 %v8579_v28, %v20968_v16 }
 0x501   : > { %15527 = vmatmul.mubr.bf16.gmra.mxu0 %v13892_v3  ;;  %v15284_v44 = vpop.f32.mrf.mxu1  ;;  %v15244_v19 = vpop.f32.mrf.mxu0 }
 0x502   : > { %v19814_v10 = vadd.f32 %v15284_v44, %v19763_v50  ;;  %15530 = vmatprep.mubr.bf16.mxu0 %v13893_v42  ;;  %v8669_v41 = vadd.f32 %v15244_v19, %v19620_v40 }
 0x503   : > { %v9009_v60 = vpop.f32.mrf.mxu1  ;;  %v8592_v0 = vpop.f32.mrf.mxu0 }
 0x504   : > { %v19822_v45 = vadd.f32 %v9009_v60, %v19771_v35  ;;  %v8667_v31 = vadd.f32 %v8592_v0, %v19630_v20 }
 0x505   : > { %v15285_v7 = vpop.f32.mrf.mxu1  ;;  %v15245_v50 = vpop.f32.mrf.mxu0 }
 0x506   : > { %v19826_v62 = vadd.f32 %v15285_v7, %v19781_v39  ;;  %v8670_v40 = vadd.f32 %v15245_v50, %v19637_v34 }
 0x507   : > { %v9012_v6 = vpop.f32.mrf.mxu1  ;;  %v8595_v59 = vpop.f32.mrf.mxu0 }
 0x508   : > { %v19829_v57 = vadd.f32 %v9012_v6, %v8660_v2  ;;  %v8668_v48 = vadd.f32 %v8595_v59, %v19650_v23 }
 0x509   : > { %15531 = vmatmul.mubr.bf16.gmra.mxu0 %v13894_v8  ;;  %v15288_v38 = vpop.f32.mrf.mxu1  ;;  %v15312_v35 = vpop.f32.mrf.mxu0 }
 0x50a   : > { %v19832_v58 = vadd.f32 %v15288_v38, %v8665_v43  ;;  %v9907_v20 = vadd.f32 %v15312_v35, %v19660_v12 }
 0x50b   : > { %v9025_v32 = vpop.f32.mrf.mxu1  ;;  %v9746_v37 = vpop.f32.mrf.mxu0 }
 0x50c   : > { %v19835_v56 = vadd.f32 %v9025_v32, %v8663_v11  ;;  %v9905_v39 = vadd.f32 %v9746_v37, %v19668_v53 }
 0x50d   : > { %v15289_v34 = vpop.f32.mrf.mxu1  ;;  %v15313_v5 = vpop.f32.mrf.mxu0 }
 0x50e   : > { %v19838_v61 = vadd.f32 %v15289_v34, %v8666_v21  ;;  %v9908_v2 = vadd.f32 %v15313_v5, %v19676_v27 }
 0x50f   : > { %v9028_v23 = vpop.f32.mrf.mxu1  ;;  %v9749_v52 = vpop.f32.mrf.mxu0 }
 0x510   : > { %v19841_v30 = vadd.f32 %v9028_v23, %v8664_v33  ;;  %v19844_v43 = vadd.f32 %v9749_v52, %v19688_v13 }
 0x511   : > { %v15292_v12 = vpop.f32.mrf.mxu1  ;;  %v15316_v3 = vpop.f32.mrf.mxu0 }
 0x512   : > { %v19846_v36 = vadd.f32 %v15292_v12, %v8669_v41  ;;  %v9911_v11 = vadd.f32 %v15316_v3, %v19694_v17 }
 0x513   : > { %v9041_v53 = vpop.f32.mrf.mxu1  ;;  %v9762_v28 = vpop.f32.mrf.mxu0 }
 0x514   : > { %v19849_v42 = vadd.f32 %v9041_v53, %v8667_v31  ;;  %v19852_v21 = vadd.f32 %v9762_v28, %v19700_v24 }
 0x515   : > { %v15293_v27 = vpop.f32.mrf.mxu1  ;;  %v15317_v16 = vpop.f32.mrf.mxu0 }
 0x516   : > { %v19854_v33 = vadd.f32 %v15293_v27, %v8670_v40  ;;  %v9912_v13 = vadd.f32 %v15317_v16, %v19710_v47  ;;  %v19915_v16 = vld [vmem:[%s20712_s7 + $0x70] sm:$0xff] }
 0x517   : > { %v9044_v44 = vpop.f32.mrf.mxu1  ;;  %v9765_v19 = vpop.f32.mrf.mxu0  ;;  %20970 = vst [vmem:[#allocation37_spill] sm:$0xff] %v19915_v16 }
 0x518   : > { %v19857_v54 = vadd.f32 %v9044_v44, %v8668_v48  ;;  %v19860_v41 = vadd.f32 %v9765_v19, %v19720_v25 }
 0x519   : > { %v15360_v17 = vpop.f32.mrf.mxu1  ;;  %v15320_v9 = vpop.f32.mrf.mxu0 }
 0x51a   : > { %v19862_v60 = vadd.f32 %v15360_v17, %v9907_v20  ;;  %v9915_v24 = vadd.f32 %v15320_v9, %v19728_v14 }
 0x51b   : > { %v10339_v0 = vpop.f32.mrf.mxu1  ;;  %v9778_v31 = vpop.f32.mrf.mxu0 }
 0x51c   : > { %v19865_v7 = vadd.f32 %v10339_v0, %v9905_v39  ;;  %v19868_v8 = vadd.f32 %v9778_v31, %v19734_v15 }
 0x51d   : > { %v15361_v47 = vpop.f32.mrf.mxu1  ;;  %v15321_v50 = vpop.f32.mrf.mxu0 }
 0x51e   : > { %v19870_v40 = vadd.f32 %v15361_v47, %v9908_v2  ;;  %v9916_v25 = vadd.f32 %v15321_v50, %v19745_v29 }
 0x51f   : > { %v19873_v6 = vpop.f32.mrf.mxu1  ;;  %v9781_v59 = vpop.f32.mrf.mxu0 }
 0x520   : > { %v19876_v48 = vadd.f32 %v9781_v59, %v19755_v55  ;;  %v19945_v59 = vld [vmem:[%s20712_s7 + $0x60] sm:$0xff] }
 0x521   : > { %v15364_v14 = vpop.f32.mrf.mxu1  ;;  %v15324_v38 = vpop.f32.mrf.mxu0  ;;  %20973 = vst [vmem:[#allocation39_spill] sm:$0xff] %v19945_v59 }
 0x522   : > { %v19878_v35 = vadd.f32 %v15364_v14, %v9911_v11  ;;  %v9919_v20 = vadd.f32 %v15324_v38, %v19760_v26 }
 0x523   : > { %v19881_v15 = vpop.f32.mrf.mxu1  ;;  %v9794_v32 = vpop.f32.mrf.mxu0 }
 0x524   : > { %v19884_v37 = vadd.f32 %v9794_v32, %v19766_v51  ;;  %v19900_v51 = vld [vmem:[%s20712_s7 + $0x78] sm:$0xff] }
 0x525   : > { %v15365_v39 = vpop.f32.mrf.mxu1  ;;  %v15325_v29 = vpop.f32.mrf.mxu0  ;;  %20969 = vst [vmem:[#allocation36_spill] sm:$0xff] %v19900_v51  ;;  %15535 = vmatpush3.msra.mxu1 %v19900_v51 }
 0x526   : > { %v19886_v34 = vadd.f32 %v15365_v39, %v9912_v13  ;;  %v9920_v5 = vadd.f32 %v15325_v29, %v19776_v49  ;;  %15536 = vmatprep.subr.mxu1 %v20963_v63  ;;  %v19960_v29 = vld [vmem:[%s20712_s7 + $0x58] sm:$0xff] }
 0x527   : > { %v19889_v55 = vpop.f32.mrf.mxu1  ;;  %v9797_v2 = vpop.f32.mrf.mxu0  ;;  %15537 = vmatpush3.msra.mxu1 %v19915_v16  ;;  %20975 = vst [vmem:[#allocation63_spill] sm:$0xff] %v19960_v29  ;;  %v20095_v16 = vld [vmem:[%s20712_s7 + $0x20] sm:$0xff] }
 0x528   : > { %v19892_v23 = vadd.f32 %v9797_v2, %v19786_v18  ;;  %15538 = vmatprep.subr.mxu1 %v20963_v63  ;;  %20992 = vst [vmem:[#allocation46_spill] sm:$0xff] %v20095_v16 }
 0x529   : > { %v15368_v52 = vpop.f32.mrf.mxu1  ;;  %v15328_v26 = vpop.f32.mrf.mxu0 }
 0x52a   : > { %v19894_v12 = vadd.f32 %v15368_v52, %v9915_v24  ;;  %v9923_v3 = vadd.f32 %v15328_v26, %v19790_v4  ;;  %v19930_v24 = vld [vmem:[%s20712_s7 + $0x68] sm:$0xff] }
 0x52b   : > { %v19902_v11 = vpop.f32.mrf.mxu1  ;;  %v9810_v49 = vpop.f32.mrf.mxu0  ;;  %20971 = vst [vmem:[#allocation16_spill] sm:$0xff] %v19930_v24  ;;  %15539 = vmatpush3.msra.mxu1 %v19930_v24 }
 0x52c   : > { %v19906_v53 = vadd.f32 %v9810_v49, %v19794_v46  ;;  %15540 = vmatprep.subr.mxu1 %v20963_v63  ;;  %v19975_v49 = vld [vmem:[%s20712_s7 + $0x50] sm:$0xff] }
 0x52d   : > { %v15369_v18 = vpop.f32.mrf.mxu1  ;;  %v15329_v28 = vpop.f32.mrf.mxu0  ;;  %15541 = vmatpush3.msra.mxu1 %v19945_v59  ;;  %20977 = vst [vmem:[#allocation66_spill] sm:$0xff] %v19975_v49 }
 0x52e   : > { %v19909_v27 = vadd.f32 %v15369_v18, %v9916_v25  ;;  %v9924_v4 = vadd.f32 %v15329_v28, %v19804_v22  ;;  %15542 = vmatprep.subr.mxu1 %v20963_v63 }
 0x52f   : > { %v19917_v13 = vpop.f32.mrf.mxu1  ;;  %v9813_v44 = vpop.f32.mrf.mxu0  ;;  %15543 = vmatpush3.msra.mxu1 %v19960_v29 }
 0x530   : > { %v19921_v46 = vadd.f32 %v9813_v44, %v19810_v1  ;;  %15544 = vmatprep.subr.mxu1 %v20963_v63 }
 0x531   : > { %v15372_v19 = vpop.f32.mrf.mxu1  ;;  %v15332_v17 = vpop.f32.mrf.mxu0  ;;  %15545 = vmatpush3.msra.mxu1 %v19975_v49 }
 0x532   : > { %v19924_v9 = vadd.f32 %v15372_v19, %v9919_v20  ;;  %v9927_v22 = vadd.f32 %v15332_v17, %v19814_v10  ;;  %15546 = vmatprep.subr.mxu1 %v20963_v63 }
 0x533   : > { %v19932_v0 = vpop.f32.mrf.mxu1  ;;  %v9826_v31 = vpop.f32.mrf.mxu0 }
 0x534   : > { %v19936_v1 = vadd.f32 %v9826_v31, %v19822_v45 }
 0x535   : > { %v15373_v47 = vpop.f32.mrf.mxu1  ;;  %v15333_v50 = vpop.f32.mrf.mxu0 }
 0x536   : > { %20972 = vst [vmem:[#allocation17_spill] sm:$0xff] %v19936_v1  ;;  %v19939_v25 = vadd.f32 %v15373_v47, %v9920_v5  ;;  %v9928_v10 = vadd.f32 %v15333_v50, %v19826_v62 }
 0x537   : > { %v19947_v14 = vpop.f32.mrf.mxu1  ;;  %v9829_v38 = vpop.f32.mrf.mxu0 }
 0x538   : > { %v19951_v45 = vadd.f32 %v9829_v38, %v19829_v57  ;;  %v20004_v38 = vld [vmem:[%s20712_s7 + $0x40] sm:$0xff] }
 0x539   : > { %v15376_v20 = vpop.f32.mrf.mxu1  ;;  %v15336_v32 = vpop.f32.mrf.mxu0  ;;  %20982 = vst [vmem:[#allocation34_spill] sm:$0xff] %v20004_v38 }
 0x53a   : > { %20974 = vst [vmem:[#allocation27_spill] sm:$0xff] %v19951_v45  ;;  %v19954_v39 = vadd.f32 %v15376_v20, %v9923_v3  ;;  %v9931_v62 = vadd.f32 %v15336_v32, %v19832_v58 }
 0x53b   : > { %v19962_v5 = vpop.f32.mrf.mxu1  ;;  %v9842_v2 = vpop.f32.mrf.mxu0 }
 0x53c   : > { %v19966_v57 = vadd.f32 %v9842_v2, %v19835_v56 }
 0x53d   : > { %v15377_v52 = vpop.f32.mrf.mxu1  ;;  %v15337_v26 = vpop.f32.mrf.mxu0 }
 0x53e   : > { %20976 = vst [vmem:[#allocation12_spill] sm:$0xff] %v19966_v57  ;;  %v19969_v3 = vadd.f32 %v15377_v52, %v9924_v4  ;;  %v9932_v58 = vadd.f32 %v15337_v26, %v19838_v61  ;;  %v19989_v61 = vld [vmem:[%s20712_s7 + $0x48] sm:$0xff]  ;;  %v20019_v26 = vld [vmem:[%s20712_s7 + $0x38] sm:$0xff] }
 0x53f   : > { %v19977_v18 = vpop.f32.mrf.mxu1  ;;  %v9845_v28 = vpop.f32.mrf.mxu0  ;;  %20979 = vst [vmem:[#allocation21_spill] sm:$0xff] %v19989_v61  ;;  %15547 = vmatpush3.msra.mxu1 %v19989_v61  ;;  %20985 = vst [vmem:[#allocation68_spill] sm:$0xff] %v20019_v26 }
 0x540   : > { %v19981_v56 = vadd.f32 %v9845_v28, %v19841_v30  ;;  %15548 = vmatprep.subr.mxu1 %v20963_v63 }
 0x541   : > { %v15380_v44 = vpop.f32.mrf.mxu1  ;;  %15549 = vmatpush3.msra.mxu1 %v20004_v38 }
 0x542   : > { %20978 = vst [vmem:[#allocation19_spill] sm:$0xff] %v19981_v56  ;;  %v19984_v4 = vadd.f32 %v15380_v44, %v9927_v22  ;;  %15550 = vmatprep.subr.mxu1 %v20963_v63 }
 0x543   : > { %v19991_v19 = vpop.f32.mrf.mxu1  ;;  %v15340_v17 = vpop.f32.mrf.mxu0  ;;  %15551 = vmatpush3.msra.mxu1 %v20019_v26 }
 0x544   : > { %20980 = vst [vmem:[#allocation30_spill] sm:$0xff] %v19991_v19  ;;  %v9935_v31 = vadd.f32 %v15340_v17, %v19846_v36  ;;  %15552 = vmatprep.subr.mxu1 %v20963_v63 }
 0x545   : > { %v15381_v30 = vpop.f32.mrf.mxu1  ;;  %v9858_v47 = vpop.f32.mrf.mxu0 }
 0x546   : > { %v19996_v50 = vadd.f32 %v15381_v30, %v9928_v10  ;;  %v19999_v22 = vadd.f32 %v9858_v47, %v19849_v42  ;;  %v20036_v47 = vld [vmem:[%s20712_s7 + $0x30] sm:$0xff] }
 0x547   : > { %v20006_v20 = vpop.f32.mrf.mxu1  ;;  %v15341_v32 = vpop.f32.mrf.mxu0  ;;  %20987 = vst [vmem:[#allocation65_spill] sm:$0xff] %v20036_v47  ;;  %15553 = vmatpush3.msra.mxu1 %v20036_v47 }
 0x548   : > { %20981 = vst [vmem:[#allocation31_spill] sm:$0xff] %v19999_v22  ;;  %20983 = vst [vmem:[#allocation13_spill] sm:$0xff] %v20006_v20  ;;  %v9936_v36 = vadd.f32 %v15341_v32, %v19854_v33  ;;  %15554 = vmatprep.subr.mxu1 %v20963_v63 }
 0x549   : > { %v15384_v2 = vpop.f32.mrf.mxu1  ;;  %v9861_v10 = vpop.f32.mrf.mxu0 }
 0x54a   : > { %v20011_v52 = vadd.f32 %v15384_v2, %v9931_v62  ;;  %v20014_v42 = vadd.f32 %v9861_v10, %v19857_v54 }
 0x54b   : > { %v20021_v28 = vpop.f32.mrf.mxu1  ;;  %v15408_v44 = vpop.f32.mrf.mxu0 }
 0x54c   : > { %20984 = vst [vmem:[#allocation64_spill] sm:$0xff] %v20014_v42  ;;  %20986 = vst [vmem:[#allocation40_spill] sm:$0xff] %v20021_v28  ;;  %v20025_v33 = vadd.f32 %v15408_v44, %v19862_v60  ;;  %v20052_v44 = vld [vmem:[%s20712_s7 + $0x28] sm:$0xff] }
 0x54d   : > { %v15385_v62 = vpop.f32.mrf.mxu1  ;;  %v10789_v17 = vpop.f32.mrf.mxu0  ;;  %20989 = vst [vmem:[#allocation70_spill] sm:$0xff] %v20052_v44  ;;  %15555 = vmatpush3.msra.mxu1 %v20052_v44 }
 0x54e   : > { %v20028_v30 = vadd.f32 %v15385_v62, %v9932_v58  ;;  %v20031_v54 = vadd.f32 %v10789_v17, %v19865_v7  ;;  %15556 = vmatprep.subr.mxu1 %v20963_v63 }
 0x54f   : > { %v20038_v32 = vpop.f32.mrf.mxu1  ;;  %v15409_v2 = vpop.f32.mrf.mxu0  ;;  %15557 = vmatpush3.msra.mxu1 %v20095_v16 }
 0x550   : > { %20988 = vst [vmem:[#allocation18_spill] sm:$0xff] %v20038_v32  ;;  %v20042_v60 = vadd.f32 %v15409_v2, %v19870_v40  ;;  %15558 = vmatprep.subr.mxu1 %v20963_v63 }
 0x551   : > { %v15388_v58 = vpop.f32.mrf.mxu1  ;;  %v20045_v10 = vpop.f32.mrf.mxu0 }
 0x552   : > { %v20047_v7 = vadd.f32 %v15388_v58, %v9935_v31 }
 0x553   : > { %v20054_v62 = vpop.f32.mrf.mxu1  ;;  %v15412_v17 = vpop.f32.mrf.mxu0 }
 0x554   : > { %20990 = vst [vmem:[#allocation23_spill] sm:$0xff] %v20054_v62  ;;  %v20058_v40 = vadd.f32 %v15412_v17, %v19878_v35 }
 0x555   : > { %v15389_v2 = vpop.f32.mrf.mxu1  ;;  %v20061_v47 = vpop.f32.mrf.mxu0 }
 0x556   : > { %v20063_v31 = vadd.f32 %v15389_v2, %v9936_v36 }
 0x557   : > { %v20065_v58 = vpop.f32.mrf.mxu1  ;;  %v15413_v26 = vpop.f32.mrf.mxu0 }
 0x558   : > { %20991 = vst [vmem:[#allocation26_spill] sm:$0xff] %v20065_v58  ;;  %v20068_v38 = vadd.f32 %v15413_v26, %v19886_v34 }
 0x559   : > { %v20070_v61 = vpop.f32.mrf.mxu1  ;;  %v20072_v49 = vpop.f32.mrf.mxu0 }
 0x55b   : > { %v20074_v44 = vpop.f32.mrf.mxu1  ;;  %v15416_v35 = vpop.f32.mrf.mxu0 }
 0x55c   : > { %v20077_v17 = vadd.f32 %v15416_v35, %v19894_v12  ;;  %v20100_v12 = vld [vmem:[%s20712_s7 + $0x18] sm:$0xff] }
 0x55d   : > { %v20079_v29 = vpop.f32.mrf.mxu1  ;;  %v20081_v36 = vpop.f32.mrf.mxu0  ;;  %20993 = vst [vmem:[#allocation20_spill] sm:$0xff] %v20100_v12  ;;  %15559 = vmatpush3.msra.mxu1 %v20100_v12  ;;  %v20133_v12 = vld [vmem:[%s20712_s7] sm:$0xff] }
 0x55e   : > { %15560 = vmatprep.subr.mxu1 %v20963_v63  ;;  %20996 = vst [vmem:[#allocation67_spill] sm:$0xff] %v20133_v12 }
 0x55f   : > { %v20083_v2 = vpop.f32.mrf.mxu1  ;;  %v15417_v59 = vpop.f32.mrf.mxu0 }
 0x560   : > { %v20086_v34 = vadd.f32 %v15417_v59, %v19909_v27  ;;  %v20112_v59 = vld [vmem:[%s20712_s7 + $0x10] sm:$0xff] }
 0x561   : > { %v20088_v26 = vpop.f32.mrf.mxu1  ;;  %v20090_v24 = vpop.f32.mrf.mxu0  ;;  %20994 = vst [vmem:[#allocation43_spill] sm:$0xff] %v20112_v59  ;;  %15561 = vmatpush3.msra.mxu1 %v20112_v59 }
 0x562   : > { %15562 = vmatprep.subr.mxu1 %v20963_v63 }
 0x563   : > { %v20102_v35 = vpop.f32.mrf.mxu1  ;;  %v15420_v51 = vpop.f32.mrf.mxu0 }
 0x564   : > { %v20106_v27 = vadd.f32 %v15420_v51, %v19924_v9  ;;  %v20123_v51 = vld [vmem:[%s20712_s7 + $0x8] sm:$0xff] }
 0x565   : > { %v20114_v58 = vpop.f32.mrf.mxu0  ;;  %v20117_v42 = vpop.f32.mrf.mxu1  ;;  %20995 = vst [vmem:[#allocation44_spill] sm:$0xff] %v20123_v51  ;;  %15563 = vmatpush3.msra.mxu1 %v20123_v51 }
 0x566   : > { %15564 = vmatprep.subr.mxu1 %v20963_v63 }
 0x567   : > { %v15421_v9 = vpop.f32.mrf.mxu0  ;;  %v20138_v22 = vpop.f32.mrf.mxu1  ;;  %15565 = vmatpush3.msra.mxu1 %v20133_v12 }
 0x568   : > { %v20127_v16 = vadd.f32 %v15421_v9, %v19939_v25  ;;  %15569 = vmatprep.subr.mxu1 %v20963_v63 }
 0x569   : > { %v20135_v62 = vpop.f32.mrf.mxu0  ;;  %v20148_v59 = vpop.f32.mrf.mxu1 }
 0x56b   : > { %v15424_v32 = vpop.f32.mrf.mxu0  ;;  %v20155_v57 = vpop.f32.mrf.mxu1 }
 0x56c   : > { %v20143_v25 = vadd.f32 %v15424_v32, %v19954_v39 }
 0x56d   : > { %v20146_v9 = vpop.f32.mrf.mxu0  ;;  %v20162_v32 = vpop.f32.mrf.mxu1 }
 0x56e   : > { %20997 = vst [vmem:[#allocation47_spill] sm:$0xff] %v20143_v25 }
 0x56f   : > { %v15425_v56 = vpop.f32.mrf.mxu0 }
 0x570   : > { %v20151_v28 = vadd.f32 %v15425_v56, %v19969_v3  ;;  %v20169_v3 = vpop.f32.mrf.mxu1 }
 0x571   : > { %v20153_v51 = vpop.f32.mrf.mxu0 }
 0x572   : > { %20998 = vst [vmem:[#allocation72_spill] sm:$0xff] %v20151_v28 }
 0x573   : > { %v15428_v20 = vpop.f32.mrf.mxu0 }
 0x574   : > { %v20158_v12 = vadd.f32 %v15428_v20, %v19984_v4  ;;  %v20176_v4 = vpop.f32.mrf.mxu1 }
 0x575   : > { %v20160_v39 = vpop.f32.mrf.mxu0 }
 0x576   : > { %20999 = vst [vmem:[#allocation22_spill] sm:$0xff] %v20158_v12  ;;  %21000 = vst [vmem:[#allocation74_spill] sm:$0xff] %v20160_v39 }
 0x577   : > { %v15429_v63 = vpop.f32.mrf.mxu0 }
 0x578   : > { %v20165_v45 = vadd.f32 %v15429_v63, %v19996_v50  ;;  %v20183_v63 = vpop.f32.mrf.mxu1 }
 0x579   : > { %v20167_v25 = vpop.f32.mrf.mxu0 }
 0x57a   : > { %21001 = vst [vmem:[#allocation69_spill] sm:$0xff] %v20165_v45  ;;  %21002 = vst [vmem:[#allocation52_spill] sm:$0xff] %v20167_v25  ;;  %v20185_v45 = vpop.f32.mrf.mxu1 }
 0x57b   : > { %v15432_v56 = vpop.f32.mrf.mxu0 }
 0x57c   : > { %v20172_v28 = vadd.f32 %v15432_v56, %v20011_v52 }
 0x57d   : > { %v20174_v19 = vpop.f32.mrf.mxu0 }
 0x57e   : > { %21003 = vst [vmem:[#allocation50_spill] sm:$0xff] %v20172_v28  ;;  %21004 = vst [vmem:[#allocation51_spill] sm:$0xff] %v20174_v19  ;;  %v20192_v28 = vpop.f32.mrf.mxu1 }
 0x57f   : > { %v15433_v20 = vpop.f32.mrf.mxu0 }
 0x580   : > { %v20179_v12 = vadd.f32 %v15433_v20, %v20028_v30  ;;  %v20199_v20 = vpop.f32.mrf.mxu1 }
 0x581   : > { %v20181_v39 = vpop.f32.mrf.mxu0 }
 0x582   : > { %21005 = vst [vmem:[#allocation54_spill] sm:$0xff] %v20179_v12  ;;  %21006 = vst [vmem:[#allocation76_spill] sm:$0xff] %v20181_v39  ;;  %v10499_v39 = vadd.f32 %v19873_v6, %v19844_v43  ;;  %v20203_v1 = vpop.f32.mrf.mxu1 }
 0x584   : > { %v15436_v50 = vpop.f32.mrf.mxu0  ;;  %v20215_v43 = vpop.f32.mrf.mxu1 }
 0x585   : > { %v20188_v25 = vadd.f32 %v15436_v50, %v20047_v7  ;;  %v10949_v50 = vadd.f32 %v20045_v10, %v10499_v39  ;;  %v11768_v10 = vadd.f32 %v20079_v29, %v20042_v60  ;;  %v10503_v29 = vadd.f32 %v19889_v55, %v19860_v41 }
 0x586   : > { %v20190_v52 = vpop.f32.mrf.mxu0 }
 0x587   : > { %21007 = vst [vmem:[#allocation71_spill] sm:$0xff] %v20188_v25  ;;  %21008 = vst [vmem:[#allocation29_spill] sm:$0xff] %v20190_v52  ;;  %v11765_v25 = vadd.f32 %v20074_v44, %v20031_v54 }
 0x588   : > { %v15437_v56 = vpop.f32.mrf.mxu0 }
 0x589   : > { %v20195_v19 = vadd.f32 %v15437_v56, %v20063_v31  ;;  %v11767_v31 = vadd.f32 %v20070_v61, %v20025_v33  ;;  %v11766_v56 = vadd.f32 %v20083_v2, %v10949_v50 }
 0x58a   : > { %v20197_v30 = vpop.f32.mrf.mxu0 }
 0x58b   : > { %21009 = vst [vmem:[#allocation73_spill] sm:$0xff] %v20195_v19  ;;  %21010 = vst [vmem:[#allocation75_spill] sm:$0xff] %v20197_v30  ;;  %v10502_v30 = vadd.f32 %v19881_v15, %v19852_v21 }
 0x58d   : > { %v10952_v44 = vadd.f32 %v20061_v47, %v10502_v30 }
 0x58f   : > { %v11769_v60 = vadd.f32 %v20102_v35, %v10952_v44  ;;  %v10506_v35 = vadd.f32 %v19902_v11, %v19868_v8 }
 0x590   : > { %v15504_v12 = vpop.f32.mrf.mxu0 }
 0x591   : > { %v20219_v39 = vadd.f32 %v15504_v12, %v11767_v31  ;;  %v20235_v12 = vpop.f32.mrf.mxu1 }
 0x592   : > { %v12199_v7 = vpop.f32.mrf.mxu0 }
 0x593   : > { %v20211_v19 = vadd.f32 %v12199_v7, %v11765_v25  ;;  %v12493_v47 = vmul.f32 %v20219_v39, %v20219_v39  ;;  %v10953_v7 = vadd.f32 %v20072_v49, %v10503_v29  ;;  %v20251_v44 = vpop.f32.mrf.mxu1  ;;  %v10956_v29 = vadd.f32 %v20081_v36, %v10506_v35 }
 0x594   : > { %v15505_v52 = vpop.f32.mrf.mxu0 }
 0x595   : > { %v12491_v61 = vmul.f32 %v20211_v19, %v20211_v19  ;;  %v20226_v33 = vadd.f32 %v15505_v52, %v11768_v10  ;;  %v11770_v10 = vadd.f32 %v20138_v22, %v10953_v7  ;;  %v10507_v22 = vadd.f32 %v19917_v13, %v19876_v48 }
 0x596   : > { %v12202_v6 = vpop.f32.mrf.mxu0 }
 0x597   : > { %v20221_v54 = vadd.f32 %v12202_v6, %v11766_v56  ;;  %v12494_v31 = vmul.f32 %v20226_v33, %v20226_v33  ;;  %v11771_v6 = vadd.f32 %v20088_v26, %v20058_v40 }
 0x599   : > { %v12454_v21 = vadd.f32 %v20221_v54, %v20211_v19  ;;  %v12492_v15 = vmul.f32 %v20221_v54, %v20221_v54  ;;  %v15508_v2 = vpop.f32.mrf.mxu0 }
 0x59a   : > { %v20259_v8 = vadd.f32 %v15508_v2, %v11771_v6 }
 0x59b   : > { %v12455_v25 = vadd.f32 %v12454_v21, %v20219_v39  ;;  %v12523_v52 = vadd.f32 %v12492_v15, %v12491_v61  ;;  %v12215_v30 = vpop.f32.mrf.mxu0 }
 0x59c   : > { %v20241_v50 = vadd.f32 %v12215_v30, %v11769_v60  ;;  %v11772_v60 = vadd.f32 %v20117_v42, %v20068_v38  ;;  %v10957_v42 = vadd.f32 %v20090_v24, %v10507_v22  ;;  %v12497_v30 = vmul.f32 %v20259_v8, %v20259_v8 }
 0x59d   : > { %v12524_v56 = vadd.f32 %v12523_v52, %v12493_v47  ;;  %v12456_v41 = vadd.f32 %v12455_v25, %v20226_v33  ;;  %v15509_v55 = vpop.f32.mrf.mxu0  ;;  %v11773_v47 = vadd.f32 %v20155_v57, %v10956_v29  ;;  %v20266_v25 = vpop.f32.mrf.mxu1  ;;  %v10510_v57 = vadd.f32 %v19932_v0, %v19884_v37 }
 0x59e   : > { %v12495_v61 = vmul.f32 %v20241_v50, %v20241_v50  ;;  %v20268_v52 = vadd.f32 %v15509_v55, %v11772_v60 }
 0x59f   : > { %v12457_v49 = vadd.f32 %v12456_v41, %v20241_v50  ;;  %v12525_v21 = vadd.f32 %v12524_v56, %v12494_v31  ;;  %v12218_v15 = vpop.f32.mrf.mxu0  ;;  %v11775_v31 = vadd.f32 %v20148_v59, %v20077_v17  ;;  %v11774_v41 = vadd.f32 %v20169_v3, %v10957_v42  ;;  %v20284_v55 = vpop.f32.mrf.mxu1 }
 0x5a0   : > { %v20261_v11 = vadd.f32 %v12218_v15, %v11770_v10  ;;  %v12498_v24 = vmul.f32 %v20268_v52, %v20268_v52  ;;  %v10960_v10 = vadd.f32 %v20114_v58, %v10510_v57 }
 0x5a1   : > { %v12526_v40 = vadd.f32 %v12525_v21, %v12495_v61  ;;  %v15512_v26 = vpop.f32.mrf.mxu0  ;;  %v10511_v21 = vadd.f32 %v19947_v14, %v19892_v23  ;;  %v20302_v29 = vpop.f32.mrf.mxu1 }
 0x5a2   : > { %v12458_v36 = vadd.f32 %v12457_v49, %v20261_v11  ;;  %v12496_v38 = vmul.f32 %v20261_v11, %v20261_v11  ;;  %v11776_v49 = vadd.f32 %v20162_v32, %v20086_v34  ;;  %v20292_v37 = vadd.f32 %v15512_v26, %v11775_v31 }
 0x5a3   : > { %v12231_v2 = vpop.f32.mrf.mxu0  ;;  %v11777_v15 = vadd.f32 %v20183_v63, %v10960_v10  ;;  %v11780_v31 = vadd.f32 %v20185_v45, %v20127_v16 }
 0x5a4   : > { %v12459_v48 = vadd.f32 %v12458_v36, %v20259_v8  ;;  %v12527_v13 = vadd.f32 %v12526_v40, %v12496_v38  ;;  %v20277_v7 = vadd.f32 %v12231_v2, %v11773_v47  ;;  %v10961_v40 = vadd.f32 %v20135_v62, %v10511_v21 }
 0x5a5   : > { %v15513_v56 = vpop.f32.mrf.mxu0  ;;  %v12501_v47 = vmul.f32 %v20292_v37, %v20292_v37  ;;  %v10514_v36 = vadd.f32 %v19962_v5, %v19906_v53  ;;  %v11779_v38 = vadd.f32 %v20176_v4, %v20106_v27 }
 0x5a6   : > { %v12528_v35 = vadd.f32 %v12527_v13, %v12497_v30  ;;  %v12460_v6 = vadd.f32 %v12459_v48, %v20268_v52  ;;  %v12499_v59 = vmul.f32 %v20277_v7, %v20277_v7  ;;  %v20304_v32 = vadd.f32 %v15513_v56, %v11776_v49  ;;  %v20320_v30 = vpop.f32.mrf.mxu1 }
 0x5a7   : > { %v12234_v0 = vpop.f32.mrf.mxu0  ;;  %v11778_v2 = vadd.f32 %v20192_v28, %v10961_v40  ;;  %v10964_v57 = vadd.f32 %v20146_v9, %v10514_v36 }
 0x5a8   : > { %v12461_v17 = vadd.f32 %v12460_v6, %v20277_v7  ;;  %v12529_v3 = vadd.f32 %v12528_v35, %v12498_v24  ;;  %v20297_v61 = vadd.f32 %v12234_v0, %v11774_v41  ;;  %v12502_v62 = vmul.f32 %v20304_v32, %v20304_v32  ;;  %v20338_v35 = vpop.f32.mrf.mxu1 }
 0x5a9   : > { %v15516_v58 = vpop.f32.mrf.mxu0  ;;  %v10515_v41 = vadd.f32 %v19977_v18, %v19921_v46  ;;  %v11781_v24 = vadd.f32 %v20203_v1, %v10964_v57 }
 0x5aa   : > { %v12530_v34 = vadd.f32 %v12529_v3, %v12499_v59  ;;  %v12462_v60 = vadd.f32 %v12461_v17, %v20297_v61  ;;  %v12500_v22 = vmul.f32 %v20297_v61, %v20297_v61  ;;  %v20328_v53 = vadd.f32 %v15516_v58, %v11779_v38  ;;  %v21011_v59 = vld [vmem:[#allocation17_spill] sm:$0xff]  ;;  %v21012_v3 = vld [vmem:[#allocation30_spill] sm:$0xff] }
 0x5ab   : > { %v12247_v26 = vpop.f32.mrf.mxu0  ;;  %v10965_v49 = vadd.f32 %v20153_v51, %v10515_v41  ;;  %v10518_v21 = vadd.f32 %v21012_v3, %v21011_v59 }
 0x5ac   : > { %v12463_v23 = vadd.f32 %v12462_v60, %v20292_v37  ;;  %v12531_v14 = vadd.f32 %v12530_v34, %v12500_v22  ;;  %v20313_v63 = vadd.f32 %v12247_v26, %v11777_v15  ;;  %v12505_v17 = vmul.f32 %v20328_v53, %v20328_v53  ;;  %v21013_v15 = vld [vmem:[#allocation47_spill] sm:$0xff]  ;;  %v20356_v22 = vpop.f32.mrf.mxu1 }
 0x5ad   : > { %v15517_v42 = vpop.f32.mrf.mxu0  ;;  %v11783_v58 = vadd.f32 %v20199_v20, %v21013_v15  ;;  %v11782_v60 = vadd.f32 %v20235_v12, %v10965_v49 }
 0x5ae   : > { %v12532_v48 = vadd.f32 %v12531_v14, %v12501_v47  ;;  %v12464_v13 = vadd.f32 %v12463_v23, %v20304_v32  ;;  %v12503_v28 = vmul.f32 %v20313_v63, %v20313_v63  ;;  %v20340_v45 = vadd.f32 %v15517_v42, %v11780_v31  ;;  %v21014_v47 = vld [vmem:[#allocation74_spill] sm:$0xff]  ;;  %v21015_v14 = vld [vmem:[#allocation72_spill] sm:$0xff] }
 0x5af   : > { %v12250_v5 = vpop.f32.mrf.mxu0  ;;  %v10968_v23 = vadd.f32 %v21014_v47, %v10518_v21  ;;  %v11784_v36 = vadd.f32 %v20215_v43, %v21015_v14  ;;  %v21023_v14 = vld [vmem:[#allocation18_spill] sm:$0xff] }
 0x5b0   : > { %v12465_v27 = vadd.f32 %v12464_v13, %v20313_v63  ;;  %v12533_v4 = vadd.f32 %v12532_v48, %v12502_v62  ;;  %v20333_v56 = vadd.f32 %v12250_v5, %v11778_v2  ;;  %v12506_v51 = vmul.f32 %v20340_v45, %v20340_v45  ;;  %v21016_v48 = vld [vmem:[#allocation27_spill] sm:$0xff]  ;;  %v21017_v13 = vld [vmem:[#allocation13_spill] sm:$0xff] }
 0x5b1   : > { %v15520_v9 = vpop.f32.mrf.mxu0  ;;  %v10519_v57 = vadd.f32 %v21017_v13, %v21016_v48  ;;  %v11785_v31 = vadd.f32 %v20266_v25, %v10968_v23  ;;  %v21022_v23 = vld [vmem:[#allocation19_spill] sm:$0xff] }
 0x5b2   : > { %v12534_v16 = vadd.f32 %v12533_v4, %v12503_v28  ;;  %v12466_v6 = vadd.f32 %v12465_v27, %v20333_v56  ;;  %v12504_v10 = vmul.f32 %v20333_v56, %v20333_v56  ;;  %v20364_v38 = vadd.f32 %v15520_v9, %v11783_v58  ;;  %v11705_v27 = vpop.f32.mrf.mxu1  ;;  %v21020_v58 = vld [vmem:[#allocation12_spill] sm:$0xff] }
 0x5b3   : > { %v12263_v0 = vpop.f32.mrf.mxu0 }
 0x5b4   : > { %v12467_v46 = vadd.f32 %v12466_v6, %v20328_v53  ;;  %v12535_v1 = vadd.f32 %v12534_v16, %v12504_v10  ;;  %v20349_v18 = vadd.f32 %v12263_v0, %v11781_v24  ;;  %v21018_v24 = vld [vmem:[#allocation52_spill] sm:$0xff]  ;;  %v12509_v6 = vmul.f32 %v20364_v38, %v20364_v38  ;;  %v21019_v0 = vld [vmem:[#allocation22_spill] sm:$0xff]  ;;  %v15484_v59 = vpop.f32.mrf.mxu1 }
 0x5b5   : > { %v15521_v34 = vpop.f32.mrf.mxu0  ;;  %v10969_v9 = vadd.f32 %v21018_v24, %v10519_v57 }
 0x5b6   : > { %v12536_v40 = vadd.f32 %v12535_v1, %v12505_v17  ;;  %v12468_v26 = vadd.f32 %v12467_v46, %v20340_v45  ;;  %v12507_v12 = vmul.f32 %v20349_v18, %v20349_v18  ;;  %v20374_v43 = vadd.f32 %v15521_v34, %v11784_v36  ;;  %v21021_v34 = vld [vmem:[#allocation40_spill] sm:$0xff]  ;;  %v11718_v13 = vpop.f32.mrf.mxu1 }
 0x5b7   : > { %v12266_v42 = vpop.f32.mrf.mxu0  ;;  %v11787_v17 = vadd.f32 %v20251_v44, %v21019_v0  ;;  %v11786_v1 = vadd.f32 %v20302_v29, %v10969_v9  ;;  %v10523_v36 = vadd.f32 %v21023_v14, %v21022_v23  ;;  %v21032_v23 = vld [vmem:[#allocation29_spill] sm:$0xff] }
 0x5b8   : > { %v12469_v20 = vadd.f32 %v12468_v26, %v20349_v18  ;;  %v12537_v2 = vadd.f32 %v12536_v40, %v12506_v51  ;;  %v20369_v62 = vadd.f32 %v12266_v42, %v11782_v60  ;;  %v12510_v3 = vmul.f32 %v20374_v43, %v20374_v43  ;;  %v21024_v42 = vld [vmem:[#allocation51_spill] sm:$0xff]  ;;  %v15485_v0 = vpop.f32.mrf.mxu1 }
 0x5b9   : > { %v15524_v5 = vpop.f32.mrf.mxu0  ;;  %v10522_v60 = vadd.f32 %v21021_v34, %v21020_v58  ;;  %v21029_v34 = vld [vmem:[#allocation50_spill] sm:$0xff] }
 0x5ba   : > { %v12538_v28 = vadd.f32 %v12537_v2, %v12507_v12  ;;  %v12470_v4 = vadd.f32 %v12469_v20, %v20369_v62  ;;  %v12508_v41 = vmul.f32 %v20369_v62, %v20369_v62  ;;  %v20393_v51 = vadd.f32 %v15524_v5, %v11787_v17  ;;  %v21025_v2 = vld [vmem:[#allocation69_spill] sm:$0xff] }
 0x5bb   : > { %v12279_v16 = vpop.f32.mrf.mxu0  ;;  %v10972_v20 = vadd.f32 %v21024_v42, %v10522_v60  ;;  %v11788_v48 = vadd.f32 %v20284_v55, %v21025_v2  ;;  %v11791_v60 = vadd.f32 %v20320_v30, %v21029_v34  ;;  %v21033_v42 = vld [vmem:[#allocation54_spill] sm:$0xff]  ;;  %v11721_v2 = vpop.f32.mrf.mxu1 }
 0x5bc   : > { %v12471_v10 = vadd.f32 %v12470_v4, %v20364_v38  ;;  %v12539_v49 = vadd.f32 %v12538_v28, %v12508_v41  ;;  %v20383_v25 = vadd.f32 %v12279_v16, %v11785_v31  ;;  %v21026_v28 = vld [vmem:[#allocation76_spill] sm:$0xff]  ;;  %v12513_v9 = vmul.f32 %v20393_v51, %v20393_v51 }
 0x5bd   : > { %v15525_v46 = vpop.f32.mrf.mxu0  ;;  %v10973_v4 = vadd.f32 %v21026_v28, %v10523_v36  ;;  %v11789_v41 = vadd.f32 %v20338_v35, %v10972_v20  ;;  %v11792_v20 = vadd.f32 %v20356_v22, %v21033_v42 }
 0x5be   : > { %v12540_v21 = vadd.f32 %v12539_v49, %v12509_v6  ;;  %v12472_v15 = vadd.f32 %v12471_v10, %v20374_v43  ;;  %v12511_v44 = vmul.f32 %v20383_v25, %v20383_v25  ;;  %v20412_v16 = vadd.f32 %v15525_v46, %v11788_v48 }
 0x5bf   : > { %v12282_v40 = vpop.f32.mrf.mxu0  ;;  %v11790_v49 = vadd.f32 %v11705_v27, %v10973_v4  ;;  %v21030_v27 = vld [vmem:[#allocation64_spill] sm:$0xff] }
 0x5c0   : > { %v12473_v26 = vadd.f32 %v12472_v15, %v20383_v25  ;;  %v12541_v47 = vadd.f32 %v12540_v21, %v12510_v3  ;;  %v20398_v29 = vadd.f32 %v12282_v40, %v11786_v1  ;;  %v21027_v21 = vld [vmem:[#allocation31_spill] sm:$0xff]  ;;  %v12514_v46 = vmul.f32 %v20412_v16, %v20412_v16 }
 0x5c1   : > { %v15528_v12 = vpop.f32.mrf.mxu0  ;;  %v21028_v15 = vld [vmem:[#allocation23_spill] sm:$0xff] }
 0x5c2   : > { %v12542_v57 = vadd.f32 %v12541_v47, %v12511_v44  ;;  %v12474_v31 = vadd.f32 %v12473_v26, %v20398_v29  ;;  %v12512_v5 = vmul.f32 %v20398_v29, %v20398_v29  ;;  %v10526_v35 = vadd.f32 %v21028_v15, %v21027_v21  ;;  %v21031_v44 = vld [vmem:[#allocation26_spill] sm:$0xff]  ;;  %v21035_v21 = vld [vmem:[#allocation71_spill] sm:$0xff] }
 0x5c3   : > { %v12295_v24 = vpop.f32.mrf.mxu0  ;;  %v10527_v47 = vadd.f32 %v21031_v44, %v21030_v27  ;;  %v20432_v48 = vadd.f32 %v15528_v12, %v11791_v60 }
 0x5c4   : > { %v12475_v6 = vadd.f32 %v12474_v31, %v20393_v51  ;;  %v12543_v55 = vadd.f32 %v12542_v57, %v12512_v5  ;;  %v20415_v1 = vadd.f32 %v12295_v24, %v11789_v41  ;;  %v10976_v14 = vadd.f32 %v21032_v23, %v10526_v35  ;;  %v21034_v31 = vld [vmem:[#allocation75_spill] sm:$0xff] }
 0x5c5   : > { %v15529_v10 = vpop.f32.mrf.mxu0  ;;  %v10977_v5 = vadd.f32 %v21034_v31, %v10527_v47 }
 0x5c6   : > { %v12544_v17 = vadd.f32 %v12543_v55, %v12513_v9  ;;  %v12476_v3 = vadd.f32 %v12475_v6, %v20412_v16  ;;  %v11793_v4 = vadd.f32 %v11718_v13, %v10976_v14  ;;  %v12515_v41 = vmul.f32 %v20415_v1, %v20415_v1 }
 0x5c7   : > { %v12298_v58 = vpop.f32.mrf.mxu0  ;;  %v20438_v24 = vadd.f32 %v15529_v10, %v11792_v20  ;;  %v11794_v6 = vadd.f32 %v11721_v2, %v10977_v5  ;;  %v11795_v13 = vadd.f32 %v15484_v59, %v21035_v21  ;;  %v21036_v10 = vld [vmem:[#allocation73_spill] sm:$0xff]  ;;  %v21042_v21 = vld [vmem:[#allocation63_spill] sm:$0xff] }
 0x5c8   : > { %v12477_v40 = vadd.f32 %v12476_v3, %v20415_v1  ;;  %v20425_v26 = vadd.f32 %v12298_v58, %v11790_v49  ;;  %v12545_v30 = vadd.f32 %v12544_v17, %v12514_v46  ;;  %v11796_v58 = vadd.f32 %v15485_v0, %v21036_v10  ;;  %v21044_v10 = vld [vmem:[#allocation21_spill] sm:$0xff] }
 0x5c9   : > { %v15532_v36 = vpop.f32.mrf.mxu0  ;;  %v12518_v23 = vmul.f32 %v20438_v24, %v20438_v24 }
 0x5ca   : > { %v12478_v57 = vadd.f32 %v12477_v40, %v20425_v26  ;;  %v12546_v22 = vadd.f32 %v12545_v30, %v12515_v41  ;;  %v12516_v12 = vmul.f32 %v20425_v26, %v20425_v26  ;;  %v20451_v60 = vadd.f32 %v15532_v36, %v11795_v13  ;;  %v21037_v41 = vld [vmem:[#allocation36_spill] sm:$0xff] }
 0x5cb   : > { %v12311_v28 = vpop.f32.mrf.mxu0  ;;  %v12517_v40 = vmul.f32 %v20432_v48, %v20432_v48 }
 0x5cc   : > { %v12479_v9 = vadd.f32 %v12478_v57, %v20432_v48  ;;  %v20443_v49 = vadd.f32 %v12311_v28, %v11793_v4  ;;  %v12547_v34 = vadd.f32 %v12546_v22, %v12516_v12  ;;  %v12521_v4 = vmul.f32 %v20451_v60, %v20451_v60  ;;  %v21040_v12 = vld [vmem:[#allocation16_spill] sm:$0xff] }
 0x5cd   : > { %v15533_v55 = vpop.f32.mrf.mxu0 }
 0x5ce   : > { %v12480_v17 = vadd.f32 %v12479_v9, %v20438_v24  ;;  %v20456_v27 = vadd.f32 %v15533_v55, %v11796_v58  ;;  %v12548_v47 = vadd.f32 %v12547_v34, %v12517_v40  ;;  %v12519_v36 = vmul.f32 %v20443_v49, %v20443_v49  ;;  %v21039_v55 = vld [vmem:[#allocation37_spill] sm:$0xff]  ;;  %v21045_v34 = vld [vmem:[#allocation34_spill] sm:$0xff] }
 0x5cf   : > { %v12314_v3 = vpop.f32.mrf.mxu0  ;;  %v21038_v9 = vmov 0.0  }
 0x5d0   : > { %v12481_v15 = vadd.f32 %v12480_v17, %v20443_v49  ;;  %v20448_v35 = vadd.f32 %v12314_v3, %v11794_v6  ;;  %v12549_v0 = vadd.f32 %v12548_v47, %v12518_v23  ;;  %v12522_v22 = vmul.f32 %v20456_v27, %v20456_v27  ;;  %v21041_v3 = vld [vmem:[#allocation39_spill] sm:$0xff]  ;;  %v21048_v47 = vld [vmem:[#allocation70_spill] sm:$0xff] }
 0x5d1   : > { %v21049_v23 = vld [vmem:[#allocation46_spill] sm:$0xff] }
 0x5d2   : > { %v12482_v46 = vadd.f32 %v12481_v15, %v20448_v35  ;;  %v12550_v2 = vadd.f32 %v12549_v0, %v12519_v36  ;;  %v12520_v57 = vmul.f32 %v20448_v35, %v20448_v35  ;;  %v21043_v15 = vld [vmem:[#allocation66_spill] sm:$0xff]  ;;  %v21052_v36 = vld [vmem:[#allocation44_spill] sm:$0xff] }
 0x5d4   : > { %v12483_v44 = vadd.f32 %v12482_v46, %v20451_v60  ;;  %v12551_v28 = vadd.f32 %v12550_v2, %v12520_v57  ;;  %v21046_v46 = vld [vmem:[#allocation68_spill] sm:$0xff]  ;;  %v21053_v2 = vld [vmem:[#allocation67_spill] sm:$0xff] }
 0x5d6   : > { %v12484_v59 = vadd.f32 %v12483_v44, %v20456_v27  ;;  %v12552_v6 = vadd.f32 %v12551_v28, %v12521_v4  ;;  %v21047_v44 = vld [vmem:[#allocation65_spill] sm:$0xff] }
 0x5d8   : > { %v12485_v14 = vrot.slane %v12484_v59, 4  ;;  %v12553_v17 = vadd.f32 %v12552_v6, %v12522_v22  ;;  %v6906_v22 = vld [vmem:[%s20710_s5] sm:$0x1] }
 0x5da   : > { %v12486_v42 = vadd.f32 %v12485_v14, %v12484_v59  ;;  %v12554_v13 = vrot.slane %v12553_v17, 4  ;;  %v21050_v14 = vld [vmem:[#allocation20_spill] sm:$0xff] }
 0x5dc   : > { %v12487_v20 = vrot.slane %v12486_v42, 2  ;;  %v12555_v58 = vadd.f32 %v12554_v13, %v12553_v17  ;;  %v6907_v17 = vld [vmem:[%s20711_s6] sm:$0x1] }
 0x5de   : > { %v12488_v30 = vadd.f32 %v12487_v20, %v12486_v42  ;;  %v12556_v40 = vrot.slane %v12555_v58, 2  ;;  %v21051_v42 = vld [vmem:[#allocation43_spill] sm:$0xff] }
 0x5e0   : > { %v12489_v31 = vrot.slane %v12488_v30, 1  ;;  %v12557_v59 = vadd.f32 %v12556_v40, %v12555_v58 }
 0x5e2   : > { %v12490_v5 = vadd.f32 %v12489_v31, %v12488_v30  ;;  %v12558_v0 = vrot.slane %v12557_v59, 1 }
 0x5e4   : > { %15567 = vmatmul.mubr.f32.vlgmr.msra.gmra.mxu1 %v12490_v5  ;;  %v12559_v20 = vadd.f32 %v12558_v0, %v12557_v59 }
 0x5e5   : > { %15570 = vmatpush3.msra.mxu1 %v21037_v41  ;;  %15601 = vmatprep.mubr.msk.f32.mxu1 %vm16004_vm11, %v21038_v9 }
 0x5e6   : > { %15571 = vmatprep.subr.mxu1 %v21038_v9 }
 0x5e7   : > { %15572 = vmatpush3.msra.mxu1 %v21039_v55 }
 0x5e8   : > { %15573 = vmatprep.subr.mxu1 %v21038_v9 }
 0x5e9   : > { %15574 = vmatpush3.msra.mxu1 %v21040_v12 }
 0x5ea   : > { %15575 = vmatprep.subr.mxu1 %v21038_v9 }
 0x5eb   : > { %15576 = vmatpush3.msra.mxu1 %v21041_v3 }
 0x5ec   : > { %15577 = vmatprep.subr.mxu1 %v21038_v9 }
 0x5ed   : > { %15578 = vmatpush3.msra.mxu1 %v21042_v21  ;;  %v21054_v21 = vld [vmem:[#allocation33_spill] sm:$0xff] }
 0x5ee   : > { %15579 = vmatprep.subr.mxu1 %v21038_v9 }
 0x5ef   : > { %15580 = vmatpush3.msra.mxu1 %v21043_v15 }
 0x5f0   : > { %15581 = vmatprep.subr.mxu1 %v21038_v9 }
 0x5f1   : > { %15582 = vmatpush3.msra.mxu1 %v21044_v10 }
 0x5f2   : > { %15583 = vmatprep.subr.mxu1 %v21038_v9 }
 0x5f3   : > { %15584 = vmatpush3.msra.mxu1 %v21045_v34 }
 0x5f4   : > { %15585 = vmatprep.subr.mxu1 %v21038_v9 }
 0x5f5   : > { %15586 = vmatpush3.msra.mxu1 %v21046_v46 }
 0x5f6   : > { %15587 = vmatprep.subr.mxu1 %v21038_v9 }
 0x5f7   : > { %15588 = vmatpush3.msra.mxu1 %v21047_v44 }
 0x5f8   : > { %15589 = vmatprep.subr.mxu1 %v21038_v9 }
 0x5f9   : > { %15590 = vmatpush3.msra.mxu1 %v21048_v47 }
 0x5fa   : > { %15591 = vmatprep.subr.mxu1 %v21038_v9 }
 0x5fb   : > { %15592 = vmatpush3.msra.mxu1 %v21049_v23 }
 0x5fc   : > { %15593 = vmatprep.subr.mxu1 %v21038_v9 }
 0x5fd   : > { %15594 = vmatpush3.msra.mxu1 %v21050_v14 }
 0x5fe   : > { %15595 = vmatprep.subr.mxu1 %v21038_v9 }
 0x5ff   : > { %15596 = vmatpush3.msra.mxu1 %v21051_v42 }
 0x600   : > { %15597 = vmatprep.subr.mxu1 %v21038_v9 }
 0x601   : > { %15598 = vmatpush3.msra.mxu1 %v21052_v36 }
 0x602   : > { %15599 = vmatprep.subr.mxu1 %v21038_v9 }
 0x603   : > { %15600 = vmatpush3.msra.mxu1 %v21053_v2 }
 0x604   : > { %15602 = vmatmul.mubr.f32.vlgmr.msra.gmra.mxu1 %v12559_v20 }
 0x6a4   : > { %v12642_v30 = vpop.f32.mrf.mxu1 }
 0x6a5   : > { %v12646_v31 = vmul.f32 0.001953125, %v12642_v30 }
 0x6a6   : > { %v15568_v57 = vpop.f32.mrf.mxu1 }
 0x6a7   : > { %v12718_v28 = vmul.f32 %v12646_v31, %v12646_v31 }
 0x6c4   : > { %v12713_v5 = vpop.f32.mrf.mxu1 }
 0x6c5   : > { %v12717_v4 = vmul.f32 0.001953125, %v12713_v5 }
 0x6c6   : > { %v15603_v41 = vpop.f32.mrf.mxu1 }
 0x6c7   : > { %v12719_v6 = vsub.f32 %v12717_v4, %v12718_v28 }
 0x6c9   : > { %v12720_v55 = vadd.f32 1e-05, %v12719_v6 }
 0x6cb   : > { %15904 = vrsqrt.f32 %v12720_v55 }
 0x6d8   : > { %v15905_v12 = vpop.eup %15904 }
 0x6d9   : > { %v12722_v9 = vmul.f32 %v15905_v12, %v6906_v22 }
 0x6db   : > { %v12723_v3 = vmul.f32 %v12722_v9, %v12646_v31  ;;  %v12728_v13 = vrot.slane %v12722_v9, %v21054_v21 }
 0x6dd   : > { %v12724_v15 = vsub.f32 %v6907_v17, %v12723_v3  ;;  %v12729_v10 = vmul.f32 %v12728_v13, %v20211_v19  ;;  %v12730_v58 = vmul.f32 %v12728_v13, %v20221_v54  ;;  %v12731_v34 = vmul.f32 %v12728_v13, %v20219_v39 }
 0x6de   : > { %v12732_v46 = vmul.f32 %v12728_v13, %v20226_v33  ;;  %v12733_v40 = vmul.f32 %v12728_v13, %v20241_v50  ;;  %v12734_v44 = vmul.f32 %v12728_v13, %v20261_v11  ;;  %v12735_v47 = vmul.f32 %v12728_v13, %v20259_v8 }
 0x6df   : > { %v12765_v59 = vrot.slane %v12724_v15, %v21054_v21  ;;  %v12736_v23 = vmul.f32 %v12728_v13, %v20268_v52  ;;  %v12737_v14 = vmul.f32 %v12728_v13, %v20277_v7  ;;  %v12738_v19 = vmul.f32 %v12728_v13, %v20297_v61 }
 0x6e0   : > { %v12739_v54 = vmul.f32 %v12728_v13, %v20292_v37  ;;  %v12740_v39 = vmul.f32 %v12728_v13, %v20304_v32  ;;  %v12741_v33 = vmul.f32 %v12728_v13, %v20313_v63  ;;  %v12742_v50 = vmul.f32 %v12728_v13, %v20333_v56 }
 0x6e1   : > { %v12743_v11 = vmul.f32 %v12728_v13, %v20328_v53  ;;  %v12744_v8 = vmul.f32 %v12728_v13, %v20340_v45  ;;  %v12745_v0 = vmul.f32 %v12728_v13, %v20349_v18  ;;  %v12746_v52 = vmul.f32 %v12728_v13, %v20369_v62 }
 0x6e2   : > { %v12747_v7 = vmul.f32 %v12728_v13, %v20364_v38  ;;  %v12748_v61 = vmul.f32 %v12728_v13, %v20374_v43  ;;  %v12749_v37 = vmul.f32 %v12728_v13, %v20383_v25  ;;  %v12750_v32 = vmul.f32 %v12728_v13, %v20398_v29 }
 0x6e3   : > { %v12751_v63 = vmul.f32 %v12728_v13, %v20393_v51  ;;  %v12752_v56 = vmul.f32 %v12728_v13, %v20412_v16  ;;  %v12753_v53 = vmul.f32 %v12728_v13, %v20415_v1  ;;  %v12754_v45 = vmul.f32 %v12728_v13, %v20425_v26 }
 0x6e4   : > { %v12755_v18 = vmul.f32 %v12728_v13, %v20432_v48  ;;  %v12756_v62 = vmul.f32 %v12728_v13, %v20438_v24  ;;  %v12757_v38 = vmul.f32 %v12728_v13, %v20443_v49  ;;  %v12758_v43 = vmul.f32 %v12728_v13, %v20448_v35 }
 0x6e5   : > { %v12759_v25 = vmul.f32 %v12728_v13, %v20451_v60  ;;  %v12760_v29 = vmul.f32 %v12728_v13, %v20456_v27  ;;  %v20543_v42 = vadd.f32 %v12765_v59, %v12729_v10  ;;  %v20545_v51 = vadd.f32 %v12765_v59, %v12730_v58 }
 0x6e6   : > { %v20547_v16 = vadd.f32 %v12765_v59, %v12731_v34  ;;  %v20549_v1 = vadd.f32 %v12765_v59, %v12732_v46  ;;  %v20551_v26 = vadd.f32 %v12765_v59, %v12733_v40  ;;  %v20553_v48 = vadd.f32 %v12765_v59, %v12734_v44 }
 0x6e7   : > { %v20555_v24 = vadd.f32 %v12765_v59, %v12735_v47  ;;  %v20557_v49 = vadd.f32 %v12765_v59, %v12736_v23  ;;  %v20559_v35 = vadd.f32 %v12765_v59, %v12737_v14  ;;  %v20561_v60 = vadd.f32 %v12765_v59, %v12738_v19 }
 0x6e8   : > { %v20563_v27 = vadd.f32 %v12765_v59, %v12739_v54  ;;  %v20565_v36 = vadd.f32 %v12765_v59, %v12740_v39  ;;  %v20567_v20 = vadd.f32 %v12765_v59, %v12741_v33  ;;  %v20569_v2 = vadd.f32 %v12765_v59, %v12742_v50 }
 0x6e9   : > { %v20571_v30 = vadd.f32 %v12765_v59, %v12743_v11  ;;  %v20573_v57 = vadd.f32 %v12765_v59, %v12744_v8  ;;  %v20575_v31 = vadd.f32 %v12765_v59, %v12745_v0  ;;  %v20577_v5 = vadd.f32 %v12765_v59, %v12746_v52 }
 0x6ea   : > { %v20579_v28 = vadd.f32 %v12765_v59, %v12747_v7  ;;  %v12786_v4 = vadd.f32 %v12765_v59, %v12748_v61  ;;  %v20581_v41 = vadd.f32 %v12765_v59, %v12749_v37  ;;  %v20583_v6 = vadd.f32 %v12765_v59, %v12750_v32 }
 0x6eb   : > { %v20585_v55 = vadd.f32 %v12765_v59, %v12751_v63  ;;  %v20587_v22 = vadd.f32 %v12765_v59, %v12752_v56  ;;  %v20589_v12 = vadd.f32 %v12765_v59, %v12753_v53  ;;  %v20591_v9 = vadd.f32 %v12765_v59, %v12754_v45 }
 0x6ec   : > { %v12793_v17 = vadd.f32 %v12765_v59, %v12755_v18  ;;  %v12794_v3 = vadd.f32 %v12765_v59, %v12756_v62  ;;  %v20594_v21 = vadd.f32 %v12765_v59, %v12757_v38  ;;  %v20596_v13 = vadd.f32 %v12765_v59, %v12758_v43 }
 0x6ed   : > { %v20598_v15 = vadd.f32 %v12765_v59, %v12759_v25  ;;  %v20600_v10 = vadd.f32 %v12765_v59, %v12760_v29  ;;  %v12799_v58 = vmax.f32 %v20543_v42, 0.0  ;;  %v12800_v34 = vmax.f32 %v20545_v51, 0.0 }
 0x6ee   : > { %v12801_v46 = vmax.f32 %v20547_v16, 0.0  ;;  %v12802_v40 = vmax.f32 %v20549_v1, 0.0  ;;  %v12803_v44 = vmax.f32 %v20551_v26, 0.0  ;;  %v12804_v47 = vmax.f32 %v20553_v48, 0.0 }
 0x6ef   : > { %v12805_v23 = vmax.f32 %v20555_v24, 0.0  ;;  %v12806_v59 = vmax.f32 %v20557_v49, 0.0  ;;  %v12807_v14 = vmax.f32 %v20559_v35, 0.0  ;;  %v12808_v19 = vmax.f32 %v20561_v60, 0.0 }
 0x6f0   : > { %v12809_v54 = vmax.f32 %v20563_v27, 0.0  ;;  %v12810_v39 = vmax.f32 %v20565_v36, 0.0  ;;  %v12811_v33 = vmax.f32 %v20567_v20, 0.0  ;;  %v12812_v50 = vmax.f32 %v20569_v2, 0.0 }
 0x6f1   : > { %v12813_v11 = vmax.f32 %v20571_v30, 0.0  ;;  %v12814_v8 = vmax.f32 %v20573_v57, 0.0  ;;  %v12815_v0 = vmax.f32 %v20575_v31, 0.0  ;;  %v12816_v52 = vmax.f32 %v20577_v5, 0.0 }
 0x6f2   : > { %v12817_v7 = vmax.f32 %v20579_v28, 0.0  ;;  %v12818_v61 = vmax.f32 %v12786_v4, 0.0  ;;  %v12819_v37 = vmax.f32 %v20581_v41, 0.0  ;;  %v12820_v32 = vmax.f32 %v20583_v6, 0.0 }
 0x6f3   : > { %v12821_v63 = vmax.f32 %v20585_v55, 0.0  ;;  %v12822_v56 = vmax.f32 %v20587_v22, 0.0  ;;  %v12823_v53 = vmax.f32 %v20589_v12, 0.0  ;;  %v12824_v45 = vmax.f32 %v20591_v9, 0.0 }
 0x6f4   : > { %v12825_v18 = vmax.f32 %v12793_v17, 0.0  ;;  %v12826_v62 = vmax.f32 %v12794_v3, 0.0  ;;  %v12827_v38 = vmax.f32 %v20594_v21, 0.0  ;;  %v12828_v43 = vmax.f32 %v20596_v13, 0.0 }
 0x6f5   : > { %v12829_v25 = vmax.f32 %v20598_v15, 0.0  ;;  %v12830_v29 = vmax.f32 %v20600_v10, 0.0  ;;  %v14008_v42 = vpack.c.bf16 %v12800_v34, %v12799_v58  ;;  %v14013_v51 = vpack.c.bf16 %v12802_v40, %v12801_v46 }
 0x6f6   : > { %v14018_v16 = vpack.c.bf16 %v12804_v47, %v12803_v44  ;;  %v14023_v1 = vpack.c.bf16 %v12806_v59, %v12805_v23  ;;  %v14028_v26 = vpack.c.bf16 %v12808_v19, %v12807_v14  ;;  %v14033_v48 = vpack.c.bf16 %v12810_v39, %v12809_v54 }
 0x6f7   : > { %14009 = vst [vmem:[%s20637_s24] sm:$0xff] %v14008_v42   ;;  %14085 = vst [vmem:[%s20637_s24 + $0x8] sm:$0xff] %v14013_v51   ;;  %v14038_v24 = vpack.c.bf16 %v12812_v50, %v12811_v33  ;;  %v14043_v49 = vpack.c.bf16 %v12814_v8, %v12813_v11  ;;  %v14048_v35 = vpack.c.bf16 %v12816_v52, %v12815_v0 }
 0x6f8   : > { %v14053_v60 = vpack.c.bf16 %v12818_v61, %v12817_v7  ;;  %14086 = vst [vmem:[%s20637_s24 + $0x10] sm:$0xff] %v14018_v16   ;;  %14087 = vst [vmem:[%s20637_s24 + $0x18] sm:$0xff] %v14023_v1   ;;  %v14058_v27 = vpack.c.bf16 %v12820_v32, %v12819_v37  ;;  %v14063_v36 = vpack.c.bf16 %v12822_v56, %v12821_v63 }
 0x6f9   : > { %14088 = vst [vmem:[%s20637_s24 + $0x20] sm:$0xff] %v14028_v26   ;;  %14089 = vst [vmem:[%s20637_s24 + $0x28] sm:$0xff] %v14033_v48   ;;  %v14068_v20 = vpack.c.bf16 %v12824_v45, %v12823_v53  ;;  %v14073_v2 = vpack.c.bf16 %v12826_v62, %v12825_v18  ;;  %v14078_v30 = vpack.c.bf16 %v12828_v43, %v12827_v38 }
 0x6fa   : > { %14090 = vst [vmem:[%s20637_s24 + $0x30] sm:$0xff] %v14038_v24   ;;  %14091 = vst [vmem:[%s20637_s24 + $0x38] sm:$0xff] %v14043_v49   ;;  %v14083_v57 = vpack.c.bf16 %v12830_v29, %v12829_v25 }
 0x6fb   : > { %14092 = vst [vmem:[%s20637_s24 + $0x40] sm:$0xff] %v14048_v35   ;;  %14093 = vst [vmem:[%s20637_s24 + $0x48] sm:$0xff] %v14053_v60  }
 0x6fc   : > { %14094 = vst [vmem:[%s20637_s24 + $0x50] sm:$0xff] %v14058_v27   ;;  %14095 = vst [vmem:[%s20637_s24 + $0x58] sm:$0xff] %v14063_v36  }
 0x6fd   : > { %14096 = vst [vmem:[%s20637_s24 + $0x60] sm:$0xff] %v14068_v20   ;;  %14097 = vst [vmem:[%s20637_s24 + $0x68] sm:$0xff] %v14073_v2  }
 0x6fe   : > { %14098 = vst [vmem:[%s20637_s24 + $0x70] sm:$0xff] %v14078_v30   ;;  %14099 = vst [vmem:[%s20637_s24 + $0x78] sm:$0xff] %v14083_v57  }
 0x6ff   : > { %15947 = shalt.err (!%p15944_p0)
}
 0x700   : > { %s15948_s20 = scalar_lea.hbm %s20649_s25, 2048  ;;  %s15952_s23 = scalar_lea.hbm %s20713_s8, 4096 }
 0x701   : > { %p15949_p1 = scmp.ne.s32.totalorder %s20649_s25, %s15948_s20  ;;  %p15953_p4 = scmp.lt.s32.totalorder %s20649_s25, %s20713_s8 }
 0x702   : > { %p15954_p7 = scmp.lt.s32.totalorder %s15952_s23, %s15948_s20 }
 0x703   : > { %p15950_p2 = pnand %p15949_p1, %p16092_p5 }
 0x704   : > { %p15955_p6 = por %p15954_p7, %p15953_p4 }
 0x705   : > { %p15951_p3 = pneg %p15950_p2 }
 0x707   : > { %p15956_p8 = pnand %p15955_p6, %p15951_p3 }
 0x709   : > { %15959 = shalt.err (!%p15956_p8)
}
 0x70a   : > { %s16007_s10 = smov 64   ;;  %s16008_s13 = smov 4  }
 0x70b   : > { %15609 = dma.vmem_to_hbm [thread:$0]  (%p16092_p5), %s20651_s26, 2048, %s20649_s25, %s20665_s12, %s16007_s10, %s16007_s10, %s16008_s13  }
 0x70c PF: > { %p15621_p9 = scmp.ge.s32.totalorder %s15998_s30, 2  ;;  %s13020_s17 = sand.u32 1, %s15986_s27  }
 0x70d   : > { %p21055_p10 = scmp.ne.s32.totalorder %s20763_s16, 0  ;;  %s13021_s18 = scalar_lea.sflag [#allocation6], %s13020_s17 }
 0x70f   : > { %p15616_p11 = pnand %p15621_p9, %p21055_p10 }
 0x711   : > { %p15617_p12 = pneg %p15616_p11 }
 0x713   : > { %15981 = dma.done.wait (%p15617_p12), %s13021_s18, 2048  }
 0x714   : > { %15983 = vsyncadd (%p15617_p12), %s13021_s18, 4294965248  ;;  %p19_p13 = scmp.ge.s32.totalorder %s16079_s11, 4   ;;  %s21056_s27 = smov %s15990_s28 }
 0x715   : > { %s21057_s28 = smov %s15994_s29  ;;  %s21058_s29 = smov %s16090_s14 }
 0x716   : > { %s21059_s30 = smov %s16079_s11  ;;  %21 = sbr.rel (!%p19_p13) target bundleno = 4 (0x4), region = 97 }
 0x71b   :  { %13026 = vsyncpa [#allocation5], 1 }
 0x71c   :  { %13028 = vsyncpa [#allocation5 + $0x1], 1 }
 0x71d   :  { %13029 = vsyncpa [#allocation6], 1 }
 0x71e   :  { %13031 = vsyncpa [#allocation6 + $0x1], 1 }

</bundles_post_ra>
